<compile_context>
chip_gen: v5e
topology: v5e:2x2
jax: 0.10.0
libtpu: 0.0.40
codegen_flags: <defaults>
</compile_context>

<pallas_src>
import jax
import jax.numpy as jnp
from jax.experimental import pallas as pl
from jax.experimental.pallas import tpu as pltpu

HIDDEN = 1024


def _da_ins_head_kernel(x_ref, w1_ref, b1_ref, w2_ref, b2_ref, w3_ref, b3_ref, o_ref):
    # fc1 -> relu   (MXU, f32 accumulation)
    h = jnp.dot(x_ref[...], w1_ref[...], preferred_element_type=jnp.float32)
    h = jnp.maximum(h + b1_ref[...], 0.0)
    # (dropout == identity in eval mode)
    # fc2 -> relu   (MXU, f32 accumulation)
    h = jnp.dot(h, w2_ref[...], preferred_element_type=jnp.float32)
    h = jnp.maximum(h + b2_ref[...], 0.0)
    # fc3: (tile_n, 1024) * (1, 1024) -> lane reduce -> (tile_n, 1).  VPU + XLU, not MXU.
    out = jnp.sum(h * w3_ref[...], axis=-1, keepdims=True) + b3_ref[0, 0]
    o_ref[...] = out.astype(o_ref.dtype)


def da_ins_head(x, params, *, tile_n=256):
    """x: (N, in_channels) float32.  Returns (N, 1) float32."""
    w1, b1, w2, b2, w3, b3 = params
    n, cin = x.shape
    assert w1.shape == (cin, HIDDEN) and w2.shape == (HIDDEN, HIDDEN)
    assert w3.shape == (1, HIDDEN) and b3.shape == (1, 1)

    # Clamp tile_n to a multiple of 8 no larger than the (8-rounded) batch.
    n_ceil8 = ((n + 7) // 8) * 8
    tile_n = min(int(tile_n), n_ceil8)
    tile_n = max(8, (tile_n // 8) * 8)

    grid = (pl.cdiv(n, tile_n),)  # ragged tail handled by masked partial last block

    def _call(single_buffer_weights):
        if single_buffer_weights:
            def resident(shape):  # constant index_map -> one VMEM copy is enough
                return pl.BlockSpec(shape, lambda i: (0, 0), pipeline_mode=pl.Buffered(1))
        else:
            def resident(shape):
                return pl.BlockSpec(shape, lambda i: (0, 0))

        in_specs = [
            pl.BlockSpec((tile_n, cin), lambda i: (i, 0)),      # x tile (double-buffered)
            resident((cin, HIDDEN)),                            # W1
            resident((1, HIDDEN)),                              # b1
            resident((HIDDEN, HIDDEN)),                         # W2
            resident((1, HIDDEN)),                              # b2
            resident((1, HIDDEN)),                              # W3 (row layout)
            pl.BlockSpec(memory_space=pltpu.MemorySpace.SMEM),  # b3 scalar
        ]
        return pl.pallas_call(
            _da_ins_head_kernel,
            out_shape=jax.ShapeDtypeStruct((n, 1), jnp.float32),
            grid_spec=pltpu.PrefetchScalarGridSpec(
                num_scalar_prefetch=0,
                grid=grid,
                in_specs=in_specs,
                out_specs=pl.BlockSpec((tile_n, 1), lambda i: (i, 0)),
            ),
            compiler_params=pltpu.CompilerParams(
                dimension_semantics=("parallel",),          # rows shard across TCs on v7x
                vmem_limit_bytes=48 * 1024 * 1024,
            ),
        )(x, w1, b1, w2, b2, w3, b3)

    try:
        return _call(single_buffer_weights=True)
    except Exception:
        # pl.Buffered(1) not accepted by this jax/Mosaic build -> default double buffering.
        return _call(single_buffer_weights=False)


def init_params(key, in_channels):
    """Init matching the PyTorch module: fc1/fc2 weights ~ N(0, 0.01^2),
       fc3 weight ~ N(0, 0.05^2), all biases = 0."""
    k1, k2, k3 = jax.random.split(key, 3)
    w1 = 0.01 * jax.random.normal(k1, (in_channels, HIDDEN), jnp.float32)
    b1 = jnp.zeros((1, HIDDEN), jnp.float32)
    w2 = 0.01 * jax.random.normal(k2, (HIDDEN, HIDDEN), jnp.float32)
    b2 = jnp.zeros((1, HIDDEN), jnp.float32)
    w3 = 0.05 * jax.random.normal(k3, (1, HIDDEN), jnp.float32)   # PyTorch (out, in) layout
    b3 = jnp.zeros((1, 1), jnp.float32)
    return (w1, b1, w2, b2, w3, b3)


def _reference(x, params):
    w1, b1, w2, b2, w3, b3 = params
    h = jnp.maximum(x @ w1 + b1, 0.0)
    h = jnp.maximum(h @ w2 + b2, 0.0)
    return h @ w3.T + b3


if __name__ == "__main__":
    key = jax.random.PRNGKey(0)
    kx1, kx2, kp = jax.random.split(key, 3)

    in_channels = 32
    params = init_params(kp, in_channels)

    # Small batch: exercises the clamped-tile path (tile_n -> 8, grid of 1).
    x_small = jax.random.normal(kx1, (8, in_channels), jnp.float32)
    out_small = jax.block_until_ready(da_ins_head(x_small, params))
    ref_small = _reference(x_small, params)
    assert out_small.shape == (8, 1), out_small.shape
    assert jnp.allclose(out_small, ref_small, atol=1e-4, rtol=1e-4), "small-batch mismatch"

    # Larger, non-divisible batch: exercises multi-step grid + masked partial last block
    # (no jnp.pad of x).
    x_big = jax.random.normal(kx2, (300, in_channels), jnp.float32)
    out_big = jax.block_until_ready(da_ins_head(x_big, params, tile_n=128))
    ref_big = _reference(x_big, params)
    assert out_big.shape == (300, 1), out_big.shape
    assert jnp.allclose(out_big, ref_big, atol=1e-4, rtol=1e-4), "large-batch mismatch"

    print("KERNEL_OK")
</pallas_src>

<mosaic_0001>
module attributes {stable_mosaic.version = 11 : i64} {
  func.func @_da_ins_head_kernel(%arg0: i32, %arg1: memref<8x32xf32, #tpu.memory_space<vmem>>, %arg2: memref<32x1024xf32, #tpu.memory_space<vmem>>, %arg3: memref<1x1024xf32, #tpu.memory_space<vmem>>, %arg4: memref<1024x1024xf32, #tpu.memory_space<vmem>>, %arg5: memref<1x1024xf32, #tpu.memory_space<vmem>>, %arg6: memref<1x1024xf32, #tpu.memory_space<vmem>>, %arg7: memref<1x1xf32, #tpu.memory_space<smem>>, %arg8: memref<8x1xf32, #tpu.memory_space<vmem>>) attributes {dimension_semantics = [#tpu.dimension_semantics<parallel>], iteration_bounds = array<i64: 1>, scalar_prefetch = 0 : i64, scratch_operands = 0 : i64, tpu.core_type = #tpu.core_type<tc>, window_params = [{transform_indices = @transform_0, window_bounds = array<i64: 8, 32>}, {pipeline_mode = #tpu.pipeline_mode<synchronous>, transform_indices = @transform_1, window_bounds = array<i64: 32, 1024>}, {pipeline_mode = #tpu.pipeline_mode<synchronous>, transform_indices = @transform_2, window_bounds = array<i64: 1, 1024>}, {pipeline_mode = #tpu.pipeline_mode<synchronous>, transform_indices = @transform_3, window_bounds = array<i64: 1024, 1024>}, {pipeline_mode = #tpu.pipeline_mode<synchronous>, transform_indices = @transform_4, window_bounds = array<i64: 1, 1024>}, {pipeline_mode = #tpu.pipeline_mode<synchronous>, transform_indices = @transform_5, window_bounds = array<i64: 1, 1024>}, {transform_indices = @transform_6, window_bounds = array<i64: 1, 1>}, {transform_indices = @transform_7, window_bounds = array<i64: 8, 1>}]} {
    %c0 = arith.constant 0 : index
    %c0_0 = arith.constant 0 : index
    %0 = vector.load %arg1[%c0, %c0_0] : memref<8x32xf32, #tpu.memory_space<vmem>>, vector<8x32xf32>
    %c0_1 = arith.constant 0 : index
    %c0_2 = arith.constant 0 : index
    %1 = vector.load %arg2[%c0_1, %c0_2] : memref<32x1024xf32, #tpu.memory_space<vmem>>, vector<32x1024xf32>
    %cst = arith.constant dense<0.000000e+00> : vector<8x1024xf32>
    %2 = tpu.matmul %0, %1, %cst {dimension_numbers = #tpu.dot_dimension_numbers<[1], [0], [0], [1], [0, 0, 1, 1], [], []>} : vector<8x32xf32>, vector<32x1024xf32>, vector<8x1024xf32> -> vector<8x1024xf32>
    %c0_3 = arith.constant 0 : index
    %c0_4 = arith.constant 0 : index
    %3 = vector.load %arg3[%c0_3, %c0_4] : memref<1x1024xf32, #tpu.memory_space<vmem>>, vector<1x1024xf32>
    %4 = vector.broadcast %3 : vector<1x1024xf32> to vector<8x1024xf32>
    %5 = arith.addf %2, %4 : vector<8x1024xf32>
    %cst_5 = arith.constant 0.000000e+00 : f32
    %6 = vector.broadcast %cst_5 : f32 to vector<8x1024xf32>
    %7 = arith.maximumf %5, %6 : vector<8x1024xf32>
    %c0_6 = arith.constant 0 : index
    %c0_7 = arith.constant 0 : index
    %8 = vector.load %arg4[%c0_6, %c0_7] : memref<1024x1024xf32, #tpu.memory_space<vmem>>, vector<1024x1024xf32>
    %cst_8 = arith.constant dense<0.000000e+00> : vector<8x1024xf32>
    %9 = tpu.matmul %7, %8, %cst_8 {dimension_numbers = #tpu.dot_dimension_numbers<[1], [0], [0], [1], [0, 0, 1, 1], [], []>} : vector<8x1024xf32>, vector<1024x1024xf32>, vector<8x1024xf32> -> vector<8x1024xf32>
    %c0_9 = arith.constant 0 : index
    %c0_10 = arith.constant 0 : index
    %10 = vector.load %arg5[%c0_9, %c0_10] : memref<1x1024xf32, #tpu.memory_space<vmem>>, vector<1x1024xf32>
    %11 = vector.broadcast %10 : vector<1x1024xf32> to vector<8x1024xf32>
    %12 = arith.addf %9, %11 : vector<8x1024xf32>
    %cst_11 = arith.constant 0.000000e+00 : f32
    %13 = vector.broadcast %cst_11 : f32 to vector<8x1024xf32>
    %14 = arith.maximumf %12, %13 : vector<8x1024xf32>
    %c0_12 = arith.constant 0 : index
    %c0_13 = arith.constant 0 : index
    %15 = vector.load %arg6[%c0_12, %c0_13] : memref<1x1024xf32, #tpu.memory_space<vmem>>, vector<1x1024xf32>
    %16 = vector.broadcast %15 : vector<1x1024xf32> to vector<8x1024xf32>
    %17 = arith.mulf %14, %16 : vector<8x1024xf32>
    %cst_14 = arith.constant dense<0.000000e+00> : vector<8xf32>
    %18 = vector.multi_reduction <add>, %17, %cst_14 [1] : vector<8x1024xf32> to vector<8xf32>
    %19 = vector.shape_cast %18 : vector<8xf32> to vector<8x1xf32>
    %c0_15 = arith.constant 0 : index
    %c0_16 = arith.constant 0 : index
    %20 = memref.load %arg7[%c0_15, %c0_16] : memref<1x1xf32, #tpu.memory_space<smem>>
    %21 = vector.broadcast %20 : f32 to vector<8x1xf32>
    %22 = arith.addf %19, %21 : vector<8x1xf32>
    %c0_17 = arith.constant 0 : index
    %c0_18 = arith.constant 0 : index
    %23 = vector.load %arg8[%c0_17, %c0_18] : memref<8x1xf32, #tpu.memory_space<vmem>>, vector<8x1xf32>
    tpu.vector_store %arg8[%c0_17, %c0_18], %22 {strides = array<i32>} : memref<8x1xf32, #tpu.memory_space<vmem>>, vector<8x1xf32>,
    return
  }
  func.func @transform_0(%arg0: i32) -> (i32, i32) {
    %c0_i32 = arith.constant 0 : i32
    %c0_i32_0 = arith.constant 0 : i32
    return %arg0, %c0_i32 : i32, i32
  }
  func.func @transform_1(%arg0: i32) -> (i32, i32) {
    %c0_i32 = arith.constant 0 : i32
    %c0_i32_0 = arith.constant 0 : i32
    %c0_i32_1 = arith.constant 0 : i32
    return %c0_i32, %c0_i32_0 : i32, i32
  }
  func.func @transform_2(%arg0: i32) -> (i32, i32) {
    %c0_i32 = arith.constant 0 : i32
    %c0_i32_0 = arith.constant 0 : i32
    %c0_i32_1 = arith.constant 0 : i32
    return %c0_i32, %c0_i32_0 : i32, i32
  }
  func.func @transform_3(%arg0: i32) -> (i32, i32) {
    %c0_i32 = arith.constant 0 : i32
    %c0_i32_0 = arith.constant 0 : i32
    %c0_i32_1 = arith.constant 0 : i32
    return %c0_i32, %c0_i32_0 : i32, i32
  }
  func.func @transform_4(%arg0: i32) -> (i32, i32) {
    %c0_i32 = arith.constant 0 : i32
    %c0_i32_0 = arith.constant 0 : i32
    %c0_i32_1 = arith.constant 0 : i32
    return %c0_i32, %c0_i32_0 : i32, i32
  }
  func.func @transform_5(%arg0: i32) -> (i32, i32) {
    %c0_i32 = arith.constant 0 : i32
    %c0_i32_0 = arith.constant 0 : i32
    %c0_i32_1 = arith.constant 0 : i32
    return %c0_i32, %c0_i32_0 : i32, i32
  }
  func.func @transform_6(%arg0: i32) -> (i32, i32) {
    %c0_i32 = arith.constant 0 : i32
    %c0_i32_0 = arith.constant 0 : i32
    %c0_i32_1 = arith.constant 0 : i32
    return %c0_i32, %c0_i32_0 : i32, i32
  }
  func.func @transform_7(%arg0: i32) -> (i32, i32) {
    %c0_i32 = arith.constant 0 : i32
    %c0_i32_0 = arith.constant 0 : i32
    return %arg0, %c0_i32 : i32, i32
  }
}

module attributes {stable_mosaic.version = 11 : i64} {
  func.func @_da_ins_head_kernel(%arg0: i32, %arg1: memref<8x32xf32, #tpu.memory_space<vmem>>, %arg2: memref<32x1024xf32, #tpu.memory_space<vmem>>, %arg3: memref<1x1024xf32, #tpu.memory_space<vmem>>, %arg4: memref<1024x1024xf32, #tpu.memory_space<vmem>>, %arg5: memref<1x1024xf32, #tpu.memory_space<vmem>>, %arg6: memref<1x1024xf32, #tpu.memory_space<vmem>>, %arg7: memref<1x1xf32, #tpu.memory_space<smem>>, %arg8: memref<8x1xf32, #tpu.memory_space<vmem>>) attributes {dimension_semantics = [#tpu.dimension_semantics<parallel>], iteration_bounds = array<i64: 1>, scalar_prefetch = 0 : i64, scratch_operands = 0 : i64, tpu.core_type = #tpu.core_type<tc>, window_params = [{transform_indices = @transform_0, window_bounds = array<i64: 8, 32>}, {pipeline_mode = #tpu.pipeline_mode<synchronous>, transform_indices = @transform_1, window_bounds = array<i64: 32, 1024>}, {pipeline_mode = #tpu.pipeline_mode<synchronous>, transform_indices = @transform_2, window_bounds = array<i64: 1, 1024>}, {pipeline_mode = #tpu.pipeline_mode<synchronous>, transform_indices = @transform_3, window_bounds = array<i64: 1024, 1024>}, {pipeline_mode = #tpu.pipeline_mode<synchronous>, transform_indices = @transform_4, window_bounds = array<i64: 1, 1024>}, {pipeline_mode = #tpu.pipeline_mode<synchronous>, transform_indices = @transform_5, window_bounds = array<i64: 1, 1024>}, {transform_indices = @transform_6, window_bounds = array<i64: 1, 1>}, {transform_indices = @transform_7, window_bounds = array<i64: 8, 1>}]} {
    %c0 = arith.constant 0 : index
    %c0_0 = arith.constant 0 : index
    %0 = vector.load %arg1[%c0, %c0_0] : memref<8x32xf32, #tpu.memory_space<vmem>>, vector<8x32xf32>
    %c0_1 = arith.constant 0 : index
    %c0_2 = arith.constant 0 : index
    %1 = vector.load %arg2[%c0_1, %c0_2] : memref<32x1024xf32, #tpu.memory_space<vmem>>, vector<32x1024xf32>
    %cst = arith.constant dense<0.000000e+00> : vector<8x1024xf32>
    %2 = tpu.matmul %0, %1, %cst {dimension_numbers = #tpu.dot_dimension_numbers<[1], [0], [0], [1], [0, 0, 1, 1], [], []>} : vector<8x32xf32>, vector<32x1024xf32>, vector<8x1024xf32> -> vector<8x1024xf32>
    %c0_3 = arith.constant 0 : index
    %c0_4 = arith.constant 0 : index
    %3 = vector.load %arg3[%c0_3, %c0_4] : memref<1x1024xf32, #tpu.memory_space<vmem>>, vector<1x1024xf32>
    %4 = vector.broadcast %3 : vector<1x1024xf32> to vector<8x1024xf32>
    %5 = arith.addf %2, %4 : vector<8x1024xf32>
    %cst_5 = arith.constant 0.000000e+00 : f32
    %6 = vector.broadcast %cst_5 : f32 to vector<8x1024xf32>
    %7 = arith.maximumf %5, %6 : vector<8x1024xf32>
    %c0_6 = arith.constant 0 : index
    %c0_7 = arith.constant 0 : index
    %8 = vector.load %arg4[%c0_6, %c0_7] : memref<1024x1024xf32, #tpu.memory_space<vmem>>, vector<1024x1024xf32>
    %cst_8 = arith.constant dense<0.000000e+00> : vector<8x1024xf32>
    %9 = tpu.matmul %7, %8, %cst_8 {dimension_numbers = #tpu.dot_dimension_numbers<[1], [0], [0], [1], [0, 0, 1, 1], [], []>} : vector<8x1024xf32>, vector<1024x1024xf32>, vector<8x1024xf32> -> vector<8x1024xf32>
    %c0_9 = arith.constant 0 : index
    %c0_10 = arith.constant 0 : index
    %10 = vector.load %arg5[%c0_9, %c0_10] : memref<1x1024xf32, #tpu.memory_space<vmem>>, vector<1x1024xf32>
    %11 = vector.broadcast %10 : vector<1x1024xf32> to vector<8x1024xf32>
    %12 = arith.addf %9, %11 : vector<8x1024xf32>
    %cst_11 = arith.constant 0.000000e+00 : f32
    %13 = vector.broadcast %cst_11 : f32 to vector<8x1024xf32>
    %14 = arith.maximumf %12, %13 : vector<8x1024xf32>
    %c0_12 = arith.constant 0 : index
    %c0_13 = arith.constant 0 : index
    %15 = vector.load %arg6[%c0_12, %c0_13] : memref<1x1024xf32, #tpu.memory_space<vmem>>, vector<1x1024xf32>
    %16 = vector.broadcast %15 : vector<1x1024xf32> to vector<8x1024xf32>
    %17 = arith.mulf %14, %16 : vector<8x1024xf32>
    %cst_14 = arith.constant dense<0.000000e+00> : vector<8xf32>
    %18 = vector.multi_reduction <add>, %17, %cst_14 [1] : vector<8x1024xf32> to vector<8xf32>
    %19 = vector.shape_cast %18 : vector<8xf32> to vector<8x1xf32>
    %c0_15 = arith.constant 0 : index
    %c0_16 = arith.constant 0 : index
    %20 = memref.load %arg7[%c0_15, %c0_16] : memref<1x1xf32, #tpu.memory_space<smem>>
    %21 = vector.broadcast %20 : f32 to vector<8x1xf32>
    %22 = arith.addf %19, %21 : vector<8x1xf32>
    %c0_17 = arith.constant 0 : index
    %c0_18 = arith.constant 0 : index
    %23 = vector.load %arg8[%c0_17, %c0_18] : memref<8x1xf32, #tpu.memory_space<vmem>>, vector<8x1xf32>
    tpu.vector_store %arg8[%c0_17, %c0_18], %22 {strides = array<i32>} : memref<8x1xf32, #tpu.memory_space<vmem>>, vector<8x1xf32>,
    return
  }
  func.func @transform_0(%arg0: i32) -> (i32, i32) {
    %c0_i32 = arith.constant 0 : i32
    %c0_i32_0 = arith.constant 0 : i32
    return %arg0, %c0_i32 : i32, i32
  }
  func.func @transform_1(%arg0: i32) -> (i32, i32) {
    %c0_i32 = arith.constant 0 : i32
    %c0_i32_0 = arith.constant 0 : i32
    %c0_i32_1 = arith.constant 0 : i32
    return %c0_i32, %c0_i32_0 : i32, i32
  }
  func.func @transform_2(%arg0: i32) -> (i32, i32) {
    %c0_i32 = arith.constant 0 : i32
    %c0_i32_0 = arith.constant 0 : i32
    %c0_i32_1 = arith.constant 0 : i32
    return %c0_i32, %c0_i32_0 : i32, i32
  }
  func.func @transform_3(%arg0: i32) -> (i32, i32) {
    %c0_i32 = arith.constant 0 : i32
    %c0_i32_0 = arith.constant 0 : i32
    %c0_i32_1 = arith.constant 0 : i32
    return %c0_i32, %c0_i32_0 : i32, i32
  }
  func.func @transform_4(%arg0: i32) -> (i32, i32) {
    %c0_i32 = arith.constant 0 : i32
    %c0_i32_0 = arith.constant 0 : i32
    %c0_i32_1 = arith.constant 0 : i32
    return %c0_i32, %c0_i32_0 : i32, i32
  }
  func.func @transform_5(%arg0: i32) -> (i32, i32) {
    %c0_i32 = arith.constant 0 : i32
    %c0_i32_0 = arith.constant 0 : i32
    %c0_i32_1 = arith.constant 0 : i32
    return %c0_i32, %c0_i32_0 : i32, i32
  }
  func.func @transform_6(%arg0: i32) -> (i32, i32) {
    %c0_i32 = arith.constant 0 : i32
    %c0_i32_0 = arith.constant 0 : i32
    %c0_i32_1 = arith.constant 0 : i32
    return %c0_i32, %c0_i32_0 : i32, i32
  }
  func.func @transform_7(%arg0: i32) -> (i32, i32) {
    %c0_i32 = arith.constant 0 : i32
    %c0_i32_0 = arith.constant 0 : i32
    return %arg0, %c0_i32 : i32, i32
  }
}

</mosaic_0001>

<bundles_post_ra>
// kernel: tpu_custom_call.1
= control target key start
LH: loop header
LB: loop body
LE: loop exit
PB: predicated region body
PF: predicated region fallthrough
CT: control target
= control target key end

     0   :  { %13 = vsyncpa [#allocation4], 0  ;;  %s3079_s0 = inlined_call_operand.hbm [shape: f32[8,32], index: 0, kind: input, shape index: {}]   ;;  %s3080_s1 = inlined_call_operand.hbm [shape: f32[32,1024], index: 1, kind: input, shape index: {}]   ;;  %s3081_s2 = inlined_call_operand.hbm [shape: f32[1,1024], index: 2, kind: input, shape index: {}]   ;;  %s3082_s3 = inlined_call_operand.hbm [shape: f32[1024,1024], index: 3, kind: input, shape index: {}]   ;;  %s3083_s4 = inlined_call_operand.hbm [shape: f32[1,1024], index: 4, kind: input, shape index: {}]   ;;  %s3084_s5 = inlined_call_operand.hbm [shape: f32[1,1024], index: 5, kind: input, shape index: {}]   ;;  %s3085_s6 = inlined_call_operand.<no memory space> [shape: f32[1,1], index: 6, kind: input, shape index: {}]   ;;  %s3086_s7 = inlined_call_operand.vmem [shape: f32[8,1], index: 7, kind: output, shape index: {}]  }
   0x1   :  { %14 = vsyncpa [#allocation6], 0 }
   0x2   :  { %15 = vsyncpa [#allocation9], 0  ;;  %s32_s26 = sshll.u32 %s3080_s1, 4  ;;  %s33_s26 = int_to_ptr.hbm [resolvable:$true] %s32_s26 }
   0x3   :  { %16 = vsyncpa [#allocation12], 0  ;;  %s2884_s27 = smov [#allocation5]   ;;  %s56_s8 = sshll.u32 %s3082_s3, 4  ;;  %s57_s8 = int_to_ptr.hbm [resolvable:$true] %s56_s8 }
   0x4   :  { %s34_s28 = sshll.u32 %s2884_s27, 4  ;;  %s2885_s9 = smov 1024   ;;  %s35_s28 = int_to_ptr.vmem [resolvable:$true] %s34_s28 }
   0x5   :  { %s2886_s10 = smov 64   ;;  %s2887_s11 = smov [#allocation8]  }
   0x6   :  { %40 = dma.hbm_to_vmem [thread:$0]  %s33_s26, 4096, %s35_s28, [#allocation6], %s2885_s9, %s2885_s9, %s2886_s10  }
   0x7   :  { %s58_s12 = sshll.u32 %s2887_s11, 4  ;;  %s22_s15 = sshll.u32 %s3079_s0, 4  ;;  %s59_s12 = int_to_ptr.vmem [resolvable:$true] %s58_s12  ;;  %s23_s15 = int_to_ptr.hbm [resolvable:$true] %s22_s15 }
   0x8   :  { %64 = dma.hbm_to_vmem [thread:$0]  %s57_s8, 131072, %s59_s12, [#allocation9], %s2885_s9, %s2885_s9, %s2886_s10  }
   0x9   :  { %s46_s17 = sshll.u32 %s3081_s2, 4  ;;  %s2888_s18 = smov [#allocation3]   ;;  %s47_s17 = int_to_ptr.hbm [resolvable:$true] %s46_s17 }
   0xa   :  { %s24_s19 = sshll.u32 %s2888_s18, 4  ;;  %s2889_s3 = smov [#allocation7]   ;;  %s25_s19 = int_to_ptr.vmem [resolvable:$true] %s24_s19 }
   0xb   :  { %27 = dma.hbm_to_vmem [thread:$0]  %s23_s15, 128, %s25_s19, [#allocation4]  }
   0xc   :  { %s48_s20 = sshll.u32 %s2889_s3, 4  ;;  %s70_s23 = sshll.u32 %s3083_s4, 4  ;;  %s49_s20 = int_to_ptr.vmem [resolvable:$true] %s48_s20  ;;  %s71_s23 = int_to_ptr.hbm [resolvable:$true] %s70_s23 }
   0xd   :  { %51 = dma.hbm_to_vmem [thread:$0]  %s47_s17, 128, %s49_s20, [#allocation6]  }
   0xe   :  { %s81_s25 = sshll.u32 %s3084_s5, 4  ;;  %s2890_s26 = smov [#allocation10]   ;;  %s82_s25 = int_to_ptr.hbm [resolvable:$true] %s81_s25 }
   0xf   :  { %s72_s2 = sshll.u32 %s2890_s26, 4  ;;  %s2891_s27 = smov [#allocation11]   ;;  %s73_s2 = int_to_ptr.vmem [resolvable:$true] %s72_s2 }
  0x10   :  { %75 = dma.hbm_to_vmem [thread:$0]  %s71_s23, 128, %s73_s2, [#allocation9]  }
  0x11   :  { %s83_s28 = sshll.u32 %s2891_s27, 4  ;;  %s84_s28 = int_to_ptr.vmem [resolvable:$true] %s83_s28 }
  0x12   :  { %86 = dma.hbm_to_vmem [thread:$0]  %s82_s25, 128, %s84_s28, [#allocation12]  }
  0x13   :  { %2876 = dma.done.wait [#allocation4], 128  }
  0x14   :  { %2877 = vsyncadd [#allocation4], 4294967168 }
  0x15   :  { %2878 = dma.done.wait [#allocation6], 4224  }
  0x16   :  { %2879 = vsyncadd [#allocation6], 4294963072 }
  0x17   :  { %2880 = dma.done.wait [#allocation9], 131200  }
  0x18   :  { %2881 = vsyncadd [#allocation9], 4294836096 }
  0x19   :  { %2882 = dma.done.wait [#allocation12], 128  }
  0x1a   :  { %2883 = vsyncadd [#allocation12], 4294967168  ;;  %v138_v0 = vld [vmem:[#allocation5 + $0xc0] sm:$0xff]  ;;  %v139_v1 = vld [vmem:[#allocation5 + $0xc8] sm:$0xff]  ;;  %vm164_vm0 = vcmask 261120   ;;  %vm2704_vm1 = vcmask 7168  }
  0x1b   :  { %v140_v2 = vld [vmem:[#allocation5 + $0xd0] sm:$0xff]  ;;  %180 = vmatpush.msra.mxu0 %v138_v0  ;;  %200 = vmatpush.msra.mxu1 %v139_v1  ;;  %v141_v3 = vld [vmem:[#allocation5 + $0xd8] sm:$0xff]  ;;  %v130_v4 = vld [vmem:[#allocation5 + $0x80] sm:$0xff] }
  0x1c   :  { %v131_v5 = vld [vmem:[#allocation5 + $0x88] sm:$0xff]  ;;  %220 = vmatpush.msra.mxu2 %v140_v2  ;;  %240 = vmatpush.msra.mxu3 %v141_v3  ;;  %v132_v6 = vld [vmem:[#allocation5 + $0x90] sm:$0xff]  ;;  %v133_v7 = vld [vmem:[#allocation5 + $0x98] sm:$0xff] }
  0x1d   :  { %v122_v8 = vld [vmem:[#allocation5 + $0x40] sm:$0xff]  ;;  %181 = vmatpush.msra.mxu0 %v130_v4  ;;  %201 = vmatpush.msra.mxu1 %v131_v5  ;;  %v123_v9 = vld [vmem:[#allocation5 + $0x48] sm:$0xff]  ;;  %v124_v10 = vld [vmem:[#allocation5 + $0x50] sm:$0xff] }
  0x1e   :  { %v125_v11 = vld [vmem:[#allocation5 + $0x58] sm:$0xff]  ;;  %221 = vmatpush.msra.mxu2 %v132_v6  ;;  %241 = vmatpush.msra.mxu3 %v133_v7  ;;  %v114_v12 = vld [vmem:[#allocation5] sm:$0xff]  ;;  %v115_v13 = vld [vmem:[#allocation5 + $0x8] sm:$0xff] }
  0x1f   :  { %182 = vmatpush.msra.mxu0 %v122_v8  ;;  %202 = vmatpush.msra.mxu1 %v123_v9  ;;  %v116_v14 = vld [vmem:[#allocation5 + $0x10] sm:$0xff]  ;;  %v117_v15 = vld [vmem:[#allocation5 + $0x18] sm:$0xff]  ;;  %v142_v19 = vld [vmem:[#allocation5 + $0xe0] sm:$0xff] }
  0x20   :  { %222 = vmatpush.msra.mxu2 %v124_v10  ;;  %242 = vmatpush.msra.mxu3 %v125_v11  ;;  %v113_v16 = vld [vmem:[#allocation3] sm:$0xff]  ;;  %v144_v17 = vld [vmem:[#allocation5 + $0xf0] sm:$0xff]  ;;  %v143_v20 = vld [vmem:[#allocation5 + $0xe8] sm:$0xff] }
  0x21   :  { %183 = vmatpush.msra.mxu0 %v114_v12  ;;  %203 = vmatpush.msra.mxu1 %v115_v13  ;;  %v145_v18 = vld [vmem:[#allocation5 + $0xf8] sm:$0xff]  ;;  %v136_v21 = vld [vmem:[#allocation5 + $0xb0] sm:$0xff]  ;;  %v134_v23 = vld [vmem:[#allocation5 + $0xa0] sm:$0xff] }
  0x22   :  { %223 = vmatpush.msra.mxu2 %v116_v14  ;;  %243 = vmatpush.msra.mxu3 %v117_v15  ;;  %v137_v22 = vld [vmem:[#allocation5 + $0xb8] sm:$0xff]  ;;  %v135_v24 = vld [vmem:[#allocation5 + $0xa8] sm:$0xff]  ;;  %v128_v25 = vld [vmem:[#allocation5 + $0x70] sm:$0xff] }
  0x23   :  { %2714 = vmatmul.msk.f32.vlgmr.msra.gmra.mxu0 %vm164_vm0, %v113_v16  ;;  %2715 = vmatmul.msk.f32.vlgmr.msra.gmra.mxu1 %vm164_vm0, %v113_v16  ;;  %v129_v26 = vld [vmem:[#allocation5 + $0x78] sm:$0xff]  ;;  %v126_v27 = vld [vmem:[#allocation5 + $0x60] sm:$0xff]  ;;  %v127_v28 = vld [vmem:[#allocation5 + $0x68] sm:$0xff] }
  0x24   :  { %2716 = vmatmul.msk.f32.vlgmr.msra.gmra.mxu2 %vm164_vm0, %v113_v16  ;;  %2717 = vmatmul.msk.f32.vlgmr.msra.gmra.mxu3 %vm164_vm0, %v113_v16  ;;  %v120_v29 = vld [vmem:[#allocation5 + $0x30] sm:$0xff]  ;;  %v121_v30 = vld [vmem:[#allocation5 + $0x38] sm:$0xff]  ;;  %v118_v31 = vld [vmem:[#allocation5 + $0x20] sm:$0xff] }
  0x25   :  { %300 = vmatpush.msrb.mxu2 %v144_v17  ;;  %320 = vmatpush.msrb.mxu3 %v145_v18  ;;  %v119_v32 = vld [vmem:[#allocation5 + $0x28] sm:$0xff] }
  0x26   :  { %260 = vmatpush.msrb.mxu0 %v142_v19  ;;  %280 = vmatpush.msrb.mxu1 %v143_v20  ;;  %v456_v33 = vld [vmem:[#allocation8 + $0x3c0] sm:$0xff] }
  0x27   :  { %301 = vmatpush.msrb.mxu2 %v136_v21  ;;  %321 = vmatpush.msrb.mxu3 %v137_v22  ;;  %v584_v34 = vld [vmem:[#allocation8 + $0x7c0] sm:$0xff] }
  0x28   :  { %261 = vmatpush.msrb.mxu0 %v134_v23  ;;  %281 = vmatpush.msrb.mxu1 %v135_v24  ;;  %v712_v35 = vld [vmem:[#allocation8 + $0xbc0] sm:$0xff] }
  0x29   :  { %302 = vmatpush.msrb.mxu2 %v128_v25  ;;  %322 = vmatpush.msrb.mxu3 %v129_v26  ;;  %v840_v36 = vld [vmem:[#allocation8 + $0xfc0] sm:$0xff] }
  0x2a   :  { %262 = vmatpush.msrb.mxu0 %v126_v27  ;;  %282 = vmatpush.msrb.mxu1 %v127_v28  ;;  %v448_v37 = vld [vmem:[#allocation8 + $0x380] sm:$0xff] }
  0x2b   :  { %303 = vmatpush.msrb.mxu2 %v120_v29  ;;  %323 = vmatpush.msrb.mxu3 %v121_v30  ;;  %v576_v38 = vld [vmem:[#allocation8 + $0x780] sm:$0xff] }
  0x2c   :  { %2720 = vmatmul.msk.f32.vlgmr.msrb.gmra.mxu2 %vm164_vm0, %v113_v16  ;;  %2721 = vmatmul.msk.f32.vlgmr.msrb.gmra.mxu3 %vm164_vm0, %v113_v16  ;;  %v704_v39 = vld [vmem:[#allocation8 + $0xb80] sm:$0xff] }
  0x2d   :  { %263 = vmatpush.msrb.mxu0 %v118_v31  ;;  %283 = vmatpush.msrb.mxu1 %v119_v32  ;;  %v832_v40 = vld [vmem:[#allocation8 + $0xf80] sm:$0xff] }
  0x2e   :  { %2718 = vmatmul.msk.f32.vlgmr.msrb.gmra.mxu0 %vm164_vm0, %v113_v16  ;;  %2719 = vmatmul.msk.f32.vlgmr.msrb.gmra.mxu1 %vm164_vm0, %v113_v16  ;;  %v440_v41 = vld [vmem:[#allocation8 + $0x340] sm:$0xff] }
  0x2f   :  { %1378 = vmatpush.msra.mxu0 %v456_v33  ;;  %1398 = vmatpush.msra.mxu1 %v584_v34  ;;  %v568_v42 = vld [vmem:[#allocation8 + $0x740] sm:$0xff] }
  0x30   :  { %1418 = vmatpush.msra.mxu2 %v712_v35  ;;  %1438 = vmatpush.msra.mxu3 %v840_v36  ;;  %v696_v43 = vld [vmem:[#allocation8 + $0xb40] sm:$0xff] }
  0x31   :  { %1379 = vmatpush.msra.mxu0 %v448_v37  ;;  %1399 = vmatpush.msra.mxu1 %v576_v38  ;;  %v824_v44 = vld [vmem:[#allocation8 + $0xf40] sm:$0xff] }
  0x32   :  { %v432_v45 = vld [vmem:[#allocation8 + $0x300] sm:$0xff]  ;;  %1419 = vmatpush.msra.mxu2 %v704_v39  ;;  %1439 = vmatpush.msra.mxu3 %v832_v40 }
  0x33   :  { %v560_v46 = vld [vmem:[#allocation8 + $0x700] sm:$0xff]  ;;  %1380 = vmatpush.msra.mxu0 %v440_v41  ;;  %1400 = vmatpush.msra.mxu1 %v568_v42 }
  0x34   :  { %v688_v47 = vld [vmem:[#allocation8 + $0xb00] sm:$0xff]  ;;  %1420 = vmatpush.msra.mxu2 %v696_v43  ;;  %1440 = vmatpush.msra.mxu3 %v824_v44 }
  0x35   :  { %v816_v48 = vld [vmem:[#allocation8 + $0xf00] sm:$0xff]  ;;  %1381 = vmatpush.msra.mxu0 %v432_v45  ;;  %1401 = vmatpush.msra.mxu1 %v560_v46 }
  0x36   :  { %v424_v49 = vld [vmem:[#allocation8 + $0x2c0] sm:$0xff]  ;;  %1421 = vmatpush.msra.mxu2 %v688_v47  ;;  %1441 = vmatpush.msra.mxu3 %v816_v48 }
  0x37   :  { %v552_v50 = vld [vmem:[#allocation8 + $0x6c0] sm:$0xff]  ;;  %1382 = vmatpush.msra.mxu0 %v424_v49 }
  0x38   :  { %v680_v51 = vld [vmem:[#allocation8 + $0xac0] sm:$0xff]  ;;  %1402 = vmatpush.msra.mxu1 %v552_v50 }
  0x39   :  { %v808_v52 = vld [vmem:[#allocation8 + $0xec0] sm:$0xff]  ;;  %1422 = vmatpush.msra.mxu2 %v680_v51 }
  0x3a   :  { %v416_v53 = vld [vmem:[#allocation8 + $0x280] sm:$0xff]  ;;  %1442 = vmatpush.msra.mxu3 %v808_v52 }
  0x3b   :  { %v544_v54 = vld [vmem:[#allocation8 + $0x680] sm:$0xff]  ;;  %1383 = vmatpush.msra.mxu0 %v416_v53 }
  0x3c   :  { %v672_v55 = vld [vmem:[#allocation8 + $0xa80] sm:$0xff]  ;;  %1403 = vmatpush.msra.mxu1 %v544_v54 }
  0x3d   :  { %v800_v56 = vld [vmem:[#allocation8 + $0xe80] sm:$0xff]  ;;  %1423 = vmatpush.msra.mxu2 %v672_v55 }
  0x3e   :  { %v408_v57 = vld [vmem:[#allocation8 + $0x240] sm:$0xff]  ;;  %1443 = vmatpush.msra.mxu3 %v800_v56 }
  0x3f   :  { %v536_v58 = vld [vmem:[#allocation8 + $0x640] sm:$0xff]  ;;  %1384 = vmatpush.msra.mxu0 %v408_v57 }
  0x40   :  { %v664_v59 = vld [vmem:[#allocation8 + $0xa40] sm:$0xff]  ;;  %1404 = vmatpush.msra.mxu1 %v536_v58 }
  0x41   :  { %v792_v60 = vld [vmem:[#allocation8 + $0xe40] sm:$0xff]  ;;  %1424 = vmatpush.msra.mxu2 %v664_v59 }
  0x42   :  { %v400_v61 = vld [vmem:[#allocation8 + $0x200] sm:$0xff]  ;;  %1444 = vmatpush.msra.mxu3 %v792_v60 }
  0x43   :  { %v528_v62 = vld [vmem:[#allocation8 + $0x600] sm:$0xff]  ;;  %1385 = vmatpush.msra.mxu0 %v400_v61 }
  0x44   :  { %v656_v63 = vld [vmem:[#allocation8 + $0xa00] sm:$0xff]  ;;  %1405 = vmatpush.msra.mxu1 %v528_v62 }
  0x45   :  { %v784_v0 = vld [vmem:[#allocation8 + $0xe00] sm:$0xff]  ;;  %1425 = vmatpush.msra.mxu2 %v656_v63 }
  0x46   :  { %v392_v1 = vld [vmem:[#allocation8 + $0x1c0] sm:$0xff]  ;;  %1445 = vmatpush.msra.mxu3 %v784_v0 }
  0x47   :  { %v520_v2 = vld [vmem:[#allocation8 + $0x5c0] sm:$0xff]  ;;  %1386 = vmatpush.msra.mxu0 %v392_v1 }
  0x48   :  { %v648_v3 = vld [vmem:[#allocation8 + $0x9c0] sm:$0xff]  ;;  %1406 = vmatpush.msra.mxu1 %v520_v2 }
  0x49   :  { %v776_v4 = vld [vmem:[#allocation8 + $0xdc0] sm:$0xff]  ;;  %1426 = vmatpush.msra.mxu2 %v648_v3 }
  0x4a   :  { %v384_v5 = vld [vmem:[#allocation8 + $0x180] sm:$0xff]  ;;  %1446 = vmatpush.msra.mxu3 %v776_v4 }
  0x4b   :  { %v512_v6 = vld [vmem:[#allocation8 + $0x580] sm:$0xff]  ;;  %1387 = vmatpush.msra.mxu0 %v384_v5 }
  0x4c   :  { %v640_v7 = vld [vmem:[#allocation8 + $0x980] sm:$0xff]  ;;  %1407 = vmatpush.msra.mxu1 %v512_v6 }
  0x4d   :  { %v768_v8 = vld [vmem:[#allocation8 + $0xd80] sm:$0xff]  ;;  %1427 = vmatpush.msra.mxu2 %v640_v7 }
  0x4e   :  { %v376_v9 = vld [vmem:[#allocation8 + $0x140] sm:$0xff]  ;;  %1447 = vmatpush.msra.mxu3 %v768_v8 }
  0x4f   :  { %v504_v10 = vld [vmem:[#allocation8 + $0x540] sm:$0xff]  ;;  %1388 = vmatpush.msra.mxu0 %v376_v9 }
  0x50   :  { %v632_v11 = vld [vmem:[#allocation8 + $0x940] sm:$0xff]  ;;  %1408 = vmatpush.msra.mxu1 %v504_v10 }
  0x51   :  { %v760_v12 = vld [vmem:[#allocation8 + $0xd40] sm:$0xff]  ;;  %1428 = vmatpush.msra.mxu2 %v632_v11 }
  0x52   :  { %v368_v13 = vld [vmem:[#allocation8 + $0x100] sm:$0xff]  ;;  %1448 = vmatpush.msra.mxu3 %v760_v12 }
  0x53   :  { %v496_v14 = vld [vmem:[#allocation8 + $0x500] sm:$0xff]  ;;  %1389 = vmatpush.msra.mxu0 %v368_v13 }
  0x54   :  { %v624_v15 = vld [vmem:[#allocation8 + $0x900] sm:$0xff]  ;;  %1409 = vmatpush.msra.mxu1 %v496_v14 }
  0x55   :  { %v752_v16 = vld [vmem:[#allocation8 + $0xd00] sm:$0xff]  ;;  %1429 = vmatpush.msra.mxu2 %v624_v15 }
  0x56   :  { %v360_v17 = vld [vmem:[#allocation8 + $0xc0] sm:$0xff]  ;;  %1449 = vmatpush.msra.mxu3 %v752_v16 }
  0x57   :  { %v488_v18 = vld [vmem:[#allocation8 + $0x4c0] sm:$0xff]  ;;  %1390 = vmatpush.msra.mxu0 %v360_v17 }
  0x58   :  { %v616_v19 = vld [vmem:[#allocation8 + $0x8c0] sm:$0xff]  ;;  %1410 = vmatpush.msra.mxu1 %v488_v18 }
  0x59   :  { %v744_v20 = vld [vmem:[#allocation8 + $0xcc0] sm:$0xff]  ;;  %1430 = vmatpush.msra.mxu2 %v616_v19 }
  0x5a   :  { %v352_v21 = vld [vmem:[#allocation8 + $0x80] sm:$0xff]  ;;  %1450 = vmatpush.msra.mxu3 %v744_v20 }
  0x5b   :  { %v480_v22 = vld [vmem:[#allocation8 + $0x480] sm:$0xff]  ;;  %1391 = vmatpush.msra.mxu0 %v352_v21 }
  0x5c   :  { %v608_v23 = vld [vmem:[#allocation8 + $0x880] sm:$0xff]  ;;  %1411 = vmatpush.msra.mxu1 %v480_v22 }
  0x5d   :  { %v736_v24 = vld [vmem:[#allocation8 + $0xc80] sm:$0xff]  ;;  %1431 = vmatpush.msra.mxu2 %v608_v23 }
  0x5e   :  { %v344_v25 = vld [vmem:[#allocation8 + $0x40] sm:$0xff]  ;;  %1451 = vmatpush.msra.mxu3 %v736_v24 }
  0x5f   :  { %v472_v26 = vld [vmem:[#allocation8 + $0x440] sm:$0xff]  ;;  %1392 = vmatpush.msra.mxu0 %v344_v25 }
  0x60   :  { %v600_v27 = vld [vmem:[#allocation8 + $0x840] sm:$0xff]  ;;  %1412 = vmatpush.msra.mxu1 %v472_v26 }
  0x61   :  { %v728_v28 = vld [vmem:[#allocation8 + $0xc40] sm:$0xff]  ;;  %1432 = vmatpush.msra.mxu2 %v600_v27 }
  0x62   :  { %v336_v29 = vld [vmem:[#allocation8] sm:$0xff]  ;;  %1452 = vmatpush.msra.mxu3 %v728_v28 }
  0x63   :  { %v464_v30 = vld [vmem:[#allocation8 + $0x400] sm:$0xff]  ;;  %1393 = vmatpush.msra.mxu0 %v336_v29 }
  0x64   :  { %v968_v31 = vld [vmem:[#allocation8 + $0x13c0] sm:$0xff]  ;;  %1413 = vmatpush.msra.mxu1 %v464_v30 }
  0x65   :  { %v1096_v32 = vld [vmem:[#allocation8 + $0x17c0] sm:$0xff]  ;;  %1458 = vmatpush.msrb.mxu0 %v968_v31 }
  0x66   :  { %v592_v33 = vld [vmem:[#allocation8 + $0x800] sm:$0xff]  ;;  %1478 = vmatpush.msrb.mxu1 %v1096_v32 }
  0x67   :  { %v720_v34 = vld [vmem:[#allocation8 + $0xc00] sm:$0xff]  ;;  %1433 = vmatpush.msra.mxu2 %v592_v33  ;;  %v2958_v33 = vld [vmem:[#allocation7] sm:$0xff] }
  0x68   :  { %v960_v35 = vld [vmem:[#allocation8 + $0x1380] sm:$0xff]  ;;  %1453 = vmatpush.msra.mxu3 %v720_v34  ;;  %v148_v34 = vperm.slane %v2958_v33, 0 }
  0x69   :  { %v1088_v36 = vld [vmem:[#allocation8 + $0x1780] sm:$0xff]  ;;  %1459 = vmatpush.msrb.mxu0 %v960_v35  ;;  %v149_v35 = vperm.slane %v2958_v33, 1 }
  0x6a   :  { %v1224_v37 = vld [vmem:[#allocation8 + $0x1bc0] sm:$0xff]  ;;  %1479 = vmatpush.msrb.mxu1 %v1088_v36 }
  0x6b   :  { %v1352_v38 = vld [vmem:[#allocation8 + $0x1fc0] sm:$0xff]  ;;  %1498 = vmatpush.msrb.mxu2 %v1224_v37 }
  0x6c   :  { %v952_v39 = vld [vmem:[#allocation8 + $0x1340] sm:$0xff]  ;;  %1518 = vmatpush.msrb.mxu3 %v1352_v38 }
  0x6d   :  { %v1080_v40 = vld [vmem:[#allocation8 + $0x1740] sm:$0xff]  ;;  %1460 = vmatpush.msrb.mxu0 %v952_v39 }
  0x6e   :  { %v1216_v41 = vld [vmem:[#allocation8 + $0x1b80] sm:$0xff]  ;;  %1480 = vmatpush.msrb.mxu1 %v1080_v40 }
  0x6f   :  { %v1344_v42 = vld [vmem:[#allocation8 + $0x1f80] sm:$0xff]  ;;  %1499 = vmatpush.msrb.mxu2 %v1216_v41 }
  0x70   :  { %v944_v43 = vld [vmem:[#allocation8 + $0x1300] sm:$0xff]  ;;  %1519 = vmatpush.msrb.mxu3 %v1344_v42  ;;  %v457_v42 = vld [vmem:[#allocation8 + $0x3c8] sm:$0xff] }
  0x71   :  { %v1072_v44 = vld [vmem:[#allocation8 + $0x1700] sm:$0xff]  ;;  %1461 = vmatpush.msrb.mxu0 %v944_v43  ;;  %v585_v43 = vld [vmem:[#allocation8 + $0x7c8] sm:$0xff] }
  0x72   :  { %v1208_v45 = vld [vmem:[#allocation8 + $0x1b40] sm:$0xff]  ;;  %1481 = vmatpush.msrb.mxu1 %v1072_v44  ;;  %v150_v44 = vperm.slane %v2958_v33, 2 }
  0x73   :  { %v1336_v46 = vld [vmem:[#allocation8 + $0x1f40] sm:$0xff]  ;;  %1500 = vmatpush.msrb.mxu2 %v1208_v45  ;;  %v151_v45 = vperm.slane %v2958_v33, 3 }
  0x74   :  { %v936_v47 = vld [vmem:[#allocation8 + $0x12c0] sm:$0xff]  ;;  %1520 = vmatpush.msrb.mxu3 %v1336_v46  ;;  %v449_v46 = vld [vmem:[#allocation8 + $0x388] sm:$0xff] }
  0x75   :  { %v1064_v48 = vld [vmem:[#allocation8 + $0x16c0] sm:$0xff]  ;;  %1462 = vmatpush.msrb.mxu0 %v936_v47  ;;  %v577_v47 = vld [vmem:[#allocation8 + $0x788] sm:$0xff] }
  0x76   :  { %v1200_v49 = vld [vmem:[#allocation8 + $0x1b00] sm:$0xff]  ;;  %1482 = vmatpush.msrb.mxu1 %v1064_v48 }
  0x77   :  { %v1328_v50 = vld [vmem:[#allocation8 + $0x1f00] sm:$0xff]  ;;  %1501 = vmatpush.msrb.mxu2 %v1200_v49 }
  0x78   :  { %v928_v51 = vld [vmem:[#allocation8 + $0x1280] sm:$0xff]  ;;  %1521 = vmatpush.msrb.mxu3 %v1328_v50  ;;  %v441_v50 = vld [vmem:[#allocation8 + $0x348] sm:$0xff] }
  0x79   :  { %v1056_v52 = vld [vmem:[#allocation8 + $0x1680] sm:$0xff]  ;;  %1463 = vmatpush.msrb.mxu0 %v928_v51  ;;  %v569_v51 = vld [vmem:[#allocation8 + $0x748] sm:$0xff] }
  0x7a   :  { %v1192_v53 = vld [vmem:[#allocation8 + $0x1ac0] sm:$0xff]  ;;  %1483 = vmatpush.msrb.mxu1 %v1056_v52 }
  0x7b   :  { %v1320_v54 = vld [vmem:[#allocation8 + $0x1ec0] sm:$0xff]  ;;  %1502 = vmatpush.msrb.mxu2 %v1192_v53 }
  0x7c   :  { %v920_v55 = vld [vmem:[#allocation8 + $0x1240] sm:$0xff]  ;;  %1522 = vmatpush.msrb.mxu3 %v1320_v54 }
  0x7d   :  { %v1048_v56 = vld [vmem:[#allocation8 + $0x1640] sm:$0xff]  ;;  %1464 = vmatpush.msrb.mxu0 %v920_v55 }
  0x7e   :  { %v1184_v57 = vld [vmem:[#allocation8 + $0x1a80] sm:$0xff]  ;;  %1484 = vmatpush.msrb.mxu1 %v1048_v56  ;;  %v433_v56 = vld [vmem:[#allocation8 + $0x308] sm:$0xff] }
  0x7f   :  { %v1312_v58 = vld [vmem:[#allocation8 + $0x1e80] sm:$0xff]  ;;  %1503 = vmatpush.msrb.mxu2 %v1184_v57  ;;  %v561_v57 = vld [vmem:[#allocation8 + $0x708] sm:$0xff] }
  0x80   :  { %v912_v59 = vld [vmem:[#allocation8 + $0x1200] sm:$0xff]  ;;  %1523 = vmatpush.msrb.mxu3 %v1312_v58  ;;  %v713_v58 = vld [vmem:[#allocation8 + $0xbc8] sm:$0xff] }
  0x81   :  { %v1040_v60 = vld [vmem:[#allocation8 + $0x1600] sm:$0xff]  ;;  %1465 = vmatpush.msrb.mxu0 %v912_v59  ;;  %v841_v59 = vld [vmem:[#allocation8 + $0xfc8] sm:$0xff] }
  0x82   :  { %v1176_v61 = vld [vmem:[#allocation8 + $0x1a40] sm:$0xff]  ;;  %1485 = vmatpush.msrb.mxu1 %v1040_v60  ;;  %v152_v60 = vperm.slane %v2958_v33, 4 }
  0x83   :  { %v1304_v62 = vld [vmem:[#allocation8 + $0x1e40] sm:$0xff]  ;;  %1504 = vmatpush.msrb.mxu2 %v1176_v61  ;;  %v425_v61 = vld [vmem:[#allocation8 + $0x2c8] sm:$0xff] }
  0x84   :  { %v904_v63 = vld [vmem:[#allocation8 + $0x11c0] sm:$0xff]  ;;  %1524 = vmatpush.msrb.mxu3 %v1304_v62  ;;  %v553_v62 = vld [vmem:[#allocation8 + $0x6c8] sm:$0xff] }
  0x85   :  { %v1032_v0 = vld [vmem:[#allocation8 + $0x15c0] sm:$0xff]  ;;  %1466 = vmatpush.msrb.mxu0 %v904_v63  ;;  %v154_v63 = vperm.slane %v2958_v33, 6 }
  0x86   :  { %v1168_v1 = vld [vmem:[#allocation8 + $0x1a00] sm:$0xff]  ;;  %1486 = vmatpush.msrb.mxu1 %v1032_v0 }
  0x87   :  { %v1296_v2 = vld [vmem:[#allocation8 + $0x1e00] sm:$0xff]  ;;  %1505 = vmatpush.msrb.mxu2 %v1168_v1  ;;  %v155_v1 = vperm.slane %v2958_v33, 7 }
  0x88   :  { %v896_v3 = vld [vmem:[#allocation8 + $0x1180] sm:$0xff]  ;;  %1525 = vmatpush.msrb.mxu3 %v1296_v2  ;;  %v705_v2 = vld [vmem:[#allocation8 + $0xb88] sm:$0xff] }
  0x89   :  { %v1024_v4 = vld [vmem:[#allocation8 + $0x1580] sm:$0xff]  ;;  %1467 = vmatpush.msrb.mxu0 %v896_v3  ;;  %v833_v3 = vld [vmem:[#allocation8 + $0xf88] sm:$0xff] }
  0x8a   :  { %v1160_v5 = vld [vmem:[#allocation8 + $0x19c0] sm:$0xff]  ;;  %1487 = vmatpush.msrb.mxu1 %v1024_v4  ;;  %v417_v4 = vld [vmem:[#allocation8 + $0x288] sm:$0xff] }
  0x8b   :  { %v1288_v6 = vld [vmem:[#allocation8 + $0x1dc0] sm:$0xff]  ;;  %1506 = vmatpush.msrb.mxu2 %v1160_v5  ;;  %v545_v5 = vld [vmem:[#allocation8 + $0x688] sm:$0xff] }
  0x8c   :  { %v888_v7 = vld [vmem:[#allocation8 + $0x1140] sm:$0xff]  ;;  %1526 = vmatpush.msrb.mxu3 %v1288_v6  ;;  %v153_v6 = vperm.slane %v2958_v33, 5  ;;  %v513_v33 = vld [vmem:[#allocation8 + $0x588] sm:$0xff] }
  0x8d   :  { %v1016_v8 = vld [vmem:[#allocation8 + $0x1540] sm:$0xff]  ;;  %1468 = vmatpush.msrb.mxu0 %v888_v7 }
  0x8e   :  { %v1152_v9 = vld [vmem:[#allocation8 + $0x1980] sm:$0xff]  ;;  %1488 = vmatpush.msrb.mxu1 %v1016_v8 }
  0x8f   :  { %v1280_v10 = vld [vmem:[#allocation8 + $0x1d80] sm:$0xff]  ;;  %1507 = vmatpush.msrb.mxu2 %v1152_v9  ;;  %v697_v9 = vld [vmem:[#allocation8 + $0xb48] sm:$0xff] }
  0x90   :  { %v880_v11 = vld [vmem:[#allocation8 + $0x1100] sm:$0xff]  ;;  %1527 = vmatpush.msrb.mxu3 %v1280_v10  ;;  %v825_v10 = vld [vmem:[#allocation8 + $0xf48] sm:$0xff] }
  0x91   :  { %v1008_v12 = vld [vmem:[#allocation8 + $0x1500] sm:$0xff]  ;;  %1469 = vmatpush.msrb.mxu0 %v880_v11 }
  0x92   :  { %v872_v13 = vld [vmem:[#allocation8 + $0x10c0] sm:$0xff]  ;;  %1489 = vmatpush.msrb.mxu1 %v1008_v12 }
  0x93   :  { %v1000_v14 = vld [vmem:[#allocation8 + $0x14c0] sm:$0xff]  ;;  %1470 = vmatpush.msrb.mxu0 %v872_v13 }
  0x94   :  { %1490 = vmatpush.msrb.mxu1 %v1000_v14  ;;  %v864_v15 = vld [vmem:[#allocation8 + $0x1080] sm:$0xff] }
  0x95   :  { %v992_v16 = vld [vmem:[#allocation8 + $0x1480] sm:$0xff]  ;;  %1471 = vmatpush.msrb.mxu0 %v864_v15  ;;  %v409_v15 = vld [vmem:[#allocation8 + $0x248] sm:$0xff] }
  0x96   :  { %v1144_v17 = vld [vmem:[#allocation8 + $0x1940] sm:$0xff]  ;;  %1491 = vmatpush.msrb.mxu1 %v992_v16  ;;  %v537_v16 = vld [vmem:[#allocation8 + $0x648] sm:$0xff] }
  0x97   :  { %v1272_v18 = vld [vmem:[#allocation8 + $0x1d40] sm:$0xff]  ;;  %1508 = vmatpush.msrb.mxu2 %v1144_v17  ;;  %v689_v17 = vld [vmem:[#allocation8 + $0xb08] sm:$0xff] }
  0x98   :  { %1528 = vmatpush.msrb.mxu3 %v1272_v18  ;;  %v856_v19 = vld [vmem:[#allocation8 + $0x1040] sm:$0xff]  ;;  %v817_v18 = vld [vmem:[#allocation8 + $0xf08] sm:$0xff] }
  0x99   :  { %v984_v20 = vld [vmem:[#allocation8 + $0x1440] sm:$0xff]  ;;  %1472 = vmatpush.msrb.mxu0 %v856_v19 }
  0x9a   :  { %v1136_v21 = vld [vmem:[#allocation8 + $0x1900] sm:$0xff]  ;;  %1492 = vmatpush.msrb.mxu1 %v984_v20 }
  0x9b   :  { %v1264_v22 = vld [vmem:[#allocation8 + $0x1d00] sm:$0xff]  ;;  %1509 = vmatpush.msrb.mxu2 %v1136_v21  ;;  %v401_v21 = vld [vmem:[#allocation8 + $0x208] sm:$0xff] }
  0x9c   :  { %v848_v23 = vld [vmem:[#allocation8 + $0x1000] sm:$0xff]  ;;  %1529 = vmatpush.msrb.mxu3 %v1264_v22 }
  0x9d   :  { %v976_v24 = vld [vmem:[#allocation8 + $0x1400] sm:$0xff]  ;;  %1473 = vmatpush.msrb.mxu0 %v848_v23  ;;  %v529_v23 = vld [vmem:[#allocation8 + $0x608] sm:$0xff] }
  0x9e   :  { %v1128_v25 = vld [vmem:[#allocation8 + $0x18c0] sm:$0xff]  ;;  %1493 = vmatpush.msrb.mxu1 %v976_v24  ;;  %v681_v24 = vld [vmem:[#allocation8 + $0xac8] sm:$0xff] }
  0x9f   :  { %v1256_v26 = vld [vmem:[#allocation8 + $0x1cc0] sm:$0xff]  ;;  %1510 = vmatpush.msrb.mxu2 %v1128_v25 }
  0xa0   :  { %1530 = vmatpush.msrb.mxu3 %v1256_v26  ;;  %v1120_v27 = vld [vmem:[#allocation8 + $0x1880] sm:$0xff]  ;;  %v185_v36 = vpop.f32.mrf.mxu0  ;;  %v205_v37 = vpop.f32.mrf.mxu1  ;;  %v809_v26 = vld [vmem:[#allocation8 + $0xec8] sm:$0xff] }
  0xa1   :  { %v1248_v28 = vld [vmem:[#allocation8 + $0x1c80] sm:$0xff]  ;;  %1511 = vmatpush.msrb.mxu2 %v1120_v27  ;;  %v186_v38 = vadd.f32 %v185_v36, %v148_v34  ;;  %v206_v39 = vadd.f32 %v205_v37, %v149_v35  ;;  %v393_v27 = vld [vmem:[#allocation8 + $0x1c8] sm:$0xff] }
  0xa2   :  { %1531 = vmatpush.msrb.mxu3 %v1248_v28  ;;  %v1112_v29 = vld [vmem:[#allocation8 + $0x1840] sm:$0xff]  ;;  %v665_v34 = vld [vmem:[#allocation8 + $0xa48] sm:$0xff] }
  0xa3   :  { %v1240_v30 = vld [vmem:[#allocation8 + $0x1c40] sm:$0xff]  ;;  %1512 = vmatpush.msrb.mxu2 %v1112_v29  ;;  %v2962_v40 = vmax.f32 %v186_v38, 0.0  ;;  %v2964_v41 = vmax.f32 %v206_v39, 0.0  ;;  %v521_v29 = vld [vmem:[#allocation8 + $0x5c8] sm:$0xff] }
  0xa4   :  { %1532 = vmatpush.msrb.mxu3 %v1240_v30  ;;  %v1104_v31 = vld [vmem:[#allocation8 + $0x1800] sm:$0xff]  ;;  %v673_v30 = vld [vmem:[#allocation8 + $0xa88] sm:$0xff] }
  0xa5   :  { %v1232_v32 = vld [vmem:[#allocation8 + $0x1c00] sm:$0xff]  ;;  %1513 = vmatpush.msrb.mxu2 %v1104_v31  ;;  %1394 = vmatmul.f32.vlgmr.msra.gmra.mxu0 %v2962_v40  ;;  %v801_v31 = vld [vmem:[#allocation8 + $0xe88] sm:$0xff] }
  0xa6   :  { %1533 = vmatpush.msrb.mxu3 %v1232_v32  ;;  %1414 = vmatmul.f32.vlgmr.msra.gmra.mxu1 %v2964_v41  ;;  %v385_v32 = vld [vmem:[#allocation8 + $0x188] sm:$0xff] }
  0xa7   :  { %1538 = vmatpush.msra.mxu0 %v457_v42  ;;  %1558 = vmatpush.msra.mxu1 %v585_v43  ;;  %v225_v48 = vpop.f32.mrf.mxu2  ;;  %v245_v49 = vpop.f32.mrf.mxu3  ;;  %v793_v35 = vld [vmem:[#allocation8 + $0xe48] sm:$0xff] }
  0xa8   :  { %v226_v52 = vadd.f32 %v225_v48, %v150_v44  ;;  %v246_v53 = vadd.f32 %v245_v49, %v151_v45  ;;  %v377_v36 = vld [vmem:[#allocation8 + $0x148] sm:$0xff] }
  0xa9   :  { %1539 = vmatpush.msra.mxu0 %v449_v46  ;;  %1559 = vmatpush.msra.mxu1 %v577_v47  ;;  %v505_v37 = vld [vmem:[#allocation8 + $0x548] sm:$0xff] }
  0xaa   :  { %v2970_v54 = vmax.f32 %v226_v52, 0.0  ;;  %v2972_v55 = vmax.f32 %v246_v53, 0.0  ;;  %v657_v38 = vld [vmem:[#allocation8 + $0xa08] sm:$0xff] }
  0xab   :  { %1540 = vmatpush.msra.mxu0 %v441_v50  ;;  %1560 = vmatpush.msra.mxu1 %v569_v51  ;;  %v265_v0 = vpop.f32.mrf.mxu0  ;;  %v285_v7 = vpop.f32.mrf.mxu1  ;;  %v785_v39 = vld [vmem:[#allocation8 + $0xe08] sm:$0xff] }
  0xac   :  { %1434 = vmatmul.f32.vlgmr.msra.gmra.mxu2 %v2970_v54  ;;  %1454 = vmatmul.f32.vlgmr.msra.gmra.mxu3 %v2972_v55  ;;  %v266_v11 = vadd.f32 %v265_v0, %v152_v60  ;;  %v286_v20 = vadd.f32 %v285_v7, %v153_v6  ;;  %v369_v42 = vld [vmem:[#allocation8 + $0x108] sm:$0xff] }
  0xad   :  { %1541 = vmatpush.msra.mxu0 %v433_v56  ;;  %1561 = vmatpush.msra.mxu1 %v561_v57  ;;  %v497_v43 = vld [vmem:[#allocation8 + $0x508] sm:$0xff] }
  0xae   :  { %1578 = vmatpush.msra.mxu2 %v713_v58  ;;  %1598 = vmatpush.msra.mxu3 %v841_v59  ;;  %v2982_v22 = vmax.f32 %v266_v11, 0.0  ;;  %v2987_v28 = vmax.f32 %v286_v20, 0.0  ;;  %v649_v44 = vld [vmem:[#allocation8 + $0x9c8] sm:$0xff] }
  0xaf   :  { %1542 = vmatpush.msra.mxu0 %v425_v61  ;;  %1562 = vmatpush.msra.mxu1 %v553_v62  ;;  %v305_v8 = vpop.f32.mrf.mxu2  ;;  %v325_v12 = vpop.f32.mrf.mxu3  ;;  %v777_v45 = vld [vmem:[#allocation8 + $0xdc8] sm:$0xff] }
  0xb0   :  { %1579 = vmatpush.msra.mxu2 %v705_v2  ;;  %1599 = vmatpush.msra.mxu3 %v833_v3  ;;  %v306_v13 = vadd.f32 %v305_v8, %v154_v63  ;;  %v326_v14 = vadd.f32 %v325_v12, %v155_v1  ;;  %v361_v46 = vld [vmem:[#allocation8 + $0xc8] sm:$0xff] }
  0xb1   :  { %1543 = vmatpush.msra.mxu0 %v417_v4  ;;  %1563 = vmatpush.msra.mxu1 %v545_v5  ;;  %v489_v47 = vld [vmem:[#allocation8 + $0x4c8] sm:$0xff] }
  0xb2   :  { %v2980_v19 = vmax.f32 %v306_v13, 0.0  ;;  %1580 = vmatpush.msra.mxu2 %v697_v9  ;;  %1600 = vmatpush.msra.mxu3 %v825_v10  ;;  %v2984_v25 = vmax.f32 %v326_v14, 0.0  ;;  %v641_v48 = vld [vmem:[#allocation8 + $0x988] sm:$0xff] }
  0xb3   :  { %1544 = vmatpush.msra.mxu0 %v409_v15  ;;  %1564 = vmatpush.msra.mxu1 %v537_v16  ;;  %v769_v49 = vld [vmem:[#allocation8 + $0xd88] sm:$0xff] }
  0xb4   :  { %1581 = vmatpush.msra.mxu2 %v689_v17  ;;  %1601 = vmatpush.msra.mxu3 %v817_v18  ;;  %v353_v50 = vld [vmem:[#allocation8 + $0x88] sm:$0xff] }
  0xb5   :  { %1514 = vmatmul.f32.vlgmr.msrb.gmra.mxu2 %v2980_v19  ;;  %1545 = vmatpush.msra.mxu0 %v401_v21  ;;  %v481_v51 = vld [vmem:[#allocation8 + $0x488] sm:$0xff] }
  0xb6   :  { %1565 = vmatpush.msra.mxu1 %v529_v23  ;;  %1582 = vmatpush.msra.mxu2 %v681_v24  ;;  %v633_v52 = vld [vmem:[#allocation8 + $0x948] sm:$0xff] }
  0xb7   :  { %1602 = vmatpush.msra.mxu3 %v809_v26  ;;  %1474 = vmatmul.f32.vlgmr.msrb.gmra.mxu0 %v2982_v22  ;;  %v761_v53 = vld [vmem:[#allocation8 + $0xd48] sm:$0xff] }
  0xb8   :  { %1534 = vmatmul.f32.vlgmr.msrb.gmra.mxu3 %v2984_v25  ;;  %1546 = vmatpush.msra.mxu0 %v393_v27  ;;  %v345_v56 = vld [vmem:[#allocation8 + $0x48] sm:$0xff] }
  0xb9   :  { %1566 = vmatpush.msra.mxu1 %v521_v29  ;;  %1583 = vmatpush.msra.mxu2 %v673_v30  ;;  %v473_v57 = vld [vmem:[#allocation8 + $0x448] sm:$0xff] }
  0xba   :  { %1603 = vmatpush.msra.mxu3 %v801_v31  ;;  %1494 = vmatmul.f32.vlgmr.msrb.gmra.mxu1 %v2987_v28  ;;  %v625_v58 = vld [vmem:[#allocation8 + $0x908] sm:$0xff] }
  0xbb   :  { %1547 = vmatpush.msra.mxu0 %v385_v32  ;;  %1567 = vmatpush.msra.mxu1 %v513_v33  ;;  %v753_v59 = vld [vmem:[#allocation8 + $0xd08] sm:$0xff] }
  0xbc   :  { %1584 = vmatpush.msra.mxu2 %v665_v34  ;;  %1604 = vmatpush.msra.mxu3 %v793_v35  ;;  %v337_v60 = vld [vmem:[#allocation8 + $0x8] sm:$0xff] }
  0xbd   :  { %1548 = vmatpush.msra.mxu0 %v377_v36  ;;  %1568 = vmatpush.msra.mxu1 %v505_v37  ;;  %v465_v61 = vld [vmem:[#allocation8 + $0x408] sm:$0xff] }
  0xbe   :  { %1585 = vmatpush.msra.mxu2 %v657_v38  ;;  %1605 = vmatpush.msra.mxu3 %v785_v39  ;;  %v617_v62 = vld [vmem:[#allocation8 + $0x8c8] sm:$0xff] }
  0xbf   :  { %1549 = vmatpush.msra.mxu0 %v369_v42  ;;  %1569 = vmatpush.msra.mxu1 %v497_v43  ;;  %v745_v63 = vld [vmem:[#allocation8 + $0xcc8] sm:$0xff] }
  0xc0   :  { %1586 = vmatpush.msra.mxu2 %v649_v44  ;;  %1606 = vmatpush.msra.mxu3 %v777_v45  ;;  %v969_v0 = vld [vmem:[#allocation8 + $0x13c8] sm:$0xff] }
  0xc1   :  { %1550 = vmatpush.msra.mxu0 %v361_v46  ;;  %1570 = vmatpush.msra.mxu1 %v489_v47  ;;  %v1097_v1 = vld [vmem:[#allocation8 + $0x17c8] sm:$0xff] }
  0xc2   :  { %1587 = vmatpush.msra.mxu2 %v641_v48  ;;  %1607 = vmatpush.msra.mxu3 %v769_v49  ;;  %v609_v2 = vld [vmem:[#allocation8 + $0x888] sm:$0xff] }
  0xc3   :  { %1551 = vmatpush.msra.mxu0 %v353_v50  ;;  %1571 = vmatpush.msra.mxu1 %v481_v51  ;;  %v737_v3 = vld [vmem:[#allocation8 + $0xc88] sm:$0xff] }
  0xc4   :  { %1588 = vmatpush.msra.mxu2 %v633_v52  ;;  %1608 = vmatpush.msra.mxu3 %v761_v53  ;;  %v961_v4 = vld [vmem:[#allocation8 + $0x1388] sm:$0xff] }
  0xc5   :  { %1552 = vmatpush.msra.mxu0 %v345_v56  ;;  %1572 = vmatpush.msra.mxu1 %v473_v57  ;;  %v1089_v5 = vld [vmem:[#allocation8 + $0x1788] sm:$0xff] }
  0xc6   :  { %1589 = vmatpush.msra.mxu2 %v625_v58  ;;  %1609 = vmatpush.msra.mxu3 %v753_v59  ;;  %v601_v6 = vld [vmem:[#allocation8 + $0x848] sm:$0xff] }
  0xc7   :  { %1553 = vmatpush.msra.mxu0 %v337_v60  ;;  %1573 = vmatpush.msra.mxu1 %v465_v61  ;;  %v729_v7 = vld [vmem:[#allocation8 + $0xc48] sm:$0xff] }
  0xc8   :  { %1590 = vmatpush.msra.mxu2 %v617_v62  ;;  %1610 = vmatpush.msra.mxu3 %v745_v63  ;;  %v953_v8 = vld [vmem:[#allocation8 + $0x1348] sm:$0xff] }
  0xc9   :  { %1554 = vmatmul.f32.vlgmr.msra.gmra.mxu0 %v2962_v40  ;;  %1574 = vmatmul.f32.vlgmr.msra.gmra.mxu1 %v2964_v41  ;;  %v1081_v9 = vld [vmem:[#allocation8 + $0x1748] sm:$0xff] }
  0xca   :  { %1618 = vmatpush.msrb.mxu0 %v969_v0  ;;  %1638 = vmatpush.msrb.mxu1 %v1097_v1  ;;  %v593_v10 = vld [vmem:[#allocation8 + $0x808] sm:$0xff] }
  0xcb   :  { %1591 = vmatpush.msra.mxu2 %v609_v2  ;;  %1611 = vmatpush.msra.mxu3 %v737_v3  ;;  %v721_v11 = vld [vmem:[#allocation8 + $0xc08] sm:$0xff] }
  0xcc   :  { %1619 = vmatpush.msrb.mxu0 %v961_v4  ;;  %1639 = vmatpush.msrb.mxu1 %v1089_v5  ;;  %v945_v12 = vld [vmem:[#allocation8 + $0x1308] sm:$0xff] }
  0xcd   :  { %1592 = vmatpush.msra.mxu2 %v601_v6  ;;  %1612 = vmatpush.msra.mxu3 %v729_v7  ;;  %v1073_v13 = vld [vmem:[#allocation8 + $0x1708] sm:$0xff] }
  0xce   :  { %1620 = vmatpush.msrb.mxu0 %v953_v8  ;;  %1640 = vmatpush.msrb.mxu1 %v1081_v9  ;;  %v1225_v14 = vld [vmem:[#allocation8 + $0x1bc8] sm:$0xff]  ;;  %v458_v8 = vld [vmem:[#allocation8 + $0x3d0] sm:$0xff] }
  0xcf   :  { %1593 = vmatpush.msra.mxu2 %v593_v10  ;;  %1613 = vmatpush.msra.mxu3 %v721_v11  ;;  %v1353_v15 = vld [vmem:[#allocation8 + $0x1fc8] sm:$0xff]  ;;  %v586_v9 = vld [vmem:[#allocation8 + $0x7d0] sm:$0xff] }
  0xd0   :  { %1594 = vmatmul.f32.vlgmr.msra.gmra.mxu2 %v2970_v54  ;;  %1614 = vmatmul.f32.vlgmr.msra.gmra.mxu3 %v2972_v55  ;;  %v937_v16 = vld [vmem:[#allocation8 + $0x12c8] sm:$0xff] }
  0xd1   :  { %v1065_v17 = vld [vmem:[#allocation8 + $0x16c8] sm:$0xff]  ;;  %1621 = vmatpush.msrb.mxu0 %v945_v12  ;;  %1641 = vmatpush.msrb.mxu1 %v1073_v13  ;;  %v450_v12 = vld [vmem:[#allocation8 + $0x390] sm:$0xff] }
  0xd2   :  { %v1217_v18 = vld [vmem:[#allocation8 + $0x1b88] sm:$0xff]  ;;  %1658 = vmatpush.msrb.mxu2 %v1225_v14  ;;  %1678 = vmatpush.msrb.mxu3 %v1353_v15  ;;  %v578_v13 = vld [vmem:[#allocation8 + $0x790] sm:$0xff] }
  0xd3   :  { %v1345_v20 = vld [vmem:[#allocation8 + $0x1f88] sm:$0xff]  ;;  %1622 = vmatpush.msrb.mxu0 %v937_v16  ;;  %1642 = vmatpush.msrb.mxu1 %v1065_v17  ;;  %v442_v16 = vld [vmem:[#allocation8 + $0x350] sm:$0xff] }
  0xd4   :  { %v929_v21 = vld [vmem:[#allocation8 + $0x1288] sm:$0xff]  ;;  %1659 = vmatpush.msrb.mxu2 %v1217_v18  ;;  %1679 = vmatpush.msrb.mxu3 %v1345_v20  ;;  %v570_v17 = vld [vmem:[#allocation8 + $0x750] sm:$0xff] }
  0xd5   :  { %v1057_v23 = vld [vmem:[#allocation8 + $0x1688] sm:$0xff]  ;;  %1623 = vmatpush.msrb.mxu0 %v929_v21  ;;  %v434_v21 = vld [vmem:[#allocation8 + $0x310] sm:$0xff] }
  0xd6   :  { %v1209_v24 = vld [vmem:[#allocation8 + $0x1b48] sm:$0xff]  ;;  %1643 = vmatpush.msrb.mxu1 %v1057_v23  ;;  %v562_v23 = vld [vmem:[#allocation8 + $0x710] sm:$0xff] }
  0xd7   :  { %v1337_v26 = vld [vmem:[#allocation8 + $0x1f48] sm:$0xff]  ;;  %1660 = vmatpush.msrb.mxu2 %v1209_v24  ;;  %v714_v24 = vld [vmem:[#allocation8 + $0xbd0] sm:$0xff] }
  0xd8   :  { %v921_v27 = vld [vmem:[#allocation8 + $0x1248] sm:$0xff]  ;;  %1680 = vmatpush.msrb.mxu3 %v1337_v26  ;;  %v842_v26 = vld [vmem:[#allocation8 + $0xfd0] sm:$0xff] }
  0xd9   :  { %v1049_v29 = vld [vmem:[#allocation8 + $0x1648] sm:$0xff]  ;;  %1624 = vmatpush.msrb.mxu0 %v921_v27  ;;  %v426_v27 = vld [vmem:[#allocation8 + $0x2d0] sm:$0xff] }
  0xda   :  { %v1201_v30 = vld [vmem:[#allocation8 + $0x1b08] sm:$0xff]  ;;  %1644 = vmatpush.msrb.mxu1 %v1049_v29  ;;  %v554_v29 = vld [vmem:[#allocation8 + $0x6d0] sm:$0xff] }
  0xdb   :  { %v1329_v31 = vld [vmem:[#allocation8 + $0x1f08] sm:$0xff]  ;;  %1661 = vmatpush.msrb.mxu2 %v1201_v30  ;;  %v706_v30 = vld [vmem:[#allocation8 + $0xb90] sm:$0xff] }
  0xdc   :  { %v913_v32 = vld [vmem:[#allocation8 + $0x1208] sm:$0xff]  ;;  %1681 = vmatpush.msrb.mxu3 %v1329_v31  ;;  %v834_v31 = vld [vmem:[#allocation8 + $0xf90] sm:$0xff] }
  0xdd   :  { %v1041_v33 = vld [vmem:[#allocation8 + $0x1608] sm:$0xff]  ;;  %1625 = vmatpush.msrb.mxu0 %v913_v32  ;;  %v418_v32 = vld [vmem:[#allocation8 + $0x290] sm:$0xff] }
  0xde   :  { %v1193_v34 = vld [vmem:[#allocation8 + $0x1ac8] sm:$0xff]  ;;  %1645 = vmatpush.msrb.mxu1 %v1041_v33  ;;  %v546_v33 = vld [vmem:[#allocation8 + $0x690] sm:$0xff] }
  0xdf   :  { %v1321_v35 = vld [vmem:[#allocation8 + $0x1ec8] sm:$0xff]  ;;  %1662 = vmatpush.msrb.mxu2 %v1193_v34  ;;  %v698_v34 = vld [vmem:[#allocation8 + $0xb50] sm:$0xff] }
  0xe0   :  { %v905_v36 = vld [vmem:[#allocation8 + $0x11c8] sm:$0xff]  ;;  %1682 = vmatpush.msrb.mxu3 %v1321_v35  ;;  %v826_v35 = vld [vmem:[#allocation8 + $0xf50] sm:$0xff] }
  0xe1   :  { %v1033_v37 = vld [vmem:[#allocation8 + $0x15c8] sm:$0xff]  ;;  %1626 = vmatpush.msrb.mxu0 %v905_v36  ;;  %v410_v36 = vld [vmem:[#allocation8 + $0x250] sm:$0xff] }
  0xe2   :  { %v1185_v38 = vld [vmem:[#allocation8 + $0x1a88] sm:$0xff]  ;;  %1646 = vmatpush.msrb.mxu1 %v1033_v37  ;;  %v538_v37 = vld [vmem:[#allocation8 + $0x650] sm:$0xff] }
  0xe3   :  { %v1313_v39 = vld [vmem:[#allocation8 + $0x1e88] sm:$0xff]  ;;  %1663 = vmatpush.msrb.mxu2 %v1185_v38  ;;  %v690_v38 = vld [vmem:[#allocation8 + $0xb10] sm:$0xff] }
  0xe4   :  { %v897_v42 = vld [vmem:[#allocation8 + $0x1188] sm:$0xff]  ;;  %1683 = vmatpush.msrb.mxu3 %v1313_v39  ;;  %v818_v39 = vld [vmem:[#allocation8 + $0xf10] sm:$0xff] }
  0xe5   :  { %v1025_v43 = vld [vmem:[#allocation8 + $0x1588] sm:$0xff]  ;;  %1627 = vmatpush.msrb.mxu0 %v897_v42  ;;  %v402_v42 = vld [vmem:[#allocation8 + $0x210] sm:$0xff] }
  0xe6   :  { %v1177_v44 = vld [vmem:[#allocation8 + $0x1a48] sm:$0xff]  ;;  %1647 = vmatpush.msrb.mxu1 %v1025_v43  ;;  %v530_v43 = vld [vmem:[#allocation8 + $0x610] sm:$0xff] }
  0xe7   :  { %v1305_v45 = vld [vmem:[#allocation8 + $0x1e48] sm:$0xff]  ;;  %1664 = vmatpush.msrb.mxu2 %v1177_v44  ;;  %v682_v44 = vld [vmem:[#allocation8 + $0xad0] sm:$0xff] }
  0xe8   :  { %v889_v46 = vld [vmem:[#allocation8 + $0x1148] sm:$0xff]  ;;  %1684 = vmatpush.msrb.mxu3 %v1305_v45  ;;  %v810_v45 = vld [vmem:[#allocation8 + $0xed0] sm:$0xff] }
  0xe9   :  { %v1017_v47 = vld [vmem:[#allocation8 + $0x1548] sm:$0xff]  ;;  %1628 = vmatpush.msrb.mxu0 %v889_v46  ;;  %v394_v46 = vld [vmem:[#allocation8 + $0x1d0] sm:$0xff] }
  0xea   :  { %v1169_v48 = vld [vmem:[#allocation8 + $0x1a08] sm:$0xff]  ;;  %1648 = vmatpush.msrb.mxu1 %v1017_v47  ;;  %v522_v47 = vld [vmem:[#allocation8 + $0x5d0] sm:$0xff] }
  0xeb   :  { %v1297_v49 = vld [vmem:[#allocation8 + $0x1e08] sm:$0xff]  ;;  %1665 = vmatpush.msrb.mxu2 %v1169_v48  ;;  %v674_v48 = vld [vmem:[#allocation8 + $0xa90] sm:$0xff] }
  0xec   :  { %v881_v50 = vld [vmem:[#allocation8 + $0x1108] sm:$0xff]  ;;  %1685 = vmatpush.msrb.mxu3 %v1297_v49  ;;  %v802_v49 = vld [vmem:[#allocation8 + $0xe90] sm:$0xff] }
  0xed   :  { %v1009_v51 = vld [vmem:[#allocation8 + $0x1508] sm:$0xff]  ;;  %1629 = vmatpush.msrb.mxu0 %v881_v50  ;;  %v386_v50 = vld [vmem:[#allocation8 + $0x190] sm:$0xff] }
  0xee   :  { %v1161_v52 = vld [vmem:[#allocation8 + $0x19c8] sm:$0xff]  ;;  %1649 = vmatpush.msrb.mxu1 %v1009_v51  ;;  %v514_v51 = vld [vmem:[#allocation8 + $0x590] sm:$0xff] }
  0xef   :  { %v1289_v53 = vld [vmem:[#allocation8 + $0x1dc8] sm:$0xff]  ;;  %1666 = vmatpush.msrb.mxu2 %v1161_v52  ;;  %v666_v52 = vld [vmem:[#allocation8 + $0xa50] sm:$0xff] }
  0xf0   :  { %v873_v56 = vld [vmem:[#allocation8 + $0x10c8] sm:$0xff]  ;;  %1686 = vmatpush.msrb.mxu3 %v1289_v53  ;;  %v794_v53 = vld [vmem:[#allocation8 + $0xe50] sm:$0xff] }
  0xf1   :  { %v1001_v57 = vld [vmem:[#allocation8 + $0x14c8] sm:$0xff]  ;;  %1630 = vmatpush.msrb.mxu0 %v873_v56  ;;  %v378_v56 = vld [vmem:[#allocation8 + $0x150] sm:$0xff] }
  0xf2   :  { %v1153_v58 = vld [vmem:[#allocation8 + $0x1988] sm:$0xff]  ;;  %1650 = vmatpush.msrb.mxu1 %v1001_v57  ;;  %v506_v57 = vld [vmem:[#allocation8 + $0x550] sm:$0xff] }
  0xf3   :  { %v1281_v59 = vld [vmem:[#allocation8 + $0x1d88] sm:$0xff]  ;;  %1667 = vmatpush.msrb.mxu2 %v1153_v58  ;;  %v658_v58 = vld [vmem:[#allocation8 + $0xa10] sm:$0xff] }
  0xf4   :  { %v865_v60 = vld [vmem:[#allocation8 + $0x1088] sm:$0xff]  ;;  %1687 = vmatpush.msrb.mxu3 %v1281_v59  ;;  %v786_v59 = vld [vmem:[#allocation8 + $0xe10] sm:$0xff] }
  0xf5   :  { %v993_v61 = vld [vmem:[#allocation8 + $0x1488] sm:$0xff]  ;;  %1631 = vmatpush.msrb.mxu0 %v865_v60  ;;  %v370_v60 = vld [vmem:[#allocation8 + $0x110] sm:$0xff] }
  0xf6   :  { %v1145_v62 = vld [vmem:[#allocation8 + $0x1948] sm:$0xff]  ;;  %1651 = vmatpush.msrb.mxu1 %v993_v61  ;;  %v498_v61 = vld [vmem:[#allocation8 + $0x510] sm:$0xff] }
  0xf7   :  { %v1273_v63 = vld [vmem:[#allocation8 + $0x1d48] sm:$0xff]  ;;  %1668 = vmatpush.msrb.mxu2 %v1145_v62  ;;  %v650_v62 = vld [vmem:[#allocation8 + $0x9d0] sm:$0xff] }
  0xf8   :  { %v857_v0 = vld [vmem:[#allocation8 + $0x1048] sm:$0xff]  ;;  %1688 = vmatpush.msrb.mxu3 %v1273_v63  ;;  %v778_v63 = vld [vmem:[#allocation8 + $0xdd0] sm:$0xff] }
  0xf9   :  { %v985_v1 = vld [vmem:[#allocation8 + $0x1448] sm:$0xff]  ;;  %1632 = vmatpush.msrb.mxu0 %v857_v0  ;;  %v362_v0 = vld [vmem:[#allocation8 + $0xd0] sm:$0xff] }
  0xfa   :  { %v1137_v2 = vld [vmem:[#allocation8 + $0x1908] sm:$0xff]  ;;  %1652 = vmatpush.msrb.mxu1 %v985_v1  ;;  %v490_v1 = vld [vmem:[#allocation8 + $0x4d0] sm:$0xff] }
  0xfb   :  { %v1265_v3 = vld [vmem:[#allocation8 + $0x1d08] sm:$0xff]  ;;  %1669 = vmatpush.msrb.mxu2 %v1137_v2  ;;  %v642_v2 = vld [vmem:[#allocation8 + $0x990] sm:$0xff] }
  0xfc   :  { %v849_v4 = vld [vmem:[#allocation8 + $0x1008] sm:$0xff]  ;;  %1689 = vmatpush.msrb.mxu3 %v1265_v3  ;;  %v770_v3 = vld [vmem:[#allocation8 + $0xd90] sm:$0xff] }
  0xfd   :  { %v977_v5 = vld [vmem:[#allocation8 + $0x1408] sm:$0xff]  ;;  %1633 = vmatpush.msrb.mxu0 %v849_v4  ;;  %v354_v4 = vld [vmem:[#allocation8 + $0x90] sm:$0xff] }
  0xfe   :  { %v1129_v6 = vld [vmem:[#allocation8 + $0x18c8] sm:$0xff]  ;;  %1653 = vmatpush.msrb.mxu1 %v977_v5  ;;  %1634 = vmatmul.f32.vlgmr.msrb.gmra.mxu0 %v2982_v22  ;;  %v482_v5 = vld [vmem:[#allocation8 + $0x490] sm:$0xff] }
  0xff   :  { %v1257_v7 = vld [vmem:[#allocation8 + $0x1cc8] sm:$0xff]  ;;  %1670 = vmatpush.msrb.mxu2 %v1129_v6  ;;  %1654 = vmatmul.f32.vlgmr.msrb.gmra.mxu1 %v2987_v28  ;;  %v634_v6 = vld [vmem:[#allocation8 + $0x950] sm:$0xff] }
 0x100   :  { %1690 = vmatpush.msrb.mxu3 %v1257_v7  ;;  %v1121_v10 = vld [vmem:[#allocation8 + $0x1888] sm:$0xff]  ;;  %1698 = vmatpush.msra.mxu0 %v458_v8  ;;  %v762_v7 = vld [vmem:[#allocation8 + $0xd50] sm:$0xff] }
 0x101   :  { %v1249_v11 = vld [vmem:[#allocation8 + $0x1c88] sm:$0xff]  ;;  %1718 = vmatpush.msra.mxu1 %v586_v9  ;;  %1671 = vmatpush.msrb.mxu2 %v1121_v10  ;;  %v346_v8 = vld [vmem:[#allocation8 + $0x50] sm:$0xff] }
 0x102   :  { %v1113_v14 = vld [vmem:[#allocation8 + $0x1848] sm:$0xff]  ;;  %1691 = vmatpush.msrb.mxu3 %v1249_v11  ;;  %1699 = vmatpush.msra.mxu0 %v450_v12  ;;  %v474_v9 = vld [vmem:[#allocation8 + $0x450] sm:$0xff] }
 0x103   :  { %v1241_v15 = vld [vmem:[#allocation8 + $0x1c48] sm:$0xff]  ;;  %1719 = vmatpush.msra.mxu1 %v578_v13  ;;  %1672 = vmatpush.msrb.mxu2 %v1113_v14  ;;  %v626_v10 = vld [vmem:[#allocation8 + $0x910] sm:$0xff] }
 0x104   :  { %v1105_v18 = vld [vmem:[#allocation8 + $0x1808] sm:$0xff]  ;;  %1692 = vmatpush.msrb.mxu3 %v1241_v15  ;;  %1700 = vmatpush.msra.mxu0 %v442_v16  ;;  %v754_v11 = vld [vmem:[#allocation8 + $0xd10] sm:$0xff] }
 0x105   :  { %v1233_v20 = vld [vmem:[#allocation8 + $0x1c08] sm:$0xff]  ;;  %1720 = vmatpush.msra.mxu1 %v570_v17  ;;  %1673 = vmatpush.msrb.mxu2 %v1105_v18  ;;  %v338_v12 = vld [vmem:[#allocation8 + $0x10] sm:$0xff] }
 0x106   :  { %1693 = vmatpush.msrb.mxu3 %v1233_v20  ;;  %1674 = vmatmul.f32.vlgmr.msrb.gmra.mxu2 %v2980_v19  ;;  %v466_v13 = vld [vmem:[#allocation8 + $0x410] sm:$0xff] }
 0x107   :  { %1694 = vmatmul.f32.vlgmr.msrb.gmra.mxu3 %v2984_v25  ;;  %1701 = vmatpush.msra.mxu0 %v434_v21  ;;  %v618_v14 = vld [vmem:[#allocation8 + $0x8d0] sm:$0xff] }
 0x108   :  { %1721 = vmatpush.msra.mxu1 %v562_v23  ;;  %1738 = vmatpush.msra.mxu2 %v714_v24  ;;  %v746_v15 = vld [vmem:[#allocation8 + $0xcd0] sm:$0xff] }
 0x109   :  { %1758 = vmatpush.msra.mxu3 %v842_v26  ;;  %1702 = vmatpush.msra.mxu0 %v426_v27  ;;  %v970_v16 = vld [vmem:[#allocation8 + $0x13d0] sm:$0xff] }
 0x10a   :  { %1722 = vmatpush.msra.mxu1 %v554_v29  ;;  %1739 = vmatpush.msra.mxu2 %v706_v30  ;;  %v1098_v17 = vld [vmem:[#allocation8 + $0x17d0] sm:$0xff] }
 0x10b   :  { %1759 = vmatpush.msra.mxu3 %v834_v31  ;;  %1703 = vmatpush.msra.mxu0 %v418_v32  ;;  %v610_v18 = vld [vmem:[#allocation8 + $0x890] sm:$0xff] }
 0x10c   :  { %1723 = vmatpush.msra.mxu1 %v546_v33  ;;  %1740 = vmatpush.msra.mxu2 %v698_v34  ;;  %v738_v20 = vld [vmem:[#allocation8 + $0xc90] sm:$0xff] }
 0x10d   :  { %1760 = vmatpush.msra.mxu3 %v826_v35  ;;  %1704 = vmatpush.msra.mxu0 %v410_v36  ;;  %v962_v21 = vld [vmem:[#allocation8 + $0x1390] sm:$0xff] }
 0x10e   :  { %1724 = vmatpush.msra.mxu1 %v538_v37  ;;  %1741 = vmatpush.msra.mxu2 %v690_v38  ;;  %v1090_v23 = vld [vmem:[#allocation8 + $0x1790] sm:$0xff] }
 0x10f   :  { %1761 = vmatpush.msra.mxu3 %v818_v39  ;;  %1705 = vmatpush.msra.mxu0 %v402_v42  ;;  %v602_v24 = vld [vmem:[#allocation8 + $0x850] sm:$0xff] }
 0x110   :  { %1725 = vmatpush.msra.mxu1 %v530_v43  ;;  %1742 = vmatpush.msra.mxu2 %v682_v44  ;;  %v730_v26 = vld [vmem:[#allocation8 + $0xc50] sm:$0xff] }
 0x111   :  { %1762 = vmatpush.msra.mxu3 %v810_v45  ;;  %1706 = vmatpush.msra.mxu0 %v394_v46  ;;  %v954_v27 = vld [vmem:[#allocation8 + $0x1350] sm:$0xff] }
 0x112   :  { %1726 = vmatpush.msra.mxu1 %v522_v47  ;;  %1743 = vmatpush.msra.mxu2 %v674_v48  ;;  %v1082_v29 = vld [vmem:[#allocation8 + $0x1750] sm:$0xff] }
 0x113   :  { %1763 = vmatpush.msra.mxu3 %v802_v49  ;;  %1707 = vmatpush.msra.mxu0 %v386_v50  ;;  %v594_v30 = vld [vmem:[#allocation8 + $0x810] sm:$0xff] }
 0x114   :  { %1727 = vmatpush.msra.mxu1 %v514_v51  ;;  %1744 = vmatpush.msra.mxu2 %v666_v52  ;;  %v722_v31 = vld [vmem:[#allocation8 + $0xc10] sm:$0xff] }
 0x115   :  { %1764 = vmatpush.msra.mxu3 %v794_v53  ;;  %1708 = vmatpush.msra.mxu0 %v378_v56  ;;  %v946_v32 = vld [vmem:[#allocation8 + $0x1310] sm:$0xff] }
 0x116   :  { %1728 = vmatpush.msra.mxu1 %v506_v57  ;;  %1745 = vmatpush.msra.mxu2 %v658_v58  ;;  %v1074_v33 = vld [vmem:[#allocation8 + $0x1710] sm:$0xff]  ;;  %v3004_v58 = vld [vmem:[#allocation10] sm:$0xff] }
 0x117   :  { %1765 = vmatpush.msra.mxu3 %v786_v59  ;;  %1709 = vmatpush.msra.mxu0 %v370_v60  ;;  %v1226_v34 = vld [vmem:[#allocation8 + $0x1bd0] sm:$0xff] }
 0x118   :  { %1729 = vmatpush.msra.mxu1 %v498_v61  ;;  %1746 = vmatpush.msra.mxu2 %v650_v62  ;;  %v1354_v35 = vld [vmem:[#allocation8 + $0x1fd0] sm:$0xff] }
 0x119   :  { %1766 = vmatpush.msra.mxu3 %v778_v63  ;;  %1710 = vmatpush.msra.mxu0 %v362_v0  ;;  %v938_v36 = vld [vmem:[#allocation8 + $0x12d0] sm:$0xff] }
 0x11a   :  { %1730 = vmatpush.msra.mxu1 %v490_v1  ;;  %1747 = vmatpush.msra.mxu2 %v642_v2  ;;  %v1066_v37 = vld [vmem:[#allocation8 + $0x16d0] sm:$0xff]  ;;  %v1362_v1 = vperm.slane %v3004_v58, 0 }
 0x11b   :  { %1767 = vmatpush.msra.mxu3 %v770_v3  ;;  %1711 = vmatpush.msra.mxu0 %v354_v4  ;;  %v1218_v38 = vld [vmem:[#allocation8 + $0x1b90] sm:$0xff] }
 0x11c   :  { %1731 = vmatpush.msra.mxu1 %v482_v5  ;;  %1748 = vmatpush.msra.mxu2 %v634_v6  ;;  %v1346_v39 = vld [vmem:[#allocation8 + $0x1f90] sm:$0xff] }
 0x11d   :  { %1768 = vmatpush.msra.mxu3 %v762_v7  ;;  %1712 = vmatpush.msra.mxu0 %v346_v8  ;;  %v930_v42 = vld [vmem:[#allocation8 + $0x1290] sm:$0xff] }
 0x11e   :  { %1732 = vmatpush.msra.mxu1 %v474_v9  ;;  %1749 = vmatpush.msra.mxu2 %v626_v10  ;;  %v1058_v43 = vld [vmem:[#allocation8 + $0x1690] sm:$0xff] }
 0x11f   :  { %1769 = vmatpush.msra.mxu3 %v754_v11  ;;  %1713 = vmatpush.msra.mxu0 %v338_v12  ;;  %v1210_v44 = vld [vmem:[#allocation8 + $0x1b50] sm:$0xff] }
 0x120   :  { %1733 = vmatpush.msra.mxu1 %v466_v13  ;;  %1750 = vmatpush.msra.mxu2 %v618_v14  ;;  %v1338_v45 = vld [vmem:[#allocation8 + $0x1f50] sm:$0xff] }
 0x121   :  { %1770 = vmatpush.msra.mxu3 %v746_v15  ;;  %1714 = vmatmul.f32.vlgmr.msra.gmra.mxu0 %v2962_v40  ;;  %v922_v46 = vld [vmem:[#allocation8 + $0x1250] sm:$0xff] }
 0x122   :  { %1734 = vmatmul.f32.vlgmr.msra.gmra.mxu1 %v2964_v41  ;;  %1778 = vmatpush.msrb.mxu0 %v970_v16  ;;  %v1050_v47 = vld [vmem:[#allocation8 + $0x1650] sm:$0xff]  ;;  %v1395_v8 = vpop.f32.mrf.mxu0 }
 0x123   :  { %1798 = vmatpush.msrb.mxu1 %v1098_v17  ;;  %1751 = vmatpush.msra.mxu2 %v610_v18  ;;  %v1202_v48 = vld [vmem:[#allocation8 + $0x1b10] sm:$0xff]  ;;  %v1415_v9 = vpop.f32.mrf.mxu1  ;;  %v1396_v12 = vadd.f32 %v1395_v8, %v1362_v1  ;;  %v411_v8 = vld [vmem:[#allocation8 + $0x258] sm:$0xff] }
 0x124   :  { %1771 = vmatpush.msra.mxu3 %v738_v20  ;;  %1779 = vmatpush.msrb.mxu0 %v962_v21  ;;  %v1330_v49 = vld [vmem:[#allocation8 + $0x1f10] sm:$0xff] }
 0x125   :  { %1799 = vmatpush.msrb.mxu1 %v1090_v23  ;;  %1752 = vmatpush.msra.mxu2 %v602_v24  ;;  %v914_v50 = vld [vmem:[#allocation8 + $0x1210] sm:$0xff]  ;;  %v1416_v17 = vadd.f32 %v1415_v9, %v1396_v12  ;;  %v539_v9 = vld [vmem:[#allocation8 + $0x658] sm:$0xff] }
 0x126   :  { %1772 = vmatpush.msra.mxu3 %v730_v26  ;;  %1780 = vmatpush.msrb.mxu0 %v954_v27  ;;  %v1042_v51 = vld [vmem:[#allocation8 + $0x1610] sm:$0xff]  ;;  %v819_v12 = vld [vmem:[#allocation8 + $0xf18] sm:$0xff] }
 0x127   :  { %1800 = vmatpush.msrb.mxu1 %v1082_v29  ;;  %1753 = vmatpush.msra.mxu2 %v594_v30  ;;  %v1194_v52 = vld [vmem:[#allocation8 + $0x1ad0] sm:$0xff] }
 0x128   :  { %1773 = vmatpush.msra.mxu3 %v722_v31  ;;  %1754 = vmatmul.f32.vlgmr.msra.gmra.mxu2 %v2970_v54  ;;  %v1322_v53 = vld [vmem:[#allocation8 + $0x1ed0] sm:$0xff] }
 0x129   :  { %1774 = vmatmul.f32.vlgmr.msra.gmra.mxu3 %v2972_v55  ;;  %1781 = vmatpush.msrb.mxu0 %v946_v32  ;;  %v906_v56 = vld [vmem:[#allocation8 + $0x11d0] sm:$0xff] }
 0x12a   :  { %1801 = vmatpush.msrb.mxu1 %v1074_v33  ;;  %1818 = vmatpush.msrb.mxu2 %v1226_v34  ;;  %v1034_v57 = vld [vmem:[#allocation8 + $0x15d0] sm:$0xff]  ;;  %v459_v34 = vld [vmem:[#allocation8 + $0x3d8] sm:$0xff] }
 0x12b   :  { %1838 = vmatpush.msrb.mxu3 %v1354_v35  ;;  %1782 = vmatpush.msrb.mxu0 %v938_v36  ;;  %v1186_v59 = vld [vmem:[#allocation8 + $0x1a90] sm:$0xff]  ;;  %v587_v35 = vld [vmem:[#allocation8 + $0x7d8] sm:$0xff] }
 0x12c   :  { %1802 = vmatpush.msrb.mxu1 %v1066_v37  ;;  %1819 = vmatpush.msrb.mxu2 %v1218_v38  ;;  %v1314_v60 = vld [vmem:[#allocation8 + $0x1e90] sm:$0xff]  ;;  %v451_v38 = vld [vmem:[#allocation8 + $0x398] sm:$0xff] }
 0x12d   :  { %1839 = vmatpush.msrb.mxu3 %v1346_v39  ;;  %1783 = vmatpush.msrb.mxu0 %v930_v42  ;;  %v898_v61 = vld [vmem:[#allocation8 + $0x1190] sm:$0xff]  ;;  %v579_v39 = vld [vmem:[#allocation8 + $0x798] sm:$0xff] }
 0x12e   :  { %1803 = vmatpush.msrb.mxu1 %v1058_v43  ;;  %1820 = vmatpush.msrb.mxu2 %v1210_v44  ;;  %v1026_v62 = vld [vmem:[#allocation8 + $0x1590] sm:$0xff] }
 0x12f   :  { %1840 = vmatpush.msrb.mxu3 %v1338_v45  ;;  %1784 = vmatpush.msrb.mxu0 %v922_v46  ;;  %v1178_v63 = vld [vmem:[#allocation8 + $0x1a50] sm:$0xff]  ;;  %v1435_v42 = vpop.f32.mrf.mxu2  ;;  %v1455_v43 = vpop.f32.mrf.mxu3 }
 0x130   :  { %1804 = vmatpush.msrb.mxu1 %v1050_v47  ;;  %1821 = vmatpush.msrb.mxu2 %v1202_v48  ;;  %v1306_v0 = vld [vmem:[#allocation8 + $0x1e50] sm:$0xff]  ;;  %v1436_v46 = vadd.f32 %v1435_v42, %v1416_v17  ;;  %v443_v47 = vld [vmem:[#allocation8 + $0x358] sm:$0xff] }
 0x131   :  { %1841 = vmatpush.msrb.mxu3 %v1330_v49  ;;  %1785 = vmatpush.msrb.mxu0 %v914_v50  ;;  %v890_v2 = vld [vmem:[#allocation8 + $0x1150] sm:$0xff]  ;;  %v571_v48 = vld [vmem:[#allocation8 + $0x758] sm:$0xff] }
 0x132   :  { %1805 = vmatpush.msrb.mxu1 %v1042_v51  ;;  %1822 = vmatpush.msrb.mxu2 %v1194_v52  ;;  %v1018_v3 = vld [vmem:[#allocation8 + $0x1550] sm:$0xff]  ;;  %v1456_v51 = vadd.f32 %v1455_v43, %v1436_v46  ;;  %v435_v52 = vld [vmem:[#allocation8 + $0x318] sm:$0xff] }
 0x133   :  { %1842 = vmatpush.msrb.mxu3 %v1322_v53  ;;  %1786 = vmatpush.msrb.mxu0 %v906_v56  ;;  %v1170_v4 = vld [vmem:[#allocation8 + $0x1a10] sm:$0xff]  ;;  %v563_v53 = vld [vmem:[#allocation8 + $0x718] sm:$0xff] }
 0x134   :  { %1806 = vmatpush.msrb.mxu1 %v1034_v57  ;;  %1823 = vmatpush.msrb.mxu2 %v1186_v59  ;;  %v1298_v5 = vld [vmem:[#allocation8 + $0x1e10] sm:$0xff]  ;;  %v1475_v56 = vpop.f32.mrf.mxu0  ;;  %v715_v57 = vld [vmem:[#allocation8 + $0xbd8] sm:$0xff] }
 0x135   :  { %1843 = vmatpush.msrb.mxu3 %v1314_v60  ;;  %1787 = vmatpush.msrb.mxu0 %v898_v61  ;;  %v882_v6 = vld [vmem:[#allocation8 + $0x1110] sm:$0xff]  ;;  %v843_v59 = vld [vmem:[#allocation8 + $0xfd8] sm:$0xff]  ;;  %v1476_v60 = vadd.f32 %v1475_v56, %v1456_v51 }
 0x136   :  { %1807 = vmatpush.msrb.mxu1 %v1026_v62  ;;  %1824 = vmatpush.msrb.mxu2 %v1178_v63  ;;  %v1010_v7 = vld [vmem:[#allocation8 + $0x1510] sm:$0xff]  ;;  %v427_v61 = vld [vmem:[#allocation8 + $0x2d8] sm:$0xff] }
 0x137   :  { %1844 = vmatpush.msrb.mxu3 %v1306_v0  ;;  %1788 = vmatpush.msrb.mxu0 %v890_v2  ;;  %v1162_v10 = vld [vmem:[#allocation8 + $0x19d0] sm:$0xff]  ;;  %v555_v62 = vld [vmem:[#allocation8 + $0x6d8] sm:$0xff]  ;;  %v1495_v1 = vpop.f32.mrf.mxu1 }
 0x138   :  { %1808 = vmatpush.msrb.mxu1 %v1018_v3  ;;  %v1290_v11 = vld [vmem:[#allocation8 + $0x1dd0] sm:$0xff]  ;;  %1825 = vmatpush.msrb.mxu2 %v1170_v4  ;;  %v707_v63 = vld [vmem:[#allocation8 + $0xb98] sm:$0xff]  ;;  %v1496_v4 = vadd.f32 %v1495_v1, %v1476_v60 }
 0x139   :  { %1845 = vmatpush.msrb.mxu3 %v1298_v5  ;;  %v874_v13 = vld [vmem:[#allocation8 + $0x10d0] sm:$0xff]  ;;  %1789 = vmatpush.msrb.mxu0 %v882_v6  ;;  %v835_v0 = vld [vmem:[#allocation8 + $0xf98] sm:$0xff]  ;;  %v1515_v5 = vpop.f32.mrf.mxu2 }
 0x13a   :  { %v1002_v14 = vld [vmem:[#allocation8 + $0x14d0] sm:$0xff]  ;;  %1809 = vmatpush.msrb.mxu1 %v1010_v7  ;;  %1826 = vmatpush.msrb.mxu2 %v1162_v10  ;;  %v419_v2 = vld [vmem:[#allocation8 + $0x298] sm:$0xff]  ;;  %v1516_v10 = vadd.f32 %v1515_v5, %v1496_v4 }
 0x13b   :  { %v1154_v15 = vld [vmem:[#allocation8 + $0x1990] sm:$0xff]  ;;  %1846 = vmatpush.msrb.mxu3 %v1290_v11  ;;  %1790 = vmatpush.msrb.mxu0 %v874_v13  ;;  %v547_v3 = vld [vmem:[#allocation8 + $0x698] sm:$0xff]  ;;  %v1535_v13 = vpop.f32.mrf.mxu3 }
 0x13c   :  { %v1282_v16 = vld [vmem:[#allocation8 + $0x1d90] sm:$0xff]  ;;  %1810 = vmatpush.msrb.mxu1 %v1002_v14  ;;  %1827 = vmatpush.msrb.mxu2 %v1154_v15  ;;  %v699_v6 = vld [vmem:[#allocation8 + $0xb58] sm:$0xff] }
 0x13d   :  { %v866_v18 = vld [vmem:[#allocation8 + $0x1090] sm:$0xff]  ;;  %1847 = vmatpush.msrb.mxu3 %v1282_v16  ;;  %v827_v7 = vld [vmem:[#allocation8 + $0xf58] sm:$0xff]  ;;  %v3011_v16 = vadd.f32 %v1535_v13, %v1516_v10 }
 0x13e   :  { %v994_v20 = vld [vmem:[#allocation8 + $0x1490] sm:$0xff]  ;;  %1791 = vmatpush.msrb.mxu0 %v866_v18  ;;  %v691_v11 = vld [vmem:[#allocation8 + $0xb18] sm:$0xff] }
 0x13f   :  { %v1146_v21 = vld [vmem:[#allocation8 + $0x1950] sm:$0xff]  ;;  %1811 = vmatpush.msrb.mxu1 %v994_v20  ;;  %v403_v14 = vld [vmem:[#allocation8 + $0x218] sm:$0xff] }
 0x140   :  { %v1274_v23 = vld [vmem:[#allocation8 + $0x1d50] sm:$0xff]  ;;  %1828 = vmatpush.msrb.mxu2 %v1146_v21  ;;  %v531_v15 = vld [vmem:[#allocation8 + $0x618] sm:$0xff] }
 0x141   :  { %v858_v24 = vld [vmem:[#allocation8 + $0x1050] sm:$0xff]  ;;  %1848 = vmatpush.msrb.mxu3 %v1274_v23  ;;  %v683_v17 = vld [vmem:[#allocation8 + $0xad8] sm:$0xff] }
 0x142   :  { %v986_v26 = vld [vmem:[#allocation8 + $0x1450] sm:$0xff]  ;;  %1792 = vmatpush.msrb.mxu0 %v858_v24  ;;  %v811_v18 = vld [vmem:[#allocation8 + $0xed8] sm:$0xff] }
 0x143   :  { %v1138_v27 = vld [vmem:[#allocation8 + $0x1910] sm:$0xff]  ;;  %1812 = vmatpush.msrb.mxu1 %v986_v26  ;;  %v395_v20 = vld [vmem:[#allocation8 + $0x1d8] sm:$0xff] }
 0x144   :  { %v1266_v29 = vld [vmem:[#allocation8 + $0x1d10] sm:$0xff]  ;;  %1829 = vmatpush.msrb.mxu2 %v1138_v27  ;;  %v523_v21 = vld [vmem:[#allocation8 + $0x5d8] sm:$0xff] }
 0x145   :  { %v850_v30 = vld [vmem:[#allocation8 + $0x1010] sm:$0xff]  ;;  %1849 = vmatpush.msrb.mxu3 %v1266_v29  ;;  %v675_v23 = vld [vmem:[#allocation8 + $0xa98] sm:$0xff] }
 0x146   :  { %v978_v31 = vld [vmem:[#allocation8 + $0x1410] sm:$0xff]  ;;  %1793 = vmatpush.msrb.mxu0 %v850_v30  ;;  %v803_v24 = vld [vmem:[#allocation8 + $0xe98] sm:$0xff] }
 0x147   :  { %v1130_v32 = vld [vmem:[#allocation8 + $0x18d0] sm:$0xff]  ;;  %1813 = vmatpush.msrb.mxu1 %v978_v31  ;;  %1794 = vmatmul.f32.vlgmr.msrb.gmra.mxu0 %v2982_v22  ;;  %v387_v26 = vld [vmem:[#allocation8 + $0x198] sm:$0xff] }
 0x148   :  { %v1258_v33 = vld [vmem:[#allocation8 + $0x1cd0] sm:$0xff]  ;;  %1830 = vmatpush.msrb.mxu2 %v1130_v32  ;;  %1814 = vmatmul.f32.vlgmr.msrb.gmra.mxu1 %v2987_v28  ;;  %v515_v27 = vld [vmem:[#allocation8 + $0x598] sm:$0xff] }
 0x149   :  { %1850 = vmatpush.msrb.mxu3 %v1258_v33  ;;  %v1122_v36 = vld [vmem:[#allocation8 + $0x1890] sm:$0xff]  ;;  %1858 = vmatpush.msra.mxu0 %v459_v34  ;;  %v667_v29 = vld [vmem:[#allocation8 + $0xa58] sm:$0xff] }
 0x14a   :  { %v1250_v37 = vld [vmem:[#allocation8 + $0x1c90] sm:$0xff]  ;;  %1878 = vmatpush.msra.mxu1 %v587_v35  ;;  %1831 = vmatpush.msrb.mxu2 %v1122_v36  ;;  %v795_v30 = vld [vmem:[#allocation8 + $0xe58] sm:$0xff]  ;;  %v1363_v35 = vperm.slane %v3004_v58, 1 }
 0x14b   :  { %v1114_v44 = vld [vmem:[#allocation8 + $0x1850] sm:$0xff]  ;;  %1851 = vmatpush.msrb.mxu3 %v1250_v37  ;;  %1859 = vmatpush.msra.mxu0 %v451_v38  ;;  %v379_v31 = vld [vmem:[#allocation8 + $0x158] sm:$0xff] }
 0x14c   :  { %v1242_v45 = vld [vmem:[#allocation8 + $0x1c50] sm:$0xff]  ;;  %1879 = vmatpush.msra.mxu1 %v579_v39  ;;  %1832 = vmatpush.msrb.mxu2 %v1114_v44  ;;  %v507_v32 = vld [vmem:[#allocation8 + $0x558] sm:$0xff]  ;;  %v1555_v44 = vpop.f32.mrf.mxu0 }
 0x14d   :  { %v1106_v49 = vld [vmem:[#allocation8 + $0x1810] sm:$0xff]  ;;  %1852 = vmatpush.msrb.mxu3 %v1242_v45  ;;  %1860 = vmatpush.msra.mxu0 %v443_v47  ;;  %v659_v33 = vld [vmem:[#allocation8 + $0xa18] sm:$0xff]  ;;  %v1556_v47 = vadd.f32 %v1555_v44, %v1363_v35 }
 0x14e   :  { %v1234_v50 = vld [vmem:[#allocation8 + $0x1c10] sm:$0xff]  ;;  %1880 = vmatpush.msra.mxu1 %v571_v48  ;;  %1833 = vmatpush.msrb.mxu2 %v1106_v49  ;;  %v787_v34 = vld [vmem:[#allocation8 + $0xe18] sm:$0xff] }
 0x14f   :  { %1853 = vmatpush.msrb.mxu3 %v1234_v50  ;;  %1834 = vmatmul.f32.vlgmr.msrb.gmra.mxu2 %v2980_v19  ;;  %v371_v36 = vld [vmem:[#allocation8 + $0x118] sm:$0xff]  ;;  %v1575_v50 = vpop.f32.mrf.mxu1 }
 0x150   :  { %1854 = vmatmul.f32.vlgmr.msrb.gmra.mxu3 %v2984_v25  ;;  %1861 = vmatpush.msra.mxu0 %v435_v52  ;;  %v499_v37 = vld [vmem:[#allocation8 + $0x518] sm:$0xff] }
 0x151   :  { %1881 = vmatpush.msra.mxu1 %v563_v53  ;;  %1898 = vmatpush.msra.mxu2 %v715_v57  ;;  %v651_v38 = vld [vmem:[#allocation8 + $0x9d8] sm:$0xff]  ;;  %v1576_v53 = vadd.f32 %v1575_v50, %v1556_v47 }
 0x152   :  { %1918 = vmatpush.msra.mxu3 %v843_v59  ;;  %1862 = vmatpush.msra.mxu0 %v427_v61  ;;  %v779_v39 = vld [vmem:[#allocation8 + $0xdd8] sm:$0xff] }
 0x153   :  { %1882 = vmatpush.msra.mxu1 %v555_v62  ;;  %1899 = vmatpush.msra.mxu2 %v707_v63  ;;  %v363_v42 = vld [vmem:[#allocation8 + $0xd8] sm:$0xff] }
 0x154   :  { %1919 = vmatpush.msra.mxu3 %v835_v0  ;;  %1863 = vmatpush.msra.mxu0 %v419_v2  ;;  %v491_v43 = vld [vmem:[#allocation8 + $0x4d8] sm:$0xff] }
 0x155   :  { %1883 = vmatpush.msra.mxu1 %v547_v3  ;;  %1900 = vmatpush.msra.mxu2 %v699_v6  ;;  %v643_v45 = vld [vmem:[#allocation8 + $0x998] sm:$0xff] }
 0x156   :  { %1920 = vmatpush.msra.mxu3 %v827_v7  ;;  %1864 = vmatpush.msra.mxu0 %v411_v8  ;;  %v771_v46 = vld [vmem:[#allocation8 + $0xd98] sm:$0xff] }
 0x157   :  { %1884 = vmatpush.msra.mxu1 %v539_v9  ;;  %1901 = vmatpush.msra.mxu2 %v691_v11  ;;  %v355_v48 = vld [vmem:[#allocation8 + $0x98] sm:$0xff]  ;;  %v1595_v11 = vpop.f32.mrf.mxu2 }
 0x158   :  { %1921 = vmatpush.msra.mxu3 %v819_v12  ;;  %1865 = vmatpush.msra.mxu0 %v403_v14  ;;  %v483_v49 = vld [vmem:[#allocation8 + $0x498] sm:$0xff]  ;;  %v1596_v14 = vadd.f32 %v1595_v11, %v1576_v53 }
 0x159   :  { %1885 = vmatpush.msra.mxu1 %v531_v15  ;;  %1902 = vmatpush.msra.mxu2 %v683_v17  ;;  %v635_v51 = vld [vmem:[#allocation8 + $0x958] sm:$0xff]  ;;  %v1615_v15 = vpop.f32.mrf.mxu3 }
 0x15a   :  { %1922 = vmatpush.msra.mxu3 %v811_v18  ;;  %1866 = vmatpush.msra.mxu0 %v395_v20  ;;  %v763_v52 = vld [vmem:[#allocation8 + $0xd58] sm:$0xff]  ;;  %v3016_v20 = vadd.f32 %v1615_v15, %v1596_v14 }
 0x15b   :  { %1886 = vmatpush.msra.mxu1 %v523_v21  ;;  %1903 = vmatpush.msra.mxu2 %v675_v23  ;;  %v347_v56 = vld [vmem:[#allocation8 + $0x58] sm:$0xff] }
 0x15c   :  { %1923 = vmatpush.msra.mxu3 %v803_v24  ;;  %1867 = vmatpush.msra.mxu0 %v387_v26  ;;  %v475_v57 = vld [vmem:[#allocation8 + $0x458] sm:$0xff] }
 0x15d   :  { %1887 = vmatpush.msra.mxu1 %v515_v27  ;;  %1904 = vmatpush.msra.mxu2 %v667_v29  ;;  %v627_v59 = vld [vmem:[#allocation8 + $0x918] sm:$0xff] }
 0x15e   :  { %1924 = vmatpush.msra.mxu3 %v795_v30  ;;  %1868 = vmatpush.msra.mxu0 %v379_v31  ;;  %v755_v60 = vld [vmem:[#allocation8 + $0xd18] sm:$0xff] }
 0x15f   :  { %1888 = vmatpush.msra.mxu1 %v507_v32  ;;  %1905 = vmatpush.msra.mxu2 %v659_v33  ;;  %v339_v61 = vld [vmem:[#allocation8 + $0x18] sm:$0xff] }
 0x160   :  { %1925 = vmatpush.msra.mxu3 %v787_v34  ;;  %1869 = vmatpush.msra.mxu0 %v371_v36  ;;  %v467_v62 = vld [vmem:[#allocation8 + $0x418] sm:$0xff] }
 0x161   :  { %1889 = vmatpush.msra.mxu1 %v499_v37  ;;  %1906 = vmatpush.msra.mxu2 %v651_v38  ;;  %v619_v63 = vld [vmem:[#allocation8 + $0x8d8] sm:$0xff] }
 0x162   :  { %1926 = vmatpush.msra.mxu3 %v779_v39  ;;  %1870 = vmatpush.msra.mxu0 %v363_v42  ;;  %v747_v0 = vld [vmem:[#allocation8 + $0xcd8] sm:$0xff] }
 0x163   :  { %1890 = vmatpush.msra.mxu1 %v491_v43  ;;  %1907 = vmatpush.msra.mxu2 %v643_v45  ;;  %v971_v1 = vld [vmem:[#allocation8 + $0x13d8] sm:$0xff] }
 0x164   :  { %1927 = vmatpush.msra.mxu3 %v771_v46  ;;  %1871 = vmatpush.msra.mxu0 %v355_v48  ;;  %v1099_v2 = vld [vmem:[#allocation8 + $0x17d8] sm:$0xff] }
 0x165   :  { %1891 = vmatpush.msra.mxu1 %v483_v49  ;;  %1908 = vmatpush.msra.mxu2 %v635_v51  ;;  %v611_v3 = vld [vmem:[#allocation8 + $0x898] sm:$0xff] }
 0x166   :  { %1928 = vmatpush.msra.mxu3 %v763_v52  ;;  %1872 = vmatpush.msra.mxu0 %v347_v56  ;;  %v739_v4 = vld [vmem:[#allocation8 + $0xc98] sm:$0xff] }
 0x167   :  { %1892 = vmatpush.msra.mxu1 %v475_v57  ;;  %1909 = vmatpush.msra.mxu2 %v627_v59  ;;  %v963_v5 = vld [vmem:[#allocation8 + $0x1398] sm:$0xff] }
 0x168   :  { %1929 = vmatpush.msra.mxu3 %v755_v60  ;;  %1873 = vmatpush.msra.mxu0 %v339_v61  ;;  %v1091_v6 = vld [vmem:[#allocation8 + $0x1798] sm:$0xff] }
 0x169   :  { %1893 = vmatpush.msra.mxu1 %v467_v62  ;;  %1910 = vmatpush.msra.mxu2 %v619_v63  ;;  %v603_v7 = vld [vmem:[#allocation8 + $0x858] sm:$0xff] }
 0x16a   :  { %1930 = vmatpush.msra.mxu3 %v747_v0  ;;  %1874 = vmatmul.f32.vlgmr.msra.gmra.mxu0 %v2962_v40  ;;  %v731_v8 = vld [vmem:[#allocation8 + $0xc58] sm:$0xff] }
 0x16b   :  { %1894 = vmatmul.f32.vlgmr.msra.gmra.mxu1 %v2964_v41  ;;  %1938 = vmatpush.msrb.mxu0 %v971_v1  ;;  %v955_v9 = vld [vmem:[#allocation8 + $0x1358] sm:$0xff] }
 0x16c   :  { %1958 = vmatpush.msrb.mxu1 %v1099_v2  ;;  %1911 = vmatpush.msra.mxu2 %v611_v3  ;;  %v1083_v10 = vld [vmem:[#allocation8 + $0x1758] sm:$0xff] }
 0x16d   :  { %1931 = vmatpush.msra.mxu3 %v739_v4  ;;  %1939 = vmatpush.msrb.mxu0 %v963_v5  ;;  %v595_v12 = vld [vmem:[#allocation8 + $0x818] sm:$0xff] }
 0x16e   :  { %1959 = vmatpush.msrb.mxu1 %v1091_v6  ;;  %v723_v13 = vld [vmem:[#allocation8 + $0xc18] sm:$0xff]  ;;  %1912 = vmatpush.msra.mxu2 %v603_v7 }
 0x16f   :  { %1932 = vmatpush.msra.mxu3 %v731_v8  ;;  %1940 = vmatpush.msrb.mxu0 %v955_v9  ;;  %v947_v17 = vld [vmem:[#allocation8 + $0x1318] sm:$0xff] }
 0x170   :  { %1960 = vmatpush.msrb.mxu1 %v1083_v10  ;;  %v1075_v18 = vld [vmem:[#allocation8 + $0x1718] sm:$0xff]  ;;  %1913 = vmatpush.msra.mxu2 %v595_v12 }
 0x171   :  { %1933 = vmatpush.msra.mxu3 %v723_v13  ;;  %v1227_v21 = vld [vmem:[#allocation8 + $0x1bd8] sm:$0xff]  ;;  %1914 = vmatmul.f32.vlgmr.msra.gmra.mxu2 %v2970_v54 }
 0x172   :  { %v1355_v23 = vld [vmem:[#allocation8 + $0x1fd8] sm:$0xff]  ;;  %1934 = vmatmul.f32.vlgmr.msra.gmra.mxu3 %v2972_v55  ;;  %1941 = vmatpush.msrb.mxu0 %v947_v17 }
 0x173   :  { %v939_v24 = vld [vmem:[#allocation8 + $0x12d8] sm:$0xff]  ;;  %1961 = vmatpush.msrb.mxu1 %v1075_v18  ;;  %1978 = vmatpush.msrb.mxu2 %v1227_v21  ;;  %v460_v21 = vld [vmem:[#allocation8 + $0x3e0] sm:$0xff] }
 0x174   :  { %v1067_v26 = vld [vmem:[#allocation8 + $0x16d8] sm:$0xff]  ;;  %1998 = vmatpush.msrb.mxu3 %v1355_v23  ;;  %1942 = vmatpush.msrb.mxu0 %v939_v24  ;;  %v588_v23 = vld [vmem:[#allocation8 + $0x7e0] sm:$0xff] }
 0x175   :  { %v1219_v27 = vld [vmem:[#allocation8 + $0x1b98] sm:$0xff]  ;;  %1962 = vmatpush.msrb.mxu1 %v1067_v26 }
 0x176   :  { %v1347_v29 = vld [vmem:[#allocation8 + $0x1f98] sm:$0xff]  ;;  %1979 = vmatpush.msrb.mxu2 %v1219_v27  ;;  %v452_v27 = vld [vmem:[#allocation8 + $0x3a0] sm:$0xff] }
 0x177   :  { %v931_v30 = vld [vmem:[#allocation8 + $0x1298] sm:$0xff]  ;;  %1999 = vmatpush.msrb.mxu3 %v1347_v29  ;;  %v580_v29 = vld [vmem:[#allocation8 + $0x7a0] sm:$0xff] }
 0x178   :  { %v1059_v31 = vld [vmem:[#allocation8 + $0x1698] sm:$0xff]  ;;  %1943 = vmatpush.msrb.mxu0 %v931_v30 }
 0x179   :  { %v1211_v32 = vld [vmem:[#allocation8 + $0x1b58] sm:$0xff]  ;;  %1963 = vmatpush.msrb.mxu1 %v1059_v31 }
 0x17a   :  { %v1339_v33 = vld [vmem:[#allocation8 + $0x1f58] sm:$0xff]  ;;  %1980 = vmatpush.msrb.mxu2 %v1211_v32  ;;  %v3023_v32 = vld [vmem:[#allocation11] sm:$0xff] }
 0x17b   :  { %v923_v34 = vld [vmem:[#allocation8 + $0x1258] sm:$0xff]  ;;  %2000 = vmatpush.msrb.mxu3 %v1339_v33  ;;  %v1635_v1 = vpop.f32.mrf.mxu0  ;;  %v444_v33 = vld [vmem:[#allocation8 + $0x360] sm:$0xff] }
 0x17c   :  { %v1051_v35 = vld [vmem:[#allocation8 + $0x1658] sm:$0xff]  ;;  %1944 = vmatpush.msrb.mxu0 %v923_v34  ;;  %v1636_v4 = vadd.f32 %v1635_v1, %v3016_v20  ;;  %v1655_v7 = vpop.f32.mrf.mxu1  ;;  %v572_v34 = vld [vmem:[#allocation8 + $0x760] sm:$0xff] }
 0x17d   :  { %v1203_v36 = vld [vmem:[#allocation8 + $0x1b18] sm:$0xff]  ;;  %1964 = vmatpush.msrb.mxu1 %v1051_v35 }
 0x17e   :  { %v1331_v37 = vld [vmem:[#allocation8 + $0x1f18] sm:$0xff]  ;;  %1981 = vmatpush.msrb.mxu2 %v1203_v36  ;;  %v1656_v10 = vadd.f32 %v1655_v7, %v1636_v4  ;;  %v404_v4 = vld [vmem:[#allocation8 + $0x220] sm:$0xff] }
 0x17f   :  { %v915_v38 = vld [vmem:[#allocation8 + $0x1218] sm:$0xff]  ;;  %2001 = vmatpush.msrb.mxu3 %v1331_v37  ;;  %v812_v7 = vld [vmem:[#allocation8 + $0xee0] sm:$0xff] }
 0x180   :  { %v1043_v39 = vld [vmem:[#allocation8 + $0x1618] sm:$0xff]  ;;  %1945 = vmatpush.msrb.mxu0 %v915_v38 }
 0x181   :  { %v1195_v42 = vld [vmem:[#allocation8 + $0x1ad8] sm:$0xff]  ;;  %1965 = vmatpush.msrb.mxu1 %v1043_v39 }
 0x182   :  { %v1323_v43 = vld [vmem:[#allocation8 + $0x1ed8] sm:$0xff]  ;;  %1982 = vmatpush.msrb.mxu2 %v1195_v42  ;;  %v2658_v42 = vmax.f32 %v3011_v16, 0.0 }
 0x183   :  { %v907_v44 = vld [vmem:[#allocation8 + $0x11d8] sm:$0xff]  ;;  %2002 = vmatpush.msrb.mxu3 %v1323_v43  ;;  %v2668_v43 = vperm.slane %v3023_v32, 0 }
 0x184   :  { %v1035_v45 = vld [vmem:[#allocation8 + $0x15d8] sm:$0xff]  ;;  %1946 = vmatpush.msrb.mxu0 %v907_v44  ;;  %v436_v44 = vld [vmem:[#allocation8 + $0x320] sm:$0xff] }
 0x185   :  { %v1187_v46 = vld [vmem:[#allocation8 + $0x1a98] sm:$0xff]  ;;  %1966 = vmatpush.msrb.mxu1 %v1035_v45  ;;  %v564_v45 = vld [vmem:[#allocation8 + $0x720] sm:$0xff] }
 0x186   :  { %v1315_v47 = vld [vmem:[#allocation8 + $0x1e98] sm:$0xff]  ;;  %1983 = vmatpush.msrb.mxu2 %v1187_v46 }
 0x187   :  { %v899_v48 = vld [vmem:[#allocation8 + $0x1198] sm:$0xff]  ;;  %2003 = vmatpush.msrb.mxu3 %v1315_v47  ;;  %v2669_v47 = vperm.slane %v3023_v32, 1 }
 0x188   :  { %v1027_v49 = vld [vmem:[#allocation8 + $0x1598] sm:$0xff]  ;;  %1947 = vmatpush.msrb.mxu0 %v899_v48  ;;  %v716_v48 = vld [vmem:[#allocation8 + $0xbe0] sm:$0xff] }
 0x189   :  { %v1179_v50 = vld [vmem:[#allocation8 + $0x1a58] sm:$0xff]  ;;  %1967 = vmatpush.msrb.mxu1 %v1027_v49  ;;  %v1675_v35 = vpop.f32.mrf.mxu2  ;;  %v844_v49 = vld [vmem:[#allocation8 + $0xfe0] sm:$0xff] }
 0x18a   :  { %v1307_v51 = vld [vmem:[#allocation8 + $0x1e58] sm:$0xff]  ;;  %1984 = vmatpush.msrb.mxu2 %v1179_v50  ;;  %v1676_v38 = vadd.f32 %v1675_v35, %v1656_v10  ;;  %v1695_v39 = vpop.f32.mrf.mxu3  ;;  %v428_v50 = vld [vmem:[#allocation8 + $0x2e0] sm:$0xff] }
 0x18b   :  { %v891_v52 = vld [vmem:[#allocation8 + $0x1158] sm:$0xff]  ;;  %2004 = vmatpush.msrb.mxu3 %v1307_v51  ;;  %v556_v51 = vld [vmem:[#allocation8 + $0x6e0] sm:$0xff] }
 0x18c   :  { %v1019_v53 = vld [vmem:[#allocation8 + $0x1558] sm:$0xff]  ;;  %1948 = vmatpush.msrb.mxu0 %v891_v52  ;;  %v1696_v46 = vadd.f32 %v1695_v39, %v1676_v38  ;;  %v708_v52 = vld [vmem:[#allocation8 + $0xba0] sm:$0xff] }
 0x18d   :  { %v1171_v56 = vld [vmem:[#allocation8 + $0x1a18] sm:$0xff]  ;;  %1968 = vmatpush.msrb.mxu1 %v1019_v53  ;;  %v836_v53 = vld [vmem:[#allocation8 + $0xfa0] sm:$0xff] }
 0x18e   :  { %v1299_v57 = vld [vmem:[#allocation8 + $0x1e18] sm:$0xff]  ;;  %1985 = vmatpush.msrb.mxu2 %v1171_v56  ;;  %v2659_v16 = vmax.f32 %v1696_v46, 0.0  ;;  %v2684_v56 = vmul.f32 %v2668_v43, %v2658_v42  ;;  %v676_v10 = vld [vmem:[#allocation8 + $0xaa0] sm:$0xff] }
 0x18f   :  { %v883_v59 = vld [vmem:[#allocation8 + $0x1118] sm:$0xff]  ;;  %2005 = vmatpush.msrb.mxu3 %v1299_v57  ;;  %v420_v57 = vld [vmem:[#allocation8 + $0x2a0] sm:$0xff] }
 0x190   :  { %v1011_v60 = vld [vmem:[#allocation8 + $0x1518] sm:$0xff]  ;;  %1949 = vmatpush.msrb.mxu0 %v883_v59  ;;  %v548_v59 = vld [vmem:[#allocation8 + $0x6a0] sm:$0xff] }
 0x191   :  { %v1163_v61 = vld [vmem:[#allocation8 + $0x19d8] sm:$0xff]  ;;  %1969 = vmatpush.msrb.mxu1 %v1011_v60  ;;  %v2685_v60 = vmul.f32 %v2669_v47, %v2659_v16  ;;  %v772_v35 = vld [vmem:[#allocation8 + $0xda0] sm:$0xff] }
 0x192   :  { %v1291_v62 = vld [vmem:[#allocation8 + $0x1dd8] sm:$0xff]  ;;  %1986 = vmatpush.msrb.mxu2 %v1163_v61  ;;  %v700_v61 = vld [vmem:[#allocation8 + $0xb60] sm:$0xff] }
 0x193   :  { %v875_v63 = vld [vmem:[#allocation8 + $0x10d8] sm:$0xff]  ;;  %2006 = vmatpush.msrb.mxu3 %v1291_v62  ;;  %v828_v62 = vld [vmem:[#allocation8 + $0xf60] sm:$0xff]  ;;  %v3030_v1 = vadd.f32 %v2685_v60, %v2684_v56 }
 0x194   :  { %v1003_v0 = vld [vmem:[#allocation8 + $0x14d8] sm:$0xff]  ;;  %1950 = vmatpush.msrb.mxu0 %v875_v63  ;;  %v412_v63 = vld [vmem:[#allocation8 + $0x260] sm:$0xff] }
 0x195   :  { %v1155_v2 = vld [vmem:[#allocation8 + $0x1998] sm:$0xff]  ;;  %1970 = vmatpush.msrb.mxu1 %v1003_v0  ;;  %v540_v0 = vld [vmem:[#allocation8 + $0x660] sm:$0xff] }
 0x196   :  { %v1283_v3 = vld [vmem:[#allocation8 + $0x1d98] sm:$0xff]  ;;  %1987 = vmatpush.msrb.mxu2 %v1155_v2  ;;  %v692_v2 = vld [vmem:[#allocation8 + $0xb20] sm:$0xff] }
 0x197   :  { %v867_v5 = vld [vmem:[#allocation8 + $0x1098] sm:$0xff]  ;;  %2007 = vmatpush.msrb.mxu3 %v1283_v3  ;;  %v820_v3 = vld [vmem:[#allocation8 + $0xf20] sm:$0xff] }
 0x198   :  { %v995_v6 = vld [vmem:[#allocation8 + $0x1498] sm:$0xff]  ;;  %1951 = vmatpush.msrb.mxu0 %v867_v5  ;;  %v532_v5 = vld [vmem:[#allocation8 + $0x620] sm:$0xff] }
 0x199   :  { %v1147_v8 = vld [vmem:[#allocation8 + $0x1958] sm:$0xff]  ;;  %1971 = vmatpush.msrb.mxu1 %v995_v6  ;;  %v684_v6 = vld [vmem:[#allocation8 + $0xae0] sm:$0xff] }
 0x19a   :  { %v1275_v9 = vld [vmem:[#allocation8 + $0x1d58] sm:$0xff]  ;;  %1988 = vmatpush.msrb.mxu2 %v1147_v8  ;;  %v396_v8 = vld [vmem:[#allocation8 + $0x1e0] sm:$0xff] }
 0x19b   :  { %v859_v11 = vld [vmem:[#allocation8 + $0x1058] sm:$0xff]  ;;  %2008 = vmatpush.msrb.mxu3 %v1275_v9  ;;  %v524_v9 = vld [vmem:[#allocation8 + $0x5e0] sm:$0xff] }
 0x19c   :  { %v987_v12 = vld [vmem:[#allocation8 + $0x1458] sm:$0xff]  ;;  %1952 = vmatpush.msrb.mxu0 %v859_v11  ;;  %v804_v11 = vld [vmem:[#allocation8 + $0xea0] sm:$0xff] }
 0x19d   :  { %v1139_v13 = vld [vmem:[#allocation8 + $0x1918] sm:$0xff]  ;;  %1972 = vmatpush.msrb.mxu1 %v987_v12  ;;  %v388_v12 = vld [vmem:[#allocation8 + $0x1a0] sm:$0xff] }
 0x19e   :  { %v1267_v14 = vld [vmem:[#allocation8 + $0x1d18] sm:$0xff]  ;;  %1989 = vmatpush.msrb.mxu2 %v1139_v13  ;;  %v516_v13 = vld [vmem:[#allocation8 + $0x5a0] sm:$0xff] }
 0x19f   :  { %v851_v15 = vld [vmem:[#allocation8 + $0x1018] sm:$0xff]  ;;  %2009 = vmatpush.msrb.mxu3 %v1267_v14  ;;  %v668_v14 = vld [vmem:[#allocation8 + $0xa60] sm:$0xff]  ;;  %v1735_v38 = vpop.f32.mrf.mxu1 }
 0x1a0   :  { %v979_v17 = vld [vmem:[#allocation8 + $0x1418] sm:$0xff]  ;;  %1953 = vmatpush.msrb.mxu0 %v851_v15  ;;  %v796_v15 = vld [vmem:[#allocation8 + $0xe60] sm:$0xff] }
 0x1a1   :  { %v1131_v18 = vld [vmem:[#allocation8 + $0x18d8] sm:$0xff]  ;;  %1973 = vmatpush.msrb.mxu1 %v979_v17  ;;  %1954 = vmatmul.f32.vlgmr.msrb.gmra.mxu0 %v2982_v22  ;;  %v380_v17 = vld [vmem:[#allocation8 + $0x160] sm:$0xff] }
 0x1a2   :  { %v1259_v20 = vld [vmem:[#allocation8 + $0x1cd8] sm:$0xff]  ;;  %1990 = vmatpush.msrb.mxu2 %v1131_v18  ;;  %1974 = vmatmul.f32.vlgmr.msrb.gmra.mxu1 %v2987_v28  ;;  %v508_v18 = vld [vmem:[#allocation8 + $0x560] sm:$0xff] }
 0x1a3   :  { %2010 = vmatpush.msrb.mxu3 %v1259_v20  ;;  %v1123_v24 = vld [vmem:[#allocation8 + $0x1898] sm:$0xff]  ;;  %2018 = vmatpush.msra.mxu0 %v460_v21  ;;  %v660_v20 = vld [vmem:[#allocation8 + $0xa20] sm:$0xff] }
 0x1a4   :  { %v1251_v26 = vld [vmem:[#allocation8 + $0x1c98] sm:$0xff]  ;;  %2038 = vmatpush.msra.mxu1 %v588_v23  ;;  %1991 = vmatpush.msrb.mxu2 %v1123_v24  ;;  %v788_v21 = vld [vmem:[#allocation8 + $0xe20] sm:$0xff]  ;;  %v1364_v23 = vperm.slane %v3004_v58, 2 }
 0x1a5   :  { %v1115_v30 = vld [vmem:[#allocation8 + $0x1858] sm:$0xff]  ;;  %2011 = vmatpush.msrb.mxu3 %v1251_v26  ;;  %2019 = vmatpush.msra.mxu0 %v452_v27  ;;  %v372_v24 = vld [vmem:[#allocation8 + $0x120] sm:$0xff] }
 0x1a6   :  { %v1243_v31 = vld [vmem:[#allocation8 + $0x1c58] sm:$0xff]  ;;  %2039 = vmatpush.msra.mxu1 %v580_v29  ;;  %1992 = vmatpush.msrb.mxu2 %v1115_v30  ;;  %v500_v26 = vld [vmem:[#allocation8 + $0x520] sm:$0xff] }
 0x1a7   :  { %v1107_v36 = vld [vmem:[#allocation8 + $0x1818] sm:$0xff]  ;;  %2012 = vmatpush.msrb.mxu3 %v1243_v31  ;;  %2020 = vmatpush.msra.mxu0 %v444_v33  ;;  %v652_v27 = vld [vmem:[#allocation8 + $0x9e0] sm:$0xff]  ;;  %v1715_v33 = vpop.f32.mrf.mxu0 }
 0x1a8   :  { %v1235_v37 = vld [vmem:[#allocation8 + $0x1c18] sm:$0xff]  ;;  %2040 = vmatpush.msra.mxu1 %v572_v34  ;;  %1993 = vmatpush.msrb.mxu2 %v1107_v36  ;;  %v780_v29 = vld [vmem:[#allocation8 + $0xde0] sm:$0xff]  ;;  %v1716_v36 = vadd.f32 %v1715_v33, %v1364_v23 }
 0x1a9   :  { %2013 = vmatpush.msrb.mxu3 %v1235_v37  ;;  %1994 = vmatmul.f32.vlgmr.msrb.gmra.mxu2 %v2980_v19  ;;  %v364_v30 = vld [vmem:[#allocation8 + $0xe0] sm:$0xff] }
 0x1aa   :  { %2014 = vmatmul.f32.vlgmr.msrb.gmra.mxu3 %v2984_v25  ;;  %2021 = vmatpush.msra.mxu0 %v436_v44  ;;  %v492_v31 = vld [vmem:[#allocation8 + $0x4e0] sm:$0xff]  ;;  %v1736_v43 = vadd.f32 %v1735_v38, %v1716_v36 }
 0x1ab   :  { %2041 = vmatpush.msra.mxu1 %v564_v45  ;;  %2058 = vmatpush.msra.mxu2 %v716_v48  ;;  %v644_v34 = vld [vmem:[#allocation8 + $0x9a0] sm:$0xff] }
 0x1ac   :  { %2078 = vmatpush.msra.mxu3 %v844_v49  ;;  %2022 = vmatpush.msra.mxu0 %v428_v50  ;;  %v356_v58 = vld [vmem:[#allocation8 + $0xa0] sm:$0xff] }
 0x1ad   :  { %2042 = vmatpush.msra.mxu1 %v556_v51  ;;  %2059 = vmatpush.msra.mxu2 %v708_v52  ;;  %v484_v37 = vld [vmem:[#allocation8 + $0x4a0] sm:$0xff] }
 0x1ae   :  { %2079 = vmatpush.msra.mxu3 %v836_v53  ;;  %2023 = vmatpush.msra.mxu0 %v420_v57  ;;  %v636_v39 = vld [vmem:[#allocation8 + $0x960] sm:$0xff] }
 0x1af   :  { %2043 = vmatpush.msra.mxu1 %v548_v59  ;;  %2060 = vmatpush.msra.mxu2 %v700_v61  ;;  %v764_v42 = vld [vmem:[#allocation8 + $0xd60] sm:$0xff] }
 0x1b0   :  { %2080 = vmatpush.msra.mxu3 %v828_v62  ;;  %2024 = vmatpush.msra.mxu0 %v412_v63  ;;  %v348_v44 = vld [vmem:[#allocation8 + $0x60] sm:$0xff] }
 0x1b1   :  { %2044 = vmatpush.msra.mxu1 %v540_v0  ;;  %2061 = vmatpush.msra.mxu2 %v692_v2  ;;  %v476_v45 = vld [vmem:[#allocation8 + $0x460] sm:$0xff]  ;;  %v1755_v0 = vpop.f32.mrf.mxu2 }
 0x1b2   :  { %2081 = vmatpush.msra.mxu3 %v820_v3  ;;  %2025 = vmatpush.msra.mxu0 %v404_v4  ;;  %v628_v46 = vld [vmem:[#allocation8 + $0x920] sm:$0xff]  ;;  %v1756_v4 = vadd.f32 %v1755_v0, %v1736_v43 }
 0x1b3   :  { %2045 = vmatpush.msra.mxu1 %v532_v5  ;;  %2062 = vmatpush.msra.mxu2 %v684_v6  ;;  %v756_v47 = vld [vmem:[#allocation8 + $0xd20] sm:$0xff]  ;;  %v1775_v5 = vpop.f32.mrf.mxu3 }
 0x1b4   :  { %2082 = vmatpush.msra.mxu3 %v812_v7  ;;  %2026 = vmatpush.msra.mxu0 %v396_v8  ;;  %v340_v48 = vld [vmem:[#allocation8 + $0x20] sm:$0xff]  ;;  %v3035_v8 = vadd.f32 %v1775_v5, %v1756_v4 }
 0x1b5   :  { %2046 = vmatpush.msra.mxu1 %v524_v9  ;;  %2063 = vmatpush.msra.mxu2 %v676_v10  ;;  %v468_v49 = vld [vmem:[#allocation8 + $0x420] sm:$0xff] }
 0x1b6   :  { %2083 = vmatpush.msra.mxu3 %v804_v11  ;;  %2027 = vmatpush.msra.mxu0 %v388_v12  ;;  %v620_v50 = vld [vmem:[#allocation8 + $0x8e0] sm:$0xff] }
 0x1b7   :  { %2047 = vmatpush.msra.mxu1 %v516_v13  ;;  %2064 = vmatpush.msra.mxu2 %v668_v14  ;;  %v748_v51 = vld [vmem:[#allocation8 + $0xce0] sm:$0xff] }
 0x1b8   :  { %2084 = vmatpush.msra.mxu3 %v796_v15  ;;  %2028 = vmatpush.msra.mxu0 %v380_v17  ;;  %v972_v16 = vld [vmem:[#allocation8 + $0x13e0] sm:$0xff] }
 0x1b9   :  { %2048 = vmatpush.msra.mxu1 %v508_v18  ;;  %2065 = vmatpush.msra.mxu2 %v660_v20  ;;  %v1100_v52 = vld [vmem:[#allocation8 + $0x17e0] sm:$0xff] }
 0x1ba   :  { %2085 = vmatpush.msra.mxu3 %v788_v21  ;;  %2029 = vmatpush.msra.mxu0 %v372_v24  ;;  %v612_v53 = vld [vmem:[#allocation8 + $0x8a0] sm:$0xff] }
 0x1bb   :  { %2049 = vmatpush.msra.mxu1 %v500_v26  ;;  %2066 = vmatpush.msra.mxu2 %v652_v27  ;;  %v740_v56 = vld [vmem:[#allocation8 + $0xca0] sm:$0xff] }
 0x1bc   :  { %2086 = vmatpush.msra.mxu3 %v780_v29  ;;  %2030 = vmatpush.msra.mxu0 %v364_v30  ;;  %v964_v57 = vld [vmem:[#allocation8 + $0x13a0] sm:$0xff] }
 0x1bd   :  { %2050 = vmatpush.msra.mxu1 %v492_v31  ;;  %2067 = vmatpush.msra.mxu2 %v644_v34  ;;  %v1092_v59 = vld [vmem:[#allocation8 + $0x17a0] sm:$0xff] }
 0x1be   :  { %2087 = vmatpush.msra.mxu3 %v772_v35  ;;  %2031 = vmatpush.msra.mxu0 %v356_v58  ;;  %v604_v60 = vld [vmem:[#allocation8 + $0x860] sm:$0xff] }
 0x1bf   :  { %2051 = vmatpush.msra.mxu1 %v484_v37  ;;  %2068 = vmatpush.msra.mxu2 %v636_v39  ;;  %v732_v61 = vld [vmem:[#allocation8 + $0xc60] sm:$0xff] }
 0x1c0   :  { %2088 = vmatpush.msra.mxu3 %v764_v42  ;;  %2032 = vmatpush.msra.mxu0 %v348_v44  ;;  %v956_v62 = vld [vmem:[#allocation8 + $0x1360] sm:$0xff] }
 0x1c1   :  { %2052 = vmatpush.msra.mxu1 %v476_v45  ;;  %2069 = vmatpush.msra.mxu2 %v628_v46  ;;  %v1084_v63 = vld [vmem:[#allocation8 + $0x1760] sm:$0xff] }
 0x1c2   :  { %2089 = vmatpush.msra.mxu3 %v756_v47  ;;  %2033 = vmatpush.msra.mxu0 %v340_v48  ;;  %v596_v2 = vld [vmem:[#allocation8 + $0x820] sm:$0xff] }
 0x1c3   :  { %2053 = vmatpush.msra.mxu1 %v468_v49  ;;  %2070 = vmatpush.msra.mxu2 %v620_v50  ;;  %v724_v3 = vld [vmem:[#allocation8 + $0xc20] sm:$0xff] }
 0x1c4   :  { %2090 = vmatpush.msra.mxu3 %v748_v51  ;;  %2034 = vmatmul.f32.vlgmr.msra.gmra.mxu0 %v2962_v40  ;;  %v948_v6 = vld [vmem:[#allocation8 + $0x1320] sm:$0xff] }
 0x1c5   :  { %2054 = vmatmul.f32.vlgmr.msra.gmra.mxu1 %v2964_v41  ;;  %2098 = vmatpush.msrb.mxu0 %v972_v16  ;;  %v1076_v7 = vld [vmem:[#allocation8 + $0x1720] sm:$0xff]  ;;  %v1795_v16 = vpop.f32.mrf.mxu0 }
 0x1c6   :  { %2118 = vmatpush.msrb.mxu1 %v1100_v52  ;;  %2071 = vmatpush.msra.mxu2 %v612_v53  ;;  %v1228_v9 = vld [vmem:[#allocation8 + $0x1be0] sm:$0xff] }
 0x1c7   :  { %2091 = vmatpush.msra.mxu3 %v740_v56  ;;  %2099 = vmatpush.msrb.mxu0 %v964_v57  ;;  %v1356_v10 = vld [vmem:[#allocation8 + $0x1fe0] sm:$0xff]  ;;  %v1796_v56 = vadd.f32 %v1795_v16, %v3035_v8  ;;  %v533_v16 = vld [vmem:[#allocation8 + $0x628] sm:$0xff] }
 0x1c8   :  { %2119 = vmatpush.msrb.mxu1 %v1092_v59  ;;  %2072 = vmatpush.msra.mxu2 %v604_v60  ;;  %v940_v11 = vld [vmem:[#allocation8 + $0x12e0] sm:$0xff]  ;;  %v1815_v60 = vpop.f32.mrf.mxu1 }
 0x1c9   :  { %2092 = vmatpush.msra.mxu3 %v732_v61  ;;  %2100 = vmatpush.msrb.mxu0 %v956_v62  ;;  %v1068_v12 = vld [vmem:[#allocation8 + $0x16e0] sm:$0xff] }
 0x1ca   :  { %2120 = vmatpush.msrb.mxu1 %v1084_v63  ;;  %2073 = vmatpush.msra.mxu2 %v596_v2  ;;  %v1220_v13 = vld [vmem:[#allocation8 + $0x1ba0] sm:$0xff]  ;;  %v1816_v63 = vadd.f32 %v1815_v60, %v1796_v56  ;;  %v397_v56 = vld [vmem:[#allocation8 + $0x1e8] sm:$0xff] }
 0x1cb   :  { %2093 = vmatpush.msra.mxu3 %v724_v3  ;;  %2074 = vmatmul.f32.vlgmr.msra.gmra.mxu2 %v2970_v54  ;;  %v1348_v14 = vld [vmem:[#allocation8 + $0x1fa0] sm:$0xff]  ;;  %v389_v60 = vld [vmem:[#allocation8 + $0x1a8] sm:$0xff] }
 0x1cc   :  { %2094 = vmatmul.f32.vlgmr.msra.gmra.mxu3 %v2972_v55  ;;  %2101 = vmatpush.msrb.mxu0 %v948_v6  ;;  %v932_v15 = vld [vmem:[#allocation8 + $0x12a0] sm:$0xff] }
 0x1cd   :  { %2121 = vmatpush.msrb.mxu1 %v1076_v7  ;;  %2138 = vmatpush.msrb.mxu2 %v1228_v9  ;;  %v1060_v17 = vld [vmem:[#allocation8 + $0x16a0] sm:$0xff]  ;;  %v461_v9 = vld [vmem:[#allocation8 + $0x3e8] sm:$0xff] }
 0x1ce   :  { %2158 = vmatpush.msrb.mxu3 %v1356_v10  ;;  %2102 = vmatpush.msrb.mxu0 %v940_v11  ;;  %v1212_v18 = vld [vmem:[#allocation8 + $0x1b60] sm:$0xff]  ;;  %v589_v10 = vld [vmem:[#allocation8 + $0x7e8] sm:$0xff] }
 0x1cf   :  { %2122 = vmatpush.msrb.mxu1 %v1068_v12  ;;  %v1340_v20 = vld [vmem:[#allocation8 + $0x1f60] sm:$0xff]  ;;  %2139 = vmatpush.msrb.mxu2 %v1220_v13  ;;  %v453_v13 = vld [vmem:[#allocation8 + $0x3a8] sm:$0xff] }
 0x1d0   :  { %2159 = vmatpush.msrb.mxu3 %v1348_v14  ;;  %v924_v21 = vld [vmem:[#allocation8 + $0x1260] sm:$0xff]  ;;  %2103 = vmatpush.msrb.mxu0 %v932_v15  ;;  %v581_v14 = vld [vmem:[#allocation8 + $0x7a8] sm:$0xff] }
 0x1d1   :  { %v1052_v23 = vld [vmem:[#allocation8 + $0x1660] sm:$0xff]  ;;  %2123 = vmatpush.msrb.mxu1 %v1060_v17  ;;  %2140 = vmatpush.msrb.mxu2 %v1212_v18  ;;  %v445_v18 = vld [vmem:[#allocation8 + $0x368] sm:$0xff] }
 0x1d2   :  { %v1204_v24 = vld [vmem:[#allocation8 + $0x1b20] sm:$0xff]  ;;  %2160 = vmatpush.msrb.mxu3 %v1340_v20  ;;  %2104 = vmatpush.msrb.mxu0 %v924_v21  ;;  %v573_v20 = vld [vmem:[#allocation8 + $0x768] sm:$0xff]  ;;  %v1835_v21 = vpop.f32.mrf.mxu2 }
 0x1d3   :  { %v1332_v26 = vld [vmem:[#allocation8 + $0x1f20] sm:$0xff]  ;;  %2124 = vmatpush.msrb.mxu1 %v1052_v23  ;;  %2141 = vmatpush.msrb.mxu2 %v1204_v24 }
 0x1d4   :  { %v916_v27 = vld [vmem:[#allocation8 + $0x1220] sm:$0xff]  ;;  %2161 = vmatpush.msrb.mxu3 %v1332_v26  ;;  %v1836_v26 = vadd.f32 %v1835_v21, %v1816_v63  ;;  %v797_v63 = vld [vmem:[#allocation8 + $0xe68] sm:$0xff] }
 0x1d5   :  { %v1044_v29 = vld [vmem:[#allocation8 + $0x1620] sm:$0xff]  ;;  %2105 = vmatpush.msrb.mxu0 %v916_v27  ;;  %v1855_v27 = vpop.f32.mrf.mxu3  ;;  %v629_v21 = vld [vmem:[#allocation8 + $0x928] sm:$0xff] }
 0x1d6   :  { %v1196_v30 = vld [vmem:[#allocation8 + $0x1ae0] sm:$0xff]  ;;  %2125 = vmatpush.msrb.mxu1 %v1044_v29  ;;  %v437_v29 = vld [vmem:[#allocation8 + $0x328] sm:$0xff] }
 0x1d7   :  { %v1324_v31 = vld [vmem:[#allocation8 + $0x1ee0] sm:$0xff]  ;;  %2142 = vmatpush.msrb.mxu2 %v1196_v30  ;;  %v565_v30 = vld [vmem:[#allocation8 + $0x728] sm:$0xff] }
 0x1d8   :  { %v908_v33 = vld [vmem:[#allocation8 + $0x11e0] sm:$0xff]  ;;  %2162 = vmatpush.msrb.mxu3 %v1324_v31  ;;  %v1856_v31 = vadd.f32 %v1855_v27, %v1836_v26  ;;  %v469_v26 = vld [vmem:[#allocation8 + $0x428] sm:$0xff] }
 0x1d9   :  { %v1036_v34 = vld [vmem:[#allocation8 + $0x15e0] sm:$0xff]  ;;  %2106 = vmatpush.msrb.mxu0 %v908_v33  ;;  %v2670_v33 = vperm.slane %v3023_v32, 2  ;;  %v621_v27 = vld [vmem:[#allocation8 + $0x8e8] sm:$0xff] }
 0x1da   :  { %v1188_v35 = vld [vmem:[#allocation8 + $0x1aa0] sm:$0xff]  ;;  %2126 = vmatpush.msrb.mxu1 %v1036_v34  ;;  %v717_v34 = vld [vmem:[#allocation8 + $0xbe8] sm:$0xff] }
 0x1db   :  { %v1316_v36 = vld [vmem:[#allocation8 + $0x1ea0] sm:$0xff]  ;;  %2143 = vmatpush.msrb.mxu2 %v1188_v35  ;;  %v845_v35 = vld [vmem:[#allocation8 + $0xfe8] sm:$0xff] }
 0x1dc   :  { %v900_v58 = vld [vmem:[#allocation8 + $0x11a0] sm:$0xff]  ;;  %2163 = vmatpush.msrb.mxu3 %v1316_v36  ;;  %v429_v36 = vld [vmem:[#allocation8 + $0x2e8] sm:$0xff] }
 0x1dd   :  { %v1028_v37 = vld [vmem:[#allocation8 + $0x15a0] sm:$0xff]  ;;  %2107 = vmatpush.msrb.mxu0 %v900_v58  ;;  %v557_v58 = vld [vmem:[#allocation8 + $0x6e8] sm:$0xff] }
 0x1de   :  { %v1180_v38 = vld [vmem:[#allocation8 + $0x1a60] sm:$0xff]  ;;  %2127 = vmatpush.msrb.mxu1 %v1028_v37  ;;  %v2660_v37 = vmax.f32 %v1856_v31, 0.0  ;;  %v1101_v31 = vld [vmem:[#allocation8 + $0x17e8] sm:$0xff] }
 0x1df   :  { %v1308_v39 = vld [vmem:[#allocation8 + $0x1e60] sm:$0xff]  ;;  %2144 = vmatpush.msrb.mxu2 %v1180_v38  ;;  %v709_v38 = vld [vmem:[#allocation8 + $0xba8] sm:$0xff] }
 0x1e0   :  { %v892_v42 = vld [vmem:[#allocation8 + $0x1160] sm:$0xff]  ;;  %2164 = vmatpush.msrb.mxu3 %v1308_v39  ;;  %v837_v39 = vld [vmem:[#allocation8 + $0xfa8] sm:$0xff]  ;;  %v2686_v32 = vmul.f32 %v2670_v33, %v2660_v37 }
 0x1e1   :  { %v1020_v43 = vld [vmem:[#allocation8 + $0x1560] sm:$0xff]  ;;  %2108 = vmatpush.msrb.mxu0 %v892_v42  ;;  %v421_v42 = vld [vmem:[#allocation8 + $0x2a8] sm:$0xff] }
 0x1e2   :  { %v1172_v44 = vld [vmem:[#allocation8 + $0x1a20] sm:$0xff]  ;;  %2128 = vmatpush.msrb.mxu1 %v1020_v43  ;;  %v549_v43 = vld [vmem:[#allocation8 + $0x6a8] sm:$0xff] }
 0x1e3   :  { %v1300_v45 = vld [vmem:[#allocation8 + $0x1e20] sm:$0xff]  ;;  %2145 = vmatpush.msrb.mxu2 %v1172_v44  ;;  %v701_v44 = vld [vmem:[#allocation8 + $0xb68] sm:$0xff] }
 0x1e4   :  { %v884_v46 = vld [vmem:[#allocation8 + $0x1120] sm:$0xff]  ;;  %2165 = vmatpush.msrb.mxu3 %v1300_v45  ;;  %v829_v45 = vld [vmem:[#allocation8 + $0xf68] sm:$0xff] }
 0x1e5   :  { %v1012_v47 = vld [vmem:[#allocation8 + $0x1520] sm:$0xff]  ;;  %2109 = vmatpush.msrb.mxu0 %v884_v46  ;;  %v413_v46 = vld [vmem:[#allocation8 + $0x268] sm:$0xff] }
 0x1e6   :  { %v1164_v48 = vld [vmem:[#allocation8 + $0x19e0] sm:$0xff]  ;;  %2129 = vmatpush.msrb.mxu1 %v1012_v47  ;;  %v541_v47 = vld [vmem:[#allocation8 + $0x668] sm:$0xff] }
 0x1e7   :  { %v1292_v49 = vld [vmem:[#allocation8 + $0x1de0] sm:$0xff]  ;;  %2146 = vmatpush.msrb.mxu2 %v1164_v48  ;;  %v3046_v48 = vadd.f32 %v3030_v1, %v2686_v32  ;;  %v677_v1 = vld [vmem:[#allocation8 + $0xaa8] sm:$0xff] }
 0x1e8   :  { %v876_v50 = vld [vmem:[#allocation8 + $0x10e0] sm:$0xff]  ;;  %2166 = vmatpush.msrb.mxu3 %v1292_v49  ;;  %v693_v49 = vld [vmem:[#allocation8 + $0xb28] sm:$0xff] }
 0x1e9   :  { %v1004_v51 = vld [vmem:[#allocation8 + $0x14e0] sm:$0xff]  ;;  %2110 = vmatpush.msrb.mxu0 %v876_v50  ;;  %v821_v50 = vld [vmem:[#allocation8 + $0xf28] sm:$0xff] }
 0x1ea   :  { %v1156_v52 = vld [vmem:[#allocation8 + $0x19a0] sm:$0xff]  ;;  %2130 = vmatpush.msrb.mxu1 %v1004_v51  ;;  %v405_v51 = vld [vmem:[#allocation8 + $0x228] sm:$0xff] }
 0x1eb   :  { %v1284_v53 = vld [vmem:[#allocation8 + $0x1da0] sm:$0xff]  ;;  %2147 = vmatpush.msrb.mxu2 %v1156_v52  ;;  %v685_v52 = vld [vmem:[#allocation8 + $0xae8] sm:$0xff] }
 0x1ec   :  { %v868_v57 = vld [vmem:[#allocation8 + $0x10a0] sm:$0xff]  ;;  %2167 = vmatpush.msrb.mxu3 %v1284_v53  ;;  %v813_v53 = vld [vmem:[#allocation8 + $0xee8] sm:$0xff] }
 0x1ed   :  { %v996_v59 = vld [vmem:[#allocation8 + $0x14a0] sm:$0xff]  ;;  %2111 = vmatpush.msrb.mxu0 %v868_v57  ;;  %v525_v57 = vld [vmem:[#allocation8 + $0x5e8] sm:$0xff] }
 0x1ee   :  { %v1148_v61 = vld [vmem:[#allocation8 + $0x1960] sm:$0xff]  ;;  %2131 = vmatpush.msrb.mxu1 %v996_v59  ;;  %v805_v59 = vld [vmem:[#allocation8 + $0xea8] sm:$0xff] }
 0x1ef   :  { %v1276_v62 = vld [vmem:[#allocation8 + $0x1d60] sm:$0xff]  ;;  %2148 = vmatpush.msrb.mxu2 %v1148_v61  ;;  %v517_v61 = vld [vmem:[#allocation8 + $0x5a8] sm:$0xff] }
 0x1f0   :  { %v860_v0 = vld [vmem:[#allocation8 + $0x1060] sm:$0xff]  ;;  %2168 = vmatpush.msrb.mxu3 %v1276_v62  ;;  %v669_v62 = vld [vmem:[#allocation8 + $0xa68] sm:$0xff] }
 0x1f1   :  { %v988_v2 = vld [vmem:[#allocation8 + $0x1460] sm:$0xff]  ;;  %2112 = vmatpush.msrb.mxu0 %v860_v0  ;;  %v381_v0 = vld [vmem:[#allocation8 + $0x168] sm:$0xff] }
 0x1f2   :  { %v1140_v3 = vld [vmem:[#allocation8 + $0x1920] sm:$0xff]  ;;  %2132 = vmatpush.msrb.mxu1 %v988_v2  ;;  %v509_v2 = vld [vmem:[#allocation8 + $0x568] sm:$0xff] }
 0x1f3   :  { %v1268_v4 = vld [vmem:[#allocation8 + $0x1d20] sm:$0xff]  ;;  %2149 = vmatpush.msrb.mxu2 %v1140_v3  ;;  %v661_v3 = vld [vmem:[#allocation8 + $0xa28] sm:$0xff] }
 0x1f4   :  { %v852_v5 = vld [vmem:[#allocation8 + $0x1020] sm:$0xff]  ;;  %2169 = vmatpush.msrb.mxu3 %v1268_v4  ;;  %v789_v4 = vld [vmem:[#allocation8 + $0xe28] sm:$0xff] }
 0x1f5   :  { %v980_v6 = vld [vmem:[#allocation8 + $0x1420] sm:$0xff]  ;;  %2113 = vmatpush.msrb.mxu0 %v852_v5  ;;  %v373_v5 = vld [vmem:[#allocation8 + $0x128] sm:$0xff] }
 0x1f6   :  { %v1132_v7 = vld [vmem:[#allocation8 + $0x18e0] sm:$0xff]  ;;  %2133 = vmatpush.msrb.mxu1 %v980_v6  ;;  %2114 = vmatmul.f32.vlgmr.msrb.gmra.mxu0 %v2982_v22  ;;  %v501_v6 = vld [vmem:[#allocation8 + $0x528] sm:$0xff] }
 0x1f7   :  { %v1260_v8 = vld [vmem:[#allocation8 + $0x1ce0] sm:$0xff]  ;;  %2150 = vmatpush.msrb.mxu2 %v1132_v7  ;;  %2134 = vmatmul.f32.vlgmr.msrb.gmra.mxu1 %v2987_v28  ;;  %v653_v7 = vld [vmem:[#allocation8 + $0x9e8] sm:$0xff] }
 0x1f8   :  { %2170 = vmatpush.msrb.mxu3 %v1260_v8  ;;  %v1124_v11 = vld [vmem:[#allocation8 + $0x18a0] sm:$0xff]  ;;  %2178 = vmatpush.msra.mxu0 %v461_v9  ;;  %v781_v8 = vld [vmem:[#allocation8 + $0xde8] sm:$0xff] }
 0x1f9   :  { %v1252_v12 = vld [vmem:[#allocation8 + $0x1ca0] sm:$0xff]  ;;  %2198 = vmatpush.msra.mxu1 %v589_v10  ;;  %2151 = vmatpush.msrb.mxu2 %v1124_v11  ;;  %v365_v9 = vld [vmem:[#allocation8 + $0xe8] sm:$0xff] }
 0x1fa   :  { %v1116_v15 = vld [vmem:[#allocation8 + $0x1860] sm:$0xff]  ;;  %2171 = vmatpush.msrb.mxu3 %v1252_v12  ;;  %2179 = vmatpush.msra.mxu0 %v453_v13  ;;  %v493_v10 = vld [vmem:[#allocation8 + $0x4e8] sm:$0xff] }
 0x1fb   :  { %v1244_v17 = vld [vmem:[#allocation8 + $0x1c60] sm:$0xff]  ;;  %2199 = vmatpush.msra.mxu1 %v581_v14  ;;  %2152 = vmatpush.msrb.mxu2 %v1116_v15  ;;  %v645_v11 = vld [vmem:[#allocation8 + $0x9a8] sm:$0xff] }
 0x1fc   :  { %v1108_v23 = vld [vmem:[#allocation8 + $0x1820] sm:$0xff]  ;;  %2172 = vmatpush.msrb.mxu3 %v1244_v17  ;;  %2180 = vmatpush.msra.mxu0 %v445_v18  ;;  %v773_v12 = vld [vmem:[#allocation8 + $0xda8] sm:$0xff] }
 0x1fd   :  { %v1236_v24 = vld [vmem:[#allocation8 + $0x1c20] sm:$0xff]  ;;  %2200 = vmatpush.msra.mxu1 %v573_v20  ;;  %2153 = vmatpush.msrb.mxu2 %v1108_v23  ;;  %v357_v13 = vld [vmem:[#allocation8 + $0xa8] sm:$0xff] }
 0x1fe   :  { %2173 = vmatpush.msrb.mxu3 %v1236_v24  ;;  %2154 = vmatmul.f32.vlgmr.msrb.gmra.mxu2 %v2980_v19  ;;  %v485_v14 = vld [vmem:[#allocation8 + $0x4a8] sm:$0xff] }
 0x1ff   :  { %2174 = vmatmul.f32.vlgmr.msrb.gmra.mxu3 %v2984_v25  ;;  %2181 = vmatpush.msra.mxu0 %v437_v29  ;;  %v637_v15 = vld [vmem:[#allocation8 + $0x968] sm:$0xff] }
 0x200   :  { %2201 = vmatpush.msra.mxu1 %v565_v30  ;;  %2218 = vmatpush.msra.mxu2 %v717_v34  ;;  %v765_v17 = vld [vmem:[#allocation8 + $0xd68] sm:$0xff] }
 0x201   :  { %2238 = vmatpush.msra.mxu3 %v845_v35  ;;  %2182 = vmatpush.msra.mxu0 %v429_v36  ;;  %v349_v18 = vld [vmem:[#allocation8 + $0x68] sm:$0xff] }
 0x202   :  { %2202 = vmatpush.msra.mxu1 %v557_v58  ;;  %2219 = vmatpush.msra.mxu2 %v709_v38  ;;  %v477_v20 = vld [vmem:[#allocation8 + $0x468] sm:$0xff] }
 0x203   :  { %2239 = vmatpush.msra.mxu3 %v837_v39  ;;  %2183 = vmatpush.msra.mxu0 %v421_v42  ;;  %v757_v23 = vld [vmem:[#allocation8 + $0xd28] sm:$0xff] }
 0x204   :  { %2203 = vmatpush.msra.mxu1 %v549_v43  ;;  %2220 = vmatpush.msra.mxu2 %v701_v44  ;;  %v341_v24 = vld [vmem:[#allocation8 + $0x28] sm:$0xff] }
 0x205   :  { %2240 = vmatpush.msra.mxu3 %v829_v45  ;;  %2184 = vmatpush.msra.mxu0 %v413_v46  ;;  %v749_v29 = vld [vmem:[#allocation8 + $0xce8] sm:$0xff] }
 0x206   :  { %2204 = vmatpush.msra.mxu1 %v541_v47  ;;  %2221 = vmatpush.msra.mxu2 %v693_v49  ;;  %v973_v30 = vld [vmem:[#allocation8 + $0x13e8] sm:$0xff] }
 0x207   :  { %2241 = vmatpush.msra.mxu3 %v821_v50  ;;  %2185 = vmatpush.msra.mxu0 %v405_v51  ;;  %v613_v33 = vld [vmem:[#allocation8 + $0x8a8] sm:$0xff] }
 0x208   :  { %2205 = vmatpush.msra.mxu1 %v533_v16  ;;  %2222 = vmatpush.msra.mxu2 %v685_v52  ;;  %v741_v34 = vld [vmem:[#allocation8 + $0xca8] sm:$0xff] }
 0x209   :  { %2242 = vmatpush.msra.mxu3 %v813_v53  ;;  %2186 = vmatpush.msra.mxu0 %v397_v56  ;;  %v965_v35 = vld [vmem:[#allocation8 + $0x13a8] sm:$0xff] }
 0x20a   :  { %2206 = vmatpush.msra.mxu1 %v525_v57  ;;  %2223 = vmatpush.msra.mxu2 %v677_v1  ;;  %v1093_v36 = vld [vmem:[#allocation8 + $0x17a8] sm:$0xff] }
 0x20b   :  { %2243 = vmatpush.msra.mxu3 %v805_v59  ;;  %2187 = vmatpush.msra.mxu0 %v389_v60  ;;  %v605_v58 = vld [vmem:[#allocation8 + $0x868] sm:$0xff] }
 0x20c   :  { %2207 = vmatpush.msra.mxu1 %v517_v61  ;;  %2224 = vmatpush.msra.mxu2 %v669_v62  ;;  %v733_v37 = vld [vmem:[#allocation8 + $0xc68] sm:$0xff] }
 0x20d   :  { %2244 = vmatpush.msra.mxu3 %v797_v63  ;;  %2188 = vmatpush.msra.mxu0 %v381_v0  ;;  %v957_v38 = vld [vmem:[#allocation8 + $0x1368] sm:$0xff] }
 0x20e   :  { %2208 = vmatpush.msra.mxu1 %v509_v2  ;;  %2225 = vmatpush.msra.mxu2 %v661_v3  ;;  %v1085_v39 = vld [vmem:[#allocation8 + $0x1768] sm:$0xff] }
 0x20f   :  { %2245 = vmatpush.msra.mxu3 %v789_v4  ;;  %2189 = vmatpush.msra.mxu0 %v373_v5  ;;  %v597_v42 = vld [vmem:[#allocation8 + $0x828] sm:$0xff] }
 0x210   :  { %2209 = vmatpush.msra.mxu1 %v501_v6  ;;  %2226 = vmatpush.msra.mxu2 %v653_v7  ;;  %v725_v43 = vld [vmem:[#allocation8 + $0xc28] sm:$0xff] }
 0x211   :  { %2246 = vmatpush.msra.mxu3 %v781_v8  ;;  %2190 = vmatpush.msra.mxu0 %v365_v9  ;;  %v949_v32 = vld [vmem:[#allocation8 + $0x1328] sm:$0xff] }
 0x212   :  { %2210 = vmatpush.msra.mxu1 %v493_v10  ;;  %2227 = vmatpush.msra.mxu2 %v645_v11  ;;  %v1077_v44 = vld [vmem:[#allocation8 + $0x1728] sm:$0xff] }
 0x213   :  { %2247 = vmatpush.msra.mxu3 %v773_v12  ;;  %2191 = vmatpush.msra.mxu0 %v357_v13  ;;  %v1229_v45 = vld [vmem:[#allocation8 + $0x1be8] sm:$0xff] }
 0x214   :  { %2211 = vmatpush.msra.mxu1 %v485_v14  ;;  %2228 = vmatpush.msra.mxu2 %v637_v15  ;;  %v1357_v46 = vld [vmem:[#allocation8 + $0x1fe8] sm:$0xff] }
 0x215   :  { %2248 = vmatpush.msra.mxu3 %v765_v17  ;;  %2192 = vmatpush.msra.mxu0 %v349_v18  ;;  %v941_v47 = vld [vmem:[#allocation8 + $0x12e8] sm:$0xff] }
 0x216   :  { %2212 = vmatpush.msra.mxu1 %v477_v20  ;;  %2229 = vmatpush.msra.mxu2 %v629_v21  ;;  %v1069_v49 = vld [vmem:[#allocation8 + $0x16e8] sm:$0xff] }
 0x217   :  { %2249 = vmatpush.msra.mxu3 %v757_v23  ;;  %2193 = vmatpush.msra.mxu0 %v341_v24  ;;  %v1221_v50 = vld [vmem:[#allocation8 + $0x1ba8] sm:$0xff] }
 0x218   :  { %2213 = vmatpush.msra.mxu1 %v469_v26  ;;  %2230 = vmatpush.msra.mxu2 %v621_v27  ;;  %v1349_v51 = vld [vmem:[#allocation8 + $0x1fa8] sm:$0xff] }
 0x219   :  { %2250 = vmatpush.msra.mxu3 %v749_v29  ;;  %2194 = vmatmul.f32.vlgmr.msra.gmra.mxu0 %v2962_v40  ;;  %v933_v16 = vld [vmem:[#allocation8 + $0x12a8] sm:$0xff] }
 0x21a   :  { %2214 = vmatmul.f32.vlgmr.msra.gmra.mxu1 %v2964_v41  ;;  %2258 = vmatpush.msrb.mxu0 %v973_v30  ;;  %v1061_v52 = vld [vmem:[#allocation8 + $0x16a8] sm:$0xff] }
 0x21b   :  { %2278 = vmatpush.msrb.mxu1 %v1101_v31  ;;  %2231 = vmatpush.msra.mxu2 %v613_v33  ;;  %v1213_v53 = vld [vmem:[#allocation8 + $0x1b68] sm:$0xff] }
 0x21c   :  { %2251 = vmatpush.msra.mxu3 %v741_v34  ;;  %2259 = vmatpush.msrb.mxu0 %v965_v35  ;;  %v1341_v56 = vld [vmem:[#allocation8 + $0x1f68] sm:$0xff] }
 0x21d   :  { %2279 = vmatpush.msrb.mxu1 %v1093_v36  ;;  %2232 = vmatpush.msra.mxu2 %v605_v58  ;;  %v925_v57 = vld [vmem:[#allocation8 + $0x1268] sm:$0xff] }
 0x21e   :  { %2252 = vmatpush.msra.mxu3 %v733_v37  ;;  %2260 = vmatpush.msrb.mxu0 %v957_v38  ;;  %v1053_v1 = vld [vmem:[#allocation8 + $0x1668] sm:$0xff] }
 0x21f   :  { %2280 = vmatpush.msrb.mxu1 %v1085_v39  ;;  %2233 = vmatpush.msra.mxu2 %v597_v42  ;;  %v1205_v59 = vld [vmem:[#allocation8 + $0x1b28] sm:$0xff]  ;;  %v462_v39 = vld [vmem:[#allocation8 + $0x3f0] sm:$0xff] }
 0x220   :  { %2253 = vmatpush.msra.mxu3 %v725_v43  ;;  %2234 = vmatmul.f32.vlgmr.msra.gmra.mxu2 %v2970_v54  ;;  %v1333_v60 = vld [vmem:[#allocation8 + $0x1f28] sm:$0xff]  ;;  %v590_v42 = vld [vmem:[#allocation8 + $0x7f0] sm:$0xff] }
 0x221   :  { %2254 = vmatmul.f32.vlgmr.msra.gmra.mxu3 %v2972_v55  ;;  %2261 = vmatpush.msrb.mxu0 %v949_v32  ;;  %v917_v61 = vld [vmem:[#allocation8 + $0x1228] sm:$0xff] }
 0x222   :  { %2281 = vmatpush.msrb.mxu1 %v1077_v44  ;;  %2298 = vmatpush.msrb.mxu2 %v1229_v45  ;;  %v1045_v62 = vld [vmem:[#allocation8 + $0x1628] sm:$0xff]  ;;  %v454_v44 = vld [vmem:[#allocation8 + $0x3b0] sm:$0xff] }
 0x223   :  { %2318 = vmatpush.msrb.mxu3 %v1357_v46  ;;  %2262 = vmatpush.msrb.mxu0 %v941_v47  ;;  %v1197_v63 = vld [vmem:[#allocation8 + $0x1ae8] sm:$0xff]  ;;  %v582_v45 = vld [vmem:[#allocation8 + $0x7b0] sm:$0xff] }
 0x224   :  { %2282 = vmatpush.msrb.mxu1 %v1069_v49  ;;  %2299 = vmatpush.msrb.mxu2 %v1221_v50  ;;  %v1325_v0 = vld [vmem:[#allocation8 + $0x1ee8] sm:$0xff]  ;;  %v446_v49 = vld [vmem:[#allocation8 + $0x370] sm:$0xff] }
 0x225   :  { %2319 = vmatpush.msrb.mxu3 %v1349_v51  ;;  %2263 = vmatpush.msrb.mxu0 %v933_v16  ;;  %v909_v2 = vld [vmem:[#allocation8 + $0x11e8] sm:$0xff]  ;;  %v574_v50 = vld [vmem:[#allocation8 + $0x770] sm:$0xff] }
 0x226   :  { %2283 = vmatpush.msrb.mxu1 %v1061_v52  ;;  %2300 = vmatpush.msrb.mxu2 %v1213_v53  ;;  %v1037_v3 = vld [vmem:[#allocation8 + $0x15e8] sm:$0xff]  ;;  %v438_v52 = vld [vmem:[#allocation8 + $0x330] sm:$0xff] }
 0x227   :  { %2320 = vmatpush.msrb.mxu3 %v1341_v56  ;;  %2264 = vmatpush.msrb.mxu0 %v925_v57  ;;  %v1189_v4 = vld [vmem:[#allocation8 + $0x1aa8] sm:$0xff]  ;;  %v566_v53 = vld [vmem:[#allocation8 + $0x730] sm:$0xff] }
 0x228   :  { %2284 = vmatpush.msrb.mxu1 %v1053_v1  ;;  %2301 = vmatpush.msrb.mxu2 %v1205_v59  ;;  %v1317_v5 = vld [vmem:[#allocation8 + $0x1ea8] sm:$0xff]  ;;  %v718_v56 = vld [vmem:[#allocation8 + $0xbf0] sm:$0xff] }
 0x229   :  { %2321 = vmatpush.msrb.mxu3 %v1333_v60  ;;  %2265 = vmatpush.msrb.mxu0 %v917_v61  ;;  %v901_v6 = vld [vmem:[#allocation8 + $0x11a8] sm:$0xff]  ;;  %v846_v57 = vld [vmem:[#allocation8 + $0xff0] sm:$0xff] }
 0x22a   :  { %2285 = vmatpush.msrb.mxu1 %v1045_v62  ;;  %2302 = vmatpush.msrb.mxu2 %v1197_v63  ;;  %v1029_v7 = vld [vmem:[#allocation8 + $0x15a8] sm:$0xff]  ;;  %v430_v1 = vld [vmem:[#allocation8 + $0x2f0] sm:$0xff] }
 0x22b   :  { %2322 = vmatpush.msrb.mxu3 %v1325_v0  ;;  %2266 = vmatpush.msrb.mxu0 %v909_v2  ;;  %v1181_v8 = vld [vmem:[#allocation8 + $0x1a68] sm:$0xff]  ;;  %v558_v59 = vld [vmem:[#allocation8 + $0x6f0] sm:$0xff] }
 0x22c   :  { %2286 = vmatpush.msrb.mxu1 %v1037_v3  ;;  %v1309_v9 = vld [vmem:[#allocation8 + $0x1e68] sm:$0xff]  ;;  %2303 = vmatpush.msrb.mxu2 %v1189_v4  ;;  %v710_v60 = vld [vmem:[#allocation8 + $0xbb0] sm:$0xff] }
 0x22d   :  { %2323 = vmatpush.msrb.mxu3 %v1317_v5  ;;  %v893_v10 = vld [vmem:[#allocation8 + $0x1168] sm:$0xff]  ;;  %2267 = vmatpush.msrb.mxu0 %v901_v6  ;;  %v838_v61 = vld [vmem:[#allocation8 + $0xfb0] sm:$0xff] }
 0x22e   :  { %v1021_v11 = vld [vmem:[#allocation8 + $0x1568] sm:$0xff]  ;;  %2287 = vmatpush.msrb.mxu1 %v1029_v7  ;;  %2304 = vmatpush.msrb.mxu2 %v1181_v8  ;;  %v422_v62 = vld [vmem:[#allocation8 + $0x2b0] sm:$0xff] }
 0x22f   :  { %v1173_v12 = vld [vmem:[#allocation8 + $0x1a28] sm:$0xff]  ;;  %2324 = vmatpush.msrb.mxu3 %v1309_v9  ;;  %2268 = vmatpush.msrb.mxu0 %v893_v10  ;;  %v550_v63 = vld [vmem:[#allocation8 + $0x6b0] sm:$0xff] }
 0x230   :  { %v1301_v13 = vld [vmem:[#allocation8 + $0x1e28] sm:$0xff]  ;;  %2288 = vmatpush.msrb.mxu1 %v1021_v11  ;;  %2305 = vmatpush.msrb.mxu2 %v1173_v12  ;;  %v702_v0 = vld [vmem:[#allocation8 + $0xb70] sm:$0xff] }
 0x231   :  { %v885_v14 = vld [vmem:[#allocation8 + $0x1128] sm:$0xff]  ;;  %2325 = vmatpush.msrb.mxu3 %v1301_v13  ;;  %v830_v2 = vld [vmem:[#allocation8 + $0xf70] sm:$0xff] }
 0x232   :  { %v1013_v15 = vld [vmem:[#allocation8 + $0x1528] sm:$0xff]  ;;  %2269 = vmatpush.msrb.mxu0 %v885_v14  ;;  %v414_v3 = vld [vmem:[#allocation8 + $0x270] sm:$0xff] }
 0x233   :  { %v1165_v17 = vld [vmem:[#allocation8 + $0x19e8] sm:$0xff]  ;;  %2289 = vmatpush.msrb.mxu1 %v1013_v15  ;;  %v542_v4 = vld [vmem:[#allocation8 + $0x670] sm:$0xff] }
 0x234   :  { %v1293_v18 = vld [vmem:[#allocation8 + $0x1de8] sm:$0xff]  ;;  %2306 = vmatpush.msrb.mxu2 %v1165_v17  ;;  %v694_v5 = vld [vmem:[#allocation8 + $0xb30] sm:$0xff] }
 0x235   :  { %v877_v20 = vld [vmem:[#allocation8 + $0x10e8] sm:$0xff]  ;;  %2326 = vmatpush.msrb.mxu3 %v1293_v18  ;;  %v822_v6 = vld [vmem:[#allocation8 + $0xf30] sm:$0xff] }
 0x236   :  { %v1005_v21 = vld [vmem:[#allocation8 + $0x14e8] sm:$0xff]  ;;  %2270 = vmatpush.msrb.mxu0 %v877_v20  ;;  %v406_v7 = vld [vmem:[#allocation8 + $0x230] sm:$0xff] }
 0x237   :  { %v1157_v23 = vld [vmem:[#allocation8 + $0x19a8] sm:$0xff]  ;;  %2290 = vmatpush.msrb.mxu1 %v1005_v21  ;;  %v534_v8 = vld [vmem:[#allocation8 + $0x630] sm:$0xff] }
 0x238   :  { %v1285_v24 = vld [vmem:[#allocation8 + $0x1da8] sm:$0xff]  ;;  %2307 = vmatpush.msrb.mxu2 %v1157_v23  ;;  %v686_v9 = vld [vmem:[#allocation8 + $0xaf0] sm:$0xff] }
 0x239   :  { %v869_v26 = vld [vmem:[#allocation8 + $0x10a8] sm:$0xff]  ;;  %2327 = vmatpush.msrb.mxu3 %v1285_v24  ;;  %v814_v10 = vld [vmem:[#allocation8 + $0xef0] sm:$0xff] }
 0x23a   :  { %v997_v27 = vld [vmem:[#allocation8 + $0x14a8] sm:$0xff]  ;;  %2271 = vmatpush.msrb.mxu0 %v869_v26  ;;  %v398_v11 = vld [vmem:[#allocation8 + $0x1f0] sm:$0xff] }
 0x23b   :  { %v1149_v29 = vld [vmem:[#allocation8 + $0x1968] sm:$0xff]  ;;  %2291 = vmatpush.msrb.mxu1 %v997_v27  ;;  %v526_v12 = vld [vmem:[#allocation8 + $0x5f0] sm:$0xff] }
 0x23c   :  { %v1277_v30 = vld [vmem:[#allocation8 + $0x1d68] sm:$0xff]  ;;  %2308 = vmatpush.msrb.mxu2 %v1149_v29  ;;  %v678_v13 = vld [vmem:[#allocation8 + $0xab0] sm:$0xff] }
 0x23d   :  { %v861_v31 = vld [vmem:[#allocation8 + $0x1068] sm:$0xff]  ;;  %2328 = vmatpush.msrb.mxu3 %v1277_v30  ;;  %v806_v14 = vld [vmem:[#allocation8 + $0xeb0] sm:$0xff] }
 0x23e   :  { %v989_v33 = vld [vmem:[#allocation8 + $0x1468] sm:$0xff]  ;;  %2272 = vmatpush.msrb.mxu0 %v861_v31  ;;  %v390_v15 = vld [vmem:[#allocation8 + $0x1b0] sm:$0xff] }
 0x23f   :  { %v1141_v34 = vld [vmem:[#allocation8 + $0x1928] sm:$0xff]  ;;  %2292 = vmatpush.msrb.mxu1 %v989_v33  ;;  %v518_v17 = vld [vmem:[#allocation8 + $0x5b0] sm:$0xff] }
 0x240   :  { %v1269_v35 = vld [vmem:[#allocation8 + $0x1d28] sm:$0xff]  ;;  %2309 = vmatpush.msrb.mxu2 %v1141_v34  ;;  %v670_v18 = vld [vmem:[#allocation8 + $0xa70] sm:$0xff] }
 0x241   :  { %v853_v36 = vld [vmem:[#allocation8 + $0x1028] sm:$0xff]  ;;  %2329 = vmatpush.msrb.mxu3 %v1269_v35  ;;  %v798_v20 = vld [vmem:[#allocation8 + $0xe70] sm:$0xff] }
 0x242   :  { %v981_v58 = vld [vmem:[#allocation8 + $0x1428] sm:$0xff]  ;;  %2273 = vmatpush.msrb.mxu0 %v853_v36  ;;  %v382_v21 = vld [vmem:[#allocation8 + $0x170] sm:$0xff] }
 0x243   :  { %v1133_v37 = vld [vmem:[#allocation8 + $0x18e8] sm:$0xff]  ;;  %2293 = vmatpush.msrb.mxu1 %v981_v58  ;;  %2274 = vmatmul.f32.vlgmr.msrb.gmra.mxu0 %v2982_v22  ;;  %v510_v23 = vld [vmem:[#allocation8 + $0x570] sm:$0xff] }
 0x244   :  { %v1261_v38 = vld [vmem:[#allocation8 + $0x1ce8] sm:$0xff]  ;;  %2310 = vmatpush.msrb.mxu2 %v1133_v37  ;;  %2294 = vmatmul.f32.vlgmr.msrb.gmra.mxu1 %v2987_v28  ;;  %v662_v24 = vld [vmem:[#allocation8 + $0xa30] sm:$0xff] }
 0x245   :  { %2330 = vmatpush.msrb.mxu3 %v1261_v38  ;;  %v1125_v43 = vld [vmem:[#allocation8 + $0x18a8] sm:$0xff]  ;;  %2338 = vmatpush.msra.mxu0 %v462_v39  ;;  %v790_v26 = vld [vmem:[#allocation8 + $0xe30] sm:$0xff] }
 0x246   :  { %v1253_v32 = vld [vmem:[#allocation8 + $0x1ca8] sm:$0xff]  ;;  %2358 = vmatpush.msra.mxu1 %v590_v42  ;;  %2311 = vmatpush.msrb.mxu2 %v1125_v43  ;;  %v374_v27 = vld [vmem:[#allocation8 + $0x130] sm:$0xff] }
 0x247   :  { %v1117_v46 = vld [vmem:[#allocation8 + $0x1868] sm:$0xff]  ;;  %2331 = vmatpush.msrb.mxu3 %v1253_v32  ;;  %2339 = vmatpush.msra.mxu0 %v454_v44  ;;  %v502_v29 = vld [vmem:[#allocation8 + $0x530] sm:$0xff] }
 0x248   :  { %v1245_v47 = vld [vmem:[#allocation8 + $0x1c68] sm:$0xff]  ;;  %2359 = vmatpush.msra.mxu1 %v582_v45  ;;  %2312 = vmatpush.msrb.mxu2 %v1117_v46  ;;  %v654_v30 = vld [vmem:[#allocation8 + $0x9f0] sm:$0xff] }
 0x249   :  { %v1109_v51 = vld [vmem:[#allocation8 + $0x1828] sm:$0xff]  ;;  %2332 = vmatpush.msrb.mxu3 %v1245_v47  ;;  %2340 = vmatpush.msra.mxu0 %v446_v49  ;;  %v782_v31 = vld [vmem:[#allocation8 + $0xdf0] sm:$0xff] }
 0x24a   :  { %v1237_v16 = vld [vmem:[#allocation8 + $0x1c28] sm:$0xff]  ;;  %2360 = vmatpush.msra.mxu1 %v574_v50  ;;  %2313 = vmatpush.msrb.mxu2 %v1109_v51  ;;  %v366_v33 = vld [vmem:[#allocation8 + $0xf0] sm:$0xff] }
 0x24b   :  { %2333 = vmatpush.msrb.mxu3 %v1237_v16  ;;  %2314 = vmatmul.f32.vlgmr.msrb.gmra.mxu2 %v2980_v19  ;;  %v494_v34 = vld [vmem:[#allocation8 + $0x4f0] sm:$0xff] }
 0x24c   :  { %2334 = vmatmul.f32.vlgmr.msrb.gmra.mxu3 %v2984_v25  ;;  %2341 = vmatpush.msra.mxu0 %v438_v52  ;;  %v646_v35 = vld [vmem:[#allocation8 + $0x9b0] sm:$0xff] }
 0x24d   :  { %2361 = vmatpush.msra.mxu1 %v566_v53  ;;  %2378 = vmatpush.msra.mxu2 %v718_v56  ;;  %v774_v36 = vld [vmem:[#allocation8 + $0xdb0] sm:$0xff] }
 0x24e   :  { %2398 = vmatpush.msra.mxu3 %v846_v57  ;;  %2342 = vmatpush.msra.mxu0 %v430_v1  ;;  %v358_v58 = vld [vmem:[#allocation8 + $0xb0] sm:$0xff] }
 0x24f   :  { %2362 = vmatpush.msra.mxu1 %v558_v59  ;;  %2379 = vmatpush.msra.mxu2 %v710_v60  ;;  %v486_v37 = vld [vmem:[#allocation8 + $0x4b0] sm:$0xff] }
 0x250   :  { %2399 = vmatpush.msra.mxu3 %v838_v61  ;;  %2343 = vmatpush.msra.mxu0 %v422_v62  ;;  %v638_v38 = vld [vmem:[#allocation8 + $0x970] sm:$0xff] }
 0x251   :  { %2363 = vmatpush.msra.mxu1 %v550_v63  ;;  %2380 = vmatpush.msra.mxu2 %v702_v0  ;;  %v766_v39 = vld [vmem:[#allocation8 + $0xd70] sm:$0xff] }
 0x252   :  { %2400 = vmatpush.msra.mxu3 %v830_v2  ;;  %2344 = vmatpush.msra.mxu0 %v414_v3  ;;  %v350_v42 = vld [vmem:[#allocation8 + $0x70] sm:$0xff] }
 0x253   :  { %2364 = vmatpush.msra.mxu1 %v542_v4  ;;  %2381 = vmatpush.msra.mxu2 %v694_v5  ;;  %v478_v43 = vld [vmem:[#allocation8 + $0x470] sm:$0xff] }
 0x254   :  { %2401 = vmatpush.msra.mxu3 %v822_v6  ;;  %2345 = vmatpush.msra.mxu0 %v406_v7  ;;  %v630_v32 = vld [vmem:[#allocation8 + $0x930] sm:$0xff] }
 0x255   :  { %2365 = vmatpush.msra.mxu1 %v534_v8  ;;  %2382 = vmatpush.msra.mxu2 %v686_v9  ;;  %v758_v44 = vld [vmem:[#allocation8 + $0xd30] sm:$0xff] }
 0x256   :  { %2402 = vmatpush.msra.mxu3 %v814_v10  ;;  %2346 = vmatpush.msra.mxu0 %v398_v11  ;;  %v342_v45 = vld [vmem:[#allocation8 + $0x30] sm:$0xff] }
 0x257   :  { %2366 = vmatpush.msra.mxu1 %v526_v12  ;;  %2383 = vmatpush.msra.mxu2 %v678_v13  ;;  %v470_v46 = vld [vmem:[#allocation8 + $0x430] sm:$0xff] }
 0x258   :  { %2403 = vmatpush.msra.mxu3 %v806_v14  ;;  %2347 = vmatpush.msra.mxu0 %v390_v15  ;;  %v622_v47 = vld [vmem:[#allocation8 + $0x8f0] sm:$0xff] }
 0x259   :  { %2367 = vmatpush.msra.mxu1 %v518_v17  ;;  %2384 = vmatpush.msra.mxu2 %v670_v18  ;;  %v750_v49 = vld [vmem:[#allocation8 + $0xcf0] sm:$0xff] }
 0x25a   :  { %2404 = vmatpush.msra.mxu3 %v798_v20  ;;  %2348 = vmatpush.msra.mxu0 %v382_v21  ;;  %v974_v50 = vld [vmem:[#allocation8 + $0x13f0] sm:$0xff] }
 0x25b   :  { %2368 = vmatpush.msra.mxu1 %v510_v23  ;;  %2385 = vmatpush.msra.mxu2 %v662_v24  ;;  %v1102_v51 = vld [vmem:[#allocation8 + $0x17f0] sm:$0xff] }
 0x25c   :  { %2405 = vmatpush.msra.mxu3 %v790_v26  ;;  %2349 = vmatpush.msra.mxu0 %v374_v27  ;;  %v614_v16 = vld [vmem:[#allocation8 + $0x8b0] sm:$0xff] }
 0x25d   :  { %2369 = vmatpush.msra.mxu1 %v502_v29  ;;  %2386 = vmatpush.msra.mxu2 %v654_v30  ;;  %v742_v52 = vld [vmem:[#allocation8 + $0xcb0] sm:$0xff] }
 0x25e   :  { %2406 = vmatpush.msra.mxu3 %v782_v31  ;;  %2350 = vmatpush.msra.mxu0 %v366_v33  ;;  %v966_v53 = vld [vmem:[#allocation8 + $0x13b0] sm:$0xff] }
 0x25f   :  { %2370 = vmatpush.msra.mxu1 %v494_v34  ;;  %2387 = vmatpush.msra.mxu2 %v646_v35  ;;  %v1094_v56 = vld [vmem:[#allocation8 + $0x17b0] sm:$0xff] }
 0x260   :  { %2407 = vmatpush.msra.mxu3 %v774_v36  ;;  %2351 = vmatpush.msra.mxu0 %v358_v58  ;;  %v606_v57 = vld [vmem:[#allocation8 + $0x870] sm:$0xff] }
 0x261   :  { %2371 = vmatpush.msra.mxu1 %v486_v37  ;;  %2388 = vmatpush.msra.mxu2 %v638_v38  ;;  %v734_v1 = vld [vmem:[#allocation8 + $0xc70] sm:$0xff] }
 0x262   :  { %2408 = vmatpush.msra.mxu3 %v766_v39  ;;  %2352 = vmatpush.msra.mxu0 %v350_v42  ;;  %v958_v59 = vld [vmem:[#allocation8 + $0x1370] sm:$0xff] }
 0x263   :  { %2372 = vmatpush.msra.mxu1 %v478_v43  ;;  %2389 = vmatpush.msra.mxu2 %v630_v32  ;;  %v1086_v60 = vld [vmem:[#allocation8 + $0x1770] sm:$0xff] }
 0x264   :  { %2409 = vmatpush.msra.mxu3 %v758_v44  ;;  %2353 = vmatpush.msra.mxu0 %v342_v45  ;;  %v598_v61 = vld [vmem:[#allocation8 + $0x830] sm:$0xff] }
 0x265   :  { %2373 = vmatpush.msra.mxu1 %v470_v46  ;;  %2390 = vmatpush.msra.mxu2 %v622_v47  ;;  %v726_v62 = vld [vmem:[#allocation8 + $0xc30] sm:$0xff] }
 0x266   :  { %2410 = vmatpush.msra.mxu3 %v750_v49  ;;  %2354 = vmatmul.f32.vlgmr.msra.gmra.mxu0 %v2962_v40  ;;  %v950_v63 = vld [vmem:[#allocation8 + $0x1330] sm:$0xff] }
 0x267   :  { %2374 = vmatmul.f32.vlgmr.msra.gmra.mxu1 %v2964_v41  ;;  %2418 = vmatpush.msrb.mxu0 %v974_v50  ;;  %v1078_v0 = vld [vmem:[#allocation8 + $0x1730] sm:$0xff] }
 0x268   :  { %2438 = vmatpush.msrb.mxu1 %v1102_v51  ;;  %2391 = vmatpush.msra.mxu2 %v614_v16  ;;  %v1230_v2 = vld [vmem:[#allocation8 + $0x1bf0] sm:$0xff] }
 0x269   :  { %2411 = vmatpush.msra.mxu3 %v742_v52  ;;  %2419 = vmatpush.msrb.mxu0 %v966_v53  ;;  %v1358_v3 = vld [vmem:[#allocation8 + $0x1ff0] sm:$0xff] }
 0x26a   :  { %2439 = vmatpush.msrb.mxu1 %v1094_v56  ;;  %2392 = vmatpush.msra.mxu2 %v606_v57  ;;  %v942_v4 = vld [vmem:[#allocation8 + $0x12f0] sm:$0xff] }
 0x26b   :  { %2412 = vmatpush.msra.mxu3 %v734_v1  ;;  %2420 = vmatpush.msrb.mxu0 %v958_v59  ;;  %v1070_v5 = vld [vmem:[#allocation8 + $0x16f0] sm:$0xff] }
 0x26c   :  { %2440 = vmatpush.msrb.mxu1 %v1086_v60  ;;  %2393 = vmatpush.msra.mxu2 %v598_v61  ;;  %v1222_v6 = vld [vmem:[#allocation8 + $0x1bb0] sm:$0xff]  ;;  %v463_v60 = vld [vmem:[#allocation8 + $0x3f8] sm:$0xff] }
 0x26d   :  { %2413 = vmatpush.msra.mxu3 %v726_v62  ;;  %2394 = vmatmul.f32.vlgmr.msra.gmra.mxu2 %v2970_v54  ;;  %v1350_v7 = vld [vmem:[#allocation8 + $0x1fb0] sm:$0xff]  ;;  %v591_v61 = vld [vmem:[#allocation8 + $0x7f8] sm:$0xff] }
 0x26e   :  { %2414 = vmatmul.f32.vlgmr.msra.gmra.mxu3 %v2972_v55  ;;  %2421 = vmatpush.msrb.mxu0 %v950_v63  ;;  %v934_v8 = vld [vmem:[#allocation8 + $0x12b0] sm:$0xff] }
 0x26f   :  { %2441 = vmatpush.msrb.mxu1 %v1078_v0  ;;  %2458 = vmatpush.msrb.mxu2 %v1230_v2  ;;  %v1062_v9 = vld [vmem:[#allocation8 + $0x16b0] sm:$0xff]  ;;  %v455_v0 = vld [vmem:[#allocation8 + $0x3b8] sm:$0xff] }
 0x270   :  { %2478 = vmatpush.msrb.mxu3 %v1358_v3  ;;  %2422 = vmatpush.msrb.mxu0 %v942_v4  ;;  %v1214_v10 = vld [vmem:[#allocation8 + $0x1b70] sm:$0xff]  ;;  %v583_v2 = vld [vmem:[#allocation8 + $0x7b8] sm:$0xff] }
 0x271   :  { %2442 = vmatpush.msrb.mxu1 %v1070_v5  ;;  %v1342_v11 = vld [vmem:[#allocation8 + $0x1f70] sm:$0xff]  ;;  %2459 = vmatpush.msrb.mxu2 %v1222_v6  ;;  %v447_v5 = vld [vmem:[#allocation8 + $0x378] sm:$0xff] }
 0x272   :  { %2479 = vmatpush.msrb.mxu3 %v1350_v7  ;;  %v926_v12 = vld [vmem:[#allocation8 + $0x1270] sm:$0xff]  ;;  %2423 = vmatpush.msrb.mxu0 %v934_v8  ;;  %v575_v6 = vld [vmem:[#allocation8 + $0x778] sm:$0xff] }
 0x273   :  { %v1054_v13 = vld [vmem:[#allocation8 + $0x1670] sm:$0xff]  ;;  %2443 = vmatpush.msrb.mxu1 %v1062_v9  ;;  %2460 = vmatpush.msrb.mxu2 %v1214_v10  ;;  %v439_v9 = vld [vmem:[#allocation8 + $0x338] sm:$0xff] }
 0x274   :  { %v1206_v14 = vld [vmem:[#allocation8 + $0x1b30] sm:$0xff]  ;;  %2480 = vmatpush.msrb.mxu3 %v1342_v11  ;;  %2424 = vmatpush.msrb.mxu0 %v926_v12  ;;  %v567_v10 = vld [vmem:[#allocation8 + $0x738] sm:$0xff] }
 0x275   :  { %v1334_v15 = vld [vmem:[#allocation8 + $0x1f30] sm:$0xff]  ;;  %2444 = vmatpush.msrb.mxu1 %v1054_v13  ;;  %2461 = vmatpush.msrb.mxu2 %v1206_v14  ;;  %v719_v11 = vld [vmem:[#allocation8 + $0xbf8] sm:$0xff] }
 0x276   :  { %v918_v17 = vld [vmem:[#allocation8 + $0x1230] sm:$0xff]  ;;  %2481 = vmatpush.msrb.mxu3 %v1334_v15  ;;  %v847_v12 = vld [vmem:[#allocation8 + $0xff8] sm:$0xff] }
 0x277   :  { %v1046_v18 = vld [vmem:[#allocation8 + $0x1630] sm:$0xff]  ;;  %2425 = vmatpush.msrb.mxu0 %v918_v17  ;;  %v431_v13 = vld [vmem:[#allocation8 + $0x2f8] sm:$0xff] }
 0x278   :  { %v1198_v20 = vld [vmem:[#allocation8 + $0x1af0] sm:$0xff]  ;;  %2445 = vmatpush.msrb.mxu1 %v1046_v18  ;;  %v559_v14 = vld [vmem:[#allocation8 + $0x6f8] sm:$0xff] }
 0x279   :  { %v1326_v21 = vld [vmem:[#allocation8 + $0x1ef0] sm:$0xff]  ;;  %2462 = vmatpush.msrb.mxu2 %v1198_v20  ;;  %v711_v15 = vld [vmem:[#allocation8 + $0xbb8] sm:$0xff] }
 0x27a   :  { %v910_v23 = vld [vmem:[#allocation8 + $0x11f0] sm:$0xff]  ;;  %2482 = vmatpush.msrb.mxu3 %v1326_v21  ;;  %v839_v17 = vld [vmem:[#allocation8 + $0xfb8] sm:$0xff] }
 0x27b   :  { %v1038_v24 = vld [vmem:[#allocation8 + $0x15f0] sm:$0xff]  ;;  %2426 = vmatpush.msrb.mxu0 %v910_v23  ;;  %v423_v18 = vld [vmem:[#allocation8 + $0x2b8] sm:$0xff] }
 0x27c   :  { %v1190_v26 = vld [vmem:[#allocation8 + $0x1ab0] sm:$0xff]  ;;  %2446 = vmatpush.msrb.mxu1 %v1038_v24  ;;  %v551_v20 = vld [vmem:[#allocation8 + $0x6b8] sm:$0xff] }
 0x27d   :  { %v1318_v27 = vld [vmem:[#allocation8 + $0x1eb0] sm:$0xff]  ;;  %2463 = vmatpush.msrb.mxu2 %v1190_v26  ;;  %v703_v21 = vld [vmem:[#allocation8 + $0xb78] sm:$0xff] }
 0x27e   :  { %v902_v29 = vld [vmem:[#allocation8 + $0x11b0] sm:$0xff]  ;;  %2483 = vmatpush.msrb.mxu3 %v1318_v27  ;;  %v831_v23 = vld [vmem:[#allocation8 + $0xf78] sm:$0xff] }
 0x27f   :  { %v1030_v30 = vld [vmem:[#allocation8 + $0x15b0] sm:$0xff]  ;;  %2427 = vmatpush.msrb.mxu0 %v902_v29  ;;  %v415_v24 = vld [vmem:[#allocation8 + $0x278] sm:$0xff] }
 0x280   :  { %v1182_v31 = vld [vmem:[#allocation8 + $0x1a70] sm:$0xff]  ;;  %2447 = vmatpush.msrb.mxu1 %v1030_v30  ;;  %v543_v26 = vld [vmem:[#allocation8 + $0x678] sm:$0xff] }
 0x281   :  { %v1310_v33 = vld [vmem:[#allocation8 + $0x1e70] sm:$0xff]  ;;  %2464 = vmatpush.msrb.mxu2 %v1182_v31  ;;  %v695_v27 = vld [vmem:[#allocation8 + $0xb38] sm:$0xff] }
 0x282   :  { %v894_v34 = vld [vmem:[#allocation8 + $0x1170] sm:$0xff]  ;;  %2484 = vmatpush.msrb.mxu3 %v1310_v33  ;;  %v823_v29 = vld [vmem:[#allocation8 + $0xf38] sm:$0xff] }
 0x283   :  { %v1022_v35 = vld [vmem:[#allocation8 + $0x1570] sm:$0xff]  ;;  %2428 = vmatpush.msrb.mxu0 %v894_v34  ;;  %v407_v30 = vld [vmem:[#allocation8 + $0x238] sm:$0xff] }
 0x284   :  { %v1174_v36 = vld [vmem:[#allocation8 + $0x1a30] sm:$0xff]  ;;  %2448 = vmatpush.msrb.mxu1 %v1022_v35  ;;  %v535_v31 = vld [vmem:[#allocation8 + $0x638] sm:$0xff] }
 0x285   :  { %v1302_v58 = vld [vmem:[#allocation8 + $0x1e30] sm:$0xff]  ;;  %2465 = vmatpush.msrb.mxu2 %v1174_v36  ;;  %v687_v33 = vld [vmem:[#allocation8 + $0xaf8] sm:$0xff] }
 0x286   :  { %v886_v37 = vld [vmem:[#allocation8 + $0x1130] sm:$0xff]  ;;  %2485 = vmatpush.msrb.mxu3 %v1302_v58  ;;  %v815_v34 = vld [vmem:[#allocation8 + $0xef8] sm:$0xff] }
 0x287   :  { %v1014_v38 = vld [vmem:[#allocation8 + $0x1530] sm:$0xff]  ;;  %2429 = vmatpush.msrb.mxu0 %v886_v37  ;;  %v399_v35 = vld [vmem:[#allocation8 + $0x1f8] sm:$0xff] }
 0x288   :  { %v1166_v39 = vld [vmem:[#allocation8 + $0x19f0] sm:$0xff]  ;;  %2449 = vmatpush.msrb.mxu1 %v1014_v38  ;;  %v527_v36 = vld [vmem:[#allocation8 + $0x5f8] sm:$0xff] }
 0x289   :  { %v1294_v42 = vld [vmem:[#allocation8 + $0x1df0] sm:$0xff]  ;;  %2466 = vmatpush.msrb.mxu2 %v1166_v39  ;;  %v679_v58 = vld [vmem:[#allocation8 + $0xab8] sm:$0xff] }
 0x28a   :  { %v878_v43 = vld [vmem:[#allocation8 + $0x10f0] sm:$0xff]  ;;  %2486 = vmatpush.msrb.mxu3 %v1294_v42  ;;  %v807_v37 = vld [vmem:[#allocation8 + $0xeb8] sm:$0xff] }
 0x28b   :  { %v1006_v32 = vld [vmem:[#allocation8 + $0x14f0] sm:$0xff]  ;;  %2430 = vmatpush.msrb.mxu0 %v878_v43  ;;  %v391_v38 = vld [vmem:[#allocation8 + $0x1b8] sm:$0xff] }
 0x28c   :  { %v1158_v44 = vld [vmem:[#allocation8 + $0x19b0] sm:$0xff]  ;;  %2450 = vmatpush.msrb.mxu1 %v1006_v32  ;;  %v519_v39 = vld [vmem:[#allocation8 + $0x5b8] sm:$0xff] }
 0x28d   :  { %v1286_v45 = vld [vmem:[#allocation8 + $0x1db0] sm:$0xff]  ;;  %2467 = vmatpush.msrb.mxu2 %v1158_v44  ;;  %v671_v42 = vld [vmem:[#allocation8 + $0xa78] sm:$0xff] }
 0x28e   :  { %v870_v46 = vld [vmem:[#allocation8 + $0x10b0] sm:$0xff]  ;;  %2487 = vmatpush.msrb.mxu3 %v1286_v45  ;;  %v799_v43 = vld [vmem:[#allocation8 + $0xe78] sm:$0xff] }
 0x28f   :  { %v998_v47 = vld [vmem:[#allocation8 + $0x14b0] sm:$0xff]  ;;  %2431 = vmatpush.msrb.mxu0 %v870_v46  ;;  %v383_v32 = vld [vmem:[#allocation8 + $0x178] sm:$0xff] }
 0x290   :  { %v1150_v49 = vld [vmem:[#allocation8 + $0x1970] sm:$0xff]  ;;  %2451 = vmatpush.msrb.mxu1 %v998_v47  ;;  %v511_v44 = vld [vmem:[#allocation8 + $0x578] sm:$0xff] }
 0x291   :  { %v1278_v50 = vld [vmem:[#allocation8 + $0x1d70] sm:$0xff]  ;;  %2468 = vmatpush.msrb.mxu2 %v1150_v49  ;;  %v663_v45 = vld [vmem:[#allocation8 + $0xa38] sm:$0xff] }
 0x292   :  { %v862_v51 = vld [vmem:[#allocation8 + $0x1070] sm:$0xff]  ;;  %2488 = vmatpush.msrb.mxu3 %v1278_v50  ;;  %v791_v46 = vld [vmem:[#allocation8 + $0xe38] sm:$0xff] }
 0x293   :  { %v990_v16 = vld [vmem:[#allocation8 + $0x1470] sm:$0xff]  ;;  %2432 = vmatpush.msrb.mxu0 %v862_v51  ;;  %v375_v47 = vld [vmem:[#allocation8 + $0x138] sm:$0xff] }
 0x294   :  { %v1142_v52 = vld [vmem:[#allocation8 + $0x1930] sm:$0xff]  ;;  %2452 = vmatpush.msrb.mxu1 %v990_v16  ;;  %v503_v49 = vld [vmem:[#allocation8 + $0x538] sm:$0xff] }
 0x295   :  { %v1270_v53 = vld [vmem:[#allocation8 + $0x1d30] sm:$0xff]  ;;  %2469 = vmatpush.msrb.mxu2 %v1142_v52  ;;  %v655_v50 = vld [vmem:[#allocation8 + $0x9f8] sm:$0xff] }
 0x296   :  { %v854_v56 = vld [vmem:[#allocation8 + $0x1030] sm:$0xff]  ;;  %2489 = vmatpush.msrb.mxu3 %v1270_v53  ;;  %v783_v51 = vld [vmem:[#allocation8 + $0xdf8] sm:$0xff] }
 0x297   :  { %v982_v57 = vld [vmem:[#allocation8 + $0x1430] sm:$0xff]  ;;  %2433 = vmatpush.msrb.mxu0 %v854_v56  ;;  %v367_v16 = vld [vmem:[#allocation8 + $0xf8] sm:$0xff] }
 0x298   :  { %v1134_v1 = vld [vmem:[#allocation8 + $0x18f0] sm:$0xff]  ;;  %2453 = vmatpush.msrb.mxu1 %v982_v57  ;;  %2434 = vmatmul.f32.vlgmr.msrb.gmra.mxu0 %v2982_v22  ;;  %v495_v52 = vld [vmem:[#allocation8 + $0x4f8] sm:$0xff] }
 0x299   :  { %v1262_v59 = vld [vmem:[#allocation8 + $0x1cf0] sm:$0xff]  ;;  %2470 = vmatpush.msrb.mxu2 %v1134_v1  ;;  %2454 = vmatmul.f32.vlgmr.msrb.gmra.mxu1 %v2987_v28  ;;  %v647_v53 = vld [vmem:[#allocation8 + $0x9b8] sm:$0xff] }
 0x29a   :  { %2490 = vmatpush.msrb.mxu3 %v1262_v59  ;;  %v1126_v62 = vld [vmem:[#allocation8 + $0x18b0] sm:$0xff]  ;;  %2498 = vmatpush.msra.mxu0 %v463_v60  ;;  %v775_v56 = vld [vmem:[#allocation8 + $0xdb8] sm:$0xff] }
 0x29b   :  { %v1254_v63 = vld [vmem:[#allocation8 + $0x1cb0] sm:$0xff]  ;;  %2518 = vmatpush.msra.mxu1 %v591_v61  ;;  %2471 = vmatpush.msrb.mxu2 %v1126_v62  ;;  %v359_v57 = vld [vmem:[#allocation8 + $0xb8] sm:$0xff] }
 0x29c   :  { %v1118_v3 = vld [vmem:[#allocation8 + $0x1870] sm:$0xff]  ;;  %2491 = vmatpush.msrb.mxu3 %v1254_v63  ;;  %2499 = vmatpush.msra.mxu0 %v455_v0  ;;  %v487_v1 = vld [vmem:[#allocation8 + $0x4b8] sm:$0xff] }
 0x29d   :  { %v1246_v4 = vld [vmem:[#allocation8 + $0x1c70] sm:$0xff]  ;;  %2519 = vmatpush.msra.mxu1 %v583_v2  ;;  %2472 = vmatpush.msrb.mxu2 %v1118_v3  ;;  %v639_v59 = vld [vmem:[#allocation8 + $0x978] sm:$0xff] }
 0x29e   :  { %v1110_v7 = vld [vmem:[#allocation8 + $0x1830] sm:$0xff]  ;;  %2492 = vmatpush.msrb.mxu3 %v1246_v4  ;;  %2500 = vmatpush.msra.mxu0 %v447_v5  ;;  %v767_v60 = vld [vmem:[#allocation8 + $0xd78] sm:$0xff] }
 0x29f   :  { %v1238_v8 = vld [vmem:[#allocation8 + $0x1c30] sm:$0xff]  ;;  %2520 = vmatpush.msra.mxu1 %v575_v6  ;;  %2473 = vmatpush.msrb.mxu2 %v1110_v7  ;;  %v351_v61 = vld [vmem:[#allocation8 + $0x78] sm:$0xff] }
 0x2a0   :  { %2493 = vmatpush.msrb.mxu3 %v1238_v8  ;;  %2474 = vmatmul.f32.vlgmr.msrb.gmra.mxu2 %v2980_v19  ;;  %v479_v62 = vld [vmem:[#allocation8 + $0x478] sm:$0xff] }
 0x2a1   :  { %2494 = vmatmul.f32.vlgmr.msrb.gmra.mxu3 %v2984_v25  ;;  %2501 = vmatpush.msra.mxu0 %v439_v9  ;;  %v631_v63 = vld [vmem:[#allocation8 + $0x938] sm:$0xff] }
 0x2a2   :  { %2521 = vmatpush.msra.mxu1 %v567_v10  ;;  %2538 = vmatpush.msra.mxu2 %v719_v11  ;;  %v759_v0 = vld [vmem:[#allocation8 + $0xd38] sm:$0xff] }
 0x2a3   :  { %2558 = vmatpush.msra.mxu3 %v847_v12  ;;  %2502 = vmatpush.msra.mxu0 %v431_v13  ;;  %v343_v2 = vld [vmem:[#allocation8 + $0x38] sm:$0xff] }
 0x2a4   :  { %2522 = vmatpush.msra.mxu1 %v559_v14  ;;  %2539 = vmatpush.msra.mxu2 %v711_v15  ;;  %v471_v3 = vld [vmem:[#allocation8 + $0x438] sm:$0xff] }
 0x2a5   :  { %2559 = vmatpush.msra.mxu3 %v839_v17  ;;  %2503 = vmatpush.msra.mxu0 %v423_v18  ;;  %v623_v4 = vld [vmem:[#allocation8 + $0x8f8] sm:$0xff] }
 0x2a6   :  { %2523 = vmatpush.msra.mxu1 %v551_v20  ;;  %2540 = vmatpush.msra.mxu2 %v703_v21  ;;  %v751_v5 = vld [vmem:[#allocation8 + $0xcf8] sm:$0xff] }
 0x2a7   :  { %2560 = vmatpush.msra.mxu3 %v831_v23  ;;  %2504 = vmatpush.msra.mxu0 %v415_v24  ;;  %v975_v6 = vld [vmem:[#allocation8 + $0x13f8] sm:$0xff] }
 0x2a8   :  { %2524 = vmatpush.msra.mxu1 %v543_v26  ;;  %2541 = vmatpush.msra.mxu2 %v695_v27  ;;  %v1103_v7 = vld [vmem:[#allocation8 + $0x17f8] sm:$0xff] }
 0x2a9   :  { %2561 = vmatpush.msra.mxu3 %v823_v29  ;;  %2505 = vmatpush.msra.mxu0 %v407_v30  ;;  %v615_v8 = vld [vmem:[#allocation8 + $0x8b8] sm:$0xff] }
 0x2aa   :  { %2525 = vmatpush.msra.mxu1 %v535_v31  ;;  %2542 = vmatpush.msra.mxu2 %v687_v33  ;;  %v743_v9 = vld [vmem:[#allocation8 + $0xcb8] sm:$0xff] }
 0x2ab   :  { %2562 = vmatpush.msra.mxu3 %v815_v34  ;;  %2506 = vmatpush.msra.mxu0 %v399_v35  ;;  %v967_v10 = vld [vmem:[#allocation8 + $0x13b8] sm:$0xff] }
 0x2ac   :  { %2526 = vmatpush.msra.mxu1 %v527_v36  ;;  %2543 = vmatpush.msra.mxu2 %v679_v58  ;;  %v1095_v11 = vld [vmem:[#allocation8 + $0x17b8] sm:$0xff] }
 0x2ad   :  { %2563 = vmatpush.msra.mxu3 %v807_v37  ;;  %2507 = vmatpush.msra.mxu0 %v391_v38  ;;  %v607_v12 = vld [vmem:[#allocation8 + $0x878] sm:$0xff] }
 0x2ae   :  { %2527 = vmatpush.msra.mxu1 %v519_v39  ;;  %2544 = vmatpush.msra.mxu2 %v671_v42  ;;  %v735_v13 = vld [vmem:[#allocation8 + $0xc78] sm:$0xff] }
 0x2af   :  { %2564 = vmatpush.msra.mxu3 %v799_v43  ;;  %2508 = vmatpush.msra.mxu0 %v383_v32  ;;  %v959_v14 = vld [vmem:[#allocation8 + $0x1378] sm:$0xff] }
 0x2b0   :  { %2528 = vmatpush.msra.mxu1 %v511_v44  ;;  %2545 = vmatpush.msra.mxu2 %v663_v45  ;;  %v1087_v15 = vld [vmem:[#allocation8 + $0x1778] sm:$0xff] }
 0x2b1   :  { %2565 = vmatpush.msra.mxu3 %v791_v46  ;;  %2509 = vmatpush.msra.mxu0 %v375_v47  ;;  %v599_v17 = vld [vmem:[#allocation8 + $0x838] sm:$0xff] }
 0x2b2   :  { %2529 = vmatpush.msra.mxu1 %v503_v49  ;;  %2546 = vmatpush.msra.mxu2 %v655_v50  ;;  %v727_v18 = vld [vmem:[#allocation8 + $0xc38] sm:$0xff] }
 0x2b3   :  { %2566 = vmatpush.msra.mxu3 %v783_v51  ;;  %2510 = vmatpush.msra.mxu0 %v367_v16  ;;  %v1231_v20 = vld [vmem:[#allocation8 + $0x1bf8] sm:$0xff] }
 0x2b4   :  { %2530 = vmatpush.msra.mxu1 %v495_v52  ;;  %2547 = vmatpush.msra.mxu2 %v647_v53  ;;  %v1359_v21 = vld [vmem:[#allocation8 + $0x1ff8] sm:$0xff] }
 0x2b5   :  { %2567 = vmatpush.msra.mxu3 %v775_v56  ;;  %2511 = vmatpush.msra.mxu0 %v359_v57  ;;  %v943_v23 = vld [vmem:[#allocation8 + $0x12f8] sm:$0xff] }
 0x2b6   :  { %2531 = vmatpush.msra.mxu1 %v487_v1  ;;  %2548 = vmatpush.msra.mxu2 %v639_v59  ;;  %v1071_v24 = vld [vmem:[#allocation8 + $0x16f8] sm:$0xff] }
 0x2b7   :  { %2568 = vmatpush.msra.mxu3 %v767_v60  ;;  %2512 = vmatpush.msra.mxu0 %v351_v61  ;;  %v1223_v26 = vld [vmem:[#allocation8 + $0x1bb8] sm:$0xff] }
 0x2b8   :  { %2532 = vmatpush.msra.mxu1 %v479_v62  ;;  %2549 = vmatpush.msra.mxu2 %v631_v63  ;;  %v1351_v27 = vld [vmem:[#allocation8 + $0x1fb8] sm:$0xff] }
 0x2b9   :  { %2569 = vmatpush.msra.mxu3 %v759_v0  ;;  %2513 = vmatpush.msra.mxu0 %v343_v2  ;;  %v935_v29 = vld [vmem:[#allocation8 + $0x12b8] sm:$0xff] }
 0x2ba   :  { %2533 = vmatpush.msra.mxu1 %v471_v3  ;;  %2550 = vmatpush.msra.mxu2 %v623_v4  ;;  %v1063_v30 = vld [vmem:[#allocation8 + $0x16b8] sm:$0xff] }
 0x2bb   :  { %2570 = vmatpush.msra.mxu3 %v751_v5  ;;  %2514 = vmatmul.f32.vlgmr.msra.gmra.mxu0 %v2962_v40  ;;  %v951_v40 = vld [vmem:[#allocation8 + $0x1338] sm:$0xff] }
 0x2bc   :  { %2534 = vmatmul.f32.vlgmr.msra.gmra.mxu1 %v2964_v41  ;;  %2578 = vmatpush.msrb.mxu0 %v975_v6  ;;  %v1079_v41 = vld [vmem:[#allocation8 + $0x1738] sm:$0xff] }
 0x2bd   :  { %2598 = vmatpush.msrb.mxu1 %v1103_v7  ;;  %2551 = vmatpush.msra.mxu2 %v615_v8  ;;  %v1215_v31 = vld [vmem:[#allocation8 + $0x1b78] sm:$0xff] }
 0x2be   :  { %2571 = vmatpush.msra.mxu3 %v743_v9  ;;  %2579 = vmatpush.msrb.mxu0 %v967_v10  ;;  %v1343_v33 = vld [vmem:[#allocation8 + $0x1f78] sm:$0xff] }
 0x2bf   :  { %2599 = vmatpush.msrb.mxu1 %v1095_v11  ;;  %2552 = vmatpush.msra.mxu2 %v607_v12  ;;  %v927_v34 = vld [vmem:[#allocation8 + $0x1278] sm:$0xff] }
 0x2c0   :  { %2572 = vmatpush.msra.mxu3 %v735_v13  ;;  %2580 = vmatpush.msrb.mxu0 %v959_v14  ;;  %v1335_v35 = vld [vmem:[#allocation8 + $0x1f38] sm:$0xff] }
 0x2c1   :  { %2600 = vmatpush.msrb.mxu1 %v1087_v15  ;;  %2553 = vmatpush.msra.mxu2 %v599_v17  ;;  %v919_v36 = vld [vmem:[#allocation8 + $0x1238] sm:$0xff] }
 0x2c2   :  { %2573 = vmatpush.msra.mxu3 %v727_v18  ;;  %2554 = vmatmul.f32.vlgmr.msra.gmra.mxu2 %v2970_v54  ;;  %v1055_v54 = vld [vmem:[#allocation8 + $0x1678] sm:$0xff]  ;;  %v1875_v18 = vpop.f32.mrf.mxu0 }
 0x2c3   :  { %2574 = vmatmul.f32.vlgmr.msra.gmra.mxu3 %v2972_v55  ;;  %2581 = vmatpush.msrb.mxu0 %v951_v40  ;;  %v1207_v55 = vld [vmem:[#allocation8 + $0x1b38] sm:$0xff]  ;;  %v1895_v40 = vpop.f32.mrf.mxu1 }
 0x2c4   :  { %2601 = vmatpush.msrb.mxu1 %v1079_v41  ;;  %2618 = vmatpush.msrb.mxu2 %v1231_v20  ;;  %v1047_v58 = vld [vmem:[#allocation8 + $0x1638] sm:$0xff]  ;;  %v1915_v41 = vpop.f32.mrf.mxu2  ;;  %v1935_v20 = vpop.f32.mrf.mxu3 }
 0x2c5   :  { %2638 = vmatpush.msrb.mxu3 %v1359_v21  ;;  %2582 = vmatpush.msrb.mxu0 %v943_v23  ;;  %v1199_v37 = vld [vmem:[#allocation8 + $0x1af8] sm:$0xff] }
 0x2c6   :  { %2602 = vmatpush.msrb.mxu1 %v1071_v24  ;;  %2619 = vmatpush.msrb.mxu2 %v1223_v26  ;;  %v1327_v38 = vld [vmem:[#allocation8 + $0x1ef8] sm:$0xff] }
 0x2c7   :  { %2639 = vmatpush.msrb.mxu3 %v1351_v27  ;;  %2583 = vmatpush.msrb.mxu0 %v935_v29  ;;  %v911_v39 = vld [vmem:[#allocation8 + $0x11f8] sm:$0xff] }
 0x2c8   :  { %2603 = vmatpush.msrb.mxu1 %v1063_v30  ;;  %2620 = vmatpush.msrb.mxu2 %v1215_v31  ;;  %v1039_v42 = vld [vmem:[#allocation8 + $0x15f8] sm:$0xff] }
 0x2c9   :  { %2640 = vmatpush.msrb.mxu3 %v1343_v33  ;;  %2584 = vmatpush.msrb.mxu0 %v927_v34  ;;  %v1191_v43 = vld [vmem:[#allocation8 + $0x1ab8] sm:$0xff] }
 0x2ca   :  { %2604 = vmatpush.msrb.mxu1 %v1055_v54  ;;  %2621 = vmatpush.msrb.mxu2 %v1207_v55  ;;  %v1319_v32 = vld [vmem:[#allocation8 + $0x1eb8] sm:$0xff] }
 0x2cb   :  { %2641 = vmatpush.msrb.mxu3 %v1335_v35  ;;  %2585 = vmatpush.msrb.mxu0 %v919_v36  ;;  %v903_v44 = vld [vmem:[#allocation8 + $0x11b8] sm:$0xff] }
 0x2cc   :  { %2605 = vmatpush.msrb.mxu1 %v1047_v58  ;;  %2622 = vmatpush.msrb.mxu2 %v1199_v37  ;;  %v1031_v45 = vld [vmem:[#allocation8 + $0x15b8] sm:$0xff]  ;;  %v1995_v21 = vpop.f32.mrf.mxu2  ;;  %v2015_v24 = vpop.f32.mrf.mxu3  ;;  %v2730_v37 = vld [vmem:[#allocation10] sm:$0xff] }
 0x2cd   :  { %2642 = vmatpush.msrb.mxu3 %v1327_v38  ;;  %2586 = vmatpush.msrb.mxu0 %v911_v39  ;;  %v1183_v46 = vld [vmem:[#allocation8 + $0x1a78] sm:$0xff]  ;;  %v1365_v38 = vperm.slane %v2730_v37, 3 }
 0x2ce   :  { %2606 = vmatpush.msrb.mxu1 %v1039_v42  ;;  %v1311_v47 = vld [vmem:[#allocation8 + $0x1e78] sm:$0xff]  ;;  %2623 = vmatpush.msrb.mxu2 %v1191_v43  ;;  %v1366_v42 = vperm.slane %v2730_v37, 4 }
 0x2cf   :  { %2643 = vmatpush.msrb.mxu3 %v1319_v32  ;;  %v895_v49 = vld [vmem:[#allocation8 + $0x1178] sm:$0xff]  ;;  %2587 = vmatpush.msrb.mxu0 %v903_v44  ;;  %v1876_v43 = vadd.f32 %v1875_v18, %v1365_v38  ;;  %v1367_v32 = vperm.slane %v2730_v37, 5 }
 0x2d0   :  { %v1023_v50 = vld [vmem:[#allocation8 + $0x1578] sm:$0xff]  ;;  %2607 = vmatpush.msrb.mxu1 %v1031_v45  ;;  %2624 = vmatpush.msrb.mxu2 %v1183_v46  ;;  %v1368_v46 = vperm.slane %v2730_v37, 6 }
 0x2d1   :  { %v1175_v51 = vld [vmem:[#allocation8 + $0x1a38] sm:$0xff]  ;;  %2644 = vmatpush.msrb.mxu3 %v1311_v47  ;;  %2588 = vmatpush.msrb.mxu0 %v895_v49 }
 0x2d2   :  { %v1303_v16 = vld [vmem:[#allocation8 + $0x1e38] sm:$0xff]  ;;  %2608 = vmatpush.msrb.mxu1 %v1023_v50  ;;  %2625 = vmatpush.msrb.mxu2 %v1175_v51  ;;  %v1896_v50 = vadd.f32 %v1895_v40, %v1876_v43 }
 0x2d3   :  { %v887_v52 = vld [vmem:[#allocation8 + $0x1138] sm:$0xff]  ;;  %2645 = vmatpush.msrb.mxu3 %v1303_v16 }
 0x2d4   :  { %v1015_v53 = vld [vmem:[#allocation8 + $0x1538] sm:$0xff]  ;;  %2589 = vmatpush.msrb.mxu0 %v887_v52  ;;  %v2075_v27 = vpop.f32.mrf.mxu2  ;;  %v2095_v30 = vpop.f32.mrf.mxu3  ;;  %v1916_v52 = vadd.f32 %v1915_v41, %v1896_v50 }
 0x2d5   :  { %v1167_v56 = vld [vmem:[#allocation8 + $0x19f8] sm:$0xff]  ;;  %2609 = vmatpush.msrb.mxu1 %v1015_v53 }
 0x2d6   :  { %v1295_v57 = vld [vmem:[#allocation8 + $0x1df8] sm:$0xff]  ;;  %2626 = vmatpush.msrb.mxu2 %v1167_v56 }
 0x2d7   :  { %v879_v1 = vld [vmem:[#allocation8 + $0x10f8] sm:$0xff]  ;;  %2646 = vmatpush.msrb.mxu3 %v1295_v57 }
 0x2d8   :  { %v1007_v59 = vld [vmem:[#allocation8 + $0x14f8] sm:$0xff]  ;;  %2590 = vmatpush.msrb.mxu0 %v879_v1 }
 0x2d9   :  { %v1159_v60 = vld [vmem:[#allocation8 + $0x19b8] sm:$0xff]  ;;  %2610 = vmatpush.msrb.mxu1 %v1007_v59 }
 0x2da   :  { %v1287_v61 = vld [vmem:[#allocation8 + $0x1db8] sm:$0xff]  ;;  %2627 = vmatpush.msrb.mxu2 %v1159_v60  ;;  %v1936_v60 = vadd.f32 %v1935_v20, %v1916_v52 }
 0x2db   :  { %v871_v62 = vld [vmem:[#allocation8 + $0x10b8] sm:$0xff]  ;;  %2647 = vmatpush.msrb.mxu3 %v1287_v61 }
 0x2dc   :  { %v999_v63 = vld [vmem:[#allocation8 + $0x14b8] sm:$0xff]  ;;  %2591 = vmatpush.msrb.mxu0 %v871_v62  ;;  %v2155_v33 = vpop.f32.mrf.mxu2  ;;  %v2175_v54 = vpop.f32.mrf.mxu3 }
 0x2dd   :  { %v1151_v0 = vld [vmem:[#allocation8 + $0x1978] sm:$0xff]  ;;  %2611 = vmatpush.msrb.mxu1 %v999_v63 }
 0x2de   :  { %v1279_v2 = vld [vmem:[#allocation8 + $0x1d78] sm:$0xff]  ;;  %2628 = vmatpush.msrb.mxu2 %v1151_v0 }
 0x2df   :  { %v863_v3 = vld [vmem:[#allocation8 + $0x1078] sm:$0xff]  ;;  %2648 = vmatpush.msrb.mxu3 %v1279_v2 }
 0x2e0   :  { %v991_v4 = vld [vmem:[#allocation8 + $0x1478] sm:$0xff]  ;;  %2592 = vmatpush.msrb.mxu0 %v863_v3 }
 0x2e1   :  { %v1143_v5 = vld [vmem:[#allocation8 + $0x1938] sm:$0xff]  ;;  %2612 = vmatpush.msrb.mxu1 %v991_v4 }
 0x2e2   :  { %v1271_v6 = vld [vmem:[#allocation8 + $0x1d38] sm:$0xff]  ;;  %2629 = vmatpush.msrb.mxu2 %v1143_v5  ;;  %v1369_v5 = vperm.slane %v2730_v37, 7 }
 0x2e3   :  { %v855_v7 = vld [vmem:[#allocation8 + $0x1038] sm:$0xff]  ;;  %2649 = vmatpush.msrb.mxu3 %v1271_v6 }
 0x2e4   :  { %v983_v8 = vld [vmem:[#allocation8 + $0x1438] sm:$0xff]  ;;  %2593 = vmatpush.msrb.mxu0 %v855_v7  ;;  %v2235_v55 = vpop.f32.mrf.mxu2  ;;  %v2255_v35 = vpop.f32.mrf.mxu3 }
 0x2e5   :  { %v1135_v9 = vld [vmem:[#allocation8 + $0x18f8] sm:$0xff]  ;;  %2613 = vmatpush.msrb.mxu1 %v983_v8  ;;  %2594 = vmatmul.f32.vlgmr.msrb.gmra.mxu0 %v2982_v22  ;;  %v1955_v22 = vpop.f32.mrf.mxu0 }
 0x2e6   :  { %v1263_v10 = vld [vmem:[#allocation8 + $0x1cf8] sm:$0xff]  ;;  %2630 = vmatpush.msrb.mxu2 %v1135_v9  ;;  %2614 = vmatmul.f32.vlgmr.msrb.gmra.mxu1 %v2987_v28  ;;  %v1975_v28 = vpop.f32.mrf.mxu1  ;;  %v1956_v2 = vadd.f32 %v1955_v22, %v1936_v60 }
 0x2e7   :  { %v1127_v11 = vld [vmem:[#allocation8 + $0x18b8] sm:$0xff]  ;;  %2650 = vmatpush.msrb.mxu3 %v1263_v10 }
 0x2e8   :  { %v1255_v12 = vld [vmem:[#allocation8 + $0x1cb8] sm:$0xff]  ;;  %2631 = vmatpush.msrb.mxu2 %v1127_v11  ;;  %v1976_v9 = vadd.f32 %v1975_v28, %v1956_v2 }
 0x2e9   :  { %v1119_v13 = vld [vmem:[#allocation8 + $0x1878] sm:$0xff]  ;;  %2651 = vmatpush.msrb.mxu3 %v1255_v12 }
 0x2ea   :  { %v1247_v14 = vld [vmem:[#allocation8 + $0x1c78] sm:$0xff]  ;;  %2632 = vmatpush.msrb.mxu2 %v1119_v13 }
 0x2eb   :  { %v1111_v15 = vld [vmem:[#allocation8 + $0x1838] sm:$0xff]  ;;  %2652 = vmatpush.msrb.mxu3 %v1247_v14  ;;  %v1996_v14 = vadd.f32 %v1995_v21, %v1976_v9 }
 0x2ec   :  { %v1239_v17 = vld [vmem:[#allocation8 + $0x1c38] sm:$0xff]  ;;  %2633 = vmatpush.msrb.mxu2 %v1111_v15  ;;  %v2315_v58 = vpop.f32.mrf.mxu2  ;;  %v2335_v44 = vpop.f32.mrf.mxu3 }
 0x2ed   :  { %2653 = vmatpush.msrb.mxu3 %v1239_v17  ;;  %2634 = vmatmul.f32.vlgmr.msrb.gmra.mxu2 %v2980_v19  ;;  %v2035_v23 = vpop.f32.mrf.mxu0  ;;  %v2016_v22 = vadd.f32 %v2015_v24, %v1996_v14 }
 0x2ee   :  { %2654 = vmatmul.f32.vlgmr.msrb.gmra.mxu3 %v2984_v25  ;;  %v2055_v26 = vpop.f32.mrf.mxu1  ;;  %v2036_v45 = vadd.f32 %v2035_v23, %v1366_v42 }
 0x2f0   :  { %v2056_v53 = vadd.f32 %v2055_v26, %v2036_v45 }
 0x2f2   :  { %v2076_v57 = vadd.f32 %v2075_v27, %v2056_v53 }
 0x2f4   :  { %v2395_v49 = vpop.f32.mrf.mxu2  ;;  %v2415_v59 = vpop.f32.mrf.mxu3  ;;  %v2096_v3 = vadd.f32 %v2095_v30, %v2076_v57 }
 0x2f5   :  { %v2115_v29 = vpop.f32.mrf.mxu0 }
 0x2f6   :  { %v2135_v31 = vpop.f32.mrf.mxu1  ;;  %v2116_v7 = vadd.f32 %v2115_v29, %v2096_v3 }
 0x2f8   :  { %v2136_v15 = vadd.f32 %v2135_v31, %v2116_v7 }
 0x2fa   :  { %v2156_v41 = vadd.f32 %v2155_v33, %v2136_v15 }
 0x2fd   :  { %v2195_v34 = vpop.f32.mrf.mxu0 }
 0x2fe   :  { %v2215_v19 = vpop.f32.mrf.mxu1  ;;  %v2196_v51 = vadd.f32 %v2195_v34, %v1367_v32  ;;  %v2176_v34 = vadd.f32 %v2175_v54, %v2156_v41 }
 0x300   :  { %v2216_v1 = vadd.f32 %v2215_v19, %v2196_v51  ;;  %v2662_v31 = vmax.f32 %v2176_v34, 0.0 }
 0x302   :  { %v2236_v61 = vadd.f32 %v2235_v55, %v2216_v1  ;;  %v2661_v55 = vmax.f32 %v2016_v22, 0.0 }
 0x304   :  { %v2256_v8 = vadd.f32 %v2255_v35, %v2236_v61  ;;  %v2702_v61 = vstv %s3085_s6 }
 0x305   :  { %v2275_v25 = vpop.f32.mrf.mxu0 }
 0x306   :  { %v2295_v36 = vpop.f32.mrf.mxu1  ;;  %v2276_v10 = vadd.f32 %v2275_v25, %v2256_v8  ;;  %v2731_v25 = vld [vmem:[#allocation11] sm:$0xff] }
 0x307   :  { %v2671_v35 = vperm.slane %v2731_v25, 3  ;;  %v2672_v38 = vperm.slane %v2731_v25, 4  ;;  %v2673_v43 = vperm.slane %v2731_v25, 5  ;;  %v2674_v45 = vperm.slane %v2731_v25, 6 }
 0x308   :  { %v2296_v20 = vadd.f32 %v2295_v36, %v2276_v10  ;;  %v2675_v53 = vperm.slane %v2731_v25, 7 }
 0x309   :  { %v2687_v33 = vmul.f32 %v2671_v35, %v2661_v55 }
 0x30a   :  { %v2316_v26 = vadd.f32 %v2315_v58, %v2296_v20  ;;  %v2688_v58 = vmul.f32 %v2672_v38, %v2662_v31 }
 0x30c   :  { %v2336_v37 = vadd.f32 %v2335_v44, %v2316_v26 }
 0x30d   :  { %v2355_v39 = vpop.f32.mrf.mxu0 }
 0x30e   :  { %v2375_v47 = vpop.f32.mrf.mxu1  ;;  %v2356_v56 = vadd.f32 %v2355_v39, %v1368_v46  ;;  %v2663_v36 = vmax.f32 %v2336_v37, 0.0 }
 0x310   :  { %v2376_v62 = vadd.f32 %v2375_v47, %v2356_v56  ;;  %v2694_v47 = vadd.f32 %v3046_v48, %v2687_v33 }
 0x312   :  { %v2396_v4 = vadd.f32 %v2395_v49, %v2376_v62  ;;  %v2689_v49 = vmul.f32 %v2673_v43, %v2663_v36  ;;  %v2695_v44 = vadd.f32 %v2694_v47, %v2688_v58 }
 0x314   :  { %v2416_v11 = vadd.f32 %v2415_v59, %v2396_v4  ;;  %v2696_v57 = vadd.f32 %v2695_v44, %v2689_v49 }
 0x315   :  { %v2435_v16 = vpop.f32.mrf.mxu0 }
 0x316   :  { %v2455_v63 = vpop.f32.mrf.mxu1  ;;  %v2436_v17 = vadd.f32 %v2435_v16, %v2416_v11 }
 0x318   :  { %v2456_v27 = vadd.f32 %v2455_v63, %v2436_v17 }
 0x323   :  { %v2475_v0 = vpop.f32.mrf.mxu2 }
 0x324   :  { %v2495_v13 = vpop.f32.mrf.mxu3  ;;  %v2476_v29 = vadd.f32 %v2475_v0, %v2456_v27 }
 0x326   :  { %v2496_v39 = vadd.f32 %v2495_v13, %v2476_v29 }
 0x328   :  { %v2664_v32 = vmax.f32 %v2496_v39, 0.0 }
 0x32a   :  { %v2690_v16 = vmul.f32 %v2674_v45, %v2664_v32 }
 0x32c   :  { %v2697_v59 = vadd.f32 %v2696_v57, %v2690_v16 }
 0x338   :  { %v2515_v6 = vpop.f32.mrf.mxu0 }
 0x339   :  { %v2516_v12 = vadd.f32 %v2515_v6, %v1369_v5  ;;  %v2535_v18 = vpop.f32.mrf.mxu1 }
 0x33b   :  { %v2536_v23 = vadd.f32 %v2535_v18, %v2516_v12 }
 0x345   :  { %v2555_v40 = vpop.f32.mrf.mxu2 }
 0x346   :  { %v2556_v30 = vadd.f32 %v2555_v40, %v2536_v23  ;;  %v2575_v19 = vpop.f32.mrf.mxu3 }
 0x348   :  { %v2576_v21 = vadd.f32 %v2575_v19, %v2556_v30 }
 0x362   :  { %v2595_v28 = vpop.f32.mrf.mxu0 }
 0x363   :  { %v2596_v42 = vadd.f32 %v2595_v28, %v2576_v21  ;;  %v2615_v24 = vpop.f32.mrf.mxu1 }
 0x365   :  { %v2616_v54 = vadd.f32 %v2615_v24, %v2596_v42 }
 0x370   :  { %v2635_v46 = vpop.f32.mrf.mxu2 }
 0x371   :  { %v2636_v50 = vadd.f32 %v2635_v46, %v2616_v54  ;;  %v2655_v51 = vpop.f32.mrf.mxu3 }
 0x373   :  { %v2656_v52 = vadd.f32 %v2655_v51, %v2636_v50 }
 0x375   :  { %v2665_v56 = vmax.f32 %v2656_v52, 0.0 }
 0x377   :  { %v2691_v1 = vmul.f32 %v2675_v53, %v2665_v56 }
 0x379   :  { %v2698_v60 = vadd.f32 %v2697_v59, %v2691_v1 }
 0x37b   :  { %2699 = vadd.xlane.f32.xlu0 %v2698_v60 }
 0x3ee   :  { %v2700_v62 = vpop.xlane.xlu0 %2699 }
 0x3ef   :  { %v2703_v48 = vadd.f32 %v2702_v61, %v2700_v62 }
 0x3f1   :  { %2705 = vst.msk [vmem:[%s3086_s7] sm:$0xff] %vm2704_vm1, %v2703_v48 }
 0x3f2   :  { %2710 = vsyncpa [#allocation4], 1 }
 0x3f3   :  { %2711 = vsyncpa [#allocation6], 1 }
 0x3f4   :  { %2712 = vsyncpa [#allocation9], 1 }
 0x3f5   :  { %2713 = vsyncpa [#allocation12], 1 }

// kernel: tpu_custom_call.1
= control target key start
LH: loop header
LB: loop body
LE: loop exit
PB: predicated region body
PF: predicated region fallthrough
CT: control target
= control target key end

     0   :  { %13 = vsyncpa [#allocation4], 0  ;;  %s3079_s0 = inlined_call_operand.hbm [shape: f32[8,32], index: 0, kind: input, shape index: {}]   ;;  %s3080_s1 = inlined_call_operand.hbm [shape: f32[32,1024], index: 1, kind: input, shape index: {}]   ;;  %s3081_s2 = inlined_call_operand.hbm [shape: f32[1,1024], index: 2, kind: input, shape index: {}]   ;;  %s3082_s3 = inlined_call_operand.hbm [shape: f32[1024,1024], index: 3, kind: input, shape index: {}]   ;;  %s3083_s4 = inlined_call_operand.hbm [shape: f32[1,1024], index: 4, kind: input, shape index: {}]   ;;  %s3084_s5 = inlined_call_operand.hbm [shape: f32[1,1024], index: 5, kind: input, shape index: {}]   ;;  %s3085_s6 = inlined_call_operand.<no memory space> [shape: f32[1,1], index: 6, kind: input, shape index: {}]   ;;  %s3086_s7 = inlined_call_operand.vmem [shape: f32[8,1], index: 7, kind: output, shape index: {}]  }
   0x1   :  { %14 = vsyncpa [#allocation6], 0 }
   0x2   :  { %15 = vsyncpa [#allocation9], 0  ;;  %s32_s26 = sshll.u32 %s3080_s1, 4  ;;  %s33_s26 = int_to_ptr.hbm [resolvable:$true] %s32_s26 }
   0x3   :  { %16 = vsyncpa [#allocation12], 0  ;;  %s2884_s27 = smov [#allocation5]   ;;  %s56_s8 = sshll.u32 %s3082_s3, 4  ;;  %s57_s8 = int_to_ptr.hbm [resolvable:$true] %s56_s8 }
   0x4   :  { %s34_s28 = sshll.u32 %s2884_s27, 4  ;;  %s2885_s9 = smov 1024   ;;  %s35_s28 = int_to_ptr.vmem [resolvable:$true] %s34_s28 }
   0x5   :  { %s2886_s10 = smov 64   ;;  %s2887_s11 = smov [#allocation8]  }
   0x6   :  { %40 = dma.hbm_to_vmem [thread:$0]  %s33_s26, 4096, %s35_s28, [#allocation6], %s2885_s9, %s2885_s9, %s2886_s10  }
   0x7   :  { %s58_s12 = sshll.u32 %s2887_s11, 4  ;;  %s22_s15 = sshll.u32 %s3079_s0, 4  ;;  %s59_s12 = int_to_ptr.vmem [resolvable:$true] %s58_s12  ;;  %s23_s15 = int_to_ptr.hbm [resolvable:$true] %s22_s15 }
   0x8   :  { %64 = dma.hbm_to_vmem [thread:$0]  %s57_s8, 131072, %s59_s12, [#allocation9], %s2885_s9, %s2885_s9, %s2886_s10  }
   0x9   :  { %s46_s17 = sshll.u32 %s3081_s2, 4  ;;  %s2888_s18 = smov [#allocation3]   ;;  %s47_s17 = int_to_ptr.hbm [resolvable:$true] %s46_s17 }
   0xa   :  { %s24_s19 = sshll.u32 %s2888_s18, 4  ;;  %s2889_s3 = smov [#allocation7]   ;;  %s25_s19 = int_to_ptr.vmem [resolvable:$true] %s24_s19 }
   0xb   :  { %27 = dma.hbm_to_vmem [thread:$0]  %s23_s15, 128, %s25_s19, [#allocation4]  }
   0xc   :  { %s48_s20 = sshll.u32 %s2889_s3, 4  ;;  %s70_s23 = sshll.u32 %s3083_s4, 4  ;;  %s49_s20 = int_to_ptr.vmem [resolvable:$true] %s48_s20  ;;  %s71_s23 = int_to_ptr.hbm [resolvable:$true] %s70_s23 }
   0xd   :  { %51 = dma.hbm_to_vmem [thread:$0]  %s47_s17, 128, %s49_s20, [#allocation6]  }
   0xe   :  { %s81_s25 = sshll.u32 %s3084_s5, 4  ;;  %s2890_s26 = smov [#allocation10]   ;;  %s82_s25 = int_to_ptr.hbm [resolvable:$true] %s81_s25 }
   0xf   :  { %s72_s2 = sshll.u32 %s2890_s26, 4  ;;  %s2891_s27 = smov [#allocation11]   ;;  %s73_s2 = int_to_ptr.vmem [resolvable:$true] %s72_s2 }
  0x10   :  { %75 = dma.hbm_to_vmem [thread:$0]  %s71_s23, 128, %s73_s2, [#allocation9]  }
  0x11   :  { %s83_s28 = sshll.u32 %s2891_s27, 4  ;;  %s84_s28 = int_to_ptr.vmem [resolvable:$true] %s83_s28 }
  0x12   :  { %86 = dma.hbm_to_vmem [thread:$0]  %s82_s25, 128, %s84_s28, [#allocation12]  }
  0x13   :  { %2876 = dma.done.wait [#allocation4], 128  }
  0x14   :  { %2877 = vsyncadd [#allocation4], 4294967168 }
  0x15   :  { %2878 = dma.done.wait [#allocation6], 4224  }
  0x16   :  { %2879 = vsyncadd [#allocation6], 4294963072 }
  0x17   :  { %2880 = dma.done.wait [#allocation9], 131200  }
  0x18   :  { %2881 = vsyncadd [#allocation9], 4294836096 }
  0x19   :  { %2882 = dma.done.wait [#allocation12], 128  }
  0x1a   :  { %2883 = vsyncadd [#allocation12], 4294967168  ;;  %v138_v0 = vld [vmem:[#allocation5 + $0xc0] sm:$0xff]  ;;  %v139_v1 = vld [vmem:[#allocation5 + $0xc8] sm:$0xff]  ;;  %vm164_vm0 = vcmask 261120   ;;  %vm2704_vm1 = vcmask 7168  }
  0x1b   :  { %v140_v2 = vld [vmem:[#allocation5 + $0xd0] sm:$0xff]  ;;  %180 = vmatpush.msra.mxu0 %v138_v0  ;;  %200 = vmatpush.msra.mxu1 %v139_v1  ;;  %v141_v3 = vld [vmem:[#allocation5 + $0xd8] sm:$0xff]  ;;  %v130_v4 = vld [vmem:[#allocation5 + $0x80] sm:$0xff] }
  0x1c   :  { %v131_v5 = vld [vmem:[#allocation5 + $0x88] sm:$0xff]  ;;  %220 = vmatpush.msra.mxu2 %v140_v2  ;;  %240 = vmatpush.msra.mxu3 %v141_v3  ;;  %v132_v6 = vld [vmem:[#allocation5 + $0x90] sm:$0xff]  ;;  %v133_v7 = vld [vmem:[#allocation5 + $0x98] sm:$0xff] }
  0x1d   :  { %v122_v8 = vld [vmem:[#allocation5 + $0x40] sm:$0xff]  ;;  %181 = vmatpush.msra.mxu0 %v130_v4  ;;  %201 = vmatpush.msra.mxu1 %v131_v5  ;;  %v123_v9 = vld [vmem:[#allocation5 + $0x48] sm:$0xff]  ;;  %v124_v10 = vld [vmem:[#allocation5 + $0x50] sm:$0xff] }
  0x1e   :  { %v125_v11 = vld [vmem:[#allocation5 + $0x58] sm:$0xff]  ;;  %221 = vmatpush.msra.mxu2 %v132_v6  ;;  %241 = vmatpush.msra.mxu3 %v133_v7  ;;  %v114_v12 = vld [vmem:[#allocation5] sm:$0xff]  ;;  %v115_v13 = vld [vmem:[#allocation5 + $0x8] sm:$0xff] }
  0x1f   :  { %182 = vmatpush.msra.mxu0 %v122_v8  ;;  %202 = vmatpush.msra.mxu1 %v123_v9  ;;  %v116_v14 = vld [vmem:[#allocation5 + $0x10] sm:$0xff]  ;;  %v117_v15 = vld [vmem:[#allocation5 + $0x18] sm:$0xff]  ;;  %v142_v19 = vld [vmem:[#allocation5 + $0xe0] sm:$0xff] }
  0x20   :  { %222 = vmatpush.msra.mxu2 %v124_v10  ;;  %242 = vmatpush.msra.mxu3 %v125_v11  ;;  %v113_v16 = vld [vmem:[#allocation3] sm:$0xff]  ;;  %v144_v17 = vld [vmem:[#allocation5 + $0xf0] sm:$0xff]  ;;  %v143_v20 = vld [vmem:[#allocation5 + $0xe8] sm:$0xff] }
  0x21   :  { %183 = vmatpush.msra.mxu0 %v114_v12  ;;  %203 = vmatpush.msra.mxu1 %v115_v13  ;;  %v145_v18 = vld [vmem:[#allocation5 + $0xf8] sm:$0xff]  ;;  %v136_v21 = vld [vmem:[#allocation5 + $0xb0] sm:$0xff]  ;;  %v134_v23 = vld [vmem:[#allocation5 + $0xa0] sm:$0xff] }
  0x22   :  { %223 = vmatpush.msra.mxu2 %v116_v14  ;;  %243 = vmatpush.msra.mxu3 %v117_v15  ;;  %v137_v22 = vld [vmem:[#allocation5 + $0xb8] sm:$0xff]  ;;  %v135_v24 = vld [vmem:[#allocation5 + $0xa8] sm:$0xff]  ;;  %v128_v25 = vld [vmem:[#allocation5 + $0x70] sm:$0xff] }
  0x23   :  { %2714 = vmatmul.msk.f32.vlgmr.msra.gmra.mxu0 %vm164_vm0, %v113_v16  ;;  %2715 = vmatmul.msk.f32.vlgmr.msra.gmra.mxu1 %vm164_vm0, %v113_v16  ;;  %v129_v26 = vld [vmem:[#allocation5 + $0x78] sm:$0xff]  ;;  %v126_v27 = vld [vmem:[#allocation5 + $0x60] sm:$0xff]  ;;  %v127_v28 = vld [vmem:[#allocation5 + $0x68] sm:$0xff] }
  0x24   :  { %2716 = vmatmul.msk.f32.vlgmr.msra.gmra.mxu2 %vm164_vm0, %v113_v16  ;;  %2717 = vmatmul.msk.f32.vlgmr.msra.gmra.mxu3 %vm164_vm0, %v113_v16  ;;  %v120_v29 = vld [vmem:[#allocation5 + $0x30] sm:$0xff]  ;;  %v121_v30 = vld [vmem:[#allocation5 + $0x38] sm:$0xff]  ;;  %v118_v31 = vld [vmem:[#allocation5 + $0x20] sm:$0xff] }
  0x25   :  { %300 = vmatpush.msrb.mxu2 %v144_v17  ;;  %320 = vmatpush.msrb.mxu3 %v145_v18  ;;  %v119_v32 = vld [vmem:[#allocation5 + $0x28] sm:$0xff] }
  0x26   :  { %260 = vmatpush.msrb.mxu0 %v142_v19  ;;  %280 = vmatpush.msrb.mxu1 %v143_v20  ;;  %v456_v33 = vld [vmem:[#allocation8 + $0x3c0] sm:$0xff] }
  0x27   :  { %301 = vmatpush.msrb.mxu2 %v136_v21  ;;  %321 = vmatpush.msrb.mxu3 %v137_v22  ;;  %v584_v34 = vld [vmem:[#allocation8 + $0x7c0] sm:$0xff] }
  0x28   :  { %261 = vmatpush.msrb.mxu0 %v134_v23  ;;  %281 = vmatpush.msrb.mxu1 %v135_v24  ;;  %v712_v35 = vld [vmem:[#allocation8 + $0xbc0] sm:$0xff] }
  0x29   :  { %302 = vmatpush.msrb.mxu2 %v128_v25  ;;  %322 = vmatpush.msrb.mxu3 %v129_v26  ;;  %v840_v36 = vld [vmem:[#allocation8 + $0xfc0] sm:$0xff] }
  0x2a   :  { %262 = vmatpush.msrb.mxu0 %v126_v27  ;;  %282 = vmatpush.msrb.mxu1 %v127_v28  ;;  %v448_v37 = vld [vmem:[#allocation8 + $0x380] sm:$0xff] }
  0x2b   :  { %303 = vmatpush.msrb.mxu2 %v120_v29  ;;  %323 = vmatpush.msrb.mxu3 %v121_v30  ;;  %v576_v38 = vld [vmem:[#allocation8 + $0x780] sm:$0xff] }
  0x2c   :  { %2720 = vmatmul.msk.f32.vlgmr.msrb.gmra.mxu2 %vm164_vm0, %v113_v16  ;;  %2721 = vmatmul.msk.f32.vlgmr.msrb.gmra.mxu3 %vm164_vm0, %v113_v16  ;;  %v704_v39 = vld [vmem:[#allocation8 + $0xb80] sm:$0xff] }
  0x2d   :  { %263 = vmatpush.msrb.mxu0 %v118_v31  ;;  %283 = vmatpush.msrb.mxu1 %v119_v32  ;;  %v832_v40 = vld [vmem:[#allocation8 + $0xf80] sm:$0xff] }
  0x2e   :  { %2718 = vmatmul.msk.f32.vlgmr.msrb.gmra.mxu0 %vm164_vm0, %v113_v16  ;;  %2719 = vmatmul.msk.f32.vlgmr.msrb.gmra.mxu1 %vm164_vm0, %v113_v16  ;;  %v440_v41 = vld [vmem:[#allocation8 + $0x340] sm:$0xff] }
  0x2f   :  { %1378 = vmatpush.msra.mxu0 %v456_v33  ;;  %1398 = vmatpush.msra.mxu1 %v584_v34  ;;  %v568_v42 = vld [vmem:[#allocation8 + $0x740] sm:$0xff] }
  0x30   :  { %1418 = vmatpush.msra.mxu2 %v712_v35  ;;  %1438 = vmatpush.msra.mxu3 %v840_v36  ;;  %v696_v43 = vld [vmem:[#allocation8 + $0xb40] sm:$0xff] }
  0x31   :  { %1379 = vmatpush.msra.mxu0 %v448_v37  ;;  %1399 = vmatpush.msra.mxu1 %v576_v38  ;;  %v824_v44 = vld [vmem:[#allocation8 + $0xf40] sm:$0xff] }
  0x32   :  { %v432_v45 = vld [vmem:[#allocation8 + $0x300] sm:$0xff]  ;;  %1419 = vmatpush.msra.mxu2 %v704_v39  ;;  %1439 = vmatpush.msra.mxu3 %v832_v40 }
  0x33   :  { %v560_v46 = vld [vmem:[#allocation8 + $0x700] sm:$0xff]  ;;  %1380 = vmatpush.msra.mxu0 %v440_v41  ;;  %1400 = vmatpush.msra.mxu1 %v568_v42 }
  0x34   :  { %v688_v47 = vld [vmem:[#allocation8 + $0xb00] sm:$0xff]  ;;  %1420 = vmatpush.msra.mxu2 %v696_v43  ;;  %1440 = vmatpush.msra.mxu3 %v824_v44 }
  0x35   :  { %v816_v48 = vld [vmem:[#allocation8 + $0xf00] sm:$0xff]  ;;  %1381 = vmatpush.msra.mxu0 %v432_v45  ;;  %1401 = vmatpush.msra.mxu1 %v560_v46 }
  0x36   :  { %v424_v49 = vld [vmem:[#allocation8 + $0x2c0] sm:$0xff]  ;;  %1421 = vmatpush.msra.mxu2 %v688_v47  ;;  %1441 = vmatpush.msra.mxu3 %v816_v48 }
  0x37   :  { %v552_v50 = vld [vmem:[#allocation8 + $0x6c0] sm:$0xff]  ;;  %1382 = vmatpush.msra.mxu0 %v424_v49 }
  0x38   :  { %v680_v51 = vld [vmem:[#allocation8 + $0xac0] sm:$0xff]  ;;  %1402 = vmatpush.msra.mxu1 %v552_v50 }
  0x39   :  { %v808_v52 = vld [vmem:[#allocation8 + $0xec0] sm:$0xff]  ;;  %1422 = vmatpush.msra.mxu2 %v680_v51 }
  0x3a   :  { %v416_v53 = vld [vmem:[#allocation8 + $0x280] sm:$0xff]  ;;  %1442 = vmatpush.msra.mxu3 %v808_v52 }
  0x3b   :  { %v544_v54 = vld [vmem:[#allocation8 + $0x680] sm:$0xff]  ;;  %1383 = vmatpush.msra.mxu0 %v416_v53 }
  0x3c   :  { %v672_v55 = vld [vmem:[#allocation8 + $0xa80] sm:$0xff]  ;;  %1403 = vmatpush.msra.mxu1 %v544_v54 }
  0x3d   :  { %v800_v56 = vld [vmem:[#allocation8 + $0xe80] sm:$0xff]  ;;  %1423 = vmatpush.msra.mxu2 %v672_v55 }
  0x3e   :  { %v408_v57 = vld [vmem:[#allocation8 + $0x240] sm:$0xff]  ;;  %1443 = vmatpush.msra.mxu3 %v800_v56 }
  0x3f   :  { %v536_v58 = vld [vmem:[#allocation8 + $0x640] sm:$0xff]  ;;  %1384 = vmatpush.msra.mxu0 %v408_v57 }
  0x40   :  { %v664_v59 = vld [vmem:[#allocation8 + $0xa40] sm:$0xff]  ;;  %1404 = vmatpush.msra.mxu1 %v536_v58 }
  0x41   :  { %v792_v60 = vld [vmem:[#allocation8 + $0xe40] sm:$0xff]  ;;  %1424 = vmatpush.msra.mxu2 %v664_v59 }
  0x42   :  { %v400_v61 = vld [vmem:[#allocation8 + $0x200] sm:$0xff]  ;;  %1444 = vmatpush.msra.mxu3 %v792_v60 }
  0x43   :  { %v528_v62 = vld [vmem:[#allocation8 + $0x600] sm:$0xff]  ;;  %1385 = vmatpush.msra.mxu0 %v400_v61 }
  0x44   :  { %v656_v63 = vld [vmem:[#allocation8 + $0xa00] sm:$0xff]  ;;  %1405 = vmatpush.msra.mxu1 %v528_v62 }
  0x45   :  { %v784_v0 = vld [vmem:[#allocation8 + $0xe00] sm:$0xff]  ;;  %1425 = vmatpush.msra.mxu2 %v656_v63 }
  0x46   :  { %v392_v1 = vld [vmem:[#allocation8 + $0x1c0] sm:$0xff]  ;;  %1445 = vmatpush.msra.mxu3 %v784_v0 }
  0x47   :  { %v520_v2 = vld [vmem:[#allocation8 + $0x5c0] sm:$0xff]  ;;  %1386 = vmatpush.msra.mxu0 %v392_v1 }
  0x48   :  { %v648_v3 = vld [vmem:[#allocation8 + $0x9c0] sm:$0xff]  ;;  %1406 = vmatpush.msra.mxu1 %v520_v2 }
  0x49   :  { %v776_v4 = vld [vmem:[#allocation8 + $0xdc0] sm:$0xff]  ;;  %1426 = vmatpush.msra.mxu2 %v648_v3 }
  0x4a   :  { %v384_v5 = vld [vmem:[#allocation8 + $0x180] sm:$0xff]  ;;  %1446 = vmatpush.msra.mxu3 %v776_v4 }
  0x4b   :  { %v512_v6 = vld [vmem:[#allocation8 + $0x580] sm:$0xff]  ;;  %1387 = vmatpush.msra.mxu0 %v384_v5 }
  0x4c   :  { %v640_v7 = vld [vmem:[#allocation8 + $0x980] sm:$0xff]  ;;  %1407 = vmatpush.msra.mxu1 %v512_v6 }
  0x4d   :  { %v768_v8 = vld [vmem:[#allocation8 + $0xd80] sm:$0xff]  ;;  %1427 = vmatpush.msra.mxu2 %v640_v7 }
  0x4e   :  { %v376_v9 = vld [vmem:[#allocation8 + $0x140] sm:$0xff]  ;;  %1447 = vmatpush.msra.mxu3 %v768_v8 }
  0x4f   :  { %v504_v10 = vld [vmem:[#allocation8 + $0x540] sm:$0xff]  ;;  %1388 = vmatpush.msra.mxu0 %v376_v9 }
  0x50   :  { %v632_v11 = vld [vmem:[#allocation8 + $0x940] sm:$0xff]  ;;  %1408 = vmatpush.msra.mxu1 %v504_v10 }
  0x51   :  { %v760_v12 = vld [vmem:[#allocation8 + $0xd40] sm:$0xff]  ;;  %1428 = vmatpush.msra.mxu2 %v632_v11 }
  0x52   :  { %v368_v13 = vld [vmem:[#allocation8 + $0x100] sm:$0xff]  ;;  %1448 = vmatpush.msra.mxu3 %v760_v12 }
  0x53   :  { %v496_v14 = vld [vmem:[#allocation8 + $0x500] sm:$0xff]  ;;  %1389 = vmatpush.msra.mxu0 %v368_v13 }
  0x54   :  { %v624_v15 = vld [vmem:[#allocation8 + $0x900] sm:$0xff]  ;;  %1409 = vmatpush.msra.mxu1 %v496_v14 }
  0x55   :  { %v752_v16 = vld [vmem:[#allocation8 + $0xd00] sm:$0xff]  ;;  %1429 = vmatpush.msra.mxu2 %v624_v15 }
  0x56   :  { %v360_v17 = vld [vmem:[#allocation8 + $0xc0] sm:$0xff]  ;;  %1449 = vmatpush.msra.mxu3 %v752_v16 }
  0x57   :  { %v488_v18 = vld [vmem:[#allocation8 + $0x4c0] sm:$0xff]  ;;  %1390 = vmatpush.msra.mxu0 %v360_v17 }
  0x58   :  { %v616_v19 = vld [vmem:[#allocation8 + $0x8c0] sm:$0xff]  ;;  %1410 = vmatpush.msra.mxu1 %v488_v18 }
  0x59   :  { %v744_v20 = vld [vmem:[#allocation8 + $0xcc0] sm:$0xff]  ;;  %1430 = vmatpush.msra.mxu2 %v616_v19 }
  0x5a   :  { %v352_v21 = vld [vmem:[#allocation8 + $0x80] sm:$0xff]  ;;  %1450 = vmatpush.msra.mxu3 %v744_v20 }
  0x5b   :  { %v480_v22 = vld [vmem:[#allocation8 + $0x480] sm:$0xff]  ;;  %1391 = vmatpush.msra.mxu0 %v352_v21 }
  0x5c   :  { %v608_v23 = vld [vmem:[#allocation8 + $0x880] sm:$0xff]  ;;  %1411 = vmatpush.msra.mxu1 %v480_v22 }
  0x5d   :  { %v736_v24 = vld [vmem:[#allocation8 + $0xc80] sm:$0xff]  ;;  %1431 = vmatpush.msra.mxu2 %v608_v23 }
  0x5e   :  { %v344_v25 = vld [vmem:[#allocation8 + $0x40] sm:$0xff]  ;;  %1451 = vmatpush.msra.mxu3 %v736_v24 }
  0x5f   :  { %v472_v26 = vld [vmem:[#allocation8 + $0x440] sm:$0xff]  ;;  %1392 = vmatpush.msra.mxu0 %v344_v25 }
  0x60   :  { %v600_v27 = vld [vmem:[#allocation8 + $0x840] sm:$0xff]  ;;  %1412 = vmatpush.msra.mxu1 %v472_v26 }
  0x61   :  { %v728_v28 = vld [vmem:[#allocation8 + $0xc40] sm:$0xff]  ;;  %1432 = vmatpush.msra.mxu2 %v600_v27 }
  0x62   :  { %v336_v29 = vld [vmem:[#allocation8] sm:$0xff]  ;;  %1452 = vmatpush.msra.mxu3 %v728_v28 }
  0x63   :  { %v464_v30 = vld [vmem:[#allocation8 + $0x400] sm:$0xff]  ;;  %1393 = vmatpush.msra.mxu0 %v336_v29 }
  0x64   :  { %v968_v31 = vld [vmem:[#allocation8 + $0x13c0] sm:$0xff]  ;;  %1413 = vmatpush.msra.mxu1 %v464_v30 }
  0x65   :  { %v1096_v32 = vld [vmem:[#allocation8 + $0x17c0] sm:$0xff]  ;;  %1458 = vmatpush.msrb.mxu0 %v968_v31 }
  0x66   :  { %v592_v33 = vld [vmem:[#allocation8 + $0x800] sm:$0xff]  ;;  %1478 = vmatpush.msrb.mxu1 %v1096_v32 }
  0x67   :  { %v720_v34 = vld [vmem:[#allocation8 + $0xc00] sm:$0xff]  ;;  %1433 = vmatpush.msra.mxu2 %v592_v33  ;;  %v2958_v33 = vld [vmem:[#allocation7] sm:$0xff] }
  0x68   :  { %v960_v35 = vld [vmem:[#allocation8 + $0x1380] sm:$0xff]  ;;  %1453 = vmatpush.msra.mxu3 %v720_v34  ;;  %v148_v34 = vperm.slane %v2958_v33, 0 }
  0x69   :  { %v1088_v36 = vld [vmem:[#allocation8 + $0x1780] sm:$0xff]  ;;  %1459 = vmatpush.msrb.mxu0 %v960_v35  ;;  %v149_v35 = vperm.slane %v2958_v33, 1 }
  0x6a   :  { %v1224_v37 = vld [vmem:[#allocation8 + $0x1bc0] sm:$0xff]  ;;  %1479 = vmatpush.msrb.mxu1 %v1088_v36 }
  0x6b   :  { %v1352_v38 = vld [vmem:[#allocation8 + $0x1fc0] sm:$0xff]  ;;  %1498 = vmatpush.msrb.mxu2 %v1224_v37 }
  0x6c   :  { %v952_v39 = vld [vmem:[#allocation8 + $0x1340] sm:$0xff]  ;;  %1518 = vmatpush.msrb.mxu3 %v1352_v38 }
  0x6d   :  { %v1080_v40 = vld [vmem:[#allocation8 + $0x1740] sm:$0xff]  ;;  %1460 = vmatpush.msrb.mxu0 %v952_v39 }
  0x6e   :  { %v1216_v41 = vld [vmem:[#allocation8 + $0x1b80] sm:$0xff]  ;;  %1480 = vmatpush.msrb.mxu1 %v1080_v40 }
  0x6f   :  { %v1344_v42 = vld [vmem:[#allocation8 + $0x1f80] sm:$0xff]  ;;  %1499 = vmatpush.msrb.mxu2 %v1216_v41 }
  0x70   :  { %v944_v43 = vld [vmem:[#allocation8 + $0x1300] sm:$0xff]  ;;  %1519 = vmatpush.msrb.mxu3 %v1344_v42  ;;  %v457_v42 = vld [vmem:[#allocation8 + $0x3c8] sm:$0xff] }
  0x71   :  { %v1072_v44 = vld [vmem:[#allocation8 + $0x1700] sm:$0xff]  ;;  %1461 = vmatpush.msrb.mxu0 %v944_v43  ;;  %v585_v43 = vld [vmem:[#allocation8 + $0x7c8] sm:$0xff] }
  0x72   :  { %v1208_v45 = vld [vmem:[#allocation8 + $0x1b40] sm:$0xff]  ;;  %1481 = vmatpush.msrb.mxu1 %v1072_v44  ;;  %v150_v44 = vperm.slane %v2958_v33, 2 }
  0x73   :  { %v1336_v46 = vld [vmem:[#allocation8 + $0x1f40] sm:$0xff]  ;;  %1500 = vmatpush.msrb.mxu2 %v1208_v45  ;;  %v151_v45 = vperm.slane %v2958_v33, 3 }
  0x74   :  { %v936_v47 = vld [vmem:[#allocation8 + $0x12c0] sm:$0xff]  ;;  %1520 = vmatpush.msrb.mxu3 %v1336_v46  ;;  %v449_v46 = vld [vmem:[#allocation8 + $0x388] sm:$0xff] }
  0x75   :  { %v1064_v48 = vld [vmem:[#allocation8 + $0x16c0] sm:$0xff]  ;;  %1462 = vmatpush.msrb.mxu0 %v936_v47  ;;  %v577_v47 = vld [vmem:[#allocation8 + $0x788] sm:$0xff] }
  0x76   :  { %v1200_v49 = vld [vmem:[#allocation8 + $0x1b00] sm:$0xff]  ;;  %1482 = vmatpush.msrb.mxu1 %v1064_v48 }
  0x77   :  { %v1328_v50 = vld [vmem:[#allocation8 + $0x1f00] sm:$0xff]  ;;  %1501 = vmatpush.msrb.mxu2 %v1200_v49 }
  0x78   :  { %v928_v51 = vld [vmem:[#allocation8 + $0x1280] sm:$0xff]  ;;  %1521 = vmatpush.msrb.mxu3 %v1328_v50  ;;  %v441_v50 = vld [vmem:[#allocation8 + $0x348] sm:$0xff] }
  0x79   :  { %v1056_v52 = vld [vmem:[#allocation8 + $0x1680] sm:$0xff]  ;;  %1463 = vmatpush.msrb.mxu0 %v928_v51  ;;  %v569_v51 = vld [vmem:[#allocation8 + $0x748] sm:$0xff] }
  0x7a   :  { %v1192_v53 = vld [vmem:[#allocation8 + $0x1ac0] sm:$0xff]  ;;  %1483 = vmatpush.msrb.mxu1 %v1056_v52 }
  0x7b   :  { %v1320_v54 = vld [vmem:[#allocation8 + $0x1ec0] sm:$0xff]  ;;  %1502 = vmatpush.msrb.mxu2 %v1192_v53 }
  0x7c   :  { %v920_v55 = vld [vmem:[#allocation8 + $0x1240] sm:$0xff]  ;;  %1522 = vmatpush.msrb.mxu3 %v1320_v54 }
  0x7d   :  { %v1048_v56 = vld [vmem:[#allocation8 + $0x1640] sm:$0xff]  ;;  %1464 = vmatpush.msrb.mxu0 %v920_v55 }
  0x7e   :  { %v1184_v57 = vld [vmem:[#allocation8 + $0x1a80] sm:$0xff]  ;;  %1484 = vmatpush.msrb.mxu1 %v1048_v56  ;;  %v433_v56 = vld [vmem:[#allocation8 + $0x308] sm:$0xff] }
  0x7f   :  { %v1312_v58 = vld [vmem:[#allocation8 + $0x1e80] sm:$0xff]  ;;  %1503 = vmatpush.msrb.mxu2 %v1184_v57  ;;  %v561_v57 = vld [vmem:[#allocation8 + $0x708] sm:$0xff] }
  0x80   :  { %v912_v59 = vld [vmem:[#allocation8 + $0x1200] sm:$0xff]  ;;  %1523 = vmatpush.msrb.mxu3 %v1312_v58  ;;  %v713_v58 = vld [vmem:[#allocation8 + $0xbc8] sm:$0xff] }
  0x81   :  { %v1040_v60 = vld [vmem:[#allocation8 + $0x1600] sm:$0xff]  ;;  %1465 = vmatpush.msrb.mxu0 %v912_v59  ;;  %v841_v59 = vld [vmem:[#allocation8 + $0xfc8] sm:$0xff] }
  0x82   :  { %v1176_v61 = vld [vmem:[#allocation8 + $0x1a40] sm:$0xff]  ;;  %1485 = vmatpush.msrb.mxu1 %v1040_v60  ;;  %v152_v60 = vperm.slane %v2958_v33, 4 }
  0x83   :  { %v1304_v62 = vld [vmem:[#allocation8 + $0x1e40] sm:$0xff]  ;;  %1504 = vmatpush.msrb.mxu2 %v1176_v61  ;;  %v425_v61 = vld [vmem:[#allocation8 + $0x2c8] sm:$0xff] }
  0x84   :  { %v904_v63 = vld [vmem:[#allocation8 + $0x11c0] sm:$0xff]  ;;  %1524 = vmatpush.msrb.mxu3 %v1304_v62  ;;  %v553_v62 = vld [vmem:[#allocation8 + $0x6c8] sm:$0xff] }
  0x85   :  { %v1032_v0 = vld [vmem:[#allocation8 + $0x15c0] sm:$0xff]  ;;  %1466 = vmatpush.msrb.mxu0 %v904_v63  ;;  %v154_v63 = vperm.slane %v2958_v33, 6 }
  0x86   :  { %v1168_v1 = vld [vmem:[#allocation8 + $0x1a00] sm:$0xff]  ;;  %1486 = vmatpush.msrb.mxu1 %v1032_v0 }
  0x87   :  { %v1296_v2 = vld [vmem:[#allocation8 + $0x1e00] sm:$0xff]  ;;  %1505 = vmatpush.msrb.mxu2 %v1168_v1  ;;  %v155_v1 = vperm.slane %v2958_v33, 7 }
  0x88   :  { %v896_v3 = vld [vmem:[#allocation8 + $0x1180] sm:$0xff]  ;;  %1525 = vmatpush.msrb.mxu3 %v1296_v2  ;;  %v705_v2 = vld [vmem:[#allocation8 + $0xb88] sm:$0xff] }
  0x89   :  { %v1024_v4 = vld [vmem:[#allocation8 + $0x1580] sm:$0xff]  ;;  %1467 = vmatpush.msrb.mxu0 %v896_v3  ;;  %v833_v3 = vld [vmem:[#allocation8 + $0xf88] sm:$0xff] }
  0x8a   :  { %v1160_v5 = vld [vmem:[#allocation8 + $0x19c0] sm:$0xff]  ;;  %1487 = vmatpush.msrb.mxu1 %v1024_v4  ;;  %v417_v4 = vld [vmem:[#allocation8 + $0x288] sm:$0xff] }
  0x8b   :  { %v1288_v6 = vld [vmem:[#allocation8 + $0x1dc0] sm:$0xff]  ;;  %1506 = vmatpush.msrb.mxu2 %v1160_v5  ;;  %v545_v5 = vld [vmem:[#allocation8 + $0x688] sm:$0xff] }
  0x8c   :  { %v888_v7 = vld [vmem:[#allocation8 + $0x1140] sm:$0xff]  ;;  %1526 = vmatpush.msrb.mxu3 %v1288_v6  ;;  %v153_v6 = vperm.slane %v2958_v33, 5  ;;  %v513_v33 = vld [vmem:[#allocation8 + $0x588] sm:$0xff] }
  0x8d   :  { %v1016_v8 = vld [vmem:[#allocation8 + $0x1540] sm:$0xff]  ;;  %1468 = vmatpush.msrb.mxu0 %v888_v7 }
  0x8e   :  { %v1152_v9 = vld [vmem:[#allocation8 + $0x1980] sm:$0xff]  ;;  %1488 = vmatpush.msrb.mxu1 %v1016_v8 }
  0x8f   :  { %v1280_v10 = vld [vmem:[#allocation8 + $0x1d80] sm:$0xff]  ;;  %1507 = vmatpush.msrb.mxu2 %v1152_v9  ;;  %v697_v9 = vld [vmem:[#allocation8 + $0xb48] sm:$0xff] }
  0x90   :  { %v880_v11 = vld [vmem:[#allocation8 + $0x1100] sm:$0xff]  ;;  %1527 = vmatpush.msrb.mxu3 %v1280_v10  ;;  %v825_v10 = vld [vmem:[#allocation8 + $0xf48] sm:$0xff] }
  0x91   :  { %v1008_v12 = vld [vmem:[#allocation8 + $0x1500] sm:$0xff]  ;;  %1469 = vmatpush.msrb.mxu0 %v880_v11 }
  0x92   :  { %v872_v13 = vld [vmem:[#allocation8 + $0x10c0] sm:$0xff]  ;;  %1489 = vmatpush.msrb.mxu1 %v1008_v12 }
  0x93   :  { %v1000_v14 = vld [vmem:[#allocation8 + $0x14c0] sm:$0xff]  ;;  %1470 = vmatpush.msrb.mxu0 %v872_v13 }
  0x94   :  { %1490 = vmatpush.msrb.mxu1 %v1000_v14  ;;  %v864_v15 = vld [vmem:[#allocation8 + $0x1080] sm:$0xff] }
  0x95   :  { %v992_v16 = vld [vmem:[#allocation8 + $0x1480] sm:$0xff]  ;;  %1471 = vmatpush.msrb.mxu0 %v864_v15  ;;  %v409_v15 = vld [vmem:[#allocation8 + $0x248] sm:$0xff] }
  0x96   :  { %v1144_v17 = vld [vmem:[#allocation8 + $0x1940] sm:$0xff]  ;;  %1491 = vmatpush.msrb.mxu1 %v992_v16  ;;  %v537_v16 = vld [vmem:[#allocation8 + $0x648] sm:$0xff] }
  0x97   :  { %v1272_v18 = vld [vmem:[#allocation8 + $0x1d40] sm:$0xff]  ;;  %1508 = vmatpush.msrb.mxu2 %v1144_v17  ;;  %v689_v17 = vld [vmem:[#allocation8 + $0xb08] sm:$0xff] }
  0x98   :  { %1528 = vmatpush.msrb.mxu3 %v1272_v18  ;;  %v856_v19 = vld [vmem:[#allocation8 + $0x1040] sm:$0xff]  ;;  %v817_v18 = vld [vmem:[#allocation8 + $0xf08] sm:$0xff] }
  0x99   :  { %v984_v20 = vld [vmem:[#allocation8 + $0x1440] sm:$0xff]  ;;  %1472 = vmatpush.msrb.mxu0 %v856_v19 }
  0x9a   :  { %v1136_v21 = vld [vmem:[#allocation8 + $0x1900] sm:$0xff]  ;;  %1492 = vmatpush.msrb.mxu1 %v984_v20 }
  0x9b   :  { %v1264_v22 = vld [vmem:[#allocation8 + $0x1d00] sm:$0xff]  ;;  %1509 = vmatpush.msrb.mxu2 %v1136_v21  ;;  %v401_v21 = vld [vmem:[#allocation8 + $0x208] sm:$0xff] }
  0x9c   :  { %v848_v23 = vld [vmem:[#allocation8 + $0x1000] sm:$0xff]  ;;  %1529 = vmatpush.msrb.mxu3 %v1264_v22 }
  0x9d   :  { %v976_v24 = vld [vmem:[#allocation8 + $0x1400] sm:$0xff]  ;;  %1473 = vmatpush.msrb.mxu0 %v848_v23  ;;  %v529_v23 = vld [vmem:[#allocation8 + $0x608] sm:$0xff] }
  0x9e   :  { %v1128_v25 = vld [vmem:[#allocation8 + $0x18c0] sm:$0xff]  ;;  %1493 = vmatpush.msrb.mxu1 %v976_v24  ;;  %v681_v24 = vld [vmem:[#allocation8 + $0xac8] sm:$0xff] }
  0x9f   :  { %v1256_v26 = vld [vmem:[#allocation8 + $0x1cc0] sm:$0xff]  ;;  %1510 = vmatpush.msrb.mxu2 %v1128_v25 }
  0xa0   :  { %1530 = vmatpush.msrb.mxu3 %v1256_v26  ;;  %v1120_v27 = vld [vmem:[#allocation8 + $0x1880] sm:$0xff]  ;;  %v185_v36 = vpop.f32.mrf.mxu0  ;;  %v205_v37 = vpop.f32.mrf.mxu1  ;;  %v809_v26 = vld [vmem:[#allocation8 + $0xec8] sm:$0xff] }
  0xa1   :  { %v1248_v28 = vld [vmem:[#allocation8 + $0x1c80] sm:$0xff]  ;;  %1511 = vmatpush.msrb.mxu2 %v1120_v27  ;;  %v186_v38 = vadd.f32 %v185_v36, %v148_v34  ;;  %v206_v39 = vadd.f32 %v205_v37, %v149_v35  ;;  %v393_v27 = vld [vmem:[#allocation8 + $0x1c8] sm:$0xff] }
  0xa2   :  { %1531 = vmatpush.msrb.mxu3 %v1248_v28  ;;  %v1112_v29 = vld [vmem:[#allocation8 + $0x1840] sm:$0xff]  ;;  %v665_v34 = vld [vmem:[#allocation8 + $0xa48] sm:$0xff] }
  0xa3   :  { %v1240_v30 = vld [vmem:[#allocation8 + $0x1c40] sm:$0xff]  ;;  %1512 = vmatpush.msrb.mxu2 %v1112_v29  ;;  %v2962_v40 = vmax.f32 %v186_v38, 0.0  ;;  %v2964_v41 = vmax.f32 %v206_v39, 0.0  ;;  %v521_v29 = vld [vmem:[#allocation8 + $0x5c8] sm:$0xff] }
  0xa4   :  { %1532 = vmatpush.msrb.mxu3 %v1240_v30  ;;  %v1104_v31 = vld [vmem:[#allocation8 + $0x1800] sm:$0xff]  ;;  %v673_v30 = vld [vmem:[#allocation8 + $0xa88] sm:$0xff] }
  0xa5   :  { %v1232_v32 = vld [vmem:[#allocation8 + $0x1c00] sm:$0xff]  ;;  %1513 = vmatpush.msrb.mxu2 %v1104_v31  ;;  %1394 = vmatmul.f32.vlgmr.msra.gmra.mxu0 %v2962_v40  ;;  %v801_v31 = vld [vmem:[#allocation8 + $0xe88] sm:$0xff] }
  0xa6   :  { %1533 = vmatpush.msrb.mxu3 %v1232_v32  ;;  %1414 = vmatmul.f32.vlgmr.msra.gmra.mxu1 %v2964_v41  ;;  %v385_v32 = vld [vmem:[#allocation8 + $0x188] sm:$0xff] }
  0xa7   :  { %1538 = vmatpush.msra.mxu0 %v457_v42  ;;  %1558 = vmatpush.msra.mxu1 %v585_v43  ;;  %v225_v48 = vpop.f32.mrf.mxu2  ;;  %v245_v49 = vpop.f32.mrf.mxu3  ;;  %v793_v35 = vld [vmem:[#allocation8 + $0xe48] sm:$0xff] }
  0xa8   :  { %v226_v52 = vadd.f32 %v225_v48, %v150_v44  ;;  %v246_v53 = vadd.f32 %v245_v49, %v151_v45  ;;  %v377_v36 = vld [vmem:[#allocation8 + $0x148] sm:$0xff] }
  0xa9   :  { %1539 = vmatpush.msra.mxu0 %v449_v46  ;;  %1559 = vmatpush.msra.mxu1 %v577_v47  ;;  %v505_v37 = vld [vmem:[#allocation8 + $0x548] sm:$0xff] }
  0xaa   :  { %v2970_v54 = vmax.f32 %v226_v52, 0.0  ;;  %v2972_v55 = vmax.f32 %v246_v53, 0.0  ;;  %v657_v38 = vld [vmem:[#allocation8 + $0xa08] sm:$0xff] }
  0xab   :  { %1540 = vmatpush.msra.mxu0 %v441_v50  ;;  %1560 = vmatpush.msra.mxu1 %v569_v51  ;;  %v265_v0 = vpop.f32.mrf.mxu0  ;;  %v285_v7 = vpop.f32.mrf.mxu1  ;;  %v785_v39 = vld [vmem:[#allocation8 + $0xe08] sm:$0xff] }
  0xac   :  { %1434 = vmatmul.f32.vlgmr.msra.gmra.mxu2 %v2970_v54  ;;  %1454 = vmatmul.f32.vlgmr.msra.gmra.mxu3 %v2972_v55  ;;  %v266_v11 = vadd.f32 %v265_v0, %v152_v60  ;;  %v286_v20 = vadd.f32 %v285_v7, %v153_v6  ;;  %v369_v42 = vld [vmem:[#allocation8 + $0x108] sm:$0xff] }
  0xad   :  { %1541 = vmatpush.msra.mxu0 %v433_v56  ;;  %1561 = vmatpush.msra.mxu1 %v561_v57  ;;  %v497_v43 = vld [vmem:[#allocation8 + $0x508] sm:$0xff] }
  0xae   :  { %1578 = vmatpush.msra.mxu2 %v713_v58  ;;  %1598 = vmatpush.msra.mxu3 %v841_v59  ;;  %v2982_v22 = vmax.f32 %v266_v11, 0.0  ;;  %v2987_v28 = vmax.f32 %v286_v20, 0.0  ;;  %v649_v44 = vld [vmem:[#allocation8 + $0x9c8] sm:$0xff] }
  0xaf   :  { %1542 = vmatpush.msra.mxu0 %v425_v61  ;;  %1562 = vmatpush.msra.mxu1 %v553_v62  ;;  %v305_v8 = vpop.f32.mrf.mxu2  ;;  %v325_v12 = vpop.f32.mrf.mxu3  ;;  %v777_v45 = vld [vmem:[#allocation8 + $0xdc8] sm:$0xff] }
  0xb0   :  { %1579 = vmatpush.msra.mxu2 %v705_v2  ;;  %1599 = vmatpush.msra.mxu3 %v833_v3  ;;  %v306_v13 = vadd.f32 %v305_v8, %v154_v63  ;;  %v326_v14 = vadd.f32 %v325_v12, %v155_v1  ;;  %v361_v46 = vld [vmem:[#allocation8 + $0xc8] sm:$0xff] }
  0xb1   :  { %1543 = vmatpush.msra.mxu0 %v417_v4  ;;  %1563 = vmatpush.msra.mxu1 %v545_v5  ;;  %v489_v47 = vld [vmem:[#allocation8 + $0x4c8] sm:$0xff] }
  0xb2   :  { %v2980_v19 = vmax.f32 %v306_v13, 0.0  ;;  %1580 = vmatpush.msra.mxu2 %v697_v9  ;;  %1600 = vmatpush.msra.mxu3 %v825_v10  ;;  %v2984_v25 = vmax.f32 %v326_v14, 0.0  ;;  %v641_v48 = vld [vmem:[#allocation8 + $0x988] sm:$0xff] }
  0xb3   :  { %1544 = vmatpush.msra.mxu0 %v409_v15  ;;  %1564 = vmatpush.msra.mxu1 %v537_v16  ;;  %v769_v49 = vld [vmem:[#allocation8 + $0xd88] sm:$0xff] }
  0xb4   :  { %1581 = vmatpush.msra.mxu2 %v689_v17  ;;  %1601 = vmatpush.msra.mxu3 %v817_v18  ;;  %v353_v50 = vld [vmem:[#allocation8 + $0x88] sm:$0xff] }
  0xb5   :  { %1514 = vmatmul.f32.vlgmr.msrb.gmra.mxu2 %v2980_v19  ;;  %1545 = vmatpush.msra.mxu0 %v401_v21  ;;  %v481_v51 = vld [vmem:[#allocation8 + $0x488] sm:$0xff] }
  0xb6   :  { %1565 = vmatpush.msra.mxu1 %v529_v23  ;;  %1582 = vmatpush.msra.mxu2 %v681_v24  ;;  %v633_v52 = vld [vmem:[#allocation8 + $0x948] sm:$0xff] }
  0xb7   :  { %1602 = vmatpush.msra.mxu3 %v809_v26  ;;  %1474 = vmatmul.f32.vlgmr.msrb.gmra.mxu0 %v2982_v22  ;;  %v761_v53 = vld [vmem:[#allocation8 + $0xd48] sm:$0xff] }
  0xb8   :  { %1534 = vmatmul.f32.vlgmr.msrb.gmra.mxu3 %v2984_v25  ;;  %1546 = vmatpush.msra.mxu0 %v393_v27  ;;  %v345_v56 = vld [vmem:[#allocation8 + $0x48] sm:$0xff] }
  0xb9   :  { %1566 = vmatpush.msra.mxu1 %v521_v29  ;;  %1583 = vmatpush.msra.mxu2 %v673_v30  ;;  %v473_v57 = vld [vmem:[#allocation8 + $0x448] sm:$0xff] }
  0xba   :  { %1603 = vmatpush.msra.mxu3 %v801_v31  ;;  %1494 = vmatmul.f32.vlgmr.msrb.gmra.mxu1 %v2987_v28  ;;  %v625_v58 = vld [vmem:[#allocation8 + $0x908] sm:$0xff] }
  0xbb   :  { %1547 = vmatpush.msra.mxu0 %v385_v32  ;;  %1567 = vmatpush.msra.mxu1 %v513_v33  ;;  %v753_v59 = vld [vmem:[#allocation8 + $0xd08] sm:$0xff] }
  0xbc   :  { %1584 = vmatpush.msra.mxu2 %v665_v34  ;;  %1604 = vmatpush.msra.mxu3 %v793_v35  ;;  %v337_v60 = vld [vmem:[#allocation8 + $0x8] sm:$0xff] }
  0xbd   :  { %1548 = vmatpush.msra.mxu0 %v377_v36  ;;  %1568 = vmatpush.msra.mxu1 %v505_v37  ;;  %v465_v61 = vld [vmem:[#allocation8 + $0x408] sm:$0xff] }
  0xbe   :  { %1585 = vmatpush.msra.mxu2 %v657_v38  ;;  %1605 = vmatpush.msra.mxu3 %v785_v39  ;;  %v617_v62 = vld [vmem:[#allocation8 + $0x8c8] sm:$0xff] }
  0xbf   :  { %1549 = vmatpush.msra.mxu0 %v369_v42  ;;  %1569 = vmatpush.msra.mxu1 %v497_v43  ;;  %v745_v63 = vld [vmem:[#allocation8 + $0xcc8] sm:$0xff] }
  0xc0   :  { %1586 = vmatpush.msra.mxu2 %v649_v44  ;;  %1606 = vmatpush.msra.mxu3 %v777_v45  ;;  %v969_v0 = vld [vmem:[#allocation8 + $0x13c8] sm:$0xff] }
  0xc1   :  { %1550 = vmatpush.msra.mxu0 %v361_v46  ;;  %1570 = vmatpush.msra.mxu1 %v489_v47  ;;  %v1097_v1 = vld [vmem:[#allocation8 + $0x17c8] sm:$0xff] }
  0xc2   :  { %1587 = vmatpush.msra.mxu2 %v641_v48  ;;  %1607 = vmatpush.msra.mxu3 %v769_v49  ;;  %v609_v2 = vld [vmem:[#allocation8 + $0x888] sm:$0xff] }
  0xc3   :  { %1551 = vmatpush.msra.mxu0 %v353_v50  ;;  %1571 = vmatpush.msra.mxu1 %v481_v51  ;;  %v737_v3 = vld [vmem:[#allocation8 + $0xc88] sm:$0xff] }
  0xc4   :  { %1588 = vmatpush.msra.mxu2 %v633_v52  ;;  %1608 = vmatpush.msra.mxu3 %v761_v53  ;;  %v961_v4 = vld [vmem:[#allocation8 + $0x1388] sm:$0xff] }
  0xc5   :  { %1552 = vmatpush.msra.mxu0 %v345_v56  ;;  %1572 = vmatpush.msra.mxu1 %v473_v57  ;;  %v1089_v5 = vld [vmem:[#allocation8 + $0x1788] sm:$0xff] }
  0xc6   :  { %1589 = vmatpush.msra.mxu2 %v625_v58  ;;  %1609 = vmatpush.msra.mxu3 %v753_v59  ;;  %v601_v6 = vld [vmem:[#allocation8 + $0x848] sm:$0xff] }
  0xc7   :  { %1553 = vmatpush.msra.mxu0 %v337_v60  ;;  %1573 = vmatpush.msra.mxu1 %v465_v61  ;;  %v729_v7 = vld [vmem:[#allocation8 + $0xc48] sm:$0xff] }
  0xc8   :  { %1590 = vmatpush.msra.mxu2 %v617_v62  ;;  %1610 = vmatpush.msra.mxu3 %v745_v63  ;;  %v953_v8 = vld [vmem:[#allocation8 + $0x1348] sm:$0xff] }
  0xc9   :  { %1554 = vmatmul.f32.vlgmr.msra.gmra.mxu0 %v2962_v40  ;;  %1574 = vmatmul.f32.vlgmr.msra.gmra.mxu1 %v2964_v41  ;;  %v1081_v9 = vld [vmem:[#allocation8 + $0x1748] sm:$0xff] }
  0xca   :  { %1618 = vmatpush.msrb.mxu0 %v969_v0  ;;  %1638 = vmatpush.msrb.mxu1 %v1097_v1  ;;  %v593_v10 = vld [vmem:[#allocation8 + $0x808] sm:$0xff] }
  0xcb   :  { %1591 = vmatpush.msra.mxu2 %v609_v2  ;;  %1611 = vmatpush.msra.mxu3 %v737_v3  ;;  %v721_v11 = vld [vmem:[#allocation8 + $0xc08] sm:$0xff] }
  0xcc   :  { %1619 = vmatpush.msrb.mxu0 %v961_v4  ;;  %1639 = vmatpush.msrb.mxu1 %v1089_v5  ;;  %v945_v12 = vld [vmem:[#allocation8 + $0x1308] sm:$0xff] }
  0xcd   :  { %1592 = vmatpush.msra.mxu2 %v601_v6  ;;  %1612 = vmatpush.msra.mxu3 %v729_v7  ;;  %v1073_v13 = vld [vmem:[#allocation8 + $0x1708] sm:$0xff] }
  0xce   :  { %1620 = vmatpush.msrb.mxu0 %v953_v8  ;;  %1640 = vmatpush.msrb.mxu1 %v1081_v9  ;;  %v1225_v14 = vld [vmem:[#allocation8 + $0x1bc8] sm:$0xff]  ;;  %v458_v8 = vld [vmem:[#allocation8 + $0x3d0] sm:$0xff] }
  0xcf   :  { %1593 = vmatpush.msra.mxu2 %v593_v10  ;;  %1613 = vmatpush.msra.mxu3 %v721_v11  ;;  %v1353_v15 = vld [vmem:[#allocation8 + $0x1fc8] sm:$0xff]  ;;  %v586_v9 = vld [vmem:[#allocation8 + $0x7d0] sm:$0xff] }
  0xd0   :  { %1594 = vmatmul.f32.vlgmr.msra.gmra.mxu2 %v2970_v54  ;;  %1614 = vmatmul.f32.vlgmr.msra.gmra.mxu3 %v2972_v55  ;;  %v937_v16 = vld [vmem:[#allocation8 + $0x12c8] sm:$0xff] }
  0xd1   :  { %v1065_v17 = vld [vmem:[#allocation8 + $0x16c8] sm:$0xff]  ;;  %1621 = vmatpush.msrb.mxu0 %v945_v12  ;;  %1641 = vmatpush.msrb.mxu1 %v1073_v13  ;;  %v450_v12 = vld [vmem:[#allocation8 + $0x390] sm:$0xff] }
  0xd2   :  { %v1217_v18 = vld [vmem:[#allocation8 + $0x1b88] sm:$0xff]  ;;  %1658 = vmatpush.msrb.mxu2 %v1225_v14  ;;  %1678 = vmatpush.msrb.mxu3 %v1353_v15  ;;  %v578_v13 = vld [vmem:[#allocation8 + $0x790] sm:$0xff] }
  0xd3   :  { %v1345_v20 = vld [vmem:[#allocation8 + $0x1f88] sm:$0xff]  ;;  %1622 = vmatpush.msrb.mxu0 %v937_v16  ;;  %1642 = vmatpush.msrb.mxu1 %v1065_v17  ;;  %v442_v16 = vld [vmem:[#allocation8 + $0x350] sm:$0xff] }
  0xd4   :  { %v929_v21 = vld [vmem:[#allocation8 + $0x1288] sm:$0xff]  ;;  %1659 = vmatpush.msrb.mxu2 %v1217_v18  ;;  %1679 = vmatpush.msrb.mxu3 %v1345_v20  ;;  %v570_v17 = vld [vmem:[#allocation8 + $0x750] sm:$0xff] }
  0xd5   :  { %v1057_v23 = vld [vmem:[#allocation8 + $0x1688] sm:$0xff]  ;;  %1623 = vmatpush.msrb.mxu0 %v929_v21  ;;  %v434_v21 = vld [vmem:[#allocation8 + $0x310] sm:$0xff] }
  0xd6   :  { %v1209_v24 = vld [vmem:[#allocation8 + $0x1b48] sm:$0xff]  ;;  %1643 = vmatpush.msrb.mxu1 %v1057_v23  ;;  %v562_v23 = vld [vmem:[#allocation8 + $0x710] sm:$0xff] }
  0xd7   :  { %v1337_v26 = vld [vmem:[#allocation8 + $0x1f48] sm:$0xff]  ;;  %1660 = vmatpush.msrb.mxu2 %v1209_v24  ;;  %v714_v24 = vld [vmem:[#allocation8 + $0xbd0] sm:$0xff] }
  0xd8   :  { %v921_v27 = vld [vmem:[#allocation8 + $0x1248] sm:$0xff]  ;;  %1680 = vmatpush.msrb.mxu3 %v1337_v26  ;;  %v842_v26 = vld [vmem:[#allocation8 + $0xfd0] sm:$0xff] }
  0xd9   :  { %v1049_v29 = vld [vmem:[#allocation8 + $0x1648] sm:$0xff]  ;;  %1624 = vmatpush.msrb.mxu0 %v921_v27  ;;  %v426_v27 = vld [vmem:[#allocation8 + $0x2d0] sm:$0xff] }
  0xda   :  { %v1201_v30 = vld [vmem:[#allocation8 + $0x1b08] sm:$0xff]  ;;  %1644 = vmatpush.msrb.mxu1 %v1049_v29  ;;  %v554_v29 = vld [vmem:[#allocation8 + $0x6d0] sm:$0xff] }
  0xdb   :  { %v1329_v31 = vld [vmem:[#allocation8 + $0x1f08] sm:$0xff]  ;;  %1661 = vmatpush.msrb.mxu2 %v1201_v30  ;;  %v706_v30 = vld [vmem:[#allocation8 + $0xb90] sm:$0xff] }
  0xdc   :  { %v913_v32 = vld [vmem:[#allocation8 + $0x1208] sm:$0xff]  ;;  %1681 = vmatpush.msrb.mxu3 %v1329_v31  ;;  %v834_v31 = vld [vmem:[#allocation8 + $0xf90] sm:$0xff] }
  0xdd   :  { %v1041_v33 = vld [vmem:[#allocation8 + $0x1608] sm:$0xff]  ;;  %1625 = vmatpush.msrb.mxu0 %v913_v32  ;;  %v418_v32 = vld [vmem:[#allocation8 + $0x290] sm:$0xff] }
  0xde   :  { %v1193_v34 = vld [vmem:[#allocation8 + $0x1ac8] sm:$0xff]  ;;  %1645 = vmatpush.msrb.mxu1 %v1041_v33  ;;  %v546_v33 = vld [vmem:[#allocation8 + $0x690] sm:$0xff] }
  0xdf   :  { %v1321_v35 = vld [vmem:[#allocation8 + $0x1ec8] sm:$0xff]  ;;  %1662 = vmatpush.msrb.mxu2 %v1193_v34  ;;  %v698_v34 = vld [vmem:[#allocation8 + $0xb50] sm:$0xff] }
  0xe0   :  { %v905_v36 = vld [vmem:[#allocation8 + $0x11c8] sm:$0xff]  ;;  %1682 = vmatpush.msrb.mxu3 %v1321_v35  ;;  %v826_v35 = vld [vmem:[#allocation8 + $0xf50] sm:$0xff] }
  0xe1   :  { %v1033_v37 = vld [vmem:[#allocation8 + $0x15c8] sm:$0xff]  ;;  %1626 = vmatpush.msrb.mxu0 %v905_v36  ;;  %v410_v36 = vld [vmem:[#allocation8 + $0x250] sm:$0xff] }
  0xe2   :  { %v1185_v38 = vld [vmem:[#allocation8 + $0x1a88] sm:$0xff]  ;;  %1646 = vmatpush.msrb.mxu1 %v1033_v37  ;;  %v538_v37 = vld [vmem:[#allocation8 + $0x650] sm:$0xff] }
  0xe3   :  { %v1313_v39 = vld [vmem:[#allocation8 + $0x1e88] sm:$0xff]  ;;  %1663 = vmatpush.msrb.mxu2 %v1185_v38  ;;  %v690_v38 = vld [vmem:[#allocation8 + $0xb10] sm:$0xff] }
  0xe4   :  { %v897_v42 = vld [vmem:[#allocation8 + $0x1188] sm:$0xff]  ;;  %1683 = vmatpush.msrb.mxu3 %v1313_v39  ;;  %v818_v39 = vld [vmem:[#allocation8 + $0xf10] sm:$0xff] }
  0xe5   :  { %v1025_v43 = vld [vmem:[#allocation8 + $0x1588] sm:$0xff]  ;;  %1627 = vmatpush.msrb.mxu0 %v897_v42  ;;  %v402_v42 = vld [vmem:[#allocation8 + $0x210] sm:$0xff] }
  0xe6   :  { %v1177_v44 = vld [vmem:[#allocation8 + $0x1a48] sm:$0xff]  ;;  %1647 = vmatpush.msrb.mxu1 %v1025_v43  ;;  %v530_v43 = vld [vmem:[#allocation8 + $0x610] sm:$0xff] }
  0xe7   :  { %v1305_v45 = vld [vmem:[#allocation8 + $0x1e48] sm:$0xff]  ;;  %1664 = vmatpush.msrb.mxu2 %v1177_v44  ;;  %v682_v44 = vld [vmem:[#allocation8 + $0xad0] sm:$0xff] }
  0xe8   :  { %v889_v46 = vld [vmem:[#allocation8 + $0x1148] sm:$0xff]  ;;  %1684 = vmatpush.msrb.mxu3 %v1305_v45  ;;  %v810_v45 = vld [vmem:[#allocation8 + $0xed0] sm:$0xff] }
  0xe9   :  { %v1017_v47 = vld [vmem:[#allocation8 + $0x1548] sm:$0xff]  ;;  %1628 = vmatpush.msrb.mxu0 %v889_v46  ;;  %v394_v46 = vld [vmem:[#allocation8 + $0x1d0] sm:$0xff] }
  0xea   :  { %v1169_v48 = vld [vmem:[#allocation8 + $0x1a08] sm:$0xff]  ;;  %1648 = vmatpush.msrb.mxu1 %v1017_v47  ;;  %v522_v47 = vld [vmem:[#allocation8 + $0x5d0] sm:$0xff] }
  0xeb   :  { %v1297_v49 = vld [vmem:[#allocation8 + $0x1e08] sm:$0xff]  ;;  %1665 = vmatpush.msrb.mxu2 %v1169_v48  ;;  %v674_v48 = vld [vmem:[#allocation8 + $0xa90] sm:$0xff] }
  0xec   :  { %v881_v50 = vld [vmem:[#allocation8 + $0x1108] sm:$0xff]  ;;  %1685 = vmatpush.msrb.mxu3 %v1297_v49  ;;  %v802_v49 = vld [vmem:[#allocation8 + $0xe90] sm:$0xff] }
  0xed   :  { %v1009_v51 = vld [vmem:[#allocation8 + $0x1508] sm:$0xff]  ;;  %1629 = vmatpush.msrb.mxu0 %v881_v50  ;;  %v386_v50 = vld [vmem:[#allocation8 + $0x190] sm:$0xff] }
  0xee   :  { %v1161_v52 = vld [vmem:[#allocation8 + $0x19c8] sm:$0xff]  ;;  %1649 = vmatpush.msrb.mxu1 %v1009_v51  ;;  %v514_v51 = vld [vmem:[#allocation8 + $0x590] sm:$0xff] }
  0xef   :  { %v1289_v53 = vld [vmem:[#allocation8 + $0x1dc8] sm:$0xff]  ;;  %1666 = vmatpush.msrb.mxu2 %v1161_v52  ;;  %v666_v52 = vld [vmem:[#allocation8 + $0xa50] sm:$0xff] }
  0xf0   :  { %v873_v56 = vld [vmem:[#allocation8 + $0x10c8] sm:$0xff]  ;;  %1686 = vmatpush.msrb.mxu3 %v1289_v53  ;;  %v794_v53 = vld [vmem:[#allocation8 + $0xe50] sm:$0xff] }
  0xf1   :  { %v1001_v57 = vld [vmem:[#allocation8 + $0x14c8] sm:$0xff]  ;;  %1630 = vmatpush.msrb.mxu0 %v873_v56  ;;  %v378_v56 = vld [vmem:[#allocation8 + $0x150] sm:$0xff] }
  0xf2   :  { %v1153_v58 = vld [vmem:[#allocation8 + $0x1988] sm:$0xff]  ;;  %1650 = vmatpush.msrb.mxu1 %v1001_v57  ;;  %v506_v57 = vld [vmem:[#allocation8 + $0x550] sm:$0xff] }
  0xf3   :  { %v1281_v59 = vld [vmem:[#allocation8 + $0x1d88] sm:$0xff]  ;;  %1667 = vmatpush.msrb.mxu2 %v1153_v58  ;;  %v658_v58 = vld [vmem:[#allocation8 + $0xa10] sm:$0xff] }
  0xf4   :  { %v865_v60 = vld [vmem:[#allocation8 + $0x1088] sm:$0xff]  ;;  %1687 = vmatpush.msrb.mxu3 %v1281_v59  ;;  %v786_v59 = vld [vmem:[#allocation8 + $0xe10] sm:$0xff] }
  0xf5   :  { %v993_v61 = vld [vmem:[#allocation8 + $0x1488] sm:$0xff]  ;;  %1631 = vmatpush.msrb.mxu0 %v865_v60  ;;  %v370_v60 = vld [vmem:[#allocation8 + $0x110] sm:$0xff] }
  0xf6   :  { %v1145_v62 = vld [vmem:[#allocation8 + $0x1948] sm:$0xff]  ;;  %1651 = vmatpush.msrb.mxu1 %v993_v61  ;;  %v498_v61 = vld [vmem:[#allocation8 + $0x510] sm:$0xff] }
  0xf7   :  { %v1273_v63 = vld [vmem:[#allocation8 + $0x1d48] sm:$0xff]  ;;  %1668 = vmatpush.msrb.mxu2 %v1145_v62  ;;  %v650_v62 = vld [vmem:[#allocation8 + $0x9d0] sm:$0xff] }
  0xf8   :  { %v857_v0 = vld [vmem:[#allocation8 + $0x1048] sm:$0xff]  ;;  %1688 = vmatpush.msrb.mxu3 %v1273_v63  ;;  %v778_v63 = vld [vmem:[#allocation8 + $0xdd0] sm:$0xff] }
  0xf9   :  { %v985_v1 = vld [vmem:[#allocation8 + $0x1448] sm:$0xff]  ;;  %1632 = vmatpush.msrb.mxu0 %v857_v0  ;;  %v362_v0 = vld [vmem:[#allocation8 + $0xd0] sm:$0xff] }
  0xfa   :  { %v1137_v2 = vld [vmem:[#allocation8 + $0x1908] sm:$0xff]  ;;  %1652 = vmatpush.msrb.mxu1 %v985_v1  ;;  %v490_v1 = vld [vmem:[#allocation8 + $0x4d0] sm:$0xff] }
  0xfb   :  { %v1265_v3 = vld [vmem:[#allocation8 + $0x1d08] sm:$0xff]  ;;  %1669 = vmatpush.msrb.mxu2 %v1137_v2  ;;  %v642_v2 = vld [vmem:[#allocation8 + $0x990] sm:$0xff] }
  0xfc   :  { %v849_v4 = vld [vmem:[#allocation8 + $0x1008] sm:$0xff]  ;;  %1689 = vmatpush.msrb.mxu3 %v1265_v3  ;;  %v770_v3 = vld [vmem:[#allocation8 + $0xd90] sm:$0xff] }
  0xfd   :  { %v977_v5 = vld [vmem:[#allocation8 + $0x1408] sm:$0xff]  ;;  %1633 = vmatpush.msrb.mxu0 %v849_v4  ;;  %v354_v4 = vld [vmem:[#allocation8 + $0x90] sm:$0xff] }
  0xfe   :  { %v1129_v6 = vld [vmem:[#allocation8 + $0x18c8] sm:$0xff]  ;;  %1653 = vmatpush.msrb.mxu1 %v977_v5  ;;  %1634 = vmatmul.f32.vlgmr.msrb.gmra.mxu0 %v2982_v22  ;;  %v482_v5 = vld [vmem:[#allocation8 + $0x490] sm:$0xff] }
  0xff   :  { %v1257_v7 = vld [vmem:[#allocation8 + $0x1cc8] sm:$0xff]  ;;  %1670 = vmatpush.msrb.mxu2 %v1129_v6  ;;  %1654 = vmatmul.f32.vlgmr.msrb.gmra.mxu1 %v2987_v28  ;;  %v634_v6 = vld [vmem:[#allocation8 + $0x950] sm:$0xff] }
 0x100   :  { %1690 = vmatpush.msrb.mxu3 %v1257_v7  ;;  %v1121_v10 = vld [vmem:[#allocation8 + $0x1888] sm:$0xff]  ;;  %1698 = vmatpush.msra.mxu0 %v458_v8  ;;  %v762_v7 = vld [vmem:[#allocation8 + $0xd50] sm:$0xff] }
 0x101   :  { %v1249_v11 = vld [vmem:[#allocation8 + $0x1c88] sm:$0xff]  ;;  %1718 = vmatpush.msra.mxu1 %v586_v9  ;;  %1671 = vmatpush.msrb.mxu2 %v1121_v10  ;;  %v346_v8 = vld [vmem:[#allocation8 + $0x50] sm:$0xff] }
 0x102   :  { %v1113_v14 = vld [vmem:[#allocation8 + $0x1848] sm:$0xff]  ;;  %1691 = vmatpush.msrb.mxu3 %v1249_v11  ;;  %1699 = vmatpush.msra.mxu0 %v450_v12  ;;  %v474_v9 = vld [vmem:[#allocation8 + $0x450] sm:$0xff] }
 0x103   :  { %v1241_v15 = vld [vmem:[#allocation8 + $0x1c48] sm:$0xff]  ;;  %1719 = vmatpush.msra.mxu1 %v578_v13  ;;  %1672 = vmatpush.msrb.mxu2 %v1113_v14  ;;  %v626_v10 = vld [vmem:[#allocation8 + $0x910] sm:$0xff] }
 0x104   :  { %v1105_v18 = vld [vmem:[#allocation8 + $0x1808] sm:$0xff]  ;;  %1692 = vmatpush.msrb.mxu3 %v1241_v15  ;;  %1700 = vmatpush.msra.mxu0 %v442_v16  ;;  %v754_v11 = vld [vmem:[#allocation8 + $0xd10] sm:$0xff] }
 0x105   :  { %v1233_v20 = vld [vmem:[#allocation8 + $0x1c08] sm:$0xff]  ;;  %1720 = vmatpush.msra.mxu1 %v570_v17  ;;  %1673 = vmatpush.msrb.mxu2 %v1105_v18  ;;  %v338_v12 = vld [vmem:[#allocation8 + $0x10] sm:$0xff] }
 0x106   :  { %1693 = vmatpush.msrb.mxu3 %v1233_v20  ;;  %1674 = vmatmul.f32.vlgmr.msrb.gmra.mxu2 %v2980_v19  ;;  %v466_v13 = vld [vmem:[#allocation8 + $0x410] sm:$0xff] }
 0x107   :  { %1694 = vmatmul.f32.vlgmr.msrb.gmra.mxu3 %v2984_v25  ;;  %1701 = vmatpush.msra.mxu0 %v434_v21  ;;  %v618_v14 = vld [vmem:[#allocation8 + $0x8d0] sm:$0xff] }
 0x108   :  { %1721 = vmatpush.msra.mxu1 %v562_v23  ;;  %1738 = vmatpush.msra.mxu2 %v714_v24  ;;  %v746_v15 = vld [vmem:[#allocation8 + $0xcd0] sm:$0xff] }
 0x109   :  { %1758 = vmatpush.msra.mxu3 %v842_v26  ;;  %1702 = vmatpush.msra.mxu0 %v426_v27  ;;  %v970_v16 = vld [vmem:[#allocation8 + $0x13d0] sm:$0xff] }
 0x10a   :  { %1722 = vmatpush.msra.mxu1 %v554_v29  ;;  %1739 = vmatpush.msra.mxu2 %v706_v30  ;;  %v1098_v17 = vld [vmem:[#allocation8 + $0x17d0] sm:$0xff] }
 0x10b   :  { %1759 = vmatpush.msra.mxu3 %v834_v31  ;;  %1703 = vmatpush.msra.mxu0 %v418_v32  ;;  %v610_v18 = vld [vmem:[#allocation8 + $0x890] sm:$0xff] }
 0x10c   :  { %1723 = vmatpush.msra.mxu1 %v546_v33  ;;  %1740 = vmatpush.msra.mxu2 %v698_v34  ;;  %v738_v20 = vld [vmem:[#allocation8 + $0xc90] sm:$0xff] }
 0x10d   :  { %1760 = vmatpush.msra.mxu3 %v826_v35  ;;  %1704 = vmatpush.msra.mxu0 %v410_v36  ;;  %v962_v21 = vld [vmem:[#allocation8 + $0x1390] sm:$0xff] }
 0x10e   :  { %1724 = vmatpush.msra.mxu1 %v538_v37  ;;  %1741 = vmatpush.msra.mxu2 %v690_v38  ;;  %v1090_v23 = vld [vmem:[#allocation8 + $0x1790] sm:$0xff] }
 0x10f   :  { %1761 = vmatpush.msra.mxu3 %v818_v39  ;;  %1705 = vmatpush.msra.mxu0 %v402_v42  ;;  %v602_v24 = vld [vmem:[#allocation8 + $0x850] sm:$0xff] }
 0x110   :  { %1725 = vmatpush.msra.mxu1 %v530_v43  ;;  %1742 = vmatpush.msra.mxu2 %v682_v44  ;;  %v730_v26 = vld [vmem:[#allocation8 + $0xc50] sm:$0xff] }
 0x111   :  { %1762 = vmatpush.msra.mxu3 %v810_v45  ;;  %1706 = vmatpush.msra.mxu0 %v394_v46  ;;  %v954_v27 = vld [vmem:[#allocation8 + $0x1350] sm:$0xff] }
 0x112   :  { %1726 = vmatpush.msra.mxu1 %v522_v47  ;;  %1743 = vmatpush.msra.mxu2 %v674_v48  ;;  %v1082_v29 = vld [vmem:[#allocation8 + $0x1750] sm:$0xff] }
 0x113   :  { %1763 = vmatpush.msra.mxu3 %v802_v49  ;;  %1707 = vmatpush.msra.mxu0 %v386_v50  ;;  %v594_v30 = vld [vmem:[#allocation8 + $0x810] sm:$0xff] }
 0x114   :  { %1727 = vmatpush.msra.mxu1 %v514_v51  ;;  %1744 = vmatpush.msra.mxu2 %v666_v52  ;;  %v722_v31 = vld [vmem:[#allocation8 + $0xc10] sm:$0xff] }
 0x115   :  { %1764 = vmatpush.msra.mxu3 %v794_v53  ;;  %1708 = vmatpush.msra.mxu0 %v378_v56  ;;  %v946_v32 = vld [vmem:[#allocation8 + $0x1310] sm:$0xff] }
 0x116   :  { %1728 = vmatpush.msra.mxu1 %v506_v57  ;;  %1745 = vmatpush.msra.mxu2 %v658_v58  ;;  %v1074_v33 = vld [vmem:[#allocation8 + $0x1710] sm:$0xff]  ;;  %v3004_v58 = vld [vmem:[#allocation10] sm:$0xff] }
 0x117   :  { %1765 = vmatpush.msra.mxu3 %v786_v59  ;;  %1709 = vmatpush.msra.mxu0 %v370_v60  ;;  %v1226_v34 = vld [vmem:[#allocation8 + $0x1bd0] sm:$0xff] }
 0x118   :  { %1729 = vmatpush.msra.mxu1 %v498_v61  ;;  %1746 = vmatpush.msra.mxu2 %v650_v62  ;;  %v1354_v35 = vld [vmem:[#allocation8 + $0x1fd0] sm:$0xff] }
 0x119   :  { %1766 = vmatpush.msra.mxu3 %v778_v63  ;;  %1710 = vmatpush.msra.mxu0 %v362_v0  ;;  %v938_v36 = vld [vmem:[#allocation8 + $0x12d0] sm:$0xff] }
 0x11a   :  { %1730 = vmatpush.msra.mxu1 %v490_v1  ;;  %1747 = vmatpush.msra.mxu2 %v642_v2  ;;  %v1066_v37 = vld [vmem:[#allocation8 + $0x16d0] sm:$0xff]  ;;  %v1362_v1 = vperm.slane %v3004_v58, 0 }
 0x11b   :  { %1767 = vmatpush.msra.mxu3 %v770_v3  ;;  %1711 = vmatpush.msra.mxu0 %v354_v4  ;;  %v1218_v38 = vld [vmem:[#allocation8 + $0x1b90] sm:$0xff] }
 0x11c   :  { %1731 = vmatpush.msra.mxu1 %v482_v5  ;;  %1748 = vmatpush.msra.mxu2 %v634_v6  ;;  %v1346_v39 = vld [vmem:[#allocation8 + $0x1f90] sm:$0xff] }
 0x11d   :  { %1768 = vmatpush.msra.mxu3 %v762_v7  ;;  %1712 = vmatpush.msra.mxu0 %v346_v8  ;;  %v930_v42 = vld [vmem:[#allocation8 + $0x1290] sm:$0xff] }
 0x11e   :  { %1732 = vmatpush.msra.mxu1 %v474_v9  ;;  %1749 = vmatpush.msra.mxu2 %v626_v10  ;;  %v1058_v43 = vld [vmem:[#allocation8 + $0x1690] sm:$0xff] }
 0x11f   :  { %1769 = vmatpush.msra.mxu3 %v754_v11  ;;  %1713 = vmatpush.msra.mxu0 %v338_v12  ;;  %v1210_v44 = vld [vmem:[#allocation8 + $0x1b50] sm:$0xff] }
 0x120   :  { %1733 = vmatpush.msra.mxu1 %v466_v13  ;;  %1750 = vmatpush.msra.mxu2 %v618_v14  ;;  %v1338_v45 = vld [vmem:[#allocation8 + $0x1f50] sm:$0xff] }
 0x121   :  { %1770 = vmatpush.msra.mxu3 %v746_v15  ;;  %1714 = vmatmul.f32.vlgmr.msra.gmra.mxu0 %v2962_v40  ;;  %v922_v46 = vld [vmem:[#allocation8 + $0x1250] sm:$0xff] }
 0x122   :  { %1734 = vmatmul.f32.vlgmr.msra.gmra.mxu1 %v2964_v41  ;;  %1778 = vmatpush.msrb.mxu0 %v970_v16  ;;  %v1050_v47 = vld [vmem:[#allocation8 + $0x1650] sm:$0xff]  ;;  %v1395_v8 = vpop.f32.mrf.mxu0 }
 0x123   :  { %1798 = vmatpush.msrb.mxu1 %v1098_v17  ;;  %1751 = vmatpush.msra.mxu2 %v610_v18  ;;  %v1202_v48 = vld [vmem:[#allocation8 + $0x1b10] sm:$0xff]  ;;  %v1415_v9 = vpop.f32.mrf.mxu1  ;;  %v1396_v12 = vadd.f32 %v1395_v8, %v1362_v1  ;;  %v411_v8 = vld [vmem:[#allocation8 + $0x258] sm:$0xff] }
 0x124   :  { %1771 = vmatpush.msra.mxu3 %v738_v20  ;;  %1779 = vmatpush.msrb.mxu0 %v962_v21  ;;  %v1330_v49 = vld [vmem:[#allocation8 + $0x1f10] sm:$0xff] }
 0x125   :  { %1799 = vmatpush.msrb.mxu1 %v1090_v23  ;;  %1752 = vmatpush.msra.mxu2 %v602_v24  ;;  %v914_v50 = vld [vmem:[#allocation8 + $0x1210] sm:$0xff]  ;;  %v1416_v17 = vadd.f32 %v1415_v9, %v1396_v12  ;;  %v539_v9 = vld [vmem:[#allocation8 + $0x658] sm:$0xff] }
 0x126   :  { %1772 = vmatpush.msra.mxu3 %v730_v26  ;;  %1780 = vmatpush.msrb.mxu0 %v954_v27  ;;  %v1042_v51 = vld [vmem:[#allocation8 + $0x1610] sm:$0xff]  ;;  %v819_v12 = vld [vmem:[#allocation8 + $0xf18] sm:$0xff] }
 0x127   :  { %1800 = vmatpush.msrb.mxu1 %v1082_v29  ;;  %1753 = vmatpush.msra.mxu2 %v594_v30  ;;  %v1194_v52 = vld [vmem:[#allocation8 + $0x1ad0] sm:$0xff] }
 0x128   :  { %1773 = vmatpush.msra.mxu3 %v722_v31  ;;  %1754 = vmatmul.f32.vlgmr.msra.gmra.mxu2 %v2970_v54  ;;  %v1322_v53 = vld [vmem:[#allocation8 + $0x1ed0] sm:$0xff] }
 0x129   :  { %1774 = vmatmul.f32.vlgmr.msra.gmra.mxu3 %v2972_v55  ;;  %1781 = vmatpush.msrb.mxu0 %v946_v32  ;;  %v906_v56 = vld [vmem:[#allocation8 + $0x11d0] sm:$0xff] }
 0x12a   :  { %1801 = vmatpush.msrb.mxu1 %v1074_v33  ;;  %1818 = vmatpush.msrb.mxu2 %v1226_v34  ;;  %v1034_v57 = vld [vmem:[#allocation8 + $0x15d0] sm:$0xff]  ;;  %v459_v34 = vld [vmem:[#allocation8 + $0x3d8] sm:$0xff] }
 0x12b   :  { %1838 = vmatpush.msrb.mxu3 %v1354_v35  ;;  %1782 = vmatpush.msrb.mxu0 %v938_v36  ;;  %v1186_v59 = vld [vmem:[#allocation8 + $0x1a90] sm:$0xff]  ;;  %v587_v35 = vld [vmem:[#allocation8 + $0x7d8] sm:$0xff] }
 0x12c   :  { %1802 = vmatpush.msrb.mxu1 %v1066_v37  ;;  %1819 = vmatpush.msrb.mxu2 %v1218_v38  ;;  %v1314_v60 = vld [vmem:[#allocation8 + $0x1e90] sm:$0xff]  ;;  %v451_v38 = vld [vmem:[#allocation8 + $0x398] sm:$0xff] }
 0x12d   :  { %1839 = vmatpush.msrb.mxu3 %v1346_v39  ;;  %1783 = vmatpush.msrb.mxu0 %v930_v42  ;;  %v898_v61 = vld [vmem:[#allocation8 + $0x1190] sm:$0xff]  ;;  %v579_v39 = vld [vmem:[#allocation8 + $0x798] sm:$0xff] }
 0x12e   :  { %1803 = vmatpush.msrb.mxu1 %v1058_v43  ;;  %1820 = vmatpush.msrb.mxu2 %v1210_v44  ;;  %v1026_v62 = vld [vmem:[#allocation8 + $0x1590] sm:$0xff] }
 0x12f   :  { %1840 = vmatpush.msrb.mxu3 %v1338_v45  ;;  %1784 = vmatpush.msrb.mxu0 %v922_v46  ;;  %v1178_v63 = vld [vmem:[#allocation8 + $0x1a50] sm:$0xff]  ;;  %v1435_v42 = vpop.f32.mrf.mxu2  ;;  %v1455_v43 = vpop.f32.mrf.mxu3 }
 0x130   :  { %1804 = vmatpush.msrb.mxu1 %v1050_v47  ;;  %1821 = vmatpush.msrb.mxu2 %v1202_v48  ;;  %v1306_v0 = vld [vmem:[#allocation8 + $0x1e50] sm:$0xff]  ;;  %v1436_v46 = vadd.f32 %v1435_v42, %v1416_v17  ;;  %v443_v47 = vld [vmem:[#allocation8 + $0x358] sm:$0xff] }
 0x131   :  { %1841 = vmatpush.msrb.mxu3 %v1330_v49  ;;  %1785 = vmatpush.msrb.mxu0 %v914_v50  ;;  %v890_v2 = vld [vmem:[#allocation8 + $0x1150] sm:$0xff]  ;;  %v571_v48 = vld [vmem:[#allocation8 + $0x758] sm:$0xff] }
 0x132   :  { %1805 = vmatpush.msrb.mxu1 %v1042_v51  ;;  %1822 = vmatpush.msrb.mxu2 %v1194_v52  ;;  %v1018_v3 = vld [vmem:[#allocation8 + $0x1550] sm:$0xff]  ;;  %v1456_v51 = vadd.f32 %v1455_v43, %v1436_v46  ;;  %v435_v52 = vld [vmem:[#allocation8 + $0x318] sm:$0xff] }
 0x133   :  { %1842 = vmatpush.msrb.mxu3 %v1322_v53  ;;  %1786 = vmatpush.msrb.mxu0 %v906_v56  ;;  %v1170_v4 = vld [vmem:[#allocation8 + $0x1a10] sm:$0xff]  ;;  %v563_v53 = vld [vmem:[#allocation8 + $0x718] sm:$0xff] }
 0x134   :  { %1806 = vmatpush.msrb.mxu1 %v1034_v57  ;;  %1823 = vmatpush.msrb.mxu2 %v1186_v59  ;;  %v1298_v5 = vld [vmem:[#allocation8 + $0x1e10] sm:$0xff]  ;;  %v1475_v56 = vpop.f32.mrf.mxu0  ;;  %v715_v57 = vld [vmem:[#allocation8 + $0xbd8] sm:$0xff] }
 0x135   :  { %1843 = vmatpush.msrb.mxu3 %v1314_v60  ;;  %1787 = vmatpush.msrb.mxu0 %v898_v61  ;;  %v882_v6 = vld [vmem:[#allocation8 + $0x1110] sm:$0xff]  ;;  %v843_v59 = vld [vmem:[#allocation8 + $0xfd8] sm:$0xff]  ;;  %v1476_v60 = vadd.f32 %v1475_v56, %v1456_v51 }
 0x136   :  { %1807 = vmatpush.msrb.mxu1 %v1026_v62  ;;  %1824 = vmatpush.msrb.mxu2 %v1178_v63  ;;  %v1010_v7 = vld [vmem:[#allocation8 + $0x1510] sm:$0xff]  ;;  %v427_v61 = vld [vmem:[#allocation8 + $0x2d8] sm:$0xff] }
 0x137   :  { %1844 = vmatpush.msrb.mxu3 %v1306_v0  ;;  %1788 = vmatpush.msrb.mxu0 %v890_v2  ;;  %v1162_v10 = vld [vmem:[#allocation8 + $0x19d0] sm:$0xff]  ;;  %v555_v62 = vld [vmem:[#allocation8 + $0x6d8] sm:$0xff]  ;;  %v1495_v1 = vpop.f32.mrf.mxu1 }
 0x138   :  { %1808 = vmatpush.msrb.mxu1 %v1018_v3  ;;  %v1290_v11 = vld [vmem:[#allocation8 + $0x1dd0] sm:$0xff]  ;;  %1825 = vmatpush.msrb.mxu2 %v1170_v4  ;;  %v707_v63 = vld [vmem:[#allocation8 + $0xb98] sm:$0xff]  ;;  %v1496_v4 = vadd.f32 %v1495_v1, %v1476_v60 }
 0x139   :  { %1845 = vmatpush.msrb.mxu3 %v1298_v5  ;;  %v874_v13 = vld [vmem:[#allocation8 + $0x10d0] sm:$0xff]  ;;  %1789 = vmatpush.msrb.mxu0 %v882_v6  ;;  %v835_v0 = vld [vmem:[#allocation8 + $0xf98] sm:$0xff]  ;;  %v1515_v5 = vpop.f32.mrf.mxu2 }
 0x13a   :  { %v1002_v14 = vld [vmem:[#allocation8 + $0x14d0] sm:$0xff]  ;;  %1809 = vmatpush.msrb.mxu1 %v1010_v7  ;;  %1826 = vmatpush.msrb.mxu2 %v1162_v10  ;;  %v419_v2 = vld [vmem:[#allocation8 + $0x298] sm:$0xff]  ;;  %v1516_v10 = vadd.f32 %v1515_v5, %v1496_v4 }
 0x13b   :  { %v1154_v15 = vld [vmem:[#allocation8 + $0x1990] sm:$0xff]  ;;  %1846 = vmatpush.msrb.mxu3 %v1290_v11  ;;  %1790 = vmatpush.msrb.mxu0 %v874_v13  ;;  %v547_v3 = vld [vmem:[#allocation8 + $0x698] sm:$0xff]  ;;  %v1535_v13 = vpop.f32.mrf.mxu3 }
 0x13c   :  { %v1282_v16 = vld [vmem:[#allocation8 + $0x1d90] sm:$0xff]  ;;  %1810 = vmatpush.msrb.mxu1 %v1002_v14  ;;  %1827 = vmatpush.msrb.mxu2 %v1154_v15  ;;  %v699_v6 = vld [vmem:[#allocation8 + $0xb58] sm:$0xff] }
 0x13d   :  { %v866_v18 = vld [vmem:[#allocation8 + $0x1090] sm:$0xff]  ;;  %1847 = vmatpush.msrb.mxu3 %v1282_v16  ;;  %v827_v7 = vld [vmem:[#allocation8 + $0xf58] sm:$0xff]  ;;  %v3011_v16 = vadd.f32 %v1535_v13, %v1516_v10 }
 0x13e   :  { %v994_v20 = vld [vmem:[#allocation8 + $0x1490] sm:$0xff]  ;;  %1791 = vmatpush.msrb.mxu0 %v866_v18  ;;  %v691_v11 = vld [vmem:[#allocation8 + $0xb18] sm:$0xff] }
 0x13f   :  { %v1146_v21 = vld [vmem:[#allocation8 + $0x1950] sm:$0xff]  ;;  %1811 = vmatpush.msrb.mxu1 %v994_v20  ;;  %v403_v14 = vld [vmem:[#allocation8 + $0x218] sm:$0xff] }
 0x140   :  { %v1274_v23 = vld [vmem:[#allocation8 + $0x1d50] sm:$0xff]  ;;  %1828 = vmatpush.msrb.mxu2 %v1146_v21  ;;  %v531_v15 = vld [vmem:[#allocation8 + $0x618] sm:$0xff] }
 0x141   :  { %v858_v24 = vld [vmem:[#allocation8 + $0x1050] sm:$0xff]  ;;  %1848 = vmatpush.msrb.mxu3 %v1274_v23  ;;  %v683_v17 = vld [vmem:[#allocation8 + $0xad8] sm:$0xff] }
 0x142   :  { %v986_v26 = vld [vmem:[#allocation8 + $0x1450] sm:$0xff]  ;;  %1792 = vmatpush.msrb.mxu0 %v858_v24  ;;  %v811_v18 = vld [vmem:[#allocation8 + $0xed8] sm:$0xff] }
 0x143   :  { %v1138_v27 = vld [vmem:[#allocation8 + $0x1910] sm:$0xff]  ;;  %1812 = vmatpush.msrb.mxu1 %v986_v26  ;;  %v395_v20 = vld [vmem:[#allocation8 + $0x1d8] sm:$0xff] }
 0x144   :  { %v1266_v29 = vld [vmem:[#allocation8 + $0x1d10] sm:$0xff]  ;;  %1829 = vmatpush.msrb.mxu2 %v1138_v27  ;;  %v523_v21 = vld [vmem:[#allocation8 + $0x5d8] sm:$0xff] }
 0x145   :  { %v850_v30 = vld [vmem:[#allocation8 + $0x1010] sm:$0xff]  ;;  %1849 = vmatpush.msrb.mxu3 %v1266_v29  ;;  %v675_v23 = vld [vmem:[#allocation8 + $0xa98] sm:$0xff] }
 0x146   :  { %v978_v31 = vld [vmem:[#allocation8 + $0x1410] sm:$0xff]  ;;  %1793 = vmatpush.msrb.mxu0 %v850_v30  ;;  %v803_v24 = vld [vmem:[#allocation8 + $0xe98] sm:$0xff] }
 0x147   :  { %v1130_v32 = vld [vmem:[#allocation8 + $0x18d0] sm:$0xff]  ;;  %1813 = vmatpush.msrb.mxu1 %v978_v31  ;;  %1794 = vmatmul.f32.vlgmr.msrb.gmra.mxu0 %v2982_v22  ;;  %v387_v26 = vld [vmem:[#allocation8 + $0x198] sm:$0xff] }
 0x148   :  { %v1258_v33 = vld [vmem:[#allocation8 + $0x1cd0] sm:$0xff]  ;;  %1830 = vmatpush.msrb.mxu2 %v1130_v32  ;;  %1814 = vmatmul.f32.vlgmr.msrb.gmra.mxu1 %v2987_v28  ;;  %v515_v27 = vld [vmem:[#allocation8 + $0x598] sm:$0xff] }
 0x149   :  { %1850 = vmatpush.msrb.mxu3 %v1258_v33  ;;  %v1122_v36 = vld [vmem:[#allocation8 + $0x1890] sm:$0xff]  ;;  %1858 = vmatpush.msra.mxu0 %v459_v34  ;;  %v667_v29 = vld [vmem:[#allocation8 + $0xa58] sm:$0xff] }
 0x14a   :  { %v1250_v37 = vld [vmem:[#allocation8 + $0x1c90] sm:$0xff]  ;;  %1878 = vmatpush.msra.mxu1 %v587_v35  ;;  %1831 = vmatpush.msrb.mxu2 %v1122_v36  ;;  %v795_v30 = vld [vmem:[#allocation8 + $0xe58] sm:$0xff]  ;;  %v1363_v35 = vperm.slane %v3004_v58, 1 }
 0x14b   :  { %v1114_v44 = vld [vmem:[#allocation8 + $0x1850] sm:$0xff]  ;;  %1851 = vmatpush.msrb.mxu3 %v1250_v37  ;;  %1859 = vmatpush.msra.mxu0 %v451_v38  ;;  %v379_v31 = vld [vmem:[#allocation8 + $0x158] sm:$0xff] }
 0x14c   :  { %v1242_v45 = vld [vmem:[#allocation8 + $0x1c50] sm:$0xff]  ;;  %1879 = vmatpush.msra.mxu1 %v579_v39  ;;  %1832 = vmatpush.msrb.mxu2 %v1114_v44  ;;  %v507_v32 = vld [vmem:[#allocation8 + $0x558] sm:$0xff]  ;;  %v1555_v44 = vpop.f32.mrf.mxu0 }
 0x14d   :  { %v1106_v49 = vld [vmem:[#allocation8 + $0x1810] sm:$0xff]  ;;  %1852 = vmatpush.msrb.mxu3 %v1242_v45  ;;  %1860 = vmatpush.msra.mxu0 %v443_v47  ;;  %v659_v33 = vld [vmem:[#allocation8 + $0xa18] sm:$0xff]  ;;  %v1556_v47 = vadd.f32 %v1555_v44, %v1363_v35 }
 0x14e   :  { %v1234_v50 = vld [vmem:[#allocation8 + $0x1c10] sm:$0xff]  ;;  %1880 = vmatpush.msra.mxu1 %v571_v48  ;;  %1833 = vmatpush.msrb.mxu2 %v1106_v49  ;;  %v787_v34 = vld [vmem:[#allocation8 + $0xe18] sm:$0xff] }
 0x14f   :  { %1853 = vmatpush.msrb.mxu3 %v1234_v50  ;;  %1834 = vmatmul.f32.vlgmr.msrb.gmra.mxu2 %v2980_v19  ;;  %v371_v36 = vld [vmem:[#allocation8 + $0x118] sm:$0xff]  ;;  %v1575_v50 = vpop.f32.mrf.mxu1 }
 0x150   :  { %1854 = vmatmul.f32.vlgmr.msrb.gmra.mxu3 %v2984_v25  ;;  %1861 = vmatpush.msra.mxu0 %v435_v52  ;;  %v499_v37 = vld [vmem:[#allocation8 + $0x518] sm:$0xff] }
 0x151   :  { %1881 = vmatpush.msra.mxu1 %v563_v53  ;;  %1898 = vmatpush.msra.mxu2 %v715_v57  ;;  %v651_v38 = vld [vmem:[#allocation8 + $0x9d8] sm:$0xff]  ;;  %v1576_v53 = vadd.f32 %v1575_v50, %v1556_v47 }
 0x152   :  { %1918 = vmatpush.msra.mxu3 %v843_v59  ;;  %1862 = vmatpush.msra.mxu0 %v427_v61  ;;  %v779_v39 = vld [vmem:[#allocation8 + $0xdd8] sm:$0xff] }
 0x153   :  { %1882 = vmatpush.msra.mxu1 %v555_v62  ;;  %1899 = vmatpush.msra.mxu2 %v707_v63  ;;  %v363_v42 = vld [vmem:[#allocation8 + $0xd8] sm:$0xff] }
 0x154   :  { %1919 = vmatpush.msra.mxu3 %v835_v0  ;;  %1863 = vmatpush.msra.mxu0 %v419_v2  ;;  %v491_v43 = vld [vmem:[#allocation8 + $0x4d8] sm:$0xff] }
 0x155   :  { %1883 = vmatpush.msra.mxu1 %v547_v3  ;;  %1900 = vmatpush.msra.mxu2 %v699_v6  ;;  %v643_v45 = vld [vmem:[#allocation8 + $0x998] sm:$0xff] }
 0x156   :  { %1920 = vmatpush.msra.mxu3 %v827_v7  ;;  %1864 = vmatpush.msra.mxu0 %v411_v8  ;;  %v771_v46 = vld [vmem:[#allocation8 + $0xd98] sm:$0xff] }
 0x157   :  { %1884 = vmatpush.msra.mxu1 %v539_v9  ;;  %1901 = vmatpush.msra.mxu2 %v691_v11  ;;  %v355_v48 = vld [vmem:[#allocation8 + $0x98] sm:$0xff]  ;;  %v1595_v11 = vpop.f32.mrf.mxu2 }
 0x158   :  { %1921 = vmatpush.msra.mxu3 %v819_v12  ;;  %1865 = vmatpush.msra.mxu0 %v403_v14  ;;  %v483_v49 = vld [vmem:[#allocation8 + $0x498] sm:$0xff]  ;;  %v1596_v14 = vadd.f32 %v1595_v11, %v1576_v53 }
 0x159   :  { %1885 = vmatpush.msra.mxu1 %v531_v15  ;;  %1902 = vmatpush.msra.mxu2 %v683_v17  ;;  %v635_v51 = vld [vmem:[#allocation8 + $0x958] sm:$0xff]  ;;  %v1615_v15 = vpop.f32.mrf.mxu3 }
 0x15a   :  { %1922 = vmatpush.msra.mxu3 %v811_v18  ;;  %1866 = vmatpush.msra.mxu0 %v395_v20  ;;  %v763_v52 = vld [vmem:[#allocation8 + $0xd58] sm:$0xff]  ;;  %v3016_v20 = vadd.f32 %v1615_v15, %v1596_v14 }
 0x15b   :  { %1886 = vmatpush.msra.mxu1 %v523_v21  ;;  %1903 = vmatpush.msra.mxu2 %v675_v23  ;;  %v347_v56 = vld [vmem:[#allocation8 + $0x58] sm:$0xff] }
 0x15c   :  { %1923 = vmatpush.msra.mxu3 %v803_v24  ;;  %1867 = vmatpush.msra.mxu0 %v387_v26  ;;  %v475_v57 = vld [vmem:[#allocation8 + $0x458] sm:$0xff] }
 0x15d   :  { %1887 = vmatpush.msra.mxu1 %v515_v27  ;;  %1904 = vmatpush.msra.mxu2 %v667_v29  ;;  %v627_v59 = vld [vmem:[#allocation8 + $0x918] sm:$0xff] }
 0x15e   :  { %1924 = vmatpush.msra.mxu3 %v795_v30  ;;  %1868 = vmatpush.msra.mxu0 %v379_v31  ;;  %v755_v60 = vld [vmem:[#allocation8 + $0xd18] sm:$0xff] }
 0x15f   :  { %1888 = vmatpush.msra.mxu1 %v507_v32  ;;  %1905 = vmatpush.msra.mxu2 %v659_v33  ;;  %v339_v61 = vld [vmem:[#allocation8 + $0x18] sm:$0xff] }
 0x160   :  { %1925 = vmatpush.msra.mxu3 %v787_v34  ;;  %1869 = vmatpush.msra.mxu0 %v371_v36  ;;  %v467_v62 = vld [vmem:[#allocation8 + $0x418] sm:$0xff] }
 0x161   :  { %1889 = vmatpush.msra.mxu1 %v499_v37  ;;  %1906 = vmatpush.msra.mxu2 %v651_v38  ;;  %v619_v63 = vld [vmem:[#allocation8 + $0x8d8] sm:$0xff] }
 0x162   :  { %1926 = vmatpush.msra.mxu3 %v779_v39  ;;  %1870 = vmatpush.msra.mxu0 %v363_v42  ;;  %v747_v0 = vld [vmem:[#allocation8 + $0xcd8] sm:$0xff] }
 0x163   :  { %1890 = vmatpush.msra.mxu1 %v491_v43  ;;  %1907 = vmatpush.msra.mxu2 %v643_v45  ;;  %v971_v1 = vld [vmem:[#allocation8 + $0x13d8] sm:$0xff] }
 0x164   :  { %1927 = vmatpush.msra.mxu3 %v771_v46  ;;  %1871 = vmatpush.msra.mxu0 %v355_v48  ;;  %v1099_v2 = vld [vmem:[#allocation8 + $0x17d8] sm:$0xff] }
 0x165   :  { %1891 = vmatpush.msra.mxu1 %v483_v49  ;;  %1908 = vmatpush.msra.mxu2 %v635_v51  ;;  %v611_v3 = vld [vmem:[#allocation8 + $0x898] sm:$0xff] }
 0x166   :  { %1928 = vmatpush.msra.mxu3 %v763_v52  ;;  %1872 = vmatpush.msra.mxu0 %v347_v56  ;;  %v739_v4 = vld [vmem:[#allocation8 + $0xc98] sm:$0xff] }
 0x167   :  { %1892 = vmatpush.msra.mxu1 %v475_v57  ;;  %1909 = vmatpush.msra.mxu2 %v627_v59  ;;  %v963_v5 = vld [vmem:[#allocation8 + $0x1398] sm:$0xff] }
 0x168   :  { %1929 = vmatpush.msra.mxu3 %v755_v60  ;;  %1873 = vmatpush.msra.mxu0 %v339_v61  ;;  %v1091_v6 = vld [vmem:[#allocation8 + $0x1798] sm:$0xff] }
 0x169   :  { %1893 = vmatpush.msra.mxu1 %v467_v62  ;;  %1910 = vmatpush.msra.mxu2 %v619_v63  ;;  %v603_v7 = vld [vmem:[#allocation8 + $0x858] sm:$0xff] }
 0x16a   :  { %1930 = vmatpush.msra.mxu3 %v747_v0  ;;  %1874 = vmatmul.f32.vlgmr.msra.gmra.mxu0 %v2962_v40  ;;  %v731_v8 = vld [vmem:[#allocation8 + $0xc58] sm:$0xff] }
 0x16b   :  { %1894 = vmatmul.f32.vlgmr.msra.gmra.mxu1 %v2964_v41  ;;  %1938 = vmatpush.msrb.mxu0 %v971_v1  ;;  %v955_v9 = vld [vmem:[#allocation8 + $0x1358] sm:$0xff] }
 0x16c   :  { %1958 = vmatpush.msrb.mxu1 %v1099_v2  ;;  %1911 = vmatpush.msra.mxu2 %v611_v3  ;;  %v1083_v10 = vld [vmem:[#allocation8 + $0x1758] sm:$0xff] }
 0x16d   :  { %1931 = vmatpush.msra.mxu3 %v739_v4  ;;  %1939 = vmatpush.msrb.mxu0 %v963_v5  ;;  %v595_v12 = vld [vmem:[#allocation8 + $0x818] sm:$0xff] }
 0x16e   :  { %1959 = vmatpush.msrb.mxu1 %v1091_v6  ;;  %v723_v13 = vld [vmem:[#allocation8 + $0xc18] sm:$0xff]  ;;  %1912 = vmatpush.msra.mxu2 %v603_v7 }
 0x16f   :  { %1932 = vmatpush.msra.mxu3 %v731_v8  ;;  %1940 = vmatpush.msrb.mxu0 %v955_v9  ;;  %v947_v17 = vld [vmem:[#allocation8 + $0x1318] sm:$0xff] }
 0x170   :  { %1960 = vmatpush.msrb.mxu1 %v1083_v10  ;;  %v1075_v18 = vld [vmem:[#allocation8 + $0x1718] sm:$0xff]  ;;  %1913 = vmatpush.msra.mxu2 %v595_v12 }
 0x171   :  { %1933 = vmatpush.msra.mxu3 %v723_v13  ;;  %v1227_v21 = vld [vmem:[#allocation8 + $0x1bd8] sm:$0xff]  ;;  %1914 = vmatmul.f32.vlgmr.msra.gmra.mxu2 %v2970_v54 }
 0x172   :  { %v1355_v23 = vld [vmem:[#allocation8 + $0x1fd8] sm:$0xff]  ;;  %1934 = vmatmul.f32.vlgmr.msra.gmra.mxu3 %v2972_v55  ;;  %1941 = vmatpush.msrb.mxu0 %v947_v17 }
 0x173   :  { %v939_v24 = vld [vmem:[#allocation8 + $0x12d8] sm:$0xff]  ;;  %1961 = vmatpush.msrb.mxu1 %v1075_v18  ;;  %1978 = vmatpush.msrb.mxu2 %v1227_v21  ;;  %v460_v21 = vld [vmem:[#allocation8 + $0x3e0] sm:$0xff] }
 0x174   :  { %v1067_v26 = vld [vmem:[#allocation8 + $0x16d8] sm:$0xff]  ;;  %1998 = vmatpush.msrb.mxu3 %v1355_v23  ;;  %1942 = vmatpush.msrb.mxu0 %v939_v24  ;;  %v588_v23 = vld [vmem:[#allocation8 + $0x7e0] sm:$0xff] }
 0x175   :  { %v1219_v27 = vld [vmem:[#allocation8 + $0x1b98] sm:$0xff]  ;;  %1962 = vmatpush.msrb.mxu1 %v1067_v26 }
 0x176   :  { %v1347_v29 = vld [vmem:[#allocation8 + $0x1f98] sm:$0xff]  ;;  %1979 = vmatpush.msrb.mxu2 %v1219_v27  ;;  %v452_v27 = vld [vmem:[#allocation8 + $0x3a0] sm:$0xff] }
 0x177   :  { %v931_v30 = vld [vmem:[#allocation8 + $0x1298] sm:$0xff]  ;;  %1999 = vmatpush.msrb.mxu3 %v1347_v29  ;;  %v580_v29 = vld [vmem:[#allocation8 + $0x7a0] sm:$0xff] }
 0x178   :  { %v1059_v31 = vld [vmem:[#allocation8 + $0x1698] sm:$0xff]  ;;  %1943 = vmatpush.msrb.mxu0 %v931_v30 }
 0x179   :  { %v1211_v32 = vld [vmem:[#allocation8 + $0x1b58] sm:$0xff]  ;;  %1963 = vmatpush.msrb.mxu1 %v1059_v31 }
 0x17a   :  { %v1339_v33 = vld [vmem:[#allocation8 + $0x1f58] sm:$0xff]  ;;  %1980 = vmatpush.msrb.mxu2 %v1211_v32  ;;  %v3023_v32 = vld [vmem:[#allocation11] sm:$0xff] }
 0x17b   :  { %v923_v34 = vld [vmem:[#allocation8 + $0x1258] sm:$0xff]  ;;  %2000 = vmatpush.msrb.mxu3 %v1339_v33  ;;  %v1635_v1 = vpop.f32.mrf.mxu0  ;;  %v444_v33 = vld [vmem:[#allocation8 + $0x360] sm:$0xff] }
 0x17c   :  { %v1051_v35 = vld [vmem:[#allocation8 + $0x1658] sm:$0xff]  ;;  %1944 = vmatpush.msrb.mxu0 %v923_v34  ;;  %v1636_v4 = vadd.f32 %v1635_v1, %v3016_v20  ;;  %v1655_v7 = vpop.f32.mrf.mxu1  ;;  %v572_v34 = vld [vmem:[#allocation8 + $0x760] sm:$0xff] }
 0x17d   :  { %v1203_v36 = vld [vmem:[#allocation8 + $0x1b18] sm:$0xff]  ;;  %1964 = vmatpush.msrb.mxu1 %v1051_v35 }
 0x17e   :  { %v1331_v37 = vld [vmem:[#allocation8 + $0x1f18] sm:$0xff]  ;;  %1981 = vmatpush.msrb.mxu2 %v1203_v36  ;;  %v1656_v10 = vadd.f32 %v1655_v7, %v1636_v4  ;;  %v404_v4 = vld [vmem:[#allocation8 + $0x220] sm:$0xff] }
 0x17f   :  { %v915_v38 = vld [vmem:[#allocation8 + $0x1218] sm:$0xff]  ;;  %2001 = vmatpush.msrb.mxu3 %v1331_v37  ;;  %v812_v7 = vld [vmem:[#allocation8 + $0xee0] sm:$0xff] }
 0x180   :  { %v1043_v39 = vld [vmem:[#allocation8 + $0x1618] sm:$0xff]  ;;  %1945 = vmatpush.msrb.mxu0 %v915_v38 }
 0x181   :  { %v1195_v42 = vld [vmem:[#allocation8 + $0x1ad8] sm:$0xff]  ;;  %1965 = vmatpush.msrb.mxu1 %v1043_v39 }
 0x182   :  { %v1323_v43 = vld [vmem:[#allocation8 + $0x1ed8] sm:$0xff]  ;;  %1982 = vmatpush.msrb.mxu2 %v1195_v42  ;;  %v2658_v42 = vmax.f32 %v3011_v16, 0.0 }
 0x183   :  { %v907_v44 = vld [vmem:[#allocation8 + $0x11d8] sm:$0xff]  ;;  %2002 = vmatpush.msrb.mxu3 %v1323_v43  ;;  %v2668_v43 = vperm.slane %v3023_v32, 0 }
 0x184   :  { %v1035_v45 = vld [vmem:[#allocation8 + $0x15d8] sm:$0xff]  ;;  %1946 = vmatpush.msrb.mxu0 %v907_v44  ;;  %v436_v44 = vld [vmem:[#allocation8 + $0x320] sm:$0xff] }
 0x185   :  { %v1187_v46 = vld [vmem:[#allocation8 + $0x1a98] sm:$0xff]  ;;  %1966 = vmatpush.msrb.mxu1 %v1035_v45  ;;  %v564_v45 = vld [vmem:[#allocation8 + $0x720] sm:$0xff] }
 0x186   :  { %v1315_v47 = vld [vmem:[#allocation8 + $0x1e98] sm:$0xff]  ;;  %1983 = vmatpush.msrb.mxu2 %v1187_v46 }
 0x187   :  { %v899_v48 = vld [vmem:[#allocation8 + $0x1198] sm:$0xff]  ;;  %2003 = vmatpush.msrb.mxu3 %v1315_v47  ;;  %v2669_v47 = vperm.slane %v3023_v32, 1 }
 0x188   :  { %v1027_v49 = vld [vmem:[#allocation8 + $0x1598] sm:$0xff]  ;;  %1947 = vmatpush.msrb.mxu0 %v899_v48  ;;  %v716_v48 = vld [vmem:[#allocation8 + $0xbe0] sm:$0xff] }
 0x189   :  { %v1179_v50 = vld [vmem:[#allocation8 + $0x1a58] sm:$0xff]  ;;  %1967 = vmatpush.msrb.mxu1 %v1027_v49  ;;  %v1675_v35 = vpop.f32.mrf.mxu2  ;;  %v844_v49 = vld [vmem:[#allocation8 + $0xfe0] sm:$0xff] }
 0x18a   :  { %v1307_v51 = vld [vmem:[#allocation8 + $0x1e58] sm:$0xff]  ;;  %1984 = vmatpush.msrb.mxu2 %v1179_v50  ;;  %v1676_v38 = vadd.f32 %v1675_v35, %v1656_v10  ;;  %v1695_v39 = vpop.f32.mrf.mxu3  ;;  %v428_v50 = vld [vmem:[#allocation8 + $0x2e0] sm:$0xff] }
 0x18b   :  { %v891_v52 = vld [vmem:[#allocation8 + $0x1158] sm:$0xff]  ;;  %2004 = vmatpush.msrb.mxu3 %v1307_v51  ;;  %v556_v51 = vld [vmem:[#allocation8 + $0x6e0] sm:$0xff] }
 0x18c   :  { %v1019_v53 = vld [vmem:[#allocation8 + $0x1558] sm:$0xff]  ;;  %1948 = vmatpush.msrb.mxu0 %v891_v52  ;;  %v1696_v46 = vadd.f32 %v1695_v39, %v1676_v38  ;;  %v708_v52 = vld [vmem:[#allocation8 + $0xba0] sm:$0xff] }
 0x18d   :  { %v1171_v56 = vld [vmem:[#allocation8 + $0x1a18] sm:$0xff]  ;;  %1968 = vmatpush.msrb.mxu1 %v1019_v53  ;;  %v836_v53 = vld [vmem:[#allocation8 + $0xfa0] sm:$0xff] }
 0x18e   :  { %v1299_v57 = vld [vmem:[#allocation8 + $0x1e18] sm:$0xff]  ;;  %1985 = vmatpush.msrb.mxu2 %v1171_v56  ;;  %v2659_v16 = vmax.f32 %v1696_v46, 0.0  ;;  %v2684_v56 = vmul.f32 %v2668_v43, %v2658_v42  ;;  %v676_v10 = vld [vmem:[#allocation8 + $0xaa0] sm:$0xff] }
 0x18f   :  { %v883_v59 = vld [vmem:[#allocation8 + $0x1118] sm:$0xff]  ;;  %2005 = vmatpush.msrb.mxu3 %v1299_v57  ;;  %v420_v57 = vld [vmem:[#allocation8 + $0x2a0] sm:$0xff] }
 0x190   :  { %v1011_v60 = vld [vmem:[#allocation8 + $0x1518] sm:$0xff]  ;;  %1949 = vmatpush.msrb.mxu0 %v883_v59  ;;  %v548_v59 = vld [vmem:[#allocation8 + $0x6a0] sm:$0xff] }
 0x191   :  { %v1163_v61 = vld [vmem:[#allocation8 + $0x19d8] sm:$0xff]  ;;  %1969 = vmatpush.msrb.mxu1 %v1011_v60  ;;  %v2685_v60 = vmul.f32 %v2669_v47, %v2659_v16  ;;  %v772_v35 = vld [vmem:[#allocation8 + $0xda0] sm:$0xff] }
 0x192   :  { %v1291_v62 = vld [vmem:[#allocation8 + $0x1dd8] sm:$0xff]  ;;  %1986 = vmatpush.msrb.mxu2 %v1163_v61  ;;  %v700_v61 = vld [vmem:[#allocation8 + $0xb60] sm:$0xff] }
 0x193   :  { %v875_v63 = vld [vmem:[#allocation8 + $0x10d8] sm:$0xff]  ;;  %2006 = vmatpush.msrb.mxu3 %v1291_v62  ;;  %v828_v62 = vld [vmem:[#allocation8 + $0xf60] sm:$0xff]  ;;  %v3030_v1 = vadd.f32 %v2685_v60, %v2684_v56 }
 0x194   :  { %v1003_v0 = vld [vmem:[#allocation8 + $0x14d8] sm:$0xff]  ;;  %1950 = vmatpush.msrb.mxu0 %v875_v63  ;;  %v412_v63 = vld [vmem:[#allocation8 + $0x260] sm:$0xff] }
 0x195   :  { %v1155_v2 = vld [vmem:[#allocation8 + $0x1998] sm:$0xff]  ;;  %1970 = vmatpush.msrb.mxu1 %v1003_v0  ;;  %v540_v0 = vld [vmem:[#allocation8 + $0x660] sm:$0xff] }
 0x196   :  { %v1283_v3 = vld [vmem:[#allocation8 + $0x1d98] sm:$0xff]  ;;  %1987 = vmatpush.msrb.mxu2 %v1155_v2  ;;  %v692_v2 = vld [vmem:[#allocation8 + $0xb20] sm:$0xff] }
 0x197   :  { %v867_v5 = vld [vmem:[#allocation8 + $0x1098] sm:$0xff]  ;;  %2007 = vmatpush.msrb.mxu3 %v1283_v3  ;;  %v820_v3 = vld [vmem:[#allocation8 + $0xf20] sm:$0xff] }
 0x198   :  { %v995_v6 = vld [vmem:[#allocation8 + $0x1498] sm:$0xff]  ;;  %1951 = vmatpush.msrb.mxu0 %v867_v5  ;;  %v532_v5 = vld [vmem:[#allocation8 + $0x620] sm:$0xff] }
 0x199   :  { %v1147_v8 = vld [vmem:[#allocation8 + $0x1958] sm:$0xff]  ;;  %1971 = vmatpush.msrb.mxu1 %v995_v6  ;;  %v684_v6 = vld [vmem:[#allocation8 + $0xae0] sm:$0xff] }
 0x19a   :  { %v1275_v9 = vld [vmem:[#allocation8 + $0x1d58] sm:$0xff]  ;;  %1988 = vmatpush.msrb.mxu2 %v1147_v8  ;;  %v396_v8 = vld [vmem:[#allocation8 + $0x1e0] sm:$0xff] }
 0x19b   :  { %v859_v11 = vld [vmem:[#allocation8 + $0x1058] sm:$0xff]  ;;  %2008 = vmatpush.msrb.mxu3 %v1275_v9  ;;  %v524_v9 = vld [vmem:[#allocation8 + $0x5e0] sm:$0xff] }
 0x19c   :  { %v987_v12 = vld [vmem:[#allocation8 + $0x1458] sm:$0xff]  ;;  %1952 = vmatpush.msrb.mxu0 %v859_v11  ;;  %v804_v11 = vld [vmem:[#allocation8 + $0xea0] sm:$0xff] }
 0x19d   :  { %v1139_v13 = vld [vmem:[#allocation8 + $0x1918] sm:$0xff]  ;;  %1972 = vmatpush.msrb.mxu1 %v987_v12  ;;  %v388_v12 = vld [vmem:[#allocation8 + $0x1a0] sm:$0xff] }
 0x19e   :  { %v1267_v14 = vld [vmem:[#allocation8 + $0x1d18] sm:$0xff]  ;;  %1989 = vmatpush.msrb.mxu2 %v1139_v13  ;;  %v516_v13 = vld [vmem:[#allocation8 + $0x5a0] sm:$0xff] }
 0x19f   :  { %v851_v15 = vld [vmem:[#allocation8 + $0x1018] sm:$0xff]  ;;  %2009 = vmatpush.msrb.mxu3 %v1267_v14  ;;  %v668_v14 = vld [vmem:[#allocation8 + $0xa60] sm:$0xff]  ;;  %v1735_v38 = vpop.f32.mrf.mxu1 }
 0x1a0   :  { %v979_v17 = vld [vmem:[#allocation8 + $0x1418] sm:$0xff]  ;;  %1953 = vmatpush.msrb.mxu0 %v851_v15  ;;  %v796_v15 = vld [vmem:[#allocation8 + $0xe60] sm:$0xff] }
 0x1a1   :  { %v1131_v18 = vld [vmem:[#allocation8 + $0x18d8] sm:$0xff]  ;;  %1973 = vmatpush.msrb.mxu1 %v979_v17  ;;  %1954 = vmatmul.f32.vlgmr.msrb.gmra.mxu0 %v2982_v22  ;;  %v380_v17 = vld [vmem:[#allocation8 + $0x160] sm:$0xff] }
 0x1a2   :  { %v1259_v20 = vld [vmem:[#allocation8 + $0x1cd8] sm:$0xff]  ;;  %1990 = vmatpush.msrb.mxu2 %v1131_v18  ;;  %1974 = vmatmul.f32.vlgmr.msrb.gmra.mxu1 %v2987_v28  ;;  %v508_v18 = vld [vmem:[#allocation8 + $0x560] sm:$0xff] }
 0x1a3   :  { %2010 = vmatpush.msrb.mxu3 %v1259_v20  ;;  %v1123_v24 = vld [vmem:[#allocation8 + $0x1898] sm:$0xff]  ;;  %2018 = vmatpush.msra.mxu0 %v460_v21  ;;  %v660_v20 = vld [vmem:[#allocation8 + $0xa20] sm:$0xff] }
 0x1a4   :  { %v1251_v26 = vld [vmem:[#allocation8 + $0x1c98] sm:$0xff]  ;;  %2038 = vmatpush.msra.mxu1 %v588_v23  ;;  %1991 = vmatpush.msrb.mxu2 %v1123_v24  ;;  %v788_v21 = vld [vmem:[#allocation8 + $0xe20] sm:$0xff]  ;;  %v1364_v23 = vperm.slane %v3004_v58, 2 }
 0x1a5   :  { %v1115_v30 = vld [vmem:[#allocation8 + $0x1858] sm:$0xff]  ;;  %2011 = vmatpush.msrb.mxu3 %v1251_v26  ;;  %2019 = vmatpush.msra.mxu0 %v452_v27  ;;  %v372_v24 = vld [vmem:[#allocation8 + $0x120] sm:$0xff] }
 0x1a6   :  { %v1243_v31 = vld [vmem:[#allocation8 + $0x1c58] sm:$0xff]  ;;  %2039 = vmatpush.msra.mxu1 %v580_v29  ;;  %1992 = vmatpush.msrb.mxu2 %v1115_v30  ;;  %v500_v26 = vld [vmem:[#allocation8 + $0x520] sm:$0xff] }
 0x1a7   :  { %v1107_v36 = vld [vmem:[#allocation8 + $0x1818] sm:$0xff]  ;;  %2012 = vmatpush.msrb.mxu3 %v1243_v31  ;;  %2020 = vmatpush.msra.mxu0 %v444_v33  ;;  %v652_v27 = vld [vmem:[#allocation8 + $0x9e0] sm:$0xff]  ;;  %v1715_v33 = vpop.f32.mrf.mxu0 }
 0x1a8   :  { %v1235_v37 = vld [vmem:[#allocation8 + $0x1c18] sm:$0xff]  ;;  %2040 = vmatpush.msra.mxu1 %v572_v34  ;;  %1993 = vmatpush.msrb.mxu2 %v1107_v36  ;;  %v780_v29 = vld [vmem:[#allocation8 + $0xde0] sm:$0xff]  ;;  %v1716_v36 = vadd.f32 %v1715_v33, %v1364_v23 }
 0x1a9   :  { %2013 = vmatpush.msrb.mxu3 %v1235_v37  ;;  %1994 = vmatmul.f32.vlgmr.msrb.gmra.mxu2 %v2980_v19  ;;  %v364_v30 = vld [vmem:[#allocation8 + $0xe0] sm:$0xff] }
 0x1aa   :  { %2014 = vmatmul.f32.vlgmr.msrb.gmra.mxu3 %v2984_v25  ;;  %2021 = vmatpush.msra.mxu0 %v436_v44  ;;  %v492_v31 = vld [vmem:[#allocation8 + $0x4e0] sm:$0xff]  ;;  %v1736_v43 = vadd.f32 %v1735_v38, %v1716_v36 }
 0x1ab   :  { %2041 = vmatpush.msra.mxu1 %v564_v45  ;;  %2058 = vmatpush.msra.mxu2 %v716_v48  ;;  %v644_v34 = vld [vmem:[#allocation8 + $0x9a0] sm:$0xff] }
 0x1ac   :  { %2078 = vmatpush.msra.mxu3 %v844_v49  ;;  %2022 = vmatpush.msra.mxu0 %v428_v50  ;;  %v356_v58 = vld [vmem:[#allocation8 + $0xa0] sm:$0xff] }
 0x1ad   :  { %2042 = vmatpush.msra.mxu1 %v556_v51  ;;  %2059 = vmatpush.msra.mxu2 %v708_v52  ;;  %v484_v37 = vld [vmem:[#allocation8 + $0x4a0] sm:$0xff] }
 0x1ae   :  { %2079 = vmatpush.msra.mxu3 %v836_v53  ;;  %2023 = vmatpush.msra.mxu0 %v420_v57  ;;  %v636_v39 = vld [vmem:[#allocation8 + $0x960] sm:$0xff] }
 0x1af   :  { %2043 = vmatpush.msra.mxu1 %v548_v59  ;;  %2060 = vmatpush.msra.mxu2 %v700_v61  ;;  %v764_v42 = vld [vmem:[#allocation8 + $0xd60] sm:$0xff] }
 0x1b0   :  { %2080 = vmatpush.msra.mxu3 %v828_v62  ;;  %2024 = vmatpush.msra.mxu0 %v412_v63  ;;  %v348_v44 = vld [vmem:[#allocation8 + $0x60] sm:$0xff] }
 0x1b1   :  { %2044 = vmatpush.msra.mxu1 %v540_v0  ;;  %2061 = vmatpush.msra.mxu2 %v692_v2  ;;  %v476_v45 = vld [vmem:[#allocation8 + $0x460] sm:$0xff]  ;;  %v1755_v0 = vpop.f32.mrf.mxu2 }
 0x1b2   :  { %2081 = vmatpush.msra.mxu3 %v820_v3  ;;  %2025 = vmatpush.msra.mxu0 %v404_v4  ;;  %v628_v46 = vld [vmem:[#allocation8 + $0x920] sm:$0xff]  ;;  %v1756_v4 = vadd.f32 %v1755_v0, %v1736_v43 }
 0x1b3   :  { %2045 = vmatpush.msra.mxu1 %v532_v5  ;;  %2062 = vmatpush.msra.mxu2 %v684_v6  ;;  %v756_v47 = vld [vmem:[#allocation8 + $0xd20] sm:$0xff]  ;;  %v1775_v5 = vpop.f32.mrf.mxu3 }
 0x1b4   :  { %2082 = vmatpush.msra.mxu3 %v812_v7  ;;  %2026 = vmatpush.msra.mxu0 %v396_v8  ;;  %v340_v48 = vld [vmem:[#allocation8 + $0x20] sm:$0xff]  ;;  %v3035_v8 = vadd.f32 %v1775_v5, %v1756_v4 }
 0x1b5   :  { %2046 = vmatpush.msra.mxu1 %v524_v9  ;;  %2063 = vmatpush.msra.mxu2 %v676_v10  ;;  %v468_v49 = vld [vmem:[#allocation8 + $0x420] sm:$0xff] }
 0x1b6   :  { %2083 = vmatpush.msra.mxu3 %v804_v11  ;;  %2027 = vmatpush.msra.mxu0 %v388_v12  ;;  %v620_v50 = vld [vmem:[#allocation8 + $0x8e0] sm:$0xff] }
 0x1b7   :  { %2047 = vmatpush.msra.mxu1 %v516_v13  ;;  %2064 = vmatpush.msra.mxu2 %v668_v14  ;;  %v748_v51 = vld [vmem:[#allocation8 + $0xce0] sm:$0xff] }
 0x1b8   :  { %2084 = vmatpush.msra.mxu3 %v796_v15  ;;  %2028 = vmatpush.msra.mxu0 %v380_v17  ;;  %v972_v16 = vld [vmem:[#allocation8 + $0x13e0] sm:$0xff] }
 0x1b9   :  { %2048 = vmatpush.msra.mxu1 %v508_v18  ;;  %2065 = vmatpush.msra.mxu2 %v660_v20  ;;  %v1100_v52 = vld [vmem:[#allocation8 + $0x17e0] sm:$0xff] }
 0x1ba   :  { %2085 = vmatpush.msra.mxu3 %v788_v21  ;;  %2029 = vmatpush.msra.mxu0 %v372_v24  ;;  %v612_v53 = vld [vmem:[#allocation8 + $0x8a0] sm:$0xff] }
 0x1bb   :  { %2049 = vmatpush.msra.mxu1 %v500_v26  ;;  %2066 = vmatpush.msra.mxu2 %v652_v27  ;;  %v740_v56 = vld [vmem:[#allocation8 + $0xca0] sm:$0xff] }
 0x1bc   :  { %2086 = vmatpush.msra.mxu3 %v780_v29  ;;  %2030 = vmatpush.msra.mxu0 %v364_v30  ;;  %v964_v57 = vld [vmem:[#allocation8 + $0x13a0] sm:$0xff] }
 0x1bd   :  { %2050 = vmatpush.msra.mxu1 %v492_v31  ;;  %2067 = vmatpush.msra.mxu2 %v644_v34  ;;  %v1092_v59 = vld [vmem:[#allocation8 + $0x17a0] sm:$0xff] }
 0x1be   :  { %2087 = vmatpush.msra.mxu3 %v772_v35  ;;  %2031 = vmatpush.msra.mxu0 %v356_v58  ;;  %v604_v60 = vld [vmem:[#allocation8 + $0x860] sm:$0xff] }
 0x1bf   :  { %2051 = vmatpush.msra.mxu1 %v484_v37  ;;  %2068 = vmatpush.msra.mxu2 %v636_v39  ;;  %v732_v61 = vld [vmem:[#allocation8 + $0xc60] sm:$0xff] }
 0x1c0   :  { %2088 = vmatpush.msra.mxu3 %v764_v42  ;;  %2032 = vmatpush.msra.mxu0 %v348_v44  ;;  %v956_v62 = vld [vmem:[#allocation8 + $0x1360] sm:$0xff] }
 0x1c1   :  { %2052 = vmatpush.msra.mxu1 %v476_v45  ;;  %2069 = vmatpush.msra.mxu2 %v628_v46  ;;  %v1084_v63 = vld [vmem:[#allocation8 + $0x1760] sm:$0xff] }
 0x1c2   :  { %2089 = vmatpush.msra.mxu3 %v756_v47  ;;  %2033 = vmatpush.msra.mxu0 %v340_v48  ;;  %v596_v2 = vld [vmem:[#allocation8 + $0x820] sm:$0xff] }
 0x1c3   :  { %2053 = vmatpush.msra.mxu1 %v468_v49  ;;  %2070 = vmatpush.msra.mxu2 %v620_v50  ;;  %v724_v3 = vld [vmem:[#allocation8 + $0xc20] sm:$0xff] }
 0x1c4   :  { %2090 = vmatpush.msra.mxu3 %v748_v51  ;;  %2034 = vmatmul.f32.vlgmr.msra.gmra.mxu0 %v2962_v40  ;;  %v948_v6 = vld [vmem:[#allocation8 + $0x1320] sm:$0xff] }
 0x1c5   :  { %2054 = vmatmul.f32.vlgmr.msra.gmra.mxu1 %v2964_v41  ;;  %2098 = vmatpush.msrb.mxu0 %v972_v16  ;;  %v1076_v7 = vld [vmem:[#allocation8 + $0x1720] sm:$0xff]  ;;  %v1795_v16 = vpop.f32.mrf.mxu0 }
 0x1c6   :  { %2118 = vmatpush.msrb.mxu1 %v1100_v52  ;;  %2071 = vmatpush.msra.mxu2 %v612_v53  ;;  %v1228_v9 = vld [vmem:[#allocation8 + $0x1be0] sm:$0xff] }
 0x1c7   :  { %2091 = vmatpush.msra.mxu3 %v740_v56  ;;  %2099 = vmatpush.msrb.mxu0 %v964_v57  ;;  %v1356_v10 = vld [vmem:[#allocation8 + $0x1fe0] sm:$0xff]  ;;  %v1796_v56 = vadd.f32 %v1795_v16, %v3035_v8  ;;  %v533_v16 = vld [vmem:[#allocation8 + $0x628] sm:$0xff] }
 0x1c8   :  { %2119 = vmatpush.msrb.mxu1 %v1092_v59  ;;  %2072 = vmatpush.msra.mxu2 %v604_v60  ;;  %v940_v11 = vld [vmem:[#allocation8 + $0x12e0] sm:$0xff]  ;;  %v1815_v60 = vpop.f32.mrf.mxu1 }
 0x1c9   :  { %2092 = vmatpush.msra.mxu3 %v732_v61  ;;  %2100 = vmatpush.msrb.mxu0 %v956_v62  ;;  %v1068_v12 = vld [vmem:[#allocation8 + $0x16e0] sm:$0xff] }
 0x1ca   :  { %2120 = vmatpush.msrb.mxu1 %v1084_v63  ;;  %2073 = vmatpush.msra.mxu2 %v596_v2  ;;  %v1220_v13 = vld [vmem:[#allocation8 + $0x1ba0] sm:$0xff]  ;;  %v1816_v63 = vadd.f32 %v1815_v60, %v1796_v56  ;;  %v397_v56 = vld [vmem:[#allocation8 + $0x1e8] sm:$0xff] }
 0x1cb   :  { %2093 = vmatpush.msra.mxu3 %v724_v3  ;;  %2074 = vmatmul.f32.vlgmr.msra.gmra.mxu2 %v2970_v54  ;;  %v1348_v14 = vld [vmem:[#allocation8 + $0x1fa0] sm:$0xff]  ;;  %v389_v60 = vld [vmem:[#allocation8 + $0x1a8] sm:$0xff] }
 0x1cc   :  { %2094 = vmatmul.f32.vlgmr.msra.gmra.mxu3 %v2972_v55  ;;  %2101 = vmatpush.msrb.mxu0 %v948_v6  ;;  %v932_v15 = vld [vmem:[#allocation8 + $0x12a0] sm:$0xff] }
 0x1cd   :  { %2121 = vmatpush.msrb.mxu1 %v1076_v7  ;;  %2138 = vmatpush.msrb.mxu2 %v1228_v9  ;;  %v1060_v17 = vld [vmem:[#allocation8 + $0x16a0] sm:$0xff]  ;;  %v461_v9 = vld [vmem:[#allocation8 + $0x3e8] sm:$0xff] }
 0x1ce   :  { %2158 = vmatpush.msrb.mxu3 %v1356_v10  ;;  %2102 = vmatpush.msrb.mxu0 %v940_v11  ;;  %v1212_v18 = vld [vmem:[#allocation8 + $0x1b60] sm:$0xff]  ;;  %v589_v10 = vld [vmem:[#allocation8 + $0x7e8] sm:$0xff] }
 0x1cf   :  { %2122 = vmatpush.msrb.mxu1 %v1068_v12  ;;  %v1340_v20 = vld [vmem:[#allocation8 + $0x1f60] sm:$0xff]  ;;  %2139 = vmatpush.msrb.mxu2 %v1220_v13  ;;  %v453_v13 = vld [vmem:[#allocation8 + $0x3a8] sm:$0xff] }
 0x1d0   :  { %2159 = vmatpush.msrb.mxu3 %v1348_v14  ;;  %v924_v21 = vld [vmem:[#allocation8 + $0x1260] sm:$0xff]  ;;  %2103 = vmatpush.msrb.mxu0 %v932_v15  ;;  %v581_v14 = vld [vmem:[#allocation8 + $0x7a8] sm:$0xff] }
 0x1d1   :  { %v1052_v23 = vld [vmem:[#allocation8 + $0x1660] sm:$0xff]  ;;  %2123 = vmatpush.msrb.mxu1 %v1060_v17  ;;  %2140 = vmatpush.msrb.mxu2 %v1212_v18  ;;  %v445_v18 = vld [vmem:[#allocation8 + $0x368] sm:$0xff] }
 0x1d2   :  { %v1204_v24 = vld [vmem:[#allocation8 + $0x1b20] sm:$0xff]  ;;  %2160 = vmatpush.msrb.mxu3 %v1340_v20  ;;  %2104 = vmatpush.msrb.mxu0 %v924_v21  ;;  %v573_v20 = vld [vmem:[#allocation8 + $0x768] sm:$0xff]  ;;  %v1835_v21 = vpop.f32.mrf.mxu2 }
 0x1d3   :  { %v1332_v26 = vld [vmem:[#allocation8 + $0x1f20] sm:$0xff]  ;;  %2124 = vmatpush.msrb.mxu1 %v1052_v23  ;;  %2141 = vmatpush.msrb.mxu2 %v1204_v24 }
 0x1d4   :  { %v916_v27 = vld [vmem:[#allocation8 + $0x1220] sm:$0xff]  ;;  %2161 = vmatpush.msrb.mxu3 %v1332_v26  ;;  %v1836_v26 = vadd.f32 %v1835_v21, %v1816_v63  ;;  %v797_v63 = vld [vmem:[#allocation8 + $0xe68] sm:$0xff] }
 0x1d5   :  { %v1044_v29 = vld [vmem:[#allocation8 + $0x1620] sm:$0xff]  ;;  %2105 = vmatpush.msrb.mxu0 %v916_v27  ;;  %v1855_v27 = vpop.f32.mrf.mxu3  ;;  %v629_v21 = vld [vmem:[#allocation8 + $0x928] sm:$0xff] }
 0x1d6   :  { %v1196_v30 = vld [vmem:[#allocation8 + $0x1ae0] sm:$0xff]  ;;  %2125 = vmatpush.msrb.mxu1 %v1044_v29  ;;  %v437_v29 = vld [vmem:[#allocation8 + $0x328] sm:$0xff] }
 0x1d7   :  { %v1324_v31 = vld [vmem:[#allocation8 + $0x1ee0] sm:$0xff]  ;;  %2142 = vmatpush.msrb.mxu2 %v1196_v30  ;;  %v565_v30 = vld [vmem:[#allocation8 + $0x728] sm:$0xff] }
 0x1d8   :  { %v908_v33 = vld [vmem:[#allocation8 + $0x11e0] sm:$0xff]  ;;  %2162 = vmatpush.msrb.mxu3 %v1324_v31  ;;  %v1856_v31 = vadd.f32 %v1855_v27, %v1836_v26  ;;  %v469_v26 = vld [vmem:[#allocation8 + $0x428] sm:$0xff] }
 0x1d9   :  { %v1036_v34 = vld [vmem:[#allocation8 + $0x15e0] sm:$0xff]  ;;  %2106 = vmatpush.msrb.mxu0 %v908_v33  ;;  %v2670_v33 = vperm.slane %v3023_v32, 2  ;;  %v621_v27 = vld [vmem:[#allocation8 + $0x8e8] sm:$0xff] }
 0x1da   :  { %v1188_v35 = vld [vmem:[#allocation8 + $0x1aa0] sm:$0xff]  ;;  %2126 = vmatpush.msrb.mxu1 %v1036_v34  ;;  %v717_v34 = vld [vmem:[#allocation8 + $0xbe8] sm:$0xff] }
 0x1db   :  { %v1316_v36 = vld [vmem:[#allocation8 + $0x1ea0] sm:$0xff]  ;;  %2143 = vmatpush.msrb.mxu2 %v1188_v35  ;;  %v845_v35 = vld [vmem:[#allocation8 + $0xfe8] sm:$0xff] }
 0x1dc   :  { %v900_v58 = vld [vmem:[#allocation8 + $0x11a0] sm:$0xff]  ;;  %2163 = vmatpush.msrb.mxu3 %v1316_v36  ;;  %v429_v36 = vld [vmem:[#allocation8 + $0x2e8] sm:$0xff] }
 0x1dd   :  { %v1028_v37 = vld [vmem:[#allocation8 + $0x15a0] sm:$0xff]  ;;  %2107 = vmatpush.msrb.mxu0 %v900_v58  ;;  %v557_v58 = vld [vmem:[#allocation8 + $0x6e8] sm:$0xff] }
 0x1de   :  { %v1180_v38 = vld [vmem:[#allocation8 + $0x1a60] sm:$0xff]  ;;  %2127 = vmatpush.msrb.mxu1 %v1028_v37  ;;  %v2660_v37 = vmax.f32 %v1856_v31, 0.0  ;;  %v1101_v31 = vld [vmem:[#allocation8 + $0x17e8] sm:$0xff] }
 0x1df   :  { %v1308_v39 = vld [vmem:[#allocation8 + $0x1e60] sm:$0xff]  ;;  %2144 = vmatpush.msrb.mxu2 %v1180_v38  ;;  %v709_v38 = vld [vmem:[#allocation8 + $0xba8] sm:$0xff] }
 0x1e0   :  { %v892_v42 = vld [vmem:[#allocation8 + $0x1160] sm:$0xff]  ;;  %2164 = vmatpush.msrb.mxu3 %v1308_v39  ;;  %v837_v39 = vld [vmem:[#allocation8 + $0xfa8] sm:$0xff]  ;;  %v2686_v32 = vmul.f32 %v2670_v33, %v2660_v37 }
 0x1e1   :  { %v1020_v43 = vld [vmem:[#allocation8 + $0x1560] sm:$0xff]  ;;  %2108 = vmatpush.msrb.mxu0 %v892_v42  ;;  %v421_v42 = vld [vmem:[#allocation8 + $0x2a8] sm:$0xff] }
 0x1e2   :  { %v1172_v44 = vld [vmem:[#allocation8 + $0x1a20] sm:$0xff]  ;;  %2128 = vmatpush.msrb.mxu1 %v1020_v43  ;;  %v549_v43 = vld [vmem:[#allocation8 + $0x6a8] sm:$0xff] }
 0x1e3   :  { %v1300_v45 = vld [vmem:[#allocation8 + $0x1e20] sm:$0xff]  ;;  %2145 = vmatpush.msrb.mxu2 %v1172_v44  ;;  %v701_v44 = vld [vmem:[#allocation8 + $0xb68] sm:$0xff] }
 0x1e4   :  { %v884_v46 = vld [vmem:[#allocation8 + $0x1120] sm:$0xff]  ;;  %2165 = vmatpush.msrb.mxu3 %v1300_v45  ;;  %v829_v45 = vld [vmem:[#allocation8 + $0xf68] sm:$0xff] }
 0x1e5   :  { %v1012_v47 = vld [vmem:[#allocation8 + $0x1520] sm:$0xff]  ;;  %2109 = vmatpush.msrb.mxu0 %v884_v46  ;;  %v413_v46 = vld [vmem:[#allocation8 + $0x268] sm:$0xff] }
 0x1e6   :  { %v1164_v48 = vld [vmem:[#allocation8 + $0x19e0] sm:$0xff]  ;;  %2129 = vmatpush.msrb.mxu1 %v1012_v47  ;;  %v541_v47 = vld [vmem:[#allocation8 + $0x668] sm:$0xff] }
 0x1e7   :  { %v1292_v49 = vld [vmem:[#allocation8 + $0x1de0] sm:$0xff]  ;;  %2146 = vmatpush.msrb.mxu2 %v1164_v48  ;;  %v3046_v48 = vadd.f32 %v3030_v1, %v2686_v32  ;;  %v677_v1 = vld [vmem:[#allocation8 + $0xaa8] sm:$0xff] }
 0x1e8   :  { %v876_v50 = vld [vmem:[#allocation8 + $0x10e0] sm:$0xff]  ;;  %2166 = vmatpush.msrb.mxu3 %v1292_v49  ;;  %v693_v49 = vld [vmem:[#allocation8 + $0xb28] sm:$0xff] }
 0x1e9   :  { %v1004_v51 = vld [vmem:[#allocation8 + $0x14e0] sm:$0xff]  ;;  %2110 = vmatpush.msrb.mxu0 %v876_v50  ;;  %v821_v50 = vld [vmem:[#allocation8 + $0xf28] sm:$0xff] }
 0x1ea   :  { %v1156_v52 = vld [vmem:[#allocation8 + $0x19a0] sm:$0xff]  ;;  %2130 = vmatpush.msrb.mxu1 %v1004_v51  ;;  %v405_v51 = vld [vmem:[#allocation8 + $0x228] sm:$0xff] }
 0x1eb   :  { %v1284_v53 = vld [vmem:[#allocation8 + $0x1da0] sm:$0xff]  ;;  %2147 = vmatpush.msrb.mxu2 %v1156_v52  ;;  %v685_v52 = vld [vmem:[#allocation8 + $0xae8] sm:$0xff] }
 0x1ec   :  { %v868_v57 = vld [vmem:[#allocation8 + $0x10a0] sm:$0xff]  ;;  %2167 = vmatpush.msrb.mxu3 %v1284_v53  ;;  %v813_v53 = vld [vmem:[#allocation8 + $0xee8] sm:$0xff] }
 0x1ed   :  { %v996_v59 = vld [vmem:[#allocation8 + $0x14a0] sm:$0xff]  ;;  %2111 = vmatpush.msrb.mxu0 %v868_v57  ;;  %v525_v57 = vld [vmem:[#allocation8 + $0x5e8] sm:$0xff] }
 0x1ee   :  { %v1148_v61 = vld [vmem:[#allocation8 + $0x1960] sm:$0xff]  ;;  %2131 = vmatpush.msrb.mxu1 %v996_v59  ;;  %v805_v59 = vld [vmem:[#allocation8 + $0xea8] sm:$0xff] }
 0x1ef   :  { %v1276_v62 = vld [vmem:[#allocation8 + $0x1d60] sm:$0xff]  ;;  %2148 = vmatpush.msrb.mxu2 %v1148_v61  ;;  %v517_v61 = vld [vmem:[#allocation8 + $0x5a8] sm:$0xff] }
 0x1f0   :  { %v860_v0 = vld [vmem:[#allocation8 + $0x1060] sm:$0xff]  ;;  %2168 = vmatpush.msrb.mxu3 %v1276_v62  ;;  %v669_v62 = vld [vmem:[#allocation8 + $0xa68] sm:$0xff] }
 0x1f1   :  { %v988_v2 = vld [vmem:[#allocation8 + $0x1460] sm:$0xff]  ;;  %2112 = vmatpush.msrb.mxu0 %v860_v0  ;;  %v381_v0 = vld [vmem:[#allocation8 + $0x168] sm:$0xff] }
 0x1f2   :  { %v1140_v3 = vld [vmem:[#allocation8 + $0x1920] sm:$0xff]  ;;  %2132 = vmatpush.msrb.mxu1 %v988_v2  ;;  %v509_v2 = vld [vmem:[#allocation8 + $0x568] sm:$0xff] }
 0x1f3   :  { %v1268_v4 = vld [vmem:[#allocation8 + $0x1d20] sm:$0xff]  ;;  %2149 = vmatpush.msrb.mxu2 %v1140_v3  ;;  %v661_v3 = vld [vmem:[#allocation8 + $0xa28] sm:$0xff] }
 0x1f4   :  { %v852_v5 = vld [vmem:[#allocation8 + $0x1020] sm:$0xff]  ;;  %2169 = vmatpush.msrb.mxu3 %v1268_v4  ;;  %v789_v4 = vld [vmem:[#allocation8 + $0xe28] sm:$0xff] }
 0x1f5   :  { %v980_v6 = vld [vmem:[#allocation8 + $0x1420] sm:$0xff]  ;;  %2113 = vmatpush.msrb.mxu0 %v852_v5  ;;  %v373_v5 = vld [vmem:[#allocation8 + $0x128] sm:$0xff] }
 0x1f6   :  { %v1132_v7 = vld [vmem:[#allocation8 + $0x18e0] sm:$0xff]  ;;  %2133 = vmatpush.msrb.mxu1 %v980_v6  ;;  %2114 = vmatmul.f32.vlgmr.msrb.gmra.mxu0 %v2982_v22  ;;  %v501_v6 = vld [vmem:[#allocation8 + $0x528] sm:$0xff] }
 0x1f7   :  { %v1260_v8 = vld [vmem:[#allocation8 + $0x1ce0] sm:$0xff]  ;;  %2150 = vmatpush.msrb.mxu2 %v1132_v7  ;;  %2134 = vmatmul.f32.vlgmr.msrb.gmra.mxu1 %v2987_v28  ;;  %v653_v7 = vld [vmem:[#allocation8 + $0x9e8] sm:$0xff] }
 0x1f8   :  { %2170 = vmatpush.msrb.mxu3 %v1260_v8  ;;  %v1124_v11 = vld [vmem:[#allocation8 + $0x18a0] sm:$0xff]  ;;  %2178 = vmatpush.msra.mxu0 %v461_v9  ;;  %v781_v8 = vld [vmem:[#allocation8 + $0xde8] sm:$0xff] }
 0x1f9   :  { %v1252_v12 = vld [vmem:[#allocation8 + $0x1ca0] sm:$0xff]  ;;  %2198 = vmatpush.msra.mxu1 %v589_v10  ;;  %2151 = vmatpush.msrb.mxu2 %v1124_v11  ;;  %v365_v9 = vld [vmem:[#allocation8 + $0xe8] sm:$0xff] }
 0x1fa   :  { %v1116_v15 = vld [vmem:[#allocation8 + $0x1860] sm:$0xff]  ;;  %2171 = vmatpush.msrb.mxu3 %v1252_v12  ;;  %2179 = vmatpush.msra.mxu0 %v453_v13  ;;  %v493_v10 = vld [vmem:[#allocation8 + $0x4e8] sm:$0xff] }
 0x1fb   :  { %v1244_v17 = vld [vmem:[#allocation8 + $0x1c60] sm:$0xff]  ;;  %2199 = vmatpush.msra.mxu1 %v581_v14  ;;  %2152 = vmatpush.msrb.mxu2 %v1116_v15  ;;  %v645_v11 = vld [vmem:[#allocation8 + $0x9a8] sm:$0xff] }
 0x1fc   :  { %v1108_v23 = vld [vmem:[#allocation8 + $0x1820] sm:$0xff]  ;;  %2172 = vmatpush.msrb.mxu3 %v1244_v17  ;;  %2180 = vmatpush.msra.mxu0 %v445_v18  ;;  %v773_v12 = vld [vmem:[#allocation8 + $0xda8] sm:$0xff] }
 0x1fd   :  { %v1236_v24 = vld [vmem:[#allocation8 + $0x1c20] sm:$0xff]  ;;  %2200 = vmatpush.msra.mxu1 %v573_v20  ;;  %2153 = vmatpush.msrb.mxu2 %v1108_v23  ;;  %v357_v13 = vld [vmem:[#allocation8 + $0xa8] sm:$0xff] }
 0x1fe   :  { %2173 = vmatpush.msrb.mxu3 %v1236_v24  ;;  %2154 = vmatmul.f32.vlgmr.msrb.gmra.mxu2 %v2980_v19  ;;  %v485_v14 = vld [vmem:[#allocation8 + $0x4a8] sm:$0xff] }
 0x1ff   :  { %2174 = vmatmul.f32.vlgmr.msrb.gmra.mxu3 %v2984_v25  ;;  %2181 = vmatpush.msra.mxu0 %v437_v29  ;;  %v637_v15 = vld [vmem:[#allocation8 + $0x968] sm:$0xff] }
 0x200   :  { %2201 = vmatpush.msra.mxu1 %v565_v30  ;;  %2218 = vmatpush.msra.mxu2 %v717_v34  ;;  %v765_v17 = vld [vmem:[#allocation8 + $0xd68] sm:$0xff] }
 0x201   :  { %2238 = vmatpush.msra.mxu3 %v845_v35  ;;  %2182 = vmatpush.msra.mxu0 %v429_v36  ;;  %v349_v18 = vld [vmem:[#allocation8 + $0x68] sm:$0xff] }
 0x202   :  { %2202 = vmatpush.msra.mxu1 %v557_v58  ;;  %2219 = vmatpush.msra.mxu2 %v709_v38  ;;  %v477_v20 = vld [vmem:[#allocation8 + $0x468] sm:$0xff] }
 0x203   :  { %2239 = vmatpush.msra.mxu3 %v837_v39  ;;  %2183 = vmatpush.msra.mxu0 %v421_v42  ;;  %v757_v23 = vld [vmem:[#allocation8 + $0xd28] sm:$0xff] }
 0x204   :  { %2203 = vmatpush.msra.mxu1 %v549_v43  ;;  %2220 = vmatpush.msra.mxu2 %v701_v44  ;;  %v341_v24 = vld [vmem:[#allocation8 + $0x28] sm:$0xff] }
 0x205   :  { %2240 = vmatpush.msra.mxu3 %v829_v45  ;;  %2184 = vmatpush.msra.mxu0 %v413_v46  ;;  %v749_v29 = vld [vmem:[#allocation8 + $0xce8] sm:$0xff] }
 0x206   :  { %2204 = vmatpush.msra.mxu1 %v541_v47  ;;  %2221 = vmatpush.msra.mxu2 %v693_v49  ;;  %v973_v30 = vld [vmem:[#allocation8 + $0x13e8] sm:$0xff] }
 0x207   :  { %2241 = vmatpush.msra.mxu3 %v821_v50  ;;  %2185 = vmatpush.msra.mxu0 %v405_v51  ;;  %v613_v33 = vld [vmem:[#allocation8 + $0x8a8] sm:$0xff] }
 0x208   :  { %2205 = vmatpush.msra.mxu1 %v533_v16  ;;  %2222 = vmatpush.msra.mxu2 %v685_v52  ;;  %v741_v34 = vld [vmem:[#allocation8 + $0xca8] sm:$0xff] }
 0x209   :  { %2242 = vmatpush.msra.mxu3 %v813_v53  ;;  %2186 = vmatpush.msra.mxu0 %v397_v56  ;;  %v965_v35 = vld [vmem:[#allocation8 + $0x13a8] sm:$0xff] }
 0x20a   :  { %2206 = vmatpush.msra.mxu1 %v525_v57  ;;  %2223 = vmatpush.msra.mxu2 %v677_v1  ;;  %v1093_v36 = vld [vmem:[#allocation8 + $0x17a8] sm:$0xff] }
 0x20b   :  { %2243 = vmatpush.msra.mxu3 %v805_v59  ;;  %2187 = vmatpush.msra.mxu0 %v389_v60  ;;  %v605_v58 = vld [vmem:[#allocation8 + $0x868] sm:$0xff] }
 0x20c   :  { %2207 = vmatpush.msra.mxu1 %v517_v61  ;;  %2224 = vmatpush.msra.mxu2 %v669_v62  ;;  %v733_v37 = vld [vmem:[#allocation8 + $0xc68] sm:$0xff] }
 0x20d   :  { %2244 = vmatpush.msra.mxu3 %v797_v63  ;;  %2188 = vmatpush.msra.mxu0 %v381_v0  ;;  %v957_v38 = vld [vmem:[#allocation8 + $0x1368] sm:$0xff] }
 0x20e   :  { %2208 = vmatpush.msra.mxu1 %v509_v2  ;;  %2225 = vmatpush.msra.mxu2 %v661_v3  ;;  %v1085_v39 = vld [vmem:[#allocation8 + $0x1768] sm:$0xff] }
 0x20f   :  { %2245 = vmatpush.msra.mxu3 %v789_v4  ;;  %2189 = vmatpush.msra.mxu0 %v373_v5  ;;  %v597_v42 = vld [vmem:[#allocation8 + $0x828] sm:$0xff] }
 0x210   :  { %2209 = vmatpush.msra.mxu1 %v501_v6  ;;  %2226 = vmatpush.msra.mxu2 %v653_v7  ;;  %v725_v43 = vld [vmem:[#allocation8 + $0xc28] sm:$0xff] }
 0x211   :  { %2246 = vmatpush.msra.mxu3 %v781_v8  ;;  %2190 = vmatpush.msra.mxu0 %v365_v9  ;;  %v949_v32 = vld [vmem:[#allocation8 + $0x1328] sm:$0xff] }
 0x212   :  { %2210 = vmatpush.msra.mxu1 %v493_v10  ;;  %2227 = vmatpush.msra.mxu2 %v645_v11  ;;  %v1077_v44 = vld [vmem:[#allocation8 + $0x1728] sm:$0xff] }
 0x213   :  { %2247 = vmatpush.msra.mxu3 %v773_v12  ;;  %2191 = vmatpush.msra.mxu0 %v357_v13  ;;  %v1229_v45 = vld [vmem:[#allocation8 + $0x1be8] sm:$0xff] }
 0x214   :  { %2211 = vmatpush.msra.mxu1 %v485_v14  ;;  %2228 = vmatpush.msra.mxu2 %v637_v15  ;;  %v1357_v46 = vld [vmem:[#allocation8 + $0x1fe8] sm:$0xff] }
 0x215   :  { %2248 = vmatpush.msra.mxu3 %v765_v17  ;;  %2192 = vmatpush.msra.mxu0 %v349_v18  ;;  %v941_v47 = vld [vmem:[#allocation8 + $0x12e8] sm:$0xff] }
 0x216   :  { %2212 = vmatpush.msra.mxu1 %v477_v20  ;;  %2229 = vmatpush.msra.mxu2 %v629_v21  ;;  %v1069_v49 = vld [vmem:[#allocation8 + $0x16e8] sm:$0xff] }
 0x217   :  { %2249 = vmatpush.msra.mxu3 %v757_v23  ;;  %2193 = vmatpush.msra.mxu0 %v341_v24  ;;  %v1221_v50 = vld [vmem:[#allocation8 + $0x1ba8] sm:$0xff] }
 0x218   :  { %2213 = vmatpush.msra.mxu1 %v469_v26  ;;  %2230 = vmatpush.msra.mxu2 %v621_v27  ;;  %v1349_v51 = vld [vmem:[#allocation8 + $0x1fa8] sm:$0xff] }
 0x219   :  { %2250 = vmatpush.msra.mxu3 %v749_v29  ;;  %2194 = vmatmul.f32.vlgmr.msra.gmra.mxu0 %v2962_v40  ;;  %v933_v16 = vld [vmem:[#allocation8 + $0x12a8] sm:$0xff] }
 0x21a   :  { %2214 = vmatmul.f32.vlgmr.msra.gmra.mxu1 %v2964_v41  ;;  %2258 = vmatpush.msrb.mxu0 %v973_v30  ;;  %v1061_v52 = vld [vmem:[#allocation8 + $0x16a8] sm:$0xff] }
 0x21b   :  { %2278 = vmatpush.msrb.mxu1 %v1101_v31  ;;  %2231 = vmatpush.msra.mxu2 %v613_v33  ;;  %v1213_v53 = vld [vmem:[#allocation8 + $0x1b68] sm:$0xff] }
 0x21c   :  { %2251 = vmatpush.msra.mxu3 %v741_v34  ;;  %2259 = vmatpush.msrb.mxu0 %v965_v35  ;;  %v1341_v56 = vld [vmem:[#allocation8 + $0x1f68] sm:$0xff] }
 0x21d   :  { %2279 = vmatpush.msrb.mxu1 %v1093_v36  ;;  %2232 = vmatpush.msra.mxu2 %v605_v58  ;;  %v925_v57 = vld [vmem:[#allocation8 + $0x1268] sm:$0xff] }
 0x21e   :  { %2252 = vmatpush.msra.mxu3 %v733_v37  ;;  %2260 = vmatpush.msrb.mxu0 %v957_v38  ;;  %v1053_v1 = vld [vmem:[#allocation8 + $0x1668] sm:$0xff] }
 0x21f   :  { %2280 = vmatpush.msrb.mxu1 %v1085_v39  ;;  %2233 = vmatpush.msra.mxu2 %v597_v42  ;;  %v1205_v59 = vld [vmem:[#allocation8 + $0x1b28] sm:$0xff]  ;;  %v462_v39 = vld [vmem:[#allocation8 + $0x3f0] sm:$0xff] }
 0x220   :  { %2253 = vmatpush.msra.mxu3 %v725_v43  ;;  %2234 = vmatmul.f32.vlgmr.msra.gmra.mxu2 %v2970_v54  ;;  %v1333_v60 = vld [vmem:[#allocation8 + $0x1f28] sm:$0xff]  ;;  %v590_v42 = vld [vmem:[#allocation8 + $0x7f0] sm:$0xff] }
 0x221   :  { %2254 = vmatmul.f32.vlgmr.msra.gmra.mxu3 %v2972_v55  ;;  %2261 = vmatpush.msrb.mxu0 %v949_v32  ;;  %v917_v61 = vld [vmem:[#allocation8 + $0x1228] sm:$0xff] }
 0x222   :  { %2281 = vmatpush.msrb.mxu1 %v1077_v44  ;;  %2298 = vmatpush.msrb.mxu2 %v1229_v45  ;;  %v1045_v62 = vld [vmem:[#allocation8 + $0x1628] sm:$0xff]  ;;  %v454_v44 = vld [vmem:[#allocation8 + $0x3b0] sm:$0xff] }
 0x223   :  { %2318 = vmatpush.msrb.mxu3 %v1357_v46  ;;  %2262 = vmatpush.msrb.mxu0 %v941_v47  ;;  %v1197_v63 = vld [vmem:[#allocation8 + $0x1ae8] sm:$0xff]  ;;  %v582_v45 = vld [vmem:[#allocation8 + $0x7b0] sm:$0xff] }
 0x224   :  { %2282 = vmatpush.msrb.mxu1 %v1069_v49  ;;  %2299 = vmatpush.msrb.mxu2 %v1221_v50  ;;  %v1325_v0 = vld [vmem:[#allocation8 + $0x1ee8] sm:$0xff]  ;;  %v446_v49 = vld [vmem:[#allocation8 + $0x370] sm:$0xff] }
 0x225   :  { %2319 = vmatpush.msrb.mxu3 %v1349_v51  ;;  %2263 = vmatpush.msrb.mxu0 %v933_v16  ;;  %v909_v2 = vld [vmem:[#allocation8 + $0x11e8] sm:$0xff]  ;;  %v574_v50 = vld [vmem:[#allocation8 + $0x770] sm:$0xff] }
 0x226   :  { %2283 = vmatpush.msrb.mxu1 %v1061_v52  ;;  %2300 = vmatpush.msrb.mxu2 %v1213_v53  ;;  %v1037_v3 = vld [vmem:[#allocation8 + $0x15e8] sm:$0xff]  ;;  %v438_v52 = vld [vmem:[#allocation8 + $0x330] sm:$0xff] }
 0x227   :  { %2320 = vmatpush.msrb.mxu3 %v1341_v56  ;;  %2264 = vmatpush.msrb.mxu0 %v925_v57  ;;  %v1189_v4 = vld [vmem:[#allocation8 + $0x1aa8] sm:$0xff]  ;;  %v566_v53 = vld [vmem:[#allocation8 + $0x730] sm:$0xff] }
 0x228   :  { %2284 = vmatpush.msrb.mxu1 %v1053_v1  ;;  %2301 = vmatpush.msrb.mxu2 %v1205_v59  ;;  %v1317_v5 = vld [vmem:[#allocation8 + $0x1ea8] sm:$0xff]  ;;  %v718_v56 = vld [vmem:[#allocation8 + $0xbf0] sm:$0xff] }
 0x229   :  { %2321 = vmatpush.msrb.mxu3 %v1333_v60  ;;  %2265 = vmatpush.msrb.mxu0 %v917_v61  ;;  %v901_v6 = vld [vmem:[#allocation8 + $0x11a8] sm:$0xff]  ;;  %v846_v57 = vld [vmem:[#allocation8 + $0xff0] sm:$0xff] }
 0x22a   :  { %2285 = vmatpush.msrb.mxu1 %v1045_v62  ;;  %2302 = vmatpush.msrb.mxu2 %v1197_v63  ;;  %v1029_v7 = vld [vmem:[#allocation8 + $0x15a8] sm:$0xff]  ;;  %v430_v1 = vld [vmem:[#allocation8 + $0x2f0] sm:$0xff] }
 0x22b   :  { %2322 = vmatpush.msrb.mxu3 %v1325_v0  ;;  %2266 = vmatpush.msrb.mxu0 %v909_v2  ;;  %v1181_v8 = vld [vmem:[#allocation8 + $0x1a68] sm:$0xff]  ;;  %v558_v59 = vld [vmem:[#allocation8 + $0x6f0] sm:$0xff] }
 0x22c   :  { %2286 = vmatpush.msrb.mxu1 %v1037_v3  ;;  %v1309_v9 = vld [vmem:[#allocation8 + $0x1e68] sm:$0xff]  ;;  %2303 = vmatpush.msrb.mxu2 %v1189_v4  ;;  %v710_v60 = vld [vmem:[#allocation8 + $0xbb0] sm:$0xff] }
 0x22d   :  { %2323 = vmatpush.msrb.mxu3 %v1317_v5  ;;  %v893_v10 = vld [vmem:[#allocation8 + $0x1168] sm:$0xff]  ;;  %2267 = vmatpush.msrb.mxu0 %v901_v6  ;;  %v838_v61 = vld [vmem:[#allocation8 + $0xfb0] sm:$0xff] }
 0x22e   :  { %v1021_v11 = vld [vmem:[#allocation8 + $0x1568] sm:$0xff]  ;;  %2287 = vmatpush.msrb.mxu1 %v1029_v7  ;;  %2304 = vmatpush.msrb.mxu2 %v1181_v8  ;;  %v422_v62 = vld [vmem:[#allocation8 + $0x2b0] sm:$0xff] }
 0x22f   :  { %v1173_v12 = vld [vmem:[#allocation8 + $0x1a28] sm:$0xff]  ;;  %2324 = vmatpush.msrb.mxu3 %v1309_v9  ;;  %2268 = vmatpush.msrb.mxu0 %v893_v10  ;;  %v550_v63 = vld [vmem:[#allocation8 + $0x6b0] sm:$0xff] }
 0x230   :  { %v1301_v13 = vld [vmem:[#allocation8 + $0x1e28] sm:$0xff]  ;;  %2288 = vmatpush.msrb.mxu1 %v1021_v11  ;;  %2305 = vmatpush.msrb.mxu2 %v1173_v12  ;;  %v702_v0 = vld [vmem:[#allocation8 + $0xb70] sm:$0xff] }
 0x231   :  { %v885_v14 = vld [vmem:[#allocation8 + $0x1128] sm:$0xff]  ;;  %2325 = vmatpush.msrb.mxu3 %v1301_v13  ;;  %v830_v2 = vld [vmem:[#allocation8 + $0xf70] sm:$0xff] }
 0x232   :  { %v1013_v15 = vld [vmem:[#allocation8 + $0x1528] sm:$0xff]  ;;  %2269 = vmatpush.msrb.mxu0 %v885_v14  ;;  %v414_v3 = vld [vmem:[#allocation8 + $0x270] sm:$0xff] }
 0x233   :  { %v1165_v17 = vld [vmem:[#allocation8 + $0x19e8] sm:$0xff]  ;;  %2289 = vmatpush.msrb.mxu1 %v1013_v15  ;;  %v542_v4 = vld [vmem:[#allocation8 + $0x670] sm:$0xff] }
 0x234   :  { %v1293_v18 = vld [vmem:[#allocation8 + $0x1de8] sm:$0xff]  ;;  %2306 = vmatpush.msrb.mxu2 %v1165_v17  ;;  %v694_v5 = vld [vmem:[#allocation8 + $0xb30] sm:$0xff] }
 0x235   :  { %v877_v20 = vld [vmem:[#allocation8 + $0x10e8] sm:$0xff]  ;;  %2326 = vmatpush.msrb.mxu3 %v1293_v18  ;;  %v822_v6 = vld [vmem:[#allocation8 + $0xf30] sm:$0xff] }
 0x236   :  { %v1005_v21 = vld [vmem:[#allocation8 + $0x14e8] sm:$0xff]  ;;  %2270 = vmatpush.msrb.mxu0 %v877_v20  ;;  %v406_v7 = vld [vmem:[#allocation8 + $0x230] sm:$0xff] }
 0x237   :  { %v1157_v23 = vld [vmem:[#allocation8 + $0x19a8] sm:$0xff]  ;;  %2290 = vmatpush.msrb.mxu1 %v1005_v21  ;;  %v534_v8 = vld [vmem:[#allocation8 + $0x630] sm:$0xff] }
 0x238   :  { %v1285_v24 = vld [vmem:[#allocation8 + $0x1da8] sm:$0xff]  ;;  %2307 = vmatpush.msrb.mxu2 %v1157_v23  ;;  %v686_v9 = vld [vmem:[#allocation8 + $0xaf0] sm:$0xff] }
 0x239   :  { %v869_v26 = vld [vmem:[#allocation8 + $0x10a8] sm:$0xff]  ;;  %2327 = vmatpush.msrb.mxu3 %v1285_v24  ;;  %v814_v10 = vld [vmem:[#allocation8 + $0xef0] sm:$0xff] }
 0x23a   :  { %v997_v27 = vld [vmem:[#allocation8 + $0x14a8] sm:$0xff]  ;;  %2271 = vmatpush.msrb.mxu0 %v869_v26  ;;  %v398_v11 = vld [vmem:[#allocation8 + $0x1f0] sm:$0xff] }
 0x23b   :  { %v1149_v29 = vld [vmem:[#allocation8 + $0x1968] sm:$0xff]  ;;  %2291 = vmatpush.msrb.mxu1 %v997_v27  ;;  %v526_v12 = vld [vmem:[#allocation8 + $0x5f0] sm:$0xff] }
 0x23c   :  { %v1277_v30 = vld [vmem:[#allocation8 + $0x1d68] sm:$0xff]  ;;  %2308 = vmatpush.msrb.mxu2 %v1149_v29  ;;  %v678_v13 = vld [vmem:[#allocation8 + $0xab0] sm:$0xff] }
 0x23d   :  { %v861_v31 = vld [vmem:[#allocation8 + $0x1068] sm:$0xff]  ;;  %2328 = vmatpush.msrb.mxu3 %v1277_v30  ;;  %v806_v14 = vld [vmem:[#allocation8 + $0xeb0] sm:$0xff] }
 0x23e   :  { %v989_v33 = vld [vmem:[#allocation8 + $0x1468] sm:$0xff]  ;;  %2272 = vmatpush.msrb.mxu0 %v861_v31  ;;  %v390_v15 = vld [vmem:[#allocation8 + $0x1b0] sm:$0xff] }
 0x23f   :  { %v1141_v34 = vld [vmem:[#allocation8 + $0x1928] sm:$0xff]  ;;  %2292 = vmatpush.msrb.mxu1 %v989_v33  ;;  %v518_v17 = vld [vmem:[#allocation8 + $0x5b0] sm:$0xff] }
 0x240   :  { %v1269_v35 = vld [vmem:[#allocation8 + $0x1d28] sm:$0xff]  ;;  %2309 = vmatpush.msrb.mxu2 %v1141_v34  ;;  %v670_v18 = vld [vmem:[#allocation8 + $0xa70] sm:$0xff] }
 0x241   :  { %v853_v36 = vld [vmem:[#allocation8 + $0x1028] sm:$0xff]  ;;  %2329 = vmatpush.msrb.mxu3 %v1269_v35  ;;  %v798_v20 = vld [vmem:[#allocation8 + $0xe70] sm:$0xff] }
 0x242   :  { %v981_v58 = vld [vmem:[#allocation8 + $0x1428] sm:$0xff]  ;;  %2273 = vmatpush.msrb.mxu0 %v853_v36  ;;  %v382_v21 = vld [vmem:[#allocation8 + $0x170] sm:$0xff] }
 0x243   :  { %v1133_v37 = vld [vmem:[#allocation8 + $0x18e8] sm:$0xff]  ;;  %2293 = vmatpush.msrb.mxu1 %v981_v58  ;;  %2274 = vmatmul.f32.vlgmr.msrb.gmra.mxu0 %v2982_v22  ;;  %v510_v23 = vld [vmem:[#allocation8 + $0x570] sm:$0xff] }
 0x244   :  { %v1261_v38 = vld [vmem:[#allocation8 + $0x1ce8] sm:$0xff]  ;;  %2310 = vmatpush.msrb.mxu2 %v1133_v37  ;;  %2294 = vmatmul.f32.vlgmr.msrb.gmra.mxu1 %v2987_v28  ;;  %v662_v24 = vld [vmem:[#allocation8 + $0xa30] sm:$0xff] }
 0x245   :  { %2330 = vmatpush.msrb.mxu3 %v1261_v38  ;;  %v1125_v43 = vld [vmem:[#allocation8 + $0x18a8] sm:$0xff]  ;;  %2338 = vmatpush.msra.mxu0 %v462_v39  ;;  %v790_v26 = vld [vmem:[#allocation8 + $0xe30] sm:$0xff] }
 0x246   :  { %v1253_v32 = vld [vmem:[#allocation8 + $0x1ca8] sm:$0xff]  ;;  %2358 = vmatpush.msra.mxu1 %v590_v42  ;;  %2311 = vmatpush.msrb.mxu2 %v1125_v43  ;;  %v374_v27 = vld [vmem:[#allocation8 + $0x130] sm:$0xff] }
 0x247   :  { %v1117_v46 = vld [vmem:[#allocation8 + $0x1868] sm:$0xff]  ;;  %2331 = vmatpush.msrb.mxu3 %v1253_v32  ;;  %2339 = vmatpush.msra.mxu0 %v454_v44  ;;  %v502_v29 = vld [vmem:[#allocation8 + $0x530] sm:$0xff] }
 0x248   :  { %v1245_v47 = vld [vmem:[#allocation8 + $0x1c68] sm:$0xff]  ;;  %2359 = vmatpush.msra.mxu1 %v582_v45  ;;  %2312 = vmatpush.msrb.mxu2 %v1117_v46  ;;  %v654_v30 = vld [vmem:[#allocation8 + $0x9f0] sm:$0xff] }
 0x249   :  { %v1109_v51 = vld [vmem:[#allocation8 + $0x1828] sm:$0xff]  ;;  %2332 = vmatpush.msrb.mxu3 %v1245_v47  ;;  %2340 = vmatpush.msra.mxu0 %v446_v49  ;;  %v782_v31 = vld [vmem:[#allocation8 + $0xdf0] sm:$0xff] }
 0x24a   :  { %v1237_v16 = vld [vmem:[#allocation8 + $0x1c28] sm:$0xff]  ;;  %2360 = vmatpush.msra.mxu1 %v574_v50  ;;  %2313 = vmatpush.msrb.mxu2 %v1109_v51  ;;  %v366_v33 = vld [vmem:[#allocation8 + $0xf0] sm:$0xff] }
 0x24b   :  { %2333 = vmatpush.msrb.mxu3 %v1237_v16  ;;  %2314 = vmatmul.f32.vlgmr.msrb.gmra.mxu2 %v2980_v19  ;;  %v494_v34 = vld [vmem:[#allocation8 + $0x4f0] sm:$0xff] }
 0x24c   :  { %2334 = vmatmul.f32.vlgmr.msrb.gmra.mxu3 %v2984_v25  ;;  %2341 = vmatpush.msra.mxu0 %v438_v52  ;;  %v646_v35 = vld [vmem:[#allocation8 + $0x9b0] sm:$0xff] }
 0x24d   :  { %2361 = vmatpush.msra.mxu1 %v566_v53  ;;  %2378 = vmatpush.msra.mxu2 %v718_v56  ;;  %v774_v36 = vld [vmem:[#allocation8 + $0xdb0] sm:$0xff] }
 0x24e   :  { %2398 = vmatpush.msra.mxu3 %v846_v57  ;;  %2342 = vmatpush.msra.mxu0 %v430_v1  ;;  %v358_v58 = vld [vmem:[#allocation8 + $0xb0] sm:$0xff] }
 0x24f   :  { %2362 = vmatpush.msra.mxu1 %v558_v59  ;;  %2379 = vmatpush.msra.mxu2 %v710_v60  ;;  %v486_v37 = vld [vmem:[#allocation8 + $0x4b0] sm:$0xff] }
 0x250   :  { %2399 = vmatpush.msra.mxu3 %v838_v61  ;;  %2343 = vmatpush.msra.mxu0 %v422_v62  ;;  %v638_v38 = vld [vmem:[#allocation8 + $0x970] sm:$0xff] }
 0x251   :  { %2363 = vmatpush.msra.mxu1 %v550_v63  ;;  %2380 = vmatpush.msra.mxu2 %v702_v0  ;;  %v766_v39 = vld [vmem:[#allocation8 + $0xd70] sm:$0xff] }
 0x252   :  { %2400 = vmatpush.msra.mxu3 %v830_v2  ;;  %2344 = vmatpush.msra.mxu0 %v414_v3  ;;  %v350_v42 = vld [vmem:[#allocation8 + $0x70] sm:$0xff] }
 0x253   :  { %2364 = vmatpush.msra.mxu1 %v542_v4  ;;  %2381 = vmatpush.msra.mxu2 %v694_v5  ;;  %v478_v43 = vld [vmem:[#allocation8 + $0x470] sm:$0xff] }
 0x254   :  { %2401 = vmatpush.msra.mxu3 %v822_v6  ;;  %2345 = vmatpush.msra.mxu0 %v406_v7  ;;  %v630_v32 = vld [vmem:[#allocation8 + $0x930] sm:$0xff] }
 0x255   :  { %2365 = vmatpush.msra.mxu1 %v534_v8  ;;  %2382 = vmatpush.msra.mxu2 %v686_v9  ;;  %v758_v44 = vld [vmem:[#allocation8 + $0xd30] sm:$0xff] }
 0x256   :  { %2402 = vmatpush.msra.mxu3 %v814_v10  ;;  %2346 = vmatpush.msra.mxu0 %v398_v11  ;;  %v342_v45 = vld [vmem:[#allocation8 + $0x30] sm:$0xff] }
 0x257   :  { %2366 = vmatpush.msra.mxu1 %v526_v12  ;;  %2383 = vmatpush.msra.mxu2 %v678_v13  ;;  %v470_v46 = vld [vmem:[#allocation8 + $0x430] sm:$0xff] }
 0x258   :  { %2403 = vmatpush.msra.mxu3 %v806_v14  ;;  %2347 = vmatpush.msra.mxu0 %v390_v15  ;;  %v622_v47 = vld [vmem:[#allocation8 + $0x8f0] sm:$0xff] }
 0x259   :  { %2367 = vmatpush.msra.mxu1 %v518_v17  ;;  %2384 = vmatpush.msra.mxu2 %v670_v18  ;;  %v750_v49 = vld [vmem:[#allocation8 + $0xcf0] sm:$0xff] }
 0x25a   :  { %2404 = vmatpush.msra.mxu3 %v798_v20  ;;  %2348 = vmatpush.msra.mxu0 %v382_v21  ;;  %v974_v50 = vld [vmem:[#allocation8 + $0x13f0] sm:$0xff] }
 0x25b   :  { %2368 = vmatpush.msra.mxu1 %v510_v23  ;;  %2385 = vmatpush.msra.mxu2 %v662_v24  ;;  %v1102_v51 = vld [vmem:[#allocation8 + $0x17f0] sm:$0xff] }
 0x25c   :  { %2405 = vmatpush.msra.mxu3 %v790_v26  ;;  %2349 = vmatpush.msra.mxu0 %v374_v27  ;;  %v614_v16 = vld [vmem:[#allocation8 + $0x8b0] sm:$0xff] }
 0x25d   :  { %2369 = vmatpush.msra.mxu1 %v502_v29  ;;  %2386 = vmatpush.msra.mxu2 %v654_v30  ;;  %v742_v52 = vld [vmem:[#allocation8 + $0xcb0] sm:$0xff] }
 0x25e   :  { %2406 = vmatpush.msra.mxu3 %v782_v31  ;;  %2350 = vmatpush.msra.mxu0 %v366_v33  ;;  %v966_v53 = vld [vmem:[#allocation8 + $0x13b0] sm:$0xff] }
 0x25f   :  { %2370 = vmatpush.msra.mxu1 %v494_v34  ;;  %2387 = vmatpush.msra.mxu2 %v646_v35  ;;  %v1094_v56 = vld [vmem:[#allocation8 + $0x17b0] sm:$0xff] }
 0x260   :  { %2407 = vmatpush.msra.mxu3 %v774_v36  ;;  %2351 = vmatpush.msra.mxu0 %v358_v58  ;;  %v606_v57 = vld [vmem:[#allocation8 + $0x870] sm:$0xff] }
 0x261   :  { %2371 = vmatpush.msra.mxu1 %v486_v37  ;;  %2388 = vmatpush.msra.mxu2 %v638_v38  ;;  %v734_v1 = vld [vmem:[#allocation8 + $0xc70] sm:$0xff] }
 0x262   :  { %2408 = vmatpush.msra.mxu3 %v766_v39  ;;  %2352 = vmatpush.msra.mxu0 %v350_v42  ;;  %v958_v59 = vld [vmem:[#allocation8 + $0x1370] sm:$0xff] }
 0x263   :  { %2372 = vmatpush.msra.mxu1 %v478_v43  ;;  %2389 = vmatpush.msra.mxu2 %v630_v32  ;;  %v1086_v60 = vld [vmem:[#allocation8 + $0x1770] sm:$0xff] }
 0x264   :  { %2409 = vmatpush.msra.mxu3 %v758_v44  ;;  %2353 = vmatpush.msra.mxu0 %v342_v45  ;;  %v598_v61 = vld [vmem:[#allocation8 + $0x830] sm:$0xff] }
 0x265   :  { %2373 = vmatpush.msra.mxu1 %v470_v46  ;;  %2390 = vmatpush.msra.mxu2 %v622_v47  ;;  %v726_v62 = vld [vmem:[#allocation8 + $0xc30] sm:$0xff] }
 0x266   :  { %2410 = vmatpush.msra.mxu3 %v750_v49  ;;  %2354 = vmatmul.f32.vlgmr.msra.gmra.mxu0 %v2962_v40  ;;  %v950_v63 = vld [vmem:[#allocation8 + $0x1330] sm:$0xff] }
 0x267   :  { %2374 = vmatmul.f32.vlgmr.msra.gmra.mxu1 %v2964_v41  ;;  %2418 = vmatpush.msrb.mxu0 %v974_v50  ;;  %v1078_v0 = vld [vmem:[#allocation8 + $0x1730] sm:$0xff] }
 0x268   :  { %2438 = vmatpush.msrb.mxu1 %v1102_v51  ;;  %2391 = vmatpush.msra.mxu2 %v614_v16  ;;  %v1230_v2 = vld [vmem:[#allocation8 + $0x1bf0] sm:$0xff] }
 0x269   :  { %2411 = vmatpush.msra.mxu3 %v742_v52  ;;  %2419 = vmatpush.msrb.mxu0 %v966_v53  ;;  %v1358_v3 = vld [vmem:[#allocation8 + $0x1ff0] sm:$0xff] }
 0x26a   :  { %2439 = vmatpush.msrb.mxu1 %v1094_v56  ;;  %2392 = vmatpush.msra.mxu2 %v606_v57  ;;  %v942_v4 = vld [vmem:[#allocation8 + $0x12f0] sm:$0xff] }
 0x26b   :  { %2412 = vmatpush.msra.mxu3 %v734_v1  ;;  %2420 = vmatpush.msrb.mxu0 %v958_v59  ;;  %v1070_v5 = vld [vmem:[#allocation8 + $0x16f0] sm:$0xff] }
 0x26c   :  { %2440 = vmatpush.msrb.mxu1 %v1086_v60  ;;  %2393 = vmatpush.msra.mxu2 %v598_v61  ;;  %v1222_v6 = vld [vmem:[#allocation8 + $0x1bb0] sm:$0xff]  ;;  %v463_v60 = vld [vmem:[#allocation8 + $0x3f8] sm:$0xff] }
 0x26d   :  { %2413 = vmatpush.msra.mxu3 %v726_v62  ;;  %2394 = vmatmul.f32.vlgmr.msra.gmra.mxu2 %v2970_v54  ;;  %v1350_v7 = vld [vmem:[#allocation8 + $0x1fb0] sm:$0xff]  ;;  %v591_v61 = vld [vmem:[#allocation8 + $0x7f8] sm:$0xff] }
 0x26e   :  { %2414 = vmatmul.f32.vlgmr.msra.gmra.mxu3 %v2972_v55  ;;  %2421 = vmatpush.msrb.mxu0 %v950_v63  ;;  %v934_v8 = vld [vmem:[#allocation8 + $0x12b0] sm:$0xff] }
 0x26f   :  { %2441 = vmatpush.msrb.mxu1 %v1078_v0  ;;  %2458 = vmatpush.msrb.mxu2 %v1230_v2  ;;  %v1062_v9 = vld [vmem:[#allocation8 + $0x16b0] sm:$0xff]  ;;  %v455_v0 = vld [vmem:[#allocation8 + $0x3b8] sm:$0xff] }
 0x270   :  { %2478 = vmatpush.msrb.mxu3 %v1358_v3  ;;  %2422 = vmatpush.msrb.mxu0 %v942_v4  ;;  %v1214_v10 = vld [vmem:[#allocation8 + $0x1b70] sm:$0xff]  ;;  %v583_v2 = vld [vmem:[#allocation8 + $0x7b8] sm:$0xff] }
 0x271   :  { %2442 = vmatpush.msrb.mxu1 %v1070_v5  ;;  %v1342_v11 = vld [vmem:[#allocation8 + $0x1f70] sm:$0xff]  ;;  %2459 = vmatpush.msrb.mxu2 %v1222_v6  ;;  %v447_v5 = vld [vmem:[#allocation8 + $0x378] sm:$0xff] }
 0x272   :  { %2479 = vmatpush.msrb.mxu3 %v1350_v7  ;;  %v926_v12 = vld [vmem:[#allocation8 + $0x1270] sm:$0xff]  ;;  %2423 = vmatpush.msrb.mxu0 %v934_v8  ;;  %v575_v6 = vld [vmem:[#allocation8 + $0x778] sm:$0xff] }
 0x273   :  { %v1054_v13 = vld [vmem:[#allocation8 + $0x1670] sm:$0xff]  ;;  %2443 = vmatpush.msrb.mxu1 %v1062_v9  ;;  %2460 = vmatpush.msrb.mxu2 %v1214_v10  ;;  %v439_v9 = vld [vmem:[#allocation8 + $0x338] sm:$0xff] }
 0x274   :  { %v1206_v14 = vld [vmem:[#allocation8 + $0x1b30] sm:$0xff]  ;;  %2480 = vmatpush.msrb.mxu3 %v1342_v11  ;;  %2424 = vmatpush.msrb.mxu0 %v926_v12  ;;  %v567_v10 = vld [vmem:[#allocation8 + $0x738] sm:$0xff] }
 0x275   :  { %v1334_v15 = vld [vmem:[#allocation8 + $0x1f30] sm:$0xff]  ;;  %2444 = vmatpush.msrb.mxu1 %v1054_v13  ;;  %2461 = vmatpush.msrb.mxu2 %v1206_v14  ;;  %v719_v11 = vld [vmem:[#allocation8 + $0xbf8] sm:$0xff] }
 0x276   :  { %v918_v17 = vld [vmem:[#allocation8 + $0x1230] sm:$0xff]  ;;  %2481 = vmatpush.msrb.mxu3 %v1334_v15  ;;  %v847_v12 = vld [vmem:[#allocation8 + $0xff8] sm:$0xff] }
 0x277   :  { %v1046_v18 = vld [vmem:[#allocation8 + $0x1630] sm:$0xff]  ;;  %2425 = vmatpush.msrb.mxu0 %v918_v17  ;;  %v431_v13 = vld [vmem:[#allocation8 + $0x2f8] sm:$0xff] }
 0x278   :  { %v1198_v20 = vld [vmem:[#allocation8 + $0x1af0] sm:$0xff]  ;;  %2445 = vmatpush.msrb.mxu1 %v1046_v18  ;;  %v559_v14 = vld [vmem:[#allocation8 + $0x6f8] sm:$0xff] }
 0x279   :  { %v1326_v21 = vld [vmem:[#allocation8 + $0x1ef0] sm:$0xff]  ;;  %2462 = vmatpush.msrb.mxu2 %v1198_v20  ;;  %v711_v15 = vld [vmem:[#allocation8 + $0xbb8] sm:$0xff] }
 0x27a   :  { %v910_v23 = vld [vmem:[#allocation8 + $0x11f0] sm:$0xff]  ;;  %2482 = vmatpush.msrb.mxu3 %v1326_v21  ;;  %v839_v17 = vld [vmem:[#allocation8 + $0xfb8] sm:$0xff] }
 0x27b   :  { %v1038_v24 = vld [vmem:[#allocation8 + $0x15f0] sm:$0xff]  ;;  %2426 = vmatpush.msrb.mxu0 %v910_v23  ;;  %v423_v18 = vld [vmem:[#allocation8 + $0x2b8] sm:$0xff] }
 0x27c   :  { %v1190_v26 = vld [vmem:[#allocation8 + $0x1ab0] sm:$0xff]  ;;  %2446 = vmatpush.msrb.mxu1 %v1038_v24  ;;  %v551_v20 = vld [vmem:[#allocation8 + $0x6b8] sm:$0xff] }
 0x27d   :  { %v1318_v27 = vld [vmem:[#allocation8 + $0x1eb0] sm:$0xff]  ;;  %2463 = vmatpush.msrb.mxu2 %v1190_v26  ;;  %v703_v21 = vld [vmem:[#allocation8 + $0xb78] sm:$0xff] }
 0x27e   :  { %v902_v29 = vld [vmem:[#allocation8 + $0x11b0] sm:$0xff]  ;;  %2483 = vmatpush.msrb.mxu3 %v1318_v27  ;;  %v831_v23 = vld [vmem:[#allocation8 + $0xf78] sm:$0xff] }
 0x27f   :  { %v1030_v30 = vld [vmem:[#allocation8 + $0x15b0] sm:$0xff]  ;;  %2427 = vmatpush.msrb.mxu0 %v902_v29  ;;  %v415_v24 = vld [vmem:[#allocation8 + $0x278] sm:$0xff] }
 0x280   :  { %v1182_v31 = vld [vmem:[#allocation8 + $0x1a70] sm:$0xff]  ;;  %2447 = vmatpush.msrb.mxu1 %v1030_v30  ;;  %v543_v26 = vld [vmem:[#allocation8 + $0x678] sm:$0xff] }
 0x281   :  { %v1310_v33 = vld [vmem:[#allocation8 + $0x1e70] sm:$0xff]  ;;  %2464 = vmatpush.msrb.mxu2 %v1182_v31  ;;  %v695_v27 = vld [vmem:[#allocation8 + $0xb38] sm:$0xff] }
 0x282   :  { %v894_v34 = vld [vmem:[#allocation8 + $0x1170] sm:$0xff]  ;;  %2484 = vmatpush.msrb.mxu3 %v1310_v33  ;;  %v823_v29 = vld [vmem:[#allocation8 + $0xf38] sm:$0xff] }
 0x283   :  { %v1022_v35 = vld [vmem:[#allocation8 + $0x1570] sm:$0xff]  ;;  %2428 = vmatpush.msrb.mxu0 %v894_v34  ;;  %v407_v30 = vld [vmem:[#allocation8 + $0x238] sm:$0xff] }
 0x284   :  { %v1174_v36 = vld [vmem:[#allocation8 + $0x1a30] sm:$0xff]  ;;  %2448 = vmatpush.msrb.mxu1 %v1022_v35  ;;  %v535_v31 = vld [vmem:[#allocation8 + $0x638] sm:$0xff] }
 0x285   :  { %v1302_v58 = vld [vmem:[#allocation8 + $0x1e30] sm:$0xff]  ;;  %2465 = vmatpush.msrb.mxu2 %v1174_v36  ;;  %v687_v33 = vld [vmem:[#allocation8 + $0xaf8] sm:$0xff] }
 0x286   :  { %v886_v37 = vld [vmem:[#allocation8 + $0x1130] sm:$0xff]  ;;  %2485 = vmatpush.msrb.mxu3 %v1302_v58  ;;  %v815_v34 = vld [vmem:[#allocation8 + $0xef8] sm:$0xff] }
 0x287   :  { %v1014_v38 = vld [vmem:[#allocation8 + $0x1530] sm:$0xff]  ;;  %2429 = vmatpush.msrb.mxu0 %v886_v37  ;;  %v399_v35 = vld [vmem:[#allocation8 + $0x1f8] sm:$0xff] }
 0x288   :  { %v1166_v39 = vld [vmem:[#allocation8 + $0x19f0] sm:$0xff]  ;;  %2449 = vmatpush.msrb.mxu1 %v1014_v38  ;;  %v527_v36 = vld [vmem:[#allocation8 + $0x5f8] sm:$0xff] }
 0x289   :  { %v1294_v42 = vld [vmem:[#allocation8 + $0x1df0] sm:$0xff]  ;;  %2466 = vmatpush.msrb.mxu2 %v1166_v39  ;;  %v679_v58 = vld [vmem:[#allocation8 + $0xab8] sm:$0xff] }
 0x28a   :  { %v878_v43 = vld [vmem:[#allocation8 + $0x10f0] sm:$0xff]  ;;  %2486 = vmatpush.msrb.mxu3 %v1294_v42  ;;  %v807_v37 = vld [vmem:[#allocation8 + $0xeb8] sm:$0xff] }
 0x28b   :  { %v1006_v32 = vld [vmem:[#allocation8 + $0x14f0] sm:$0xff]  ;;  %2430 = vmatpush.msrb.mxu0 %v878_v43  ;;  %v391_v38 = vld [vmem:[#allocation8 + $0x1b8] sm:$0xff] }
 0x28c   :  { %v1158_v44 = vld [vmem:[#allocation8 + $0x19b0] sm:$0xff]  ;;  %2450 = vmatpush.msrb.mxu1 %v1006_v32  ;;  %v519_v39 = vld [vmem:[#allocation8 + $0x5b8] sm:$0xff] }
 0x28d   :  { %v1286_v45 = vld [vmem:[#allocation8 + $0x1db0] sm:$0xff]  ;;  %2467 = vmatpush.msrb.mxu2 %v1158_v44  ;;  %v671_v42 = vld [vmem:[#allocation8 + $0xa78] sm:$0xff] }
 0x28e   :  { %v870_v46 = vld [vmem:[#allocation8 + $0x10b0] sm:$0xff]  ;;  %2487 = vmatpush.msrb.mxu3 %v1286_v45  ;;  %v799_v43 = vld [vmem:[#allocation8 + $0xe78] sm:$0xff] }
 0x28f   :  { %v998_v47 = vld [vmem:[#allocation8 + $0x14b0] sm:$0xff]  ;;  %2431 = vmatpush.msrb.mxu0 %v870_v46  ;;  %v383_v32 = vld [vmem:[#allocation8 + $0x178] sm:$0xff] }
 0x290   :  { %v1150_v49 = vld [vmem:[#allocation8 + $0x1970] sm:$0xff]  ;;  %2451 = vmatpush.msrb.mxu1 %v998_v47  ;;  %v511_v44 = vld [vmem:[#allocation8 + $0x578] sm:$0xff] }
 0x291   :  { %v1278_v50 = vld [vmem:[#allocation8 + $0x1d70] sm:$0xff]  ;;  %2468 = vmatpush.msrb.mxu2 %v1150_v49  ;;  %v663_v45 = vld [vmem:[#allocation8 + $0xa38] sm:$0xff] }
 0x292   :  { %v862_v51 = vld [vmem:[#allocation8 + $0x1070] sm:$0xff]  ;;  %2488 = vmatpush.msrb.mxu3 %v1278_v50  ;;  %v791_v46 = vld [vmem:[#allocation8 + $0xe38] sm:$0xff] }
 0x293   :  { %v990_v16 = vld [vmem:[#allocation8 + $0x1470] sm:$0xff]  ;;  %2432 = vmatpush.msrb.mxu0 %v862_v51  ;;  %v375_v47 = vld [vmem:[#allocation8 + $0x138] sm:$0xff] }
 0x294   :  { %v1142_v52 = vld [vmem:[#allocation8 + $0x1930] sm:$0xff]  ;;  %2452 = vmatpush.msrb.mxu1 %v990_v16  ;;  %v503_v49 = vld [vmem:[#allocation8 + $0x538] sm:$0xff] }
 0x295   :  { %v1270_v53 = vld [vmem:[#allocation8 + $0x1d30] sm:$0xff]  ;;  %2469 = vmatpush.msrb.mxu2 %v1142_v52  ;;  %v655_v50 = vld [vmem:[#allocation8 + $0x9f8] sm:$0xff] }
 0x296   :  { %v854_v56 = vld [vmem:[#allocation8 + $0x1030] sm:$0xff]  ;;  %2489 = vmatpush.msrb.mxu3 %v1270_v53  ;;  %v783_v51 = vld [vmem:[#allocation8 + $0xdf8] sm:$0xff] }
 0x297   :  { %v982_v57 = vld [vmem:[#allocation8 + $0x1430] sm:$0xff]  ;;  %2433 = vmatpush.msrb.mxu0 %v854_v56  ;;  %v367_v16 = vld [vmem:[#allocation8 + $0xf8] sm:$0xff] }
 0x298   :  { %v1134_v1 = vld [vmem:[#allocation8 + $0x18f0] sm:$0xff]  ;;  %2453 = vmatpush.msrb.mxu1 %v982_v57  ;;  %2434 = vmatmul.f32.vlgmr.msrb.gmra.mxu0 %v2982_v22  ;;  %v495_v52 = vld [vmem:[#allocation8 + $0x4f8] sm:$0xff] }
 0x299   :  { %v1262_v59 = vld [vmem:[#allocation8 + $0x1cf0] sm:$0xff]  ;;  %2470 = vmatpush.msrb.mxu2 %v1134_v1  ;;  %2454 = vmatmul.f32.vlgmr.msrb.gmra.mxu1 %v2987_v28  ;;  %v647_v53 = vld [vmem:[#allocation8 + $0x9b8] sm:$0xff] }
 0x29a   :  { %2490 = vmatpush.msrb.mxu3 %v1262_v59  ;;  %v1126_v62 = vld [vmem:[#allocation8 + $0x18b0] sm:$0xff]  ;;  %2498 = vmatpush.msra.mxu0 %v463_v60  ;;  %v775_v56 = vld [vmem:[#allocation8 + $0xdb8] sm:$0xff] }
 0x29b   :  { %v1254_v63 = vld [vmem:[#allocation8 + $0x1cb0] sm:$0xff]  ;;  %2518 = vmatpush.msra.mxu1 %v591_v61  ;;  %2471 = vmatpush.msrb.mxu2 %v1126_v62  ;;  %v359_v57 = vld [vmem:[#allocation8 + $0xb8] sm:$0xff] }
 0x29c   :  { %v1118_v3 = vld [vmem:[#allocation8 + $0x1870] sm:$0xff]  ;;  %2491 = vmatpush.msrb.mxu3 %v1254_v63  ;;  %2499 = vmatpush.msra.mxu0 %v455_v0  ;;  %v487_v1 = vld [vmem:[#allocation8 + $0x4b8] sm:$0xff] }
 0x29d   :  { %v1246_v4 = vld [vmem:[#allocation8 + $0x1c70] sm:$0xff]  ;;  %2519 = vmatpush.msra.mxu1 %v583_v2  ;;  %2472 = vmatpush.msrb.mxu2 %v1118_v3  ;;  %v639_v59 = vld [vmem:[#allocation8 + $0x978] sm:$0xff] }
 0x29e   :  { %v1110_v7 = vld [vmem:[#allocation8 + $0x1830] sm:$0xff]  ;;  %2492 = vmatpush.msrb.mxu3 %v1246_v4  ;;  %2500 = vmatpush.msra.mxu0 %v447_v5  ;;  %v767_v60 = vld [vmem:[#allocation8 + $0xd78] sm:$0xff] }
 0x29f   :  { %v1238_v8 = vld [vmem:[#allocation8 + $0x1c30] sm:$0xff]  ;;  %2520 = vmatpush.msra.mxu1 %v575_v6  ;;  %2473 = vmatpush.msrb.mxu2 %v1110_v7  ;;  %v351_v61 = vld [vmem:[#allocation8 + $0x78] sm:$0xff] }
 0x2a0   :  { %2493 = vmatpush.msrb.mxu3 %v1238_v8  ;;  %2474 = vmatmul.f32.vlgmr.msrb.gmra.mxu2 %v2980_v19  ;;  %v479_v62 = vld [vmem:[#allocation8 + $0x478] sm:$0xff] }
 0x2a1   :  { %2494 = vmatmul.f32.vlgmr.msrb.gmra.mxu3 %v2984_v25  ;;  %2501 = vmatpush.msra.mxu0 %v439_v9  ;;  %v631_v63 = vld [vmem:[#allocation8 + $0x938] sm:$0xff] }
 0x2a2   :  { %2521 = vmatpush.msra.mxu1 %v567_v10  ;;  %2538 = vmatpush.msra.mxu2 %v719_v11  ;;  %v759_v0 = vld [vmem:[#allocation8 + $0xd38] sm:$0xff] }
 0x2a3   :  { %2558 = vmatpush.msra.mxu3 %v847_v12  ;;  %2502 = vmatpush.msra.mxu0 %v431_v13  ;;  %v343_v2 = vld [vmem:[#allocation8 + $0x38] sm:$0xff] }
 0x2a4   :  { %2522 = vmatpush.msra.mxu1 %v559_v14  ;;  %2539 = vmatpush.msra.mxu2 %v711_v15  ;;  %v471_v3 = vld [vmem:[#allocation8 + $0x438] sm:$0xff] }
 0x2a5   :  { %2559 = vmatpush.msra.mxu3 %v839_v17  ;;  %2503 = vmatpush.msra.mxu0 %v423_v18  ;;  %v623_v4 = vld [vmem:[#allocation8 + $0x8f8] sm:$0xff] }
 0x2a6   :  { %2523 = vmatpush.msra.mxu1 %v551_v20  ;;  %2540 = vmatpush.msra.mxu2 %v703_v21  ;;  %v751_v5 = vld [vmem:[#allocation8 + $0xcf8] sm:$0xff] }
 0x2a7   :  { %2560 = vmatpush.msra.mxu3 %v831_v23  ;;  %2504 = vmatpush.msra.mxu0 %v415_v24  ;;  %v975_v6 = vld [vmem:[#allocation8 + $0x13f8] sm:$0xff] }
 0x2a8   :  { %2524 = vmatpush.msra.mxu1 %v543_v26  ;;  %2541 = vmatpush.msra.mxu2 %v695_v27  ;;  %v1103_v7 = vld [vmem:[#allocation8 + $0x17f8] sm:$0xff] }
 0x2a9   :  { %2561 = vmatpush.msra.mxu3 %v823_v29  ;;  %2505 = vmatpush.msra.mxu0 %v407_v30  ;;  %v615_v8 = vld [vmem:[#allocation8 + $0x8b8] sm:$0xff] }
 0x2aa   :  { %2525 = vmatpush.msra.mxu1 %v535_v31  ;;  %2542 = vmatpush.msra.mxu2 %v687_v33  ;;  %v743_v9 = vld [vmem:[#allocation8 + $0xcb8] sm:$0xff] }
 0x2ab   :  { %2562 = vmatpush.msra.mxu3 %v815_v34  ;;  %2506 = vmatpush.msra.mxu0 %v399_v35  ;;  %v967_v10 = vld [vmem:[#allocation8 + $0x13b8] sm:$0xff] }
 0x2ac   :  { %2526 = vmatpush.msra.mxu1 %v527_v36  ;;  %2543 = vmatpush.msra.mxu2 %v679_v58  ;;  %v1095_v11 = vld [vmem:[#allocation8 + $0x17b8] sm:$0xff] }
 0x2ad   :  { %2563 = vmatpush.msra.mxu3 %v807_v37  ;;  %2507 = vmatpush.msra.mxu0 %v391_v38  ;;  %v607_v12 = vld [vmem:[#allocation8 + $0x878] sm:$0xff] }
 0x2ae   :  { %2527 = vmatpush.msra.mxu1 %v519_v39  ;;  %2544 = vmatpush.msra.mxu2 %v671_v42  ;;  %v735_v13 = vld [vmem:[#allocation8 + $0xc78] sm:$0xff] }
 0x2af   :  { %2564 = vmatpush.msra.mxu3 %v799_v43  ;;  %2508 = vmatpush.msra.mxu0 %v383_v32  ;;  %v959_v14 = vld [vmem:[#allocation8 + $0x1378] sm:$0xff] }
 0x2b0   :  { %2528 = vmatpush.msra.mxu1 %v511_v44  ;;  %2545 = vmatpush.msra.mxu2 %v663_v45  ;;  %v1087_v15 = vld [vmem:[#allocation8 + $0x1778] sm:$0xff] }
 0x2b1   :  { %2565 = vmatpush.msra.mxu3 %v791_v46  ;;  %2509 = vmatpush.msra.mxu0 %v375_v47  ;;  %v599_v17 = vld [vmem:[#allocation8 + $0x838] sm:$0xff] }
 0x2b2   :  { %2529 = vmatpush.msra.mxu1 %v503_v49  ;;  %2546 = vmatpush.msra.mxu2 %v655_v50  ;;  %v727_v18 = vld [vmem:[#allocation8 + $0xc38] sm:$0xff] }
 0x2b3   :  { %2566 = vmatpush.msra.mxu3 %v783_v51  ;;  %2510 = vmatpush.msra.mxu0 %v367_v16  ;;  %v1231_v20 = vld [vmem:[#allocation8 + $0x1bf8] sm:$0xff] }
 0x2b4   :  { %2530 = vmatpush.msra.mxu1 %v495_v52  ;;  %2547 = vmatpush.msra.mxu2 %v647_v53  ;;  %v1359_v21 = vld [vmem:[#allocation8 + $0x1ff8] sm:$0xff] }
 0x2b5   :  { %2567 = vmatpush.msra.mxu3 %v775_v56  ;;  %2511 = vmatpush.msra.mxu0 %v359_v57  ;;  %v943_v23 = vld [vmem:[#allocation8 + $0x12f8] sm:$0xff] }
 0x2b6   :  { %2531 = vmatpush.msra.mxu1 %v487_v1  ;;  %2548 = vmatpush.msra.mxu2 %v639_v59  ;;  %v1071_v24 = vld [vmem:[#allocation8 + $0x16f8] sm:$0xff] }
 0x2b7   :  { %2568 = vmatpush.msra.mxu3 %v767_v60  ;;  %2512 = vmatpush.msra.mxu0 %v351_v61  ;;  %v1223_v26 = vld [vmem:[#allocation8 + $0x1bb8] sm:$0xff] }
 0x2b8   :  { %2532 = vmatpush.msra.mxu1 %v479_v62  ;;  %2549 = vmatpush.msra.mxu2 %v631_v63  ;;  %v1351_v27 = vld [vmem:[#allocation8 + $0x1fb8] sm:$0xff] }
 0x2b9   :  { %2569 = vmatpush.msra.mxu3 %v759_v0  ;;  %2513 = vmatpush.msra.mxu0 %v343_v2  ;;  %v935_v29 = vld [vmem:[#allocation8 + $0x12b8] sm:$0xff] }
 0x2ba   :  { %2533 = vmatpush.msra.mxu1 %v471_v3  ;;  %2550 = vmatpush.msra.mxu2 %v623_v4  ;;  %v1063_v30 = vld [vmem:[#allocation8 + $0x16b8] sm:$0xff] }
 0x2bb   :  { %2570 = vmatpush.msra.mxu3 %v751_v5  ;;  %2514 = vmatmul.f32.vlgmr.msra.gmra.mxu0 %v2962_v40  ;;  %v951_v40 = vld [vmem:[#allocation8 + $0x1338] sm:$0xff] }
 0x2bc   :  { %2534 = vmatmul.f32.vlgmr.msra.gmra.mxu1 %v2964_v41  ;;  %2578 = vmatpush.msrb.mxu0 %v975_v6  ;;  %v1079_v41 = vld [vmem:[#allocation8 + $0x1738] sm:$0xff] }
 0x2bd   :  { %2598 = vmatpush.msrb.mxu1 %v1103_v7  ;;  %2551 = vmatpush.msra.mxu2 %v615_v8  ;;  %v1215_v31 = vld [vmem:[#allocation8 + $0x1b78] sm:$0xff] }
 0x2be   :  { %2571 = vmatpush.msra.mxu3 %v743_v9  ;;  %2579 = vmatpush.msrb.mxu0 %v967_v10  ;;  %v1343_v33 = vld [vmem:[#allocation8 + $0x1f78] sm:$0xff] }
 0x2bf   :  { %2599 = vmatpush.msrb.mxu1 %v1095_v11  ;;  %2552 = vmatpush.msra.mxu2 %v607_v12  ;;  %v927_v34 = vld [vmem:[#allocation8 + $0x1278] sm:$0xff] }
 0x2c0   :  { %2572 = vmatpush.msra.mxu3 %v735_v13  ;;  %2580 = vmatpush.msrb.mxu0 %v959_v14  ;;  %v1335_v35 = vld [vmem:[#allocation8 + $0x1f38] sm:$0xff] }
 0x2c1   :  { %2600 = vmatpush.msrb.mxu1 %v1087_v15  ;;  %2553 = vmatpush.msra.mxu2 %v599_v17  ;;  %v919_v36 = vld [vmem:[#allocation8 + $0x1238] sm:$0xff] }
 0x2c2   :  { %2573 = vmatpush.msra.mxu3 %v727_v18  ;;  %2554 = vmatmul.f32.vlgmr.msra.gmra.mxu2 %v2970_v54  ;;  %v1055_v54 = vld [vmem:[#allocation8 + $0x1678] sm:$0xff]  ;;  %v1875_v18 = vpop.f32.mrf.mxu0 }
 0x2c3   :  { %2574 = vmatmul.f32.vlgmr.msra.gmra.mxu3 %v2972_v55  ;;  %2581 = vmatpush.msrb.mxu0 %v951_v40  ;;  %v1207_v55 = vld [vmem:[#allocation8 + $0x1b38] sm:$0xff]  ;;  %v1895_v40 = vpop.f32.mrf.mxu1 }
 0x2c4   :  { %2601 = vmatpush.msrb.mxu1 %v1079_v41  ;;  %2618 = vmatpush.msrb.mxu2 %v1231_v20  ;;  %v1047_v58 = vld [vmem:[#allocation8 + $0x1638] sm:$0xff]  ;;  %v1915_v41 = vpop.f32.mrf.mxu2  ;;  %v1935_v20 = vpop.f32.mrf.mxu3 }
 0x2c5   :  { %2638 = vmatpush.msrb.mxu3 %v1359_v21  ;;  %2582 = vmatpush.msrb.mxu0 %v943_v23  ;;  %v1199_v37 = vld [vmem:[#allocation8 + $0x1af8] sm:$0xff] }
 0x2c6   :  { %2602 = vmatpush.msrb.mxu1 %v1071_v24  ;;  %2619 = vmatpush.msrb.mxu2 %v1223_v26  ;;  %v1327_v38 = vld [vmem:[#allocation8 + $0x1ef8] sm:$0xff] }
 0x2c7   :  { %2639 = vmatpush.msrb.mxu3 %v1351_v27  ;;  %2583 = vmatpush.msrb.mxu0 %v935_v29  ;;  %v911_v39 = vld [vmem:[#allocation8 + $0x11f8] sm:$0xff] }
 0x2c8   :  { %2603 = vmatpush.msrb.mxu1 %v1063_v30  ;;  %2620 = vmatpush.msrb.mxu2 %v1215_v31  ;;  %v1039_v42 = vld [vmem:[#allocation8 + $0x15f8] sm:$0xff] }
 0x2c9   :  { %2640 = vmatpush.msrb.mxu3 %v1343_v33  ;;  %2584 = vmatpush.msrb.mxu0 %v927_v34  ;;  %v1191_v43 = vld [vmem:[#allocation8 + $0x1ab8] sm:$0xff] }
 0x2ca   :  { %2604 = vmatpush.msrb.mxu1 %v1055_v54  ;;  %2621 = vmatpush.msrb.mxu2 %v1207_v55  ;;  %v1319_v32 = vld [vmem:[#allocation8 + $0x1eb8] sm:$0xff] }
 0x2cb   :  { %2641 = vmatpush.msrb.mxu3 %v1335_v35  ;;  %2585 = vmatpush.msrb.mxu0 %v919_v36  ;;  %v903_v44 = vld [vmem:[#allocation8 + $0x11b8] sm:$0xff] }
 0x2cc   :  { %2605 = vmatpush.msrb.mxu1 %v1047_v58  ;;  %2622 = vmatpush.msrb.mxu2 %v1199_v37  ;;  %v1031_v45 = vld [vmem:[#allocation8 + $0x15b8] sm:$0xff]  ;;  %v1995_v21 = vpop.f32.mrf.mxu2  ;;  %v2015_v24 = vpop.f32.mrf.mxu3  ;;  %v2730_v37 = vld [vmem:[#allocation10] sm:$0xff] }
 0x2cd   :  { %2642 = vmatpush.msrb.mxu3 %v1327_v38  ;;  %2586 = vmatpush.msrb.mxu0 %v911_v39  ;;  %v1183_v46 = vld [vmem:[#allocation8 + $0x1a78] sm:$0xff]  ;;  %v1365_v38 = vperm.slane %v2730_v37, 3 }
 0x2ce   :  { %2606 = vmatpush.msrb.mxu1 %v1039_v42  ;;  %v1311_v47 = vld [vmem:[#allocation8 + $0x1e78] sm:$0xff]  ;;  %2623 = vmatpush.msrb.mxu2 %v1191_v43  ;;  %v1366_v42 = vperm.slane %v2730_v37, 4 }
 0x2cf   :  { %2643 = vmatpush.msrb.mxu3 %v1319_v32  ;;  %v895_v49 = vld [vmem:[#allocation8 + $0x1178] sm:$0xff]  ;;  %2587 = vmatpush.msrb.mxu0 %v903_v44  ;;  %v1876_v43 = vadd.f32 %v1875_v18, %v1365_v38  ;;  %v1367_v32 = vperm.slane %v2730_v37, 5 }
 0x2d0   :  { %v1023_v50 = vld [vmem:[#allocation8 + $0x1578] sm:$0xff]  ;;  %2607 = vmatpush.msrb.mxu1 %v1031_v45  ;;  %2624 = vmatpush.msrb.mxu2 %v1183_v46  ;;  %v1368_v46 = vperm.slane %v2730_v37, 6 }
 0x2d1   :  { %v1175_v51 = vld [vmem:[#allocation8 + $0x1a38] sm:$0xff]  ;;  %2644 = vmatpush.msrb.mxu3 %v1311_v47  ;;  %2588 = vmatpush.msrb.mxu0 %v895_v49 }
 0x2d2   :  { %v1303_v16 = vld [vmem:[#allocation8 + $0x1e38] sm:$0xff]  ;;  %2608 = vmatpush.msrb.mxu1 %v1023_v50  ;;  %2625 = vmatpush.msrb.mxu2 %v1175_v51  ;;  %v1896_v50 = vadd.f32 %v1895_v40, %v1876_v43 }
 0x2d3   :  { %v887_v52 = vld [vmem:[#allocation8 + $0x1138] sm:$0xff]  ;;  %2645 = vmatpush.msrb.mxu3 %v1303_v16 }
 0x2d4   :  { %v1015_v53 = vld [vmem:[#allocation8 + $0x1538] sm:$0xff]  ;;  %2589 = vmatpush.msrb.mxu0 %v887_v52  ;;  %v2075_v27 = vpop.f32.mrf.mxu2  ;;  %v2095_v30 = vpop.f32.mrf.mxu3  ;;  %v1916_v52 = vadd.f32 %v1915_v41, %v1896_v50 }
 0x2d5   :  { %v1167_v56 = vld [vmem:[#allocation8 + $0x19f8] sm:$0xff]  ;;  %2609 = vmatpush.msrb.mxu1 %v1015_v53 }
 0x2d6   :  { %v1295_v57 = vld [vmem:[#allocation8 + $0x1df8] sm:$0xff]  ;;  %2626 = vmatpush.msrb.mxu2 %v1167_v56 }
 0x2d7   :  { %v879_v1 = vld [vmem:[#allocation8 + $0x10f8] sm:$0xff]  ;;  %2646 = vmatpush.msrb.mxu3 %v1295_v57 }
 0x2d8   :  { %v1007_v59 = vld [vmem:[#allocation8 + $0x14f8] sm:$0xff]  ;;  %2590 = vmatpush.msrb.mxu0 %v879_v1 }
 0x2d9   :  { %v1159_v60 = vld [vmem:[#allocation8 + $0x19b8] sm:$0xff]  ;;  %2610 = vmatpush.msrb.mxu1 %v1007_v59 }
 0x2da   :  { %v1287_v61 = vld [vmem:[#allocation8 + $0x1db8] sm:$0xff]  ;;  %2627 = vmatpush.msrb.mxu2 %v1159_v60  ;;  %v1936_v60 = vadd.f32 %v1935_v20, %v1916_v52 }
 0x2db   :  { %v871_v62 = vld [vmem:[#allocation8 + $0x10b8] sm:$0xff]  ;;  %2647 = vmatpush.msrb.mxu3 %v1287_v61 }
 0x2dc   :  { %v999_v63 = vld [vmem:[#allocation8 + $0x14b8] sm:$0xff]  ;;  %2591 = vmatpush.msrb.mxu0 %v871_v62  ;;  %v2155_v33 = vpop.f32.mrf.mxu2  ;;  %v2175_v54 = vpop.f32.mrf.mxu3 }
 0x2dd   :  { %v1151_v0 = vld [vmem:[#allocation8 + $0x1978] sm:$0xff]  ;;  %2611 = vmatpush.msrb.mxu1 %v999_v63 }
 0x2de   :  { %v1279_v2 = vld [vmem:[#allocation8 + $0x1d78] sm:$0xff]  ;;  %2628 = vmatpush.msrb.mxu2 %v1151_v0 }
 0x2df   :  { %v863_v3 = vld [vmem:[#allocation8 + $0x1078] sm:$0xff]  ;;  %2648 = vmatpush.msrb.mxu3 %v1279_v2 }
 0x2e0   :  { %v991_v4 = vld [vmem:[#allocation8 + $0x1478] sm:$0xff]  ;;  %2592 = vmatpush.msrb.mxu0 %v863_v3 }
 0x2e1   :  { %v1143_v5 = vld [vmem:[#allocation8 + $0x1938] sm:$0xff]  ;;  %2612 = vmatpush.msrb.mxu1 %v991_v4 }
 0x2e2   :  { %v1271_v6 = vld [vmem:[#allocation8 + $0x1d38] sm:$0xff]  ;;  %2629 = vmatpush.msrb.mxu2 %v1143_v5  ;;  %v1369_v5 = vperm.slane %v2730_v37, 7 }
 0x2e3   :  { %v855_v7 = vld [vmem:[#allocation8 + $0x1038] sm:$0xff]  ;;  %2649 = vmatpush.msrb.mxu3 %v1271_v6 }
 0x2e4   :  { %v983_v8 = vld [vmem:[#allocation8 + $0x1438] sm:$0xff]  ;;  %2593 = vmatpush.msrb.mxu0 %v855_v7  ;;  %v2235_v55 = vpop.f32.mrf.mxu2  ;;  %v2255_v35 = vpop.f32.mrf.mxu3 }
 0x2e5   :  { %v1135_v9 = vld [vmem:[#allocation8 + $0x18f8] sm:$0xff]  ;;  %2613 = vmatpush.msrb.mxu1 %v983_v8  ;;  %2594 = vmatmul.f32.vlgmr.msrb.gmra.mxu0 %v2982_v22  ;;  %v1955_v22 = vpop.f32.mrf.mxu0 }
 0x2e6   :  { %v1263_v10 = vld [vmem:[#allocation8 + $0x1cf8] sm:$0xff]  ;;  %2630 = vmatpush.msrb.mxu2 %v1135_v9  ;;  %2614 = vmatmul.f32.vlgmr.msrb.gmra.mxu1 %v2987_v28  ;;  %v1975_v28 = vpop.f32.mrf.mxu1  ;;  %v1956_v2 = vadd.f32 %v1955_v22, %v1936_v60 }
 0x2e7   :  { %v1127_v11 = vld [vmem:[#allocation8 + $0x18b8] sm:$0xff]  ;;  %2650 = vmatpush.msrb.mxu3 %v1263_v10 }
 0x2e8   :  { %v1255_v12 = vld [vmem:[#allocation8 + $0x1cb8] sm:$0xff]  ;;  %2631 = vmatpush.msrb.mxu2 %v1127_v11  ;;  %v1976_v9 = vadd.f32 %v1975_v28, %v1956_v2 }
 0x2e9   :  { %v1119_v13 = vld [vmem:[#allocation8 + $0x1878] sm:$0xff]  ;;  %2651 = vmatpush.msrb.mxu3 %v1255_v12 }
 0x2ea   :  { %v1247_v14 = vld [vmem:[#allocation8 + $0x1c78] sm:$0xff]  ;;  %2632 = vmatpush.msrb.mxu2 %v1119_v13 }
 0x2eb   :  { %v1111_v15 = vld [vmem:[#allocation8 + $0x1838] sm:$0xff]  ;;  %2652 = vmatpush.msrb.mxu3 %v1247_v14  ;;  %v1996_v14 = vadd.f32 %v1995_v21, %v1976_v9 }
 0x2ec   :  { %v1239_v17 = vld [vmem:[#allocation8 + $0x1c38] sm:$0xff]  ;;  %2633 = vmatpush.msrb.mxu2 %v1111_v15  ;;  %v2315_v58 = vpop.f32.mrf.mxu2  ;;  %v2335_v44 = vpop.f32.mrf.mxu3 }
 0x2ed   :  { %2653 = vmatpush.msrb.mxu3 %v1239_v17  ;;  %2634 = vmatmul.f32.vlgmr.msrb.gmra.mxu2 %v2980_v19  ;;  %v2035_v23 = vpop.f32.mrf.mxu0  ;;  %v2016_v22 = vadd.f32 %v2015_v24, %v1996_v14 }
 0x2ee   :  { %2654 = vmatmul.f32.vlgmr.msrb.gmra.mxu3 %v2984_v25  ;;  %v2055_v26 = vpop.f32.mrf.mxu1  ;;  %v2036_v45 = vadd.f32 %v2035_v23, %v1366_v42 }
 0x2f0   :  { %v2056_v53 = vadd.f32 %v2055_v26, %v2036_v45 }
 0x2f2   :  { %v2076_v57 = vadd.f32 %v2075_v27, %v2056_v53 }
 0x2f4   :  { %v2395_v49 = vpop.f32.mrf.mxu2  ;;  %v2415_v59 = vpop.f32.mrf.mxu3  ;;  %v2096_v3 = vadd.f32 %v2095_v30, %v2076_v57 }
 0x2f5   :  { %v2115_v29 = vpop.f32.mrf.mxu0 }
 0x2f6   :  { %v2135_v31 = vpop.f32.mrf.mxu1  ;;  %v2116_v7 = vadd.f32 %v2115_v29, %v2096_v3 }
 0x2f8   :  { %v2136_v15 = vadd.f32 %v2135_v31, %v2116_v7 }
 0x2fa   :  { %v2156_v41 = vadd.f32 %v2155_v33, %v2136_v15 }
 0x2fd   :  { %v2195_v34 = vpop.f32.mrf.mxu0 }
 0x2fe   :  { %v2215_v19 = vpop.f32.mrf.mxu1  ;;  %v2196_v51 = vadd.f32 %v2195_v34, %v1367_v32  ;;  %v2176_v34 = vadd.f32 %v2175_v54, %v2156_v41 }
 0x300   :  { %v2216_v1 = vadd.f32 %v2215_v19, %v2196_v51  ;;  %v2662_v31 = vmax.f32 %v2176_v34, 0.0 }
 0x302   :  { %v2236_v61 = vadd.f32 %v2235_v55, %v2216_v1  ;;  %v2661_v55 = vmax.f32 %v2016_v22, 0.0 }
 0x304   :  { %v2256_v8 = vadd.f32 %v2255_v35, %v2236_v61  ;;  %v2702_v61 = vstv %s3085_s6 }
 0x305   :  { %v2275_v25 = vpop.f32.mrf.mxu0 }
 0x306   :  { %v2295_v36 = vpop.f32.mrf.mxu1  ;;  %v2276_v10 = vadd.f32 %v2275_v25, %v2256_v8  ;;  %v2731_v25 = vld [vmem:[#allocation11] sm:$0xff] }
 0x307   :  { %v2671_v35 = vperm.slane %v2731_v25, 3  ;;  %v2672_v38 = vperm.slane %v2731_v25, 4  ;;  %v2673_v43 = vperm.slane %v2731_v25, 5  ;;  %v2674_v45 = vperm.slane %v2731_v25, 6 }
 0x308   :  { %v2296_v20 = vadd.f32 %v2295_v36, %v2276_v10  ;;  %v2675_v53 = vperm.slane %v2731_v25, 7 }
 0x309   :  { %v2687_v33 = vmul.f32 %v2671_v35, %v2661_v55 }
 0x30a   :  { %v2316_v26 = vadd.f32 %v2315_v58, %v2296_v20  ;;  %v2688_v58 = vmul.f32 %v2672_v38, %v2662_v31 }
 0x30c   :  { %v2336_v37 = vadd.f32 %v2335_v44, %v2316_v26 }
 0x30d   :  { %v2355_v39 = vpop.f32.mrf.mxu0 }
 0x30e   :  { %v2375_v47 = vpop.f32.mrf.mxu1  ;;  %v2356_v56 = vadd.f32 %v2355_v39, %v1368_v46  ;;  %v2663_v36 = vmax.f32 %v2336_v37, 0.0 }
 0x310   :  { %v2376_v62 = vadd.f32 %v2375_v47, %v2356_v56  ;;  %v2694_v47 = vadd.f32 %v3046_v48, %v2687_v33 }
 0x312   :  { %v2396_v4 = vadd.f32 %v2395_v49, %v2376_v62  ;;  %v2689_v49 = vmul.f32 %v2673_v43, %v2663_v36  ;;  %v2695_v44 = vadd.f32 %v2694_v47, %v2688_v58 }
 0x314   :  { %v2416_v11 = vadd.f32 %v2415_v59, %v2396_v4  ;;  %v2696_v57 = vadd.f32 %v2695_v44, %v2689_v49 }
 0x315   :  { %v2435_v16 = vpop.f32.mrf.mxu0 }
 0x316   :  { %v2455_v63 = vpop.f32.mrf.mxu1  ;;  %v2436_v17 = vadd.f32 %v2435_v16, %v2416_v11 }
 0x318   :  { %v2456_v27 = vadd.f32 %v2455_v63, %v2436_v17 }
 0x323   :  { %v2475_v0 = vpop.f32.mrf.mxu2 }
 0x324   :  { %v2495_v13 = vpop.f32.mrf.mxu3  ;;  %v2476_v29 = vadd.f32 %v2475_v0, %v2456_v27 }
 0x326   :  { %v2496_v39 = vadd.f32 %v2495_v13, %v2476_v29 }
 0x328   :  { %v2664_v32 = vmax.f32 %v2496_v39, 0.0 }
 0x32a   :  { %v2690_v16 = vmul.f32 %v2674_v45, %v2664_v32 }
 0x32c   :  { %v2697_v59 = vadd.f32 %v2696_v57, %v2690_v16 }
 0x338   :  { %v2515_v6 = vpop.f32.mrf.mxu0 }
 0x339   :  { %v2516_v12 = vadd.f32 %v2515_v6, %v1369_v5  ;;  %v2535_v18 = vpop.f32.mrf.mxu1 }
 0x33b   :  { %v2536_v23 = vadd.f32 %v2535_v18, %v2516_v12 }
 0x345   :  { %v2555_v40 = vpop.f32.mrf.mxu2 }
 0x346   :  { %v2556_v30 = vadd.f32 %v2555_v40, %v2536_v23  ;;  %v2575_v19 = vpop.f32.mrf.mxu3 }
 0x348   :  { %v2576_v21 = vadd.f32 %v2575_v19, %v2556_v30 }
 0x362   :  { %v2595_v28 = vpop.f32.mrf.mxu0 }
 0x363   :  { %v2596_v42 = vadd.f32 %v2595_v28, %v2576_v21  ;;  %v2615_v24 = vpop.f32.mrf.mxu1 }
 0x365   :  { %v2616_v54 = vadd.f32 %v2615_v24, %v2596_v42 }
 0x370   :  { %v2635_v46 = vpop.f32.mrf.mxu2 }
 0x371   :  { %v2636_v50 = vadd.f32 %v2635_v46, %v2616_v54  ;;  %v2655_v51 = vpop.f32.mrf.mxu3 }
 0x373   :  { %v2656_v52 = vadd.f32 %v2655_v51, %v2636_v50 }
 0x375   :  { %v2665_v56 = vmax.f32 %v2656_v52, 0.0 }
 0x377   :  { %v2691_v1 = vmul.f32 %v2675_v53, %v2665_v56 }
 0x379   :  { %v2698_v60 = vadd.f32 %v2697_v59, %v2691_v1 }
 0x37b   :  { %2699 = vadd.xlane.f32.xlu0 %v2698_v60 }
 0x3ee   :  { %v2700_v62 = vpop.xlane.xlu0 %2699 }
 0x3ef   :  { %v2703_v48 = vadd.f32 %v2702_v61, %v2700_v62 }
 0x3f1   :  { %2705 = vst.msk [vmem:[%s3086_s7] sm:$0xff] %vm2704_vm1, %v2703_v48 }
 0x3f2   :  { %2710 = vsyncpa [#allocation4], 1 }
 0x3f3   :  { %2711 = vsyncpa [#allocation6], 1 }
 0x3f4   :  { %2712 = vsyncpa [#allocation9], 1 }
 0x3f5   :  { %2713 = vsyncpa [#allocation12], 1 }

</bundles_post_ra>
